<compile_context>
chip_gen: v7x
topology: tpu7x:2x2x1
jax: 0.10.0
libtpu: 0.0.40
codegen_flags: <defaults>
</compile_context>

<pallas_src>
import functools

import jax
import jax.numpy as jnp
from jax.experimental import pallas as pl
from jax.experimental.pallas import tpu as pltpu


# ---------------------------------------------------------------------------
# Per-generation tiling / VMEM budget
# ---------------------------------------------------------------------------

def _tpu_generation():
    """Best-effort TPU generation sniff; unknown chips get conservative (v7x) settings."""
    try:
        kind = jax.devices()[0].device_kind.lower()
    except Exception:
        return 0
    for g in (7, 6, 5, 4):
        if f"v{g}" in kind:
            return g
    return 0


_GEN = _tpu_generation()
_BIG_VMEM = _GEN in (5, 6)                     # v5e / v6e: 128 MiB VMEM per core
_VMEM_LIMIT_BYTES = (48 if _BIG_VMEM else 32) * 1024 * 1024
_CONV_TM = 2048                                # conv matmuls: tiny K/N, amortize grid overhead
_FC_TM = 1024 if _BIG_VMEM else 512            # fc1 has K=3136 -> bigger x tiles where VMEM allows
_PRED_TM = 512


def _pick_tm(m, cap):
    # Single full block for small M (also covers M not a multiple of 8);
    # otherwise a cdiv grid whose last (partial) tile is masked on writeback.
    return m if m <= cap else cap


# ---------------------------------------------------------------------------
# Pallas kernels
# ---------------------------------------------------------------------------

def _linear_kernel(x_ref, w_ref, b_ref, o_ref, *, relu):
    x = x_ref[...]
    if x.dtype != jnp.bfloat16:
        # uint8 conv1 patches: values 0..255 are exact in bf16; 1/255 is folded
        # into the weights, so no precision is lost normalizing the frame.
        x = x.astype(jnp.float32).astype(jnp.bfloat16)
    acc = jnp.dot(x, w_ref[...], preferred_element_type=jnp.float32)
    acc = acc + b_ref[...]
    if relu:
        acc = jnp.maximum(acc, 0.0)
    o_ref[...] = acc.astype(o_ref.dtype)


def linear_pallas(x, w, b, *, relu=False, out_dtype=jnp.float32, tm=_CONV_TM):
    """x: (M, K) uint8/bf16, w: (K, N) bf16, b: (N,) -> (M, N). Tiled over M."""
    M, K = x.shape
    N = w.shape[1]
    if jnp.issubdtype(x.dtype, jnp.floating) and x.dtype != jnp.bfloat16:
        x = x.astype(jnp.bfloat16)
    tm = _pick_tm(M, tm)
    grid_m = pl.cdiv(M, tm)
    return pl.pallas_call(
        functools.partial(_linear_kernel, relu=relu),
        out_shape=jax.ShapeDtypeStruct((M, N), out_dtype),
        grid=(grid_m,),
        in_specs=[
            pl.BlockSpec((tm, K), lambda i: (i, 0)),
            pl.BlockSpec((K, N), lambda i: (0, 0)),
            pl.BlockSpec((1, N), lambda i: (0, 0)),
        ],
        out_specs=pl.BlockSpec((tm, N), lambda i: (i, 0)),
        compiler_params=pltpu.CompilerParams(
            dimension_semantics=("parallel",),
            vmem_limit_bytes=_VMEM_LIMIT_BYTES),
    )(x, w.astype(jnp.bfloat16), b.astype(jnp.float32).reshape(1, N))


def _fc_fused_kernel(x_ref, w1_ref, b1_ref, w2_ref, b2_ref, o_ref):
    # Fused Linear+ReLU -> Linear+ReLU; the (TM, h) intermediate never leaves VMEM.
    h1 = jnp.dot(x_ref[...], w1_ref[...], preferred_element_type=jnp.float32)
    h1 = jnp.maximum(h1 + b1_ref[...], 0.0)
    h2 = jnp.dot(h1.astype(w2_ref.dtype), w2_ref[...],
                 preferred_element_type=jnp.float32)
    h2 = jnp.maximum(h2 + b2_ref[...], 0.0)
    o_ref[...] = h2.astype(o_ref.dtype)


def fc_fused_pallas(x, w1, b1, w2, b2, tm=_FC_TM):
    """x: (M, K) -> ReLU(ReLU(x@w1+b1)@w2+b2), f32 out, tiled over M."""
    M, K = x.shape
    H = w1.shape[1]
    tm = _pick_tm(M, tm)
    grid_m = pl.cdiv(M, tm)
    return pl.pallas_call(
        _fc_fused_kernel,
        out_shape=jax.ShapeDtypeStruct((M, H), jnp.float32),
        grid=(grid_m,),
        in_specs=[
            pl.BlockSpec((tm, K), lambda i: (i, 0)),
            pl.BlockSpec((K, H), lambda i: (0, 0)),
            pl.BlockSpec((1, H), lambda i: (0, 0)),
            pl.BlockSpec((H, H), lambda i: (0, 0)),
            pl.BlockSpec((1, H), lambda i: (0, 0)),
        ],
        out_specs=pl.BlockSpec((tm, H), lambda i: (i, 0)),
        compiler_params=pltpu.CompilerParams(
            dimension_semantics=("parallel",),
            vmem_limit_bytes=_VMEM_LIMIT_BYTES),
    )(x.astype(jnp.bfloat16), w1.astype(jnp.bfloat16),
      b1.astype(jnp.float32).reshape(1, H), w2.astype(jnp.bfloat16),
      b2.astype(jnp.float32).reshape(1, H))


def _pred_classify_kernel(obs_ref, rb_ref, w1_ref, w2_ref, b2_ref, c_ref, o_ref,
                          *, threshold, num_clusters):
    """Fused pfc1 + pfc2 + residual + centroid distance / argmin / threshold."""
    obs = obs_ref[...]                                            # (TM, H) f32
    # pfc1: obs_st @ W_obs + (W_act[action] + done*w_done + b1) folded in rb_ref
    h1 = jnp.dot(obs.astype(jnp.bfloat16), w1_ref[...],
                 preferred_element_type=jnp.float32)
    h1 = jnp.maximum(h1 + rb_ref[...], 0.0)
    h2 = jnp.dot(h1.astype(jnp.bfloat16), w2_ref[...],
                 preferred_element_type=jnp.float32)
    h2 = jnp.maximum(h2 + b2_ref[...], 0.0)
    st = h2 + obs                                                 # residual (f32)
    # Per-cluster squared distance in f32 on the VPU/XLU (matches PyTorch's
    # (e - c)^2.sum(-1) exactly; keeps the f32 math off the bf16-native MXU).
    rows = st.shape[0]
    best = jnp.full((rows, 1), jnp.inf, dtype=jnp.float32)
    idx = jnp.zeros((rows, 1), dtype=jnp.int32)
    for k in range(num_clusters):          # num_clusters is small and static
        diff = st - c_ref[k:k + 1, :]
        d = jnp.sum(diff * diff, axis=-1, keepdims=True)
        upd = d < best                     # strict '<' => first-occurrence ties
        best = jnp.where(upd, d, best)
        idx = jnp.where(upd, k, idx)
    classes = jnp.where(best < threshold, idx, num_clusters)
    o_ref[...] = classes.astype(jnp.int32)


def pred_classify_pallas(obs_st, row_bias, w_obs, w2, b2, centroids, threshold,
                         tm=_PRED_TM):
    """obs_st/row_bias: (M, H) f32 -> (M,) int32 class ids."""
    M, H = obs_st.shape
    Kc = centroids.shape[0]
    tm = _pick_tm(M, tm)
    grid_m = pl.cdiv(M, tm)
    out = pl.pallas_call(
        functools.partial(_pred_classify_kernel, threshold=float(threshold),
                          num_clusters=Kc),
        out_shape=jax.ShapeDtypeStruct((M, 1), jnp.int32),
        grid=(grid_m,),
        in_specs=[
            pl.BlockSpec((tm, H), lambda i: (i, 0)),   # obs_st (f32)
            pl.BlockSpec((tm, H), lambda i: (i, 0)),   # per-row bias (f32)
            pl.BlockSpec((H, H), lambda i: (0, 0)),    # W_obs (bf16)
            pl.BlockSpec((H, H), lambda i: (0, 0)),    # W2 (bf16)
            pl.BlockSpec((1, H), lambda i: (0, 0)),    # b2 (f32)
            pl.BlockSpec((Kc, H), lambda i: (0, 0)),   # centroids (f32)
        ],
        out_specs=pl.BlockSpec((tm, 1), lambda i: (i, 0)),
        compiler_params=pltpu.CompilerParams(
            dimension_semantics=("parallel",),
            vmem_limit_bytes=_VMEM_LIMIT_BYTES),
    )(obs_st.astype(jnp.float32), row_bias.astype(jnp.float32),
      w_obs.astype(jnp.bfloat16), w2.astype(jnp.bfloat16),
      b2.astype(jnp.float32).reshape(1, H), centroids.astype(jnp.float32))
    return out[:, 0]


# ---------------------------------------------------------------------------
# Conv via NHWC im2col + Pallas matmul (no inter-layer transposes)
# ---------------------------------------------------------------------------

def im2col_nhwc(x, k, s):
    """x: (N, H, W, C) -> (N*OH*OW, k*k*C); patch columns ordered (kh, kw, C).
    Runs in XLA on the input dtype (uint8 for conv1, bf16 for conv2/3)."""
    N, H, W, C = x.shape
    OH = (H - k) // s + 1
    OW = (W - k) // s + 1
    cols = []
    for kh in range(k):
        for kw in range(k):
            cols.append(x[:, kh:kh + s * (OH - 1) + 1:s,
                          kw:kw + s * (OW - 1) + 1:s, :])
    p = jnp.stack(cols, axis=3)            # (N, OH, OW, k*k, C)
    return p.reshape(N * OH * OW, k * k * C), OH, OW


def conv2d_relu_nhwc(x, w_flat, b, k, stride):
    """x: (N, H, W, C) uint8/bf16; w_flat: (k*k*C, O) in (kh,kw,C) row order -> NHWC out."""
    # TODO(synk): fold im2col (ideally the whole conv1->fc2 torso) into a single
    # VMEM-resident pallas_call and emit lane-dense (N*OH, OW*O) output slabs;
    # the JAX-side patch matrix still expands HBM traffic ~3-5x per conv layer
    # at production batch sizes.
    N = x.shape[0]
    O = w_flat.shape[1]
    patches, OH, OW = im2col_nhwc(x, k, stride)
    y = linear_pallas(patches, w_flat, b, relu=True, out_dtype=jnp.bfloat16,
                      tm=_CONV_TM)
    return y.reshape(N, OH, OW, O)


# ---------------------------------------------------------------------------
# Model forward (AtariTorso -> PredictionModel -> RewardClassifier)
# ---------------------------------------------------------------------------

def atari_torso(p, frames, h_dim):
    """frames: (M, C, 84, 84) uint8 -> (M, h_dim) f32 embeddings."""
    M = frames.shape[0]
    x = frames.transpose(0, 2, 3, 1)        # NHWC, stays uint8 until conv1 kernel
    # 1/255 normalization is folded into conv1_w; uint8 -> bf16 happens in-kernel.
    x = conv2d_relu_nhwc(x, p['conv1_w'], p['conv1_b'], k=8, stride=4)  # (M,20,20,32)
    x = conv2d_relu_nhwc(x, p['conv2_w'], p['conv2_b'], k=4, stride=2)  # (M, 9, 9,64)
    x = conv2d_relu_nhwc(x, p['conv3_w'], p['conv3_b'], k=3, stride=1)  # (M, 7, 7,64)
    x = x.reshape(M, -1)        # NHWC flatten; fc1_w rows pre-permuted to match
    return fc_fused_pallas(x, p['fc1_w'], p['fc1_b'], p['fc2_w'], p['fc2_b'],
                           tm=_FC_TM)


def reward_classifier_forward(p, centroids, frame, action, done, *,
                              threshold, num_actions, h_dim):
    """Reproduces RewardClassifier.forward (version=1 pred_net, noise=0.0)."""
    T, B = action.shape
    M = T * B
    # Torso dedup: embed each real frame once plus one zero frame (the t=0
    # "last_obs"); previous-frame embeddings are a shift of the embedding tensor
    # along T.  Exactly equivalent to the reference torso over the (frame, last)
    # concat (per-frame deterministic torso) at ~half the cost.
    frames_flat = frame.reshape((M,) + frame.shape[2:])          # (M, C, H, W)
    zero_frame = jnp.zeros((1,) + frame.shape[2:], frame.dtype)
    emb_all = atari_torso(p, jnp.concatenate([frames_flat, zero_frame], axis=0),
                          h_dim)                                 # (M+1, h) f32
    emb = emb_all[:M].reshape(T, B, h_dim)                       # torso(frame[t])
    emb_zero = emb_all[M]                                        # torso(zeros)
    emb_last = jnp.concatenate(
        [jnp.broadcast_to(emb_zero[None, None, :], (1, B, h_dim)), emb[:-1]],
        axis=0)                                                  # torso(frame[t-1])
    hh = h_dim // 2
    done_f = done.astype(jnp.float32)
    obs_st = jnp.concatenate(
        [(1.0 - done_f)[:, :, None] * emb[:, :, :hh], emb_last[:, :, hh:]],
        axis=2).reshape(M, h_dim)
    # one-hot(action)/done concat replaced by a per-row bias (embedding gather).
    row_bias = (jnp.take(p['pfc1_w_act'], action.reshape(M), axis=0)
                + done_f.reshape(M, 1) * p['pfc1_w_done'][None, :]
                + p['pfc1_b'][None, :])
    # TODO(synk): noise > 0 would need pltpu.prng_seed/prng_random_bits-based
    # gaussian noise on the embeddings; the module is exercised with noise=0.0.
    classes = pred_classify_pallas(obs_st, row_bias, p['pfc1_w_obs'],
                                   p['pfc2_w'], p['pfc2_b'], centroids, threshold)
    return classes.reshape(T, B)


# ---------------------------------------------------------------------------
# Parameter init (PyTorch layouts) + one-time layout/dtype preparation
# ---------------------------------------------------------------------------

def init_params(key, in_channels, h_dim, num_actions):
    ks = jax.random.split(key, 14)

    def u(k, shape, fan_in):
        bound = float(fan_in) ** -0.5
        return jax.random.uniform(k, shape, jnp.float32, -bound, bound)

    p = {}
    p['conv1_w'] = u(ks[0], (32, in_channels, 8, 8), in_channels * 8 * 8)
    p['conv1_b'] = u(ks[1], (32,), in_channels * 8 * 8)
    p['conv2_w'] = u(ks[2], (64, 32, 4, 4), 32 * 4 * 4)
    p['conv2_b'] = u(ks[3], (64,), 32 * 4 * 4)
    p['conv3_w'] = u(ks[4], (64, 64, 3, 3), 64 * 3 * 3)
    p['conv3_b'] = u(ks[5], (64,), 64 * 3 * 3)
    out_dim = 3136
    # Linear weights stored as (in, out); `in` of fc1 ordered (C, H, W) like PyTorch.
    p['fc1_w'] = u(ks[6], (out_dim, h_dim), out_dim)
    p['fc1_b'] = u(ks[7], (h_dim,), out_dim)
    p['fc2_w'] = u(ks[8], (h_dim, h_dim), h_dim)
    p['fc2_b'] = u(ks[9], (h_dim,), h_dim)
    in_p = h_dim + num_actions + 1
    p['pfc1_w'] = u(ks[10], (in_p, h_dim), in_p)
    p['pfc1_b'] = u(ks[11], (h_dim,), in_p)
    p['pfc2_w'] = u(ks[12], (h_dim, h_dim), h_dim)
    p['pfc2_b'] = u(ks[13], (h_dim,), h_dim)
    return p


def prepare_params(params, h_dim, num_actions):
    """One-time weight re-layout / bf16 pre-cast (kept out of the hot path)."""
    def conv_flat(w, scale=1.0):  # (O, C, k, k) -> (k*k*C, O), rows ordered (kh, kw, C)
        O, C, k, _ = w.shape
        w = w * scale
        return w.transpose(2, 3, 1, 0).reshape(k * k * C, O).astype(jnp.bfloat16)

    p = {}
    # Fold the x/255 normalization into conv1's weights; frames stay uint8.
    p['conv1_w'] = conv_flat(params['conv1_w'], scale=1.0 / 255.0)
    p['conv2_w'] = conv_flat(params['conv2_w'])
    p['conv3_w'] = conv_flat(params['conv3_w'])
    for name in ('conv1_b', 'conv2_b', 'conv3_b', 'fc1_b', 'fc2_b',
                 'pfc1_b', 'pfc2_b'):
        p[name] = params[name].astype(jnp.float32)
    # fc1 rows permuted from PyTorch's (C=64, H=7, W=7) flatten to NHWC (H, W, C).
    p['fc1_w'] = (params['fc1_w'].reshape(64, 7, 7, h_dim)
                  .transpose(1, 2, 0, 3).reshape(3136, h_dim).astype(jnp.bfloat16))
    p['fc2_w'] = params['fc2_w'].astype(jnp.bfloat16)
    w1 = params['pfc1_w']                      # (h + A + 1, h)
    p['pfc1_w_obs'] = w1[:h_dim].astype(jnp.bfloat16)
    p['pfc1_w_act'] = w1[h_dim:h_dim + num_actions].astype(jnp.float32)
    p['pfc1_w_done'] = w1[h_dim + num_actions].astype(jnp.float32)
    p['pfc2_w'] = params['pfc2_w'].astype(jnp.bfloat16)
    return p


# ---------------------------------------------------------------------------

if __name__ == "__main__":
    # Spatial size is forced to 84x84 by the hard-coded out_dim=3136 in AtariTorso.
    T, B, C, H, W = 2, 2, 4, 84, 84
    h_dim, num_actions, num_clusters = 32, 6, 5
    threshold = 10.0

    key = jax.random.PRNGKey(0)
    k_param, k_frame, k_action, k_done, k_cent = jax.random.split(key, 5)

    raw_params = init_params(k_param, C, h_dim, num_actions)
    params = prepare_params(raw_params, h_dim, num_actions)
    frame = jax.random.randint(k_frame, (T, B, C, H, W), 0, 256,
                               dtype=jnp.int32).astype(jnp.uint8)
    action = jax.random.randint(k_action, (T, B), 0, num_actions, dtype=jnp.int32)
    done = jax.random.bernoulli(k_done, 0.3, (T, B))
    centroids = jax.random.normal(k_cent, (num_clusters, h_dim), jnp.float32)

    fwd = jax.jit(functools.partial(
        reward_classifier_forward,
        threshold=threshold, num_actions=num_actions, h_dim=h_dim))
    classes = jax.block_until_ready(fwd(params, centroids, frame, action, done))

    assert classes.shape == (T, B)
    assert classes.dtype == jnp.int32
    assert bool(jnp.all((classes >= 0) & (classes <= num_clusters)))
    print("KERNEL_OK")
</pallas_src>

<mosaic_0001>
module attributes {stable_mosaic.version = 11 : i64} {
  func.func @_linear_kernel(%arg0: i32, %arg1: memref<2000x256xi8, #tpu.memory_space<vmem>>, %arg2: memref<256x32xbf16, #tpu.memory_space<vmem>>, %arg3: memref<1x32xf32, #tpu.memory_space<vmem>>, %arg4: memref<2000x32xbf16, #tpu.memory_space<vmem>>) attributes {dimension_semantics = [#tpu.dimension_semantics<parallel>], iteration_bounds = array<i64: 1>, scalar_prefetch = 0 : i64, scratch_operands = 0 : i64, tpu.core_type = #tpu.core_type<tc>, window_params = [{transform_indices = @transform_0, window_bounds = array<i64: 2000, 256>}, {pipeline_mode = #tpu.pipeline_mode<synchronous>, transform_indices = @transform_1, window_bounds = array<i64: 256, 32>}, {pipeline_mode = #tpu.pipeline_mode<synchronous>, transform_indices = @transform_2, window_bounds = array<i64: 1, 32>}, {transform_indices = @transform_3, window_bounds = array<i64: 2000, 32>}]} {
    %c0 = arith.constant 0 : index
    %c0_0 = arith.constant 0 : index
    %0 = vector.load %arg1[%c0, %c0_0] : memref<2000x256xi8, #tpu.memory_space<vmem>>, vector<2000x256xi8>
    %1 = arith.uitofp %0 : vector<2000x256xi8> to vector<2000x256xf32>
    %2 = arith.truncf %1 : vector<2000x256xf32> to vector<2000x256xbf16>
    %c0_1 = arith.constant 0 : index
    %c0_2 = arith.constant 0 : index
    %3 = vector.load %arg2[%c0_1, %c0_2] : memref<256x32xbf16, #tpu.memory_space<vmem>>, vector<256x32xbf16>
    %cst = arith.constant dense<0.000000e+00> : vector<2000x32xf32>
    %4 = tpu.matmul %2, %3, %cst {dimension_numbers = #tpu.dot_dimension_numbers<[1], [0], [0], [1], [0, 0, 1, 1], [], []>} : vector<2000x256xbf16>, vector<256x32xbf16>, vector<2000x32xf32> -> vector<2000x32xf32>
    %c0_3 = arith.constant 0 : index
    %c0_4 = arith.constant 0 : index
    %5 = vector.load %arg3[%c0_3, %c0_4] : memref<1x32xf32, #tpu.memory_space<vmem>>, vector<1x32xf32>
    %6 = vector.broadcast %5 : vector<1x32xf32> to vector<2000x32xf32>
    %7 = arith.addf %4, %6 : vector<2000x32xf32>
    %cst_5 = arith.constant 0.000000e+00 : f32
    %8 = vector.broadcast %cst_5 : f32 to vector<2000x32xf32>
    %9 = arith.maximumf %7, %8 : vector<2000x32xf32>
    %10 = arith.truncf %9 : vector<2000x32xf32> to vector<2000x32xbf16>
    %c0_6 = arith.constant 0 : index
    %c0_7 = arith.constant 0 : index
    %11 = vector.load %arg4[%c0_6, %c0_7] : memref<2000x32xbf16, #tpu.memory_space<vmem>>, vector<2000x32xbf16>
    tpu.vector_store %arg4[%c0_6, %c0_7], %10 {strides = array<i32>} : memref<2000x32xbf16, #tpu.memory_space<vmem>>, vector<2000x32xbf16>,
    return
  }
  func.func @transform_0(%arg0: i32) -> (i32, i32) {
    %c0_i32 = arith.constant 0 : i32
    %c0_i32_0 = arith.constant 0 : i32
    return %arg0, %c0_i32 : i32, i32
  }
  func.func @transform_1(%arg0: i32) -> (i32, i32) {
    %c0_i32 = arith.constant 0 : i32
    %c0_i32_0 = arith.constant 0 : i32
    %c0_i32_1 = arith.constant 0 : i32
    return %c0_i32, %c0_i32_0 : i32, i32
  }
  func.func @transform_2(%arg0: i32) -> (i32, i32) {
    %c0_i32 = arith.constant 0 : i32
    %c0_i32_0 = arith.constant 0 : i32
    %c0_i32_1 = arith.constant 0 : i32
    return %c0_i32, %c0_i32_0 : i32, i32
  }
  func.func @transform_3(%arg0: i32) -> (i32, i32) {
    %c0_i32 = arith.constant 0 : i32
    %c0_i32_0 = arith.constant 0 : i32
    return %arg0, %c0_i32 : i32, i32
  }
}

module attributes {stable_mosaic.version = 11 : i64} {
  func.func @_linear_kernel(%arg0: i32, %arg1: memref<405x512xbf16, #tpu.memory_space<vmem>>, %arg2: memref<512x64xbf16, #tpu.memory_space<vmem>>, %arg3: memref<1x64xf32, #tpu.memory_space<vmem>>, %arg4: memref<405x64xbf16, #tpu.memory_space<vmem>>) attributes {dimension_semantics = [#tpu.dimension_semantics<parallel>], iteration_bounds = array<i64: 1>, scalar_prefetch = 0 : i64, scratch_operands = 0 : i64, tpu.core_type = #tpu.core_type<tc>, window_params = [{transform_indices = @transform_0, window_bounds = array<i64: 405, 512>}, {pipeline_mode = #tpu.pipeline_mode<synchronous>, transform_indices = @transform_1, window_bounds = array<i64: 512, 64>}, {pipeline_mode = #tpu.pipeline_mode<synchronous>, transform_indices = @transform_2, window_bounds = array<i64: 1, 64>}, {transform_indices = @transform_3, window_bounds = array<i64: 405, 64>}]} {
    %c0 = arith.constant 0 : index
    %c0_0 = arith.constant 0 : index
    %0 = vector.load %arg1[%c0, %c0_0] : memref<405x512xbf16, #tpu.memory_space<vmem>>, vector<405x512xbf16>
    %c0_1 = arith.constant 0 : index
    %c0_2 = arith.constant 0 : index
    %1 = vector.load %arg2[%c0_1, %c0_2] : memref<512x64xbf16, #tpu.memory_space<vmem>>, vector<512x64xbf16>
    %cst = arith.constant dense<0.000000e+00> : vector<405x64xf32>
    %2 = tpu.matmul %0, %1, %cst {dimension_numbers = #tpu.dot_dimension_numbers<[1], [0], [0], [1], [0, 0, 1, 1], [], []>} : vector<405x512xbf16>, vector<512x64xbf16>, vector<405x64xf32> -> vector<405x64xf32>
    %c0_3 = arith.constant 0 : index
    %c0_4 = arith.constant 0 : index
    %3 = vector.load %arg3[%c0_3, %c0_4] : memref<1x64xf32, #tpu.memory_space<vmem>>, vector<1x64xf32>
    %4 = vector.broadcast %3 : vector<1x64xf32> to vector<405x64xf32>
    %5 = arith.addf %2, %4 : vector<405x64xf32>
    %cst_5 = arith.constant 0.000000e+00 : f32
    %6 = vector.broadcast %cst_5 : f32 to vector<405x64xf32>
    %7 = arith.maximumf %5, %6 : vector<405x64xf32>
    %8 = arith.truncf %7 : vector<405x64xf32> to vector<405x64xbf16>
    %c0_6 = arith.constant 0 : index
    %c0_7 = arith.constant 0 : index
    %9 = vector.load %arg4[%c0_6, %c0_7] : memref<405x64xbf16, #tpu.memory_space<vmem>>, vector<405x64xbf16>
    tpu.vector_store %arg4[%c0_6, %c0_7], %8 {strides = array<i32>} : memref<405x64xbf16, #tpu.memory_space<vmem>>, vector<405x64xbf16>,
    return
  }
  func.func @transform_0(%arg0: i32) -> (i32, i32) {
    %c0_i32 = arith.constant 0 : i32
    %c0_i32_0 = arith.constant 0 : i32
    return %arg0, %c0_i32 : i32, i32
  }
  func.func @transform_1(%arg0: i32) -> (i32, i32) {
    %c0_i32 = arith.constant 0 : i32
    %c0_i32_0 = arith.constant 0 : i32
    %c0_i32_1 = arith.constant 0 : i32
    return %c0_i32, %c0_i32_0 : i32, i32
  }
  func.func @transform_2(%arg0: i32) -> (i32, i32) {
    %c0_i32 = arith.constant 0 : i32
    %c0_i32_0 = arith.constant 0 : i32
    %c0_i32_1 = arith.constant 0 : i32
    return %c0_i32, %c0_i32_0 : i32, i32
  }
  func.func @transform_3(%arg0: i32) -> (i32, i32) {
    %c0_i32 = arith.constant 0 : i32
    %c0_i32_0 = arith.constant 0 : i32
    return %arg0, %c0_i32 : i32, i32
  }
}

module attributes {stable_mosaic.version = 11 : i64} {
  func.func @_linear_kernel(%arg0: i32, %arg1: memref<245x576xbf16, #tpu.memory_space<vmem>>, %arg2: memref<576x64xbf16, #tpu.memory_space<vmem>>, %arg3: memref<1x64xf32, #tpu.memory_space<vmem>>, %arg4: memref<245x64xbf16, #tpu.memory_space<vmem>>) attributes {dimension_semantics = [#tpu.dimension_semantics<parallel>], iteration_bounds = array<i64: 1>, scalar_prefetch = 0 : i64, scratch_operands = 0 : i64, tpu.core_type = #tpu.core_type<tc>, window_params = [{transform_indices = @transform_0, window_bounds = array<i64: 245, 576>}, {pipeline_mode = #tpu.pipeline_mode<synchronous>, transform_indices = @transform_1, window_bounds = array<i64: 576, 64>}, {pipeline_mode = #tpu.pipeline_mode<synchronous>, transform_indices = @transform_2, window_bounds = array<i64: 1, 64>}, {transform_indices = @transform_3, window_bounds = array<i64: 245, 64>}]} {
    %c0 = arith.constant 0 : index
    %c0_0 = arith.constant 0 : index
    %0 = vector.load %arg1[%c0, %c0_0] : memref<245x576xbf16, #tpu.memory_space<vmem>>, vector<245x576xbf16>
    %c0_1 = arith.constant 0 : index
    %c0_2 = arith.constant 0 : index
    %1 = vector.load %arg2[%c0_1, %c0_2] : memref<576x64xbf16, #tpu.memory_space<vmem>>, vector<576x64xbf16>
    %cst = arith.constant dense<0.000000e+00> : vector<245x64xf32>
    %2 = tpu.matmul %0, %1, %cst {dimension_numbers = #tpu.dot_dimension_numbers<[1], [0], [0], [1], [0, 0, 1, 1], [], []>} : vector<245x576xbf16>, vector<576x64xbf16>, vector<245x64xf32> -> vector<245x64xf32>
    %c0_3 = arith.constant 0 : index
    %c0_4 = arith.constant 0 : index
    %3 = vector.load %arg3[%c0_3, %c0_4] : memref<1x64xf32, #tpu.memory_space<vmem>>, vector<1x64xf32>
    %4 = vector.broadcast %3 : vector<1x64xf32> to vector<245x64xf32>
    %5 = arith.addf %2, %4 : vector<245x64xf32>
    %cst_5 = arith.constant 0.000000e+00 : f32
    %6 = vector.broadcast %cst_5 : f32 to vector<245x64xf32>
    %7 = arith.maximumf %5, %6 : vector<245x64xf32>
    %8 = arith.truncf %7 : vector<245x64xf32> to vector<245x64xbf16>
    %c0_6 = arith.constant 0 : index
    %c0_7 = arith.constant 0 : index
    %9 = vector.load %arg4[%c0_6, %c0_7] : memref<245x64xbf16, #tpu.memory_space<vmem>>, vector<245x64xbf16>
    tpu.vector_store %arg4[%c0_6, %c0_7], %8 {strides = array<i32>} : memref<245x64xbf16, #tpu.memory_space<vmem>>, vector<245x64xbf16>,
    return
  }
  func.func @transform_0(%arg0: i32) -> (i32, i32) {
    %c0_i32 = arith.constant 0 : i32
    %c0_i32_0 = arith.constant 0 : i32
    return %arg0, %c0_i32 : i32, i32
  }
  func.func @transform_1(%arg0: i32) -> (i32, i32) {
    %c0_i32 = arith.constant 0 : i32
    %c0_i32_0 = arith.constant 0 : i32
    %c0_i32_1 = arith.constant 0 : i32
    return %c0_i32, %c0_i32_0 : i32, i32
  }
  func.func @transform_2(%arg0: i32) -> (i32, i32) {
    %c0_i32 = arith.constant 0 : i32
    %c0_i32_0 = arith.constant 0 : i32
    %c0_i32_1 = arith.constant 0 : i32
    return %c0_i32, %c0_i32_0 : i32, i32
  }
  func.func @transform_3(%arg0: i32) -> (i32, i32) {
    %c0_i32 = arith.constant 0 : i32
    %c0_i32_0 = arith.constant 0 : i32
    return %arg0, %c0_i32 : i32, i32
  }
}

module attributes {stable_mosaic.version = 11 : i64} {
  func.func @_fc_fused_kernel(%arg0: i32, %arg1: memref<5x3136xbf16, #tpu.memory_space<vmem>>, %arg2: memref<3136x32xbf16, #tpu.memory_space<vmem>>, %arg3: memref<1x32xf32, #tpu.memory_space<vmem>>, %arg4: memref<32x32xbf16, #tpu.memory_space<vmem>>, %arg5: memref<1x32xf32, #tpu.memory_space<vmem>>, %arg6: memref<5x32xf32, #tpu.memory_space<vmem>>) attributes {dimension_semantics = [#tpu.dimension_semantics<parallel>], iteration_bounds = array<i64: 1>, scalar_prefetch = 0 : i64, scratch_operands = 0 : i64, tpu.core_type = #tpu.core_type<tc>, window_params = [{transform_indices = @transform_0, window_bounds = array<i64: 5, 3136>}, {pipeline_mode = #tpu.pipeline_mode<synchronous>, transform_indices = @transform_1, window_bounds = array<i64: 3136, 32>}, {pipeline_mode = #tpu.pipeline_mode<synchronous>, transform_indices = @transform_2, window_bounds = array<i64: 1, 32>}, {pipeline_mode = #tpu.pipeline_mode<synchronous>, transform_indices = @transform_3, window_bounds = array<i64: 32, 32>}, {pipeline_mode = #tpu.pipeline_mode<synchronous>, transform_indices = @transform_4, window_bounds = array<i64: 1, 32>}, {transform_indices = @transform_5, window_bounds = array<i64: 5, 32>}]} {
    %c0 = arith.constant 0 : index
    %c0_0 = arith.constant 0 : index
    %0 = vector.load %arg1[%c0, %c0_0] : memref<5x3136xbf16, #tpu.memory_space<vmem>>, vector<5x3136xbf16>
    %c0_1 = arith.constant 0 : index
    %c0_2 = arith.constant 0 : index
    %1 = vector.load %arg2[%c0_1, %c0_2] : memref<3136x32xbf16, #tpu.memory_space<vmem>>, vector<3136x32xbf16>
    %cst = arith.constant dense<0.000000e+00> : vector<5x32xf32>
    %2 = tpu.matmul %0, %1, %cst {dimension_numbers = #tpu.dot_dimension_numbers<[1], [0], [0], [1], [0, 0, 1, 1], [], []>} : vector<5x3136xbf16>, vector<3136x32xbf16>, vector<5x32xf32> -> vector<5x32xf32>
    %c0_3 = arith.constant 0 : index
    %c0_4 = arith.constant 0 : index
    %3 = vector.load %arg3[%c0_3, %c0_4] : memref<1x32xf32, #tpu.memory_space<vmem>>, vector<1x32xf32>
    %4 = vector.broadcast %3 : vector<1x32xf32> to vector<5x32xf32>
    %5 = arith.addf %2, %4 : vector<5x32xf32>
    %cst_5 = arith.constant 0.000000e+00 : f32
    %6 = vector.broadcast %cst_5 : f32 to vector<5x32xf32>
    %7 = arith.maximumf %5, %6 : vector<5x32xf32>
    %8 = arith.truncf %7 : vector<5x32xf32> to vector<5x32xbf16>
    %c0_6 = arith.constant 0 : index
    %c0_7 = arith.constant 0 : index
    %9 = vector.load %arg4[%c0_6, %c0_7] : memref<32x32xbf16, #tpu.memory_space<vmem>>, vector<32x32xbf16>
    %cst_8 = arith.constant dense<0.000000e+00> : vector<5x32xf32>
    %10 = tpu.matmul %8, %9, %cst_8 {dimension_numbers = #tpu.dot_dimension_numbers<[1], [0], [0], [1], [0, 0, 1, 1], [], []>} : vector<5x32xbf16>, vector<32x32xbf16>, vector<5x32xf32> -> vector<5x32xf32>
    %c0_9 = arith.constant 0 : index
    %c0_10 = arith.constant 0 : index
    %11 = vector.load %arg5[%c0_9, %c0_10] : memref<1x32xf32, #tpu.memory_space<vmem>>, vector<1x32xf32>
    %12 = vector.broadcast %11 : vector<1x32xf32> to vector<5x32xf32>
    %13 = arith.addf %10, %12 : vector<5x32xf32>
    %cst_11 = arith.constant 0.000000e+00 : f32
    %14 = vector.broadcast %cst_11 : f32 to vector<5x32xf32>
    %15 = arith.maximumf %13, %14 : vector<5x32xf32>
    %c0_12 = arith.constant 0 : index
    %c0_13 = arith.constant 0 : index
    %16 = vector.load %arg6[%c0_12, %c0_13] : memref<5x32xf32, #tpu.memory_space<vmem>>, vector<5x32xf32>
    tpu.vector_store %arg6[%c0_12, %c0_13], %15 {strides = array<i32>} : memref<5x32xf32, #tpu.memory_space<vmem>>, vector<5x32xf32>,
    return
  }
  func.func @transform_0(%arg0: i32) -> (i32, i32) {
    %c0_i32 = arith.constant 0 : i32
    %c0_i32_0 = arith.constant 0 : i32
    return %arg0, %c0_i32 : i32, i32
  }
  func.func @transform_1(%arg0: i32) -> (i32, i32) {
    %c0_i32 = arith.constant 0 : i32
    %c0_i32_0 = arith.constant 0 : i32
    %c0_i32_1 = arith.constant 0 : i32
    return %c0_i32, %c0_i32_0 : i32, i32
  }
  func.func @transform_2(%arg0: i32) -> (i32, i32) {
    %c0_i32 = arith.constant 0 : i32
    %c0_i32_0 = arith.constant 0 : i32
    %c0_i32_1 = arith.constant 0 : i32
    return %c0_i32, %c0_i32_0 : i32, i32
  }
  func.func @transform_3(%arg0: i32) -> (i32, i32) {
    %c0_i32 = arith.constant 0 : i32
    %c0_i32_0 = arith.constant 0 : i32
    %c0_i32_1 = arith.constant 0 : i32
    return %c0_i32, %c0_i32_0 : i32, i32
  }
  func.func @transform_4(%arg0: i32) -> (i32, i32) {
    %c0_i32 = arith.constant 0 : i32
    %c0_i32_0 = arith.constant 0 : i32
    %c0_i32_1 = arith.constant 0 : i32
    return %c0_i32, %c0_i32_0 : i32, i32
  }
  func.func @transform_5(%arg0: i32) -> (i32, i32) {
    %c0_i32 = arith.constant 0 : i32
    %c0_i32_0 = arith.constant 0 : i32
    return %arg0, %c0_i32 : i32, i32
  }
}

module attributes {stable_mosaic.version = 11 : i64} {
  func.func @_pred_classify_kernel(%arg0: i32, %arg1: memref<4x32xf32, #tpu.memory_space<vmem>>, %arg2: memref<4x32xf32, #tpu.memory_space<vmem>>, %arg3: memref<32x32xbf16, #tpu.memory_space<vmem>>, %arg4: memref<32x32xbf16, #tpu.memory_space<vmem>>, %arg5: memref<1x32xf32, #tpu.memory_space<vmem>>, %arg6: memref<5x32xf32, #tpu.memory_space<vmem>>, %arg7: memref<4x1xi32, #tpu.memory_space<vmem>>) attributes {dimension_semantics = [#tpu.dimension_semantics<parallel>], iteration_bounds = array<i64: 1>, scalar_prefetch = 0 : i64, scratch_operands = 0 : i64, tpu.core_type = #tpu.core_type<tc>, window_params = [{transform_indices = @transform_0, window_bounds = array<i64: 4, 32>}, {transform_indices = @transform_1, window_bounds = array<i64: 4, 32>}, {pipeline_mode = #tpu.pipeline_mode<synchronous>, transform_indices = @transform_2, window_bounds = array<i64: 32, 32>}, {pipeline_mode = #tpu.pipeline_mode<synchronous>, transform_indices = @transform_3, window_bounds = array<i64: 32, 32>}, {pipeline_mode = #tpu.pipeline_mode<synchronous>, transform_indices = @transform_4, window_bounds = array<i64: 1, 32>}, {pipeline_mode = #tpu.pipeline_mode<synchronous>, transform_indices = @transform_5, window_bounds = array<i64: 5, 32>}, {transform_indices = @transform_6, window_bounds = array<i64: 4, 1>}]} {
    %c0 = arith.constant 0 : index
    %c0_0 = arith.constant 0 : index
    %0 = vector.load %arg1[%c0, %c0_0] : memref<4x32xf32, #tpu.memory_space<vmem>>, vector<4x32xf32>
    %1 = arith.truncf %0 : vector<4x32xf32> to vector<4x32xbf16>
    %c0_1 = arith.constant 0 : index
    %c0_2 = arith.constant 0 : index
    %2 = vector.load %arg3[%c0_1, %c0_2] : memref<32x32xbf16, #tpu.memory_space<vmem>>, vector<32x32xbf16>
    %cst = arith.constant dense<0.000000e+00> : vector<4x32xf32>
    %3 = tpu.matmul %1, %2, %cst {dimension_numbers = #tpu.dot_dimension_numbers<[1], [0], [0], [1], [0, 0, 1, 1], [], []>} : vector<4x32xbf16>, vector<32x32xbf16>, vector<4x32xf32> -> vector<4x32xf32>
    %c0_3 = arith.constant 0 : index
    %c0_4 = arith.constant 0 : index
    %4 = vector.load %arg2[%c0_3, %c0_4] : memref<4x32xf32, #tpu.memory_space<vmem>>, vector<4x32xf32>
    %5 = arith.addf %3, %4 : vector<4x32xf32>
    %cst_5 = arith.constant 0.000000e+00 : f32
    %6 = vector.broadcast %cst_5 : f32 to vector<4x32xf32>
    %7 = arith.maximumf %5, %6 : vector<4x32xf32>
    %8 = arith.truncf %7 : vector<4x32xf32> to vector<4x32xbf16>
    %c0_6 = arith.constant 0 : index
    %c0_7 = arith.constant 0 : index
    %9 = vector.load %arg4[%c0_6, %c0_7] : memref<32x32xbf16, #tpu.memory_space<vmem>>, vector<32x32xbf16>
    %cst_8 = arith.constant dense<0.000000e+00> : vector<4x32xf32>
    %10 = tpu.matmul %8, %9, %cst_8 {dimension_numbers = #tpu.dot_dimension_numbers<[1], [0], [0], [1], [0, 0, 1, 1], [], []>} : vector<4x32xbf16>, vector<32x32xbf16>, vector<4x32xf32> -> vector<4x32xf32>
    %c0_9 = arith.constant 0 : index
    %c0_10 = arith.constant 0 : index
    %11 = vector.load %arg5[%c0_9, %c0_10] : memref<1x32xf32, #tpu.memory_space<vmem>>, vector<1x32xf32>
    %12 = vector.broadcast %11 : vector<1x32xf32> to vector<4x32xf32>
    %13 = arith.addf %10, %12 : vector<4x32xf32>
    %cst_11 = arith.constant 0.000000e+00 : f32
    %14 = vector.broadcast %cst_11 : f32 to vector<4x32xf32>
    %15 = arith.maximumf %13, %14 : vector<4x32xf32>
    %16 = arith.addf %15, %0 : vector<4x32xf32>
    %cst_12 = arith.constant 0x7F800000 : f32
    %17 = vector.broadcast %cst_12 : f32 to vector<4x1xf32>
    %c0_i32 = arith.constant 0 : i32
    %18 = vector.broadcast %c0_i32 : i32 to vector<4x1xi32>
    %c0_13 = arith.constant 0 : index
    %c0_14 = arith.constant 0 : index
    %19 = vector.load %arg6[%c0_13, %c0_14] : memref<5x32xf32, #tpu.memory_space<vmem>>, vector<1x32xf32>
    %20 = vector.broadcast %19 : vector<1x32xf32> to vector<4x32xf32>
    %21 = arith.subf %16, %20 : vector<4x32xf32>
    %22 = arith.mulf %21, %21 : vector<4x32xf32>
    %cst_15 = arith.constant dense<0.000000e+00> : vector<4xf32>
    %23 = vector.multi_reduction <add>, %22, %cst_15 [1] : vector<4x32xf32> to vector<4xf32>
    %24 = vector.shape_cast %23 : vector<4xf32> to vector<4x1xf32>
    %25 = arith.cmpf olt, %24, %17 : vector<4x1xf32>
    %26 = arith.select %25, %24, %17 : vector<4x1xi1>, vector<4x1xf32>
    %c0_i32_16 = arith.constant 0 : i32
    %27 = vector.broadcast %c0_i32_16 : i32 to vector<4x1xi32>
    %28 = arith.select %25, %27, %18 : vector<4x1xi1>, vector<4x1xi32>
    %c1 = arith.constant 1 : index
    %c0_17 = arith.constant 0 : index
    %29 = vector.load %arg6[%c1, %c0_17] : memref<5x32xf32, #tpu.memory_space<vmem>>, vector<1x32xf32>
    %30 = vector.broadcast %29 : vector<1x32xf32> to vector<4x32xf32>
    %31 = arith.subf %16, %30 : vector<4x32xf32>
    %32 = arith.mulf %31, %31 : vector<4x32xf32>
    %cst_18 = arith.constant dense<0.000000e+00> : vector<4xf32>
    %33 = vector.multi_reduction <add>, %32, %cst_18 [1] : vector<4x32xf32> to vector<4xf32>
    %34 = vector.shape_cast %33 : vector<4xf32> to vector<4x1xf32>
    %35 = arith.cmpf olt, %34, %26 : vector<4x1xf32>
    %36 = arith.select %35, %34, %26 : vector<4x1xi1>, vector<4x1xf32>
    %c1_i32 = arith.constant 1 : i32
    %37 = vector.broadcast %c1_i32 : i32 to vector<4x1xi32>
    %38 = arith.select %35, %37, %28 : vector<4x1xi1>, vector<4x1xi32>
    %c2 = arith.constant 2 : index
    %c0_19 = arith.constant 0 : index
    %39 = vector.load %arg6[%c2, %c0_19] : memref<5x32xf32, #tpu.memory_space<vmem>>, vector<1x32xf32>
    %40 = vector.broadcast %39 : vector<1x32xf32> to vector<4x32xf32>
    %41 = arith.subf %16, %40 : vector<4x32xf32>
    %42 = arith.mulf %41, %41 : vector<4x32xf32>
    %cst_20 = arith.constant dense<0.000000e+00> : vector<4xf32>
    %43 = vector.multi_reduction <add>, %42, %cst_20 [1] : vector<4x32xf32> to vector<4xf32>
    %44 = vector.shape_cast %43 : vector<4xf32> to vector<4x1xf32>
    %45 = arith.cmpf olt, %44, %36 : vector<4x1xf32>
    %46 = arith.select %45, %44, %36 : vector<4x1xi1>, vector<4x1xf32>
    %c2_i32 = arith.constant 2 : i32
    %47 = vector.broadcast %c2_i32 : i32 to vector<4x1xi32>
    %48 = arith.select %45, %47, %38 : vector<4x1xi1>, vector<4x1xi32>
    %c3 = arith.constant 3 : index
    %c0_21 = arith.constant 0 : index
    %49 = vector.load %arg6[%c3, %c0_21] : memref<5x32xf32, #tpu.memory_space<vmem>>, vector<1x32xf32>
    %50 = vector.broadcast %49 : vector<1x32xf32> to vector<4x32xf32>
    %51 = arith.subf %16, %50 : vector<4x32xf32>
    %52 = arith.mulf %51, %51 : vector<4x32xf32>
    %cst_22 = arith.constant dense<0.000000e+00> : vector<4xf32>
    %53 = vector.multi_reduction <add>, %52, %cst_22 [1] : vector<4x32xf32> to vector<4xf32>
    %54 = vector.shape_cast %53 : vector<4xf32> to vector<4x1xf32>
    %55 = arith.cmpf olt, %54, %46 : vector<4x1xf32>
    %56 = arith.select %55, %54, %46 : vector<4x1xi1>, vector<4x1xf32>
    %c3_i32 = arith.constant 3 : i32
    %57 = vector.broadcast %c3_i32 : i32 to vector<4x1xi32>
    %58 = arith.select %55, %57, %48 : vector<4x1xi1>, vector<4x1xi32>
    %c4 = arith.constant 4 : index
    %c0_23 = arith.constant 0 : index
    %59 = vector.load %arg6[%c4, %c0_23] : memref<5x32xf32, #tpu.memory_space<vmem>>, vector<1x32xf32>
    %60 = vector.broadcast %59 : vector<1x32xf32> to vector<4x32xf32>
    %61 = arith.subf %16, %60 : vector<4x32xf32>
    %62 = arith.mulf %61, %61 : vector<4x32xf32>
    %cst_24 = arith.constant dense<0.000000e+00> : vector<4xf32>
    %63 = vector.multi_reduction <add>, %62, %cst_24 [1] : vector<4x32xf32> to vector<4xf32>
    %64 = vector.shape_cast %63 : vector<4xf32> to vector<4x1xf32>
    %65 = arith.cmpf olt, %64, %56 : vector<4x1xf32>
    %66 = arith.select %65, %64, %56 : vector<4x1xi1>, vector<4x1xf32>
    %c4_i32 = arith.constant 4 : i32
    %67 = vector.broadcast %c4_i32 : i32 to vector<4x1xi32>
    %68 = arith.select %65, %67, %58 : vector<4x1xi1>, vector<4x1xi32>
    %cst_25 = arith.constant 1.000000e+01 : f32
    %69 = vector.broadcast %cst_25 : f32 to vector<4x1xf32>
    %70 = arith.cmpf olt, %66, %69 : vector<4x1xf32>
    %c5_i32 = arith.constant 5 : i32
    %71 = vector.broadcast %c5_i32 : i32 to vector<4x1xi32>
    %72 = arith.select %70, %68, %71 : vector<4x1xi1>, vector<4x1xi32>
    %c0_26 = arith.constant 0 : index
    %c0_27 = arith.constant 0 : index
    %73 = vector.load %arg7[%c0_26, %c0_27] : memref<4x1xi32, #tpu.memory_space<vmem>>, vector<4x1xi32>
    tpu.vector_store %arg7[%c0_26, %c0_27], %72 {strides = array<i32>} : memref<4x1xi32, #tpu.memory_space<vmem>>, vector<4x1xi32>,
    return
  }
  func.func @transform_0(%arg0: i32) -> (i32, i32) {
    %c0_i32 = arith.constant 0 : i32
    %c0_i32_0 = arith.constant 0 : i32
    return %arg0, %c0_i32 : i32, i32
  }
  func.func @transform_1(%arg0: i32) -> (i32, i32) {
    %c0_i32 = arith.constant 0 : i32
    %c0_i32_0 = arith.constant 0 : i32
    return %arg0, %c0_i32 : i32, i32
  }
  func.func @transform_2(%arg0: i32) -> (i32, i32) {
    %c0_i32 = arith.constant 0 : i32
    %c0_i32_0 = arith.constant 0 : i32
    %c0_i32_1 = arith.constant 0 : i32
    return %c0_i32, %c0_i32_0 : i32, i32
  }
  func.func @transform_3(%arg0: i32) -> (i32, i32) {
    %c0_i32 = arith.constant 0 : i32
    %c0_i32_0 = arith.constant 0 : i32
    %c0_i32_1 = arith.constant 0 : i32
    return %c0_i32, %c0_i32_0 : i32, i32
  }
  func.func @transform_4(%arg0: i32) -> (i32, i32) {
    %c0_i32 = arith.constant 0 : i32
    %c0_i32_0 = arith.constant 0 : i32
    %c0_i32_1 = arith.constant 0 : i32
    return %c0_i32, %c0_i32_0 : i32, i32
  }
  func.func @transform_5(%arg0: i32) -> (i32, i32) {
    %c0_i32 = arith.constant 0 : i32
    %c0_i32_0 = arith.constant 0 : i32
    %c0_i32_1 = arith.constant 0 : i32
    return %c0_i32, %c0_i32_0 : i32, i32
  }
  func.func @transform_6(%arg0: i32) -> (i32, i32) {
    %c0_i32 = arith.constant 0 : i32
    %c0_i32_0 = arith.constant 0 : i32
    return %arg0, %c0_i32 : i32, i32
  }
}

</mosaic_0001>

<bundles_post_ra>
// kernel: reward_classifier_forward.5
= control target key start
LH: loop header
LB: loop body
LE: loop exit
PB: predicated region body
PF: predicated region fallthrough
CT: control target
= control target key end

     0   :  { %v5257_v0 = vmov 0   ;;  %vm4183_vm0 = vcmask 257024   ;;  %s7802_s1 = inlined_call_operand.vmem [shape: bf16[256,32], index: 1, kind: input, shape index: {}]   ;;  %s7803_s0 = inlined_call_operand.vmem [shape: u8[2000,256], index: 0, kind: input, shape index: {}]   ;;  %s7804_s2 = inlined_call_operand.vmem [shape: f32[1,32], index: 2, kind: input, shape index: {}]   ;;  %s7805_s3 = inlined_call_operand.vmem [shape: bf16[2000,32], index: 3, kind: output, shape index: {}]  }
   0x1   :  { %1900 = vmatprep.subr.bf16.mxu0 %v5257_v0  ;;  %v5238_v1 = vld [vmem:[%s7802_s1] sm:$0xff]   ;;  %5205 = vmatprep.subr.bf16.mxu1 %v5257_v0  ;;  %v5239_v2 = vld [vmem:[%s7802_s1 + $0x8] sm:$0xff]   ;;  %v5240_v3 = vld [vmem:[%s7802_s1 + $0x10] sm:$0xff]  }
   0x2   :  { %1901 = vmatpush1.bf16.msra.mxu0 %v5238_v1  ;;  %5221 = vmatpush1.bf16.msra.mxu1 %v5238_v1  ;;  %v5241_v4 = vld [vmem:[%s7802_s1 + $0x18] sm:$0xff]   ;;  %v5242_v5 = vld [vmem:[%s7802_s1 + $0x20] sm:$0xff]   ;;  %v5243_v13 = vld [vmem:[%s7802_s1 + $0x28] sm:$0xff]  }
   0x3   :  { %1902 = vmatprep.subr.bf16.mxu0 %v5257_v0  ;;  %5206 = vmatprep.subr.bf16.mxu1 %v5257_v0  ;;  %v5306_v6 = vld [vmem:[%s7803_s0] sm:$0xf]  ;;  %v5311_v7 = vld [vmem:[%s7803_s0 + $0x4] sm:$0xf]  ;;  %v5316_v8 = vld [vmem:[%s7803_s0 + $0x1f8] sm:$0xf] }
   0x4   :  { %v265_v9 = vunpack.c.l.u8.bf16 %v5306_v6  ;;  %v266_v10 = vunpack.c.l.u8.bf16 %v5311_v7  ;;  %v5323_v11 = vld [vmem:[%s7803_s0 + $0x1fc] sm:$0xf]  ;;  %v391_v12 = vunpack.c.l.u8.bf16 %v5316_v8  ;;  %v5244_v17 = vld [vmem:[%s7802_s1 + $0x30] sm:$0xff]   ;;  %v5246_v19 = vld [vmem:[%s7802_s1 + $0x40] sm:$0xff]  }
   0x5   :  { %v392_v14 = vunpack.c.l.u8.bf16 %v5323_v11  ;;  %v5245_v18 = vld [vmem:[%s7802_s1 + $0x38] sm:$0xff]   ;;  %v5247_v20 = vld [vmem:[%s7802_s1 + $0x48] sm:$0xff]   ;;  %v5248_v21 = vld [vmem:[%s7802_s1 + $0x50] sm:$0xff]  }
   0x6   :  { %1903 = vmatpush1.bf16.msra.mxu0 %v5239_v2  ;;  %5222 = vmatpush1.bf16.msra.mxu1 %v5239_v2  ;;  %v4440_v15 = vcombine.high %v265_v9, %v266_v10  ;;  %v5249_v22 = vld [vmem:[%s7802_s1 + $0x58] sm:$0xff]   ;;  %v5250_v23 = vld [vmem:[%s7802_s1 + $0x60] sm:$0xff]   ;;  %v5251_v24 = vld [vmem:[%s7802_s1 + $0x68] sm:$0xff]   ;;  %v4439_v35 = vcombine.low %v265_v9, %v266_v10 }
   0x7   :  { %1904 = vmatprep.subr.bf16.mxu0 %v5257_v0  ;;  %5207 = vmatprep.subr.bf16.mxu1 %v5257_v0  ;;  %v4566_v16 = vcombine.high %v391_v12, %v392_v14  ;;  %v5252_v25 = vld [vmem:[%s7802_s1 + $0x70] sm:$0xff]   ;;  %v17_v26 = vld [vmem:[%s7803_s0 + $0x8] sm:$0xf]  ;;  %v18_v27 = vld [vmem:[%s7803_s0 + $0xc] sm:$0xf]  ;;  %v4565_v36 = vcombine.low %v391_v12, %v392_v14 }
   0x8   :  { %1932 = vmatprep.mubr.bf16.mxu0 %v4440_v15  ;;  %v143_v28 = vld [vmem:[%s7803_s0 + $0x200] sm:$0xf]  ;;  %v144_v29 = vld [vmem:[%s7803_s0 + $0x204] sm:$0xf]  ;;  %v5253_v30 = vld [vmem:[%s7802_s1 + $0x78] sm:$0xff]   ;;  %v267_v31 = vunpack.c.l.u8.bf16 %v17_v26  ;;  %v268_v32 = vunpack.c.l.u8.bf16 %v18_v27 }
   0x9   :  { %2436 = vmatprep.mubr.bf16.mxu1 %v4566_v16  ;;  %v393_v33 = vunpack.c.l.u8.bf16 %v143_v28  ;;  %v394_v34 = vunpack.c.l.u8.bf16 %v144_v29  ;;  %v19_v39 = vld [vmem:[%s7803_s0 + $0x10] sm:$0xf]  ;;  %v20_v40 = vld [vmem:[%s7803_s0 + $0x14] sm:$0xf]  ;;  %v145_v41 = vld [vmem:[%s7803_s0 + $0x208] sm:$0xf] }
   0xa   :  { %1905 = vmatpush1.bf16.msra.mxu0 %v5240_v3  ;;  %5223 = vmatpush1.bf16.msra.mxu1 %v5240_v3  ;;  %v4442_v37 = vcombine.high %v267_v31, %v268_v32  ;;  %v146_v42 = vld [vmem:[%s7803_s0 + $0x20c] sm:$0xf]  ;;  %v269_v43 = vunpack.c.l.u8.bf16 %v19_v39  ;;  %v270_v44 = vunpack.c.l.u8.bf16 %v20_v40  ;;  %v395_v45 = vunpack.c.l.u8.bf16 %v145_v41  ;;  %v21_v51 = vld [vmem:[%s7803_s0 + $0x18] sm:$0xf]  ;;  %v22_v52 = vld [vmem:[%s7803_s0 + $0x1c] sm:$0xf] }
   0xb   :  { %1906 = vmatprep.subr.bf16.mxu0 %v5257_v0  ;;  %5208 = vmatprep.subr.bf16.mxu1 %v5257_v0  ;;  %v4568_v38 = vcombine.high %v393_v33, %v394_v34  ;;  %v396_v46 = vunpack.c.l.u8.bf16 %v146_v42  ;;  %v4441_v47 = vcombine.low %v267_v31, %v268_v32  ;;  %v4567_v48 = vcombine.low %v393_v33, %v394_v34  ;;  %v147_v53 = vld [vmem:[%s7803_s0 + $0x210] sm:$0xf]  ;;  %v148_v54 = vld [vmem:[%s7803_s0 + $0x214] sm:$0xf]  ;;  %v23_v63 = vld [vmem:[%s7803_s0 + $0x20] sm:$0xf] }
   0xc   :  { %v4444_v49 = vcombine.high %v269_v43, %v270_v44  ;;  %v271_v55 = vunpack.c.l.u8.bf16 %v21_v51  ;;  %v272_v56 = vunpack.c.l.u8.bf16 %v22_v52  ;;  %v397_v57 = vunpack.c.l.u8.bf16 %v147_v53  ;;  %v149_v1 = vld [vmem:[%s7803_s0 + $0x218] sm:$0xf]  ;;  %v150_v2 = vld [vmem:[%s7803_s0 + $0x21c] sm:$0xf]  ;;  %v25_v11 = vld [vmem:[%s7803_s0 + $0x28] sm:$0xf] }
   0xd   :  { %v4570_v50 = vcombine.high %v395_v45, %v396_v46  ;;  %v398_v58 = vunpack.c.l.u8.bf16 %v148_v54  ;;  %v4443_v59 = vcombine.low %v269_v43, %v270_v44  ;;  %v4569_v60 = vcombine.low %v395_v45, %v396_v46  ;;  %v26_v12 = vld [vmem:[%s7803_s0 + $0x2c] sm:$0xf]  ;;  %v152_v14 = vld [vmem:[%s7803_s0 + $0x224] sm:$0xf] }
   0xe   :  { %1907 = vmatpush1.bf16.msra.mxu0 %v5241_v4  ;;  %5224 = vmatpush1.bf16.msra.mxu1 %v5241_v4  ;;  %v4446_v61 = vcombine.high %v271_v55, %v272_v56  ;;  %v273_v3 = vunpack.c.l.u8.bf16 %v23_v63  ;;  %v400_v6 = vunpack.c.l.u8.bf16 %v150_v2  ;;  %v4445_v7 = vcombine.low %v271_v55, %v272_v56  ;;  %v154_v26 = vld [vmem:[%s7803_s0 + $0x22c] sm:$0xf] }
   0xf   :  { %1908 = vmatprep.subr.bf16.mxu0 %v5257_v0  ;;  %5209 = vmatprep.subr.bf16.mxu1 %v5257_v0  ;;  %v4572_v62 = vcombine.high %v397_v57, %v398_v58  ;;  %v4571_v8 = vcombine.low %v397_v57, %v398_v58  ;;  %v275_v15 = vunpack.c.l.u8.bf16 %v25_v11  ;;  %v276_v16 = vunpack.c.l.u8.bf16 %v26_v12 }
  0x11   :  { %v4449_v31 = vcombine.low %v275_v15, %v276_v16 }
  0x12   :  { %1909 = vmatpush1.bf16.msra.mxu0 %v5242_v5  ;;  %5225 = vmatpush1.bf16.msra.mxu1 %v5242_v5  ;;  %v399_v5 = vunpack.c.l.u8.bf16 %v149_v1 }
  0x13   :  { %1910 = vmatprep.subr.bf16.mxu0 %v5257_v0  ;;  %5210 = vmatprep.subr.bf16.mxu1 %v5257_v0 }
  0x14   :  { %v4574_v10 = vcombine.high %v399_v5, %v400_v6 }
  0x16   :  { %1911 = vmatpush1.bf16.msra.mxu0 %v5243_v13  ;;  %5226 = vmatpush1.bf16.msra.mxu1 %v5243_v13  ;;  %v151_v13 = vld [vmem:[%s7803_s0 + $0x220] sm:$0xf] }
  0x17   :  { %1912 = vmatprep.subr.bf16.mxu0 %v5257_v0  ;;  %5211 = vmatprep.subr.bf16.mxu1 %v5257_v0 }
  0x1a   :  { %1913 = vmatpush1.bf16.msra.mxu0 %v5244_v17  ;;  %5227 = vmatpush1.bf16.msra.mxu1 %v5244_v17  ;;  %v401_v17 = vunpack.c.l.u8.bf16 %v151_v13 }
  0x1b   :  { %1914 = vmatprep.subr.bf16.mxu0 %v5257_v0  ;;  %5212 = vmatprep.subr.bf16.mxu1 %v5257_v0 }
  0x1e   :  { %1915 = vmatpush1.bf16.msra.mxu0 %v5245_v18  ;;  %5228 = vmatpush1.bf16.msra.mxu1 %v5245_v18  ;;  %v402_v18 = vunpack.c.l.u8.bf16 %v152_v14 }
  0x1f   :  { %1916 = vmatprep.subr.bf16.mxu0 %v5257_v0  ;;  %5213 = vmatprep.subr.bf16.mxu1 %v5257_v0 }
  0x20   :  { %v4575_v32 = vcombine.low %v401_v17, %v402_v18 }
  0x22   :  { %1917 = vmatpush1.bf16.msra.mxu0 %v5246_v19  ;;  %5229 = vmatpush1.bf16.msra.mxu1 %v5246_v19 }
  0x23   :  { %1918 = vmatprep.subr.bf16.mxu0 %v5257_v0  ;;  %5214 = vmatprep.subr.bf16.mxu1 %v5257_v0 }
  0x26   :  { %1919 = vmatpush1.bf16.msra.mxu0 %v5247_v20  ;;  %5230 = vmatpush1.bf16.msra.mxu1 %v5247_v20  ;;  %v4573_v20 = vcombine.low %v399_v5, %v400_v6 }
  0x27   :  { %1920 = vmatprep.subr.bf16.mxu0 %v5257_v0  ;;  %5215 = vmatprep.subr.bf16.mxu1 %v5257_v0 }
  0x2a   :  { %1921 = vmatpush1.bf16.msra.mxu0 %v5248_v21  ;;  %5231 = vmatpush1.bf16.msra.mxu1 %v5248_v21  ;;  %v4450_v21 = vcombine.high %v275_v15, %v276_v16 }
  0x2b   :  { %1922 = vmatprep.subr.bf16.mxu0 %v5257_v0  ;;  %5216 = vmatprep.subr.bf16.mxu1 %v5257_v0 }
  0x2e   :  { %1923 = vmatpush1.bf16.msra.mxu0 %v5249_v22  ;;  %5232 = vmatpush1.bf16.msra.mxu1 %v5249_v22  ;;  %v4576_v22 = vcombine.high %v401_v17, %v402_v18 }
  0x2f   :  { %1924 = vmatprep.subr.bf16.mxu0 %v5257_v0  ;;  %5217 = vmatprep.subr.bf16.mxu1 %v5257_v0 }
  0x32   :  { %1925 = vmatpush1.bf16.msra.mxu0 %v5250_v23  ;;  %5233 = vmatpush1.bf16.msra.mxu1 %v5250_v23  ;;  %v27_v23 = vld [vmem:[%s7803_s0 + $0x30] sm:$0xf] }
  0x33   :  { %1926 = vmatprep.subr.bf16.mxu0 %v5257_v0  ;;  %5218 = vmatprep.subr.bf16.mxu1 %v5257_v0  ;;  %v277_v27 = vunpack.c.l.u8.bf16 %v27_v23 }
  0x36   :  { %1927 = vmatpush1.bf16.msra.mxu0 %v5251_v24  ;;  %5234 = vmatpush1.bf16.msra.mxu1 %v5251_v24  ;;  %v28_v24 = vld [vmem:[%s7803_s0 + $0x34] sm:$0xf] }
  0x37   :  { %1928 = vmatprep.subr.bf16.mxu0 %v5257_v0  ;;  %5219 = vmatprep.subr.bf16.mxu1 %v5257_v0  ;;  %v278_v28 = vunpack.c.l.u8.bf16 %v28_v24 }
  0x39   :  { %v4452_v33 = vcombine.high %v277_v27, %v278_v28  ;;  %v4451_v43 = vcombine.low %v277_v27, %v278_v28 }
  0x3a   :  { %1929 = vmatpush1.bf16.msra.mxu0 %v5252_v25  ;;  %5235 = vmatpush1.bf16.msra.mxu1 %v5252_v25  ;;  %v153_v25 = vld [vmem:[%s7803_s0 + $0x228] sm:$0xf] }
  0x3b   :  { %1930 = vmatprep.subr.bf16.mxu0 %v5257_v0  ;;  %5220 = vmatprep.subr.bf16.mxu1 %v5257_v0  ;;  %v24_v0 = vld [vmem:[%s7803_s0 + $0x24] sm:$0xf]  ;;  %v403_v29 = vunpack.c.l.u8.bf16 %v153_v25 }
  0x3c   :  { %v274_v4 = vunpack.c.l.u8.bf16 %v24_v0 }
  0x3e   :  { %1931 = vmatpush1.bf16.msra.mxu0 %v5253_v30  ;;  %5236 = vmatpush1.bf16.msra.mxu1 %v5253_v30  ;;  %v4448_v9 = vcombine.high %v273_v3, %v274_v4  ;;  %v4447_v19 = vcombine.low %v273_v3, %v274_v4  ;;  %v404_v30 = vunpack.c.l.u8.bf16 %v154_v26 }
  0x40   :  { %v4578_v34 = vcombine.high %v403_v29, %v404_v30  ;;  %v4577_v44 = vcombine.low %v403_v29, %v404_v30 }
  0x41   :  { %1933 = vmatmul.mubr.bf16.vlgmr.msra.gmra.mrb[0].mxu0 %v4439_v35  ;;  %2437 = vmatmul.mubr.bf16.vlgmr.msra.gmra.mrb[0].mxu1 %v4565_v36  ;;  %v29_v35 = vld [vmem:[%s7803_s0 + $0x38] sm:$0xf]  ;;  %v30_v36 = vld [vmem:[%s7803_s0 + $0x3c] sm:$0xf] }
  0x42   :  { %1940 = vmatprep.mubr.bf16.mxu0 %v4442_v37  ;;  %2444 = vmatprep.mubr.bf16.mxu1 %v4568_v38  ;;  %v155_v37 = vld [vmem:[%s7803_s0 + $0x230] sm:$0xf]  ;;  %v156_v38 = vld [vmem:[%s7803_s0 + $0x234] sm:$0xf]  ;;  %v279_v39 = vunpack.c.l.u8.bf16 %v29_v35  ;;  %v280_v40 = vunpack.c.l.u8.bf16 %v30_v36 }
  0x43   :  { %v405_v41 = vunpack.c.l.u8.bf16 %v155_v37  ;;  %v406_v42 = vunpack.c.l.u8.bf16 %v156_v38 }
  0x44   :  { %v4454_v45 = vcombine.high %v279_v39, %v280_v40  ;;  %v4453_v55 = vcombine.low %v279_v39, %v280_v40 }
  0x45   :  { %v4580_v46 = vcombine.high %v405_v41, %v406_v42  ;;  %v4579_v56 = vcombine.low %v405_v41, %v406_v42 }
  0x49   :  { %1941 = vmatmul.mubr.bf16.gmra.mrb[4].mxu0 %v4441_v47  ;;  %2445 = vmatmul.mubr.bf16.gmra.mrb[4].mxu1 %v4567_v48  ;;  %v31_v47 = vld [vmem:[%s7803_s0 + $0x40] sm:$0xf]  ;;  %v32_v48 = vld [vmem:[%s7803_s0 + $0x44] sm:$0xf] }
  0x4a   :  { %1948 = vmatprep.mubr.bf16.mxu0 %v4444_v49  ;;  %2452 = vmatprep.mubr.bf16.mxu1 %v4570_v50  ;;  %v157_v49 = vld [vmem:[%s7803_s0 + $0x238] sm:$0xf]  ;;  %v158_v50 = vld [vmem:[%s7803_s0 + $0x23c] sm:$0xf]  ;;  %v281_v51 = vunpack.c.l.u8.bf16 %v31_v47  ;;  %v282_v52 = vunpack.c.l.u8.bf16 %v32_v48 }
  0x4b   :  { %v407_v53 = vunpack.c.l.u8.bf16 %v157_v49  ;;  %v408_v54 = vunpack.c.l.u8.bf16 %v158_v50 }
  0x4c   :  { %v4456_v57 = vcombine.high %v281_v51, %v282_v52  ;;  %v4455_v3 = vcombine.low %v281_v51, %v282_v52 }
  0x4d   :  { %v4582_v58 = vcombine.high %v407_v53, %v408_v54  ;;  %v4581_v4 = vcombine.low %v407_v53, %v408_v54 }
  0x51   :  { %1949 = vmatmul.mubr.bf16.gmra.mrb[8].mxu0 %v4443_v59  ;;  %2453 = vmatmul.mubr.bf16.gmra.mrb[8].mxu1 %v4569_v60  ;;  %v33_v59 = vld [vmem:[%s7803_s0 + $0x48] sm:$0xf]  ;;  %v34_v60 = vld [vmem:[%s7803_s0 + $0x4c] sm:$0xf] }
  0x52   :  { %1956 = vmatprep.mubr.bf16.mxu0 %v4446_v61  ;;  %2460 = vmatprep.mubr.bf16.mxu1 %v4572_v62  ;;  %v159_v61 = vld [vmem:[%s7803_s0 + $0x240] sm:$0xf]  ;;  %v160_v62 = vld [vmem:[%s7803_s0 + $0x244] sm:$0xf]  ;;  %v283_v63 = vunpack.c.l.u8.bf16 %v33_v59  ;;  %v284_v0 = vunpack.c.l.u8.bf16 %v34_v60 }
  0x53   :  { %v409_v1 = vunpack.c.l.u8.bf16 %v159_v61  ;;  %v410_v2 = vunpack.c.l.u8.bf16 %v160_v62 }
  0x54   :  { %v4458_v5 = vcombine.high %v283_v63, %v284_v0  ;;  %v4457_v15 = vcombine.low %v283_v63, %v284_v0 }
  0x55   :  { %v4584_v6 = vcombine.high %v409_v1, %v410_v2  ;;  %v4583_v16 = vcombine.low %v409_v1, %v410_v2 }
  0x59   :  { %1957 = vmatmul.mubr.bf16.gmra.mrb[12].mxu0 %v4445_v7  ;;  %2461 = vmatmul.mubr.bf16.gmra.mrb[12].mxu1 %v4571_v8  ;;  %v35_v7 = vld [vmem:[%s7803_s0 + $0x50] sm:$0xf]  ;;  %v36_v8 = vld [vmem:[%s7803_s0 + $0x54] sm:$0xf] }
  0x5a   :  { %1964 = vmatprep.mubr.bf16.mxu0 %v4448_v9  ;;  %2468 = vmatprep.mubr.bf16.mxu1 %v4574_v10  ;;  %v161_v9 = vld [vmem:[%s7803_s0 + $0x248] sm:$0xf]  ;;  %v162_v10 = vld [vmem:[%s7803_s0 + $0x24c] sm:$0xf]  ;;  %v285_v11 = vunpack.c.l.u8.bf16 %v35_v7  ;;  %v286_v12 = vunpack.c.l.u8.bf16 %v36_v8 }
  0x5b   :  { %v411_v13 = vunpack.c.l.u8.bf16 %v161_v9  ;;  %v412_v14 = vunpack.c.l.u8.bf16 %v162_v10 }
  0x5c   :  { %v4460_v17 = vcombine.high %v285_v11, %v286_v12  ;;  %v4459_v27 = vcombine.low %v285_v11, %v286_v12 }
  0x5d   :  { %v4586_v18 = vcombine.high %v411_v13, %v412_v14  ;;  %v4585_v28 = vcombine.low %v411_v13, %v412_v14 }
  0x61   :  { %1965 = vmatmul.mubr.bf16.gmra.mrb[16].mxu0 %v4447_v19  ;;  %2469 = vmatmul.mubr.bf16.gmra.mrb[16].mxu1 %v4573_v20  ;;  %v37_v19 = vld [vmem:[%s7803_s0 + $0x58] sm:$0xf]  ;;  %v38_v20 = vld [vmem:[%s7803_s0 + $0x5c] sm:$0xf] }
  0x62   :  { %1972 = vmatprep.mubr.bf16.mxu0 %v4450_v21  ;;  %2476 = vmatprep.mubr.bf16.mxu1 %v4576_v22  ;;  %v163_v21 = vld [vmem:[%s7803_s0 + $0x250] sm:$0xf]  ;;  %v164_v22 = vld [vmem:[%s7803_s0 + $0x254] sm:$0xf]  ;;  %v287_v23 = vunpack.c.l.u8.bf16 %v37_v19  ;;  %v288_v24 = vunpack.c.l.u8.bf16 %v38_v20 }
  0x63   :  { %v413_v25 = vunpack.c.l.u8.bf16 %v163_v21  ;;  %v414_v26 = vunpack.c.l.u8.bf16 %v164_v22 }
  0x64   :  { %v4462_v29 = vcombine.high %v287_v23, %v288_v24  ;;  %v4461_v39 = vcombine.low %v287_v23, %v288_v24 }
  0x65   :  { %v4588_v30 = vcombine.high %v413_v25, %v414_v26  ;;  %v4587_v40 = vcombine.low %v413_v25, %v414_v26 }
  0x69   :  { %1973 = vmatmul.mubr.bf16.gmra.mrb[20].mxu0 %v4449_v31  ;;  %2477 = vmatmul.mubr.bf16.gmra.mrb[20].mxu1 %v4575_v32  ;;  %v39_v31 = vld [vmem:[%s7803_s0 + $0x60] sm:$0xf]  ;;  %v40_v32 = vld [vmem:[%s7803_s0 + $0x64] sm:$0xf] }
  0x6a   :  { %1980 = vmatprep.mubr.bf16.mxu0 %v4452_v33  ;;  %2484 = vmatprep.mubr.bf16.mxu1 %v4578_v34  ;;  %v165_v33 = vld [vmem:[%s7803_s0 + $0x258] sm:$0xf]  ;;  %v166_v34 = vld [vmem:[%s7803_s0 + $0x25c] sm:$0xf]  ;;  %v289_v35 = vunpack.c.l.u8.bf16 %v39_v31  ;;  %v290_v36 = vunpack.c.l.u8.bf16 %v40_v32 }
  0x6b   :  { %v415_v37 = vunpack.c.l.u8.bf16 %v165_v33  ;;  %v416_v38 = vunpack.c.l.u8.bf16 %v166_v34 }
  0x6c   :  { %v4464_v41 = vcombine.high %v289_v35, %v290_v36  ;;  %v4463_v51 = vcombine.low %v289_v35, %v290_v36 }
  0x6d   :  { %v4590_v42 = vcombine.high %v415_v37, %v416_v38  ;;  %v4589_v52 = vcombine.low %v415_v37, %v416_v38 }
  0x71   :  { %1981 = vmatmul.mubr.bf16.gmra.mrb[24].mxu0 %v4451_v43  ;;  %2485 = vmatmul.mubr.bf16.gmra.mrb[24].mxu1 %v4577_v44  ;;  %v41_v43 = vld [vmem:[%s7803_s0 + $0x68] sm:$0xf]  ;;  %v42_v44 = vld [vmem:[%s7803_s0 + $0x6c] sm:$0xf] }
  0x72   :  { %1988 = vmatprep.mubr.bf16.mxu0 %v4454_v45  ;;  %2492 = vmatprep.mubr.bf16.mxu1 %v4580_v46  ;;  %v167_v45 = vld [vmem:[%s7803_s0 + $0x260] sm:$0xf]  ;;  %v168_v46 = vld [vmem:[%s7803_s0 + $0x264] sm:$0xf]  ;;  %v291_v47 = vunpack.c.l.u8.bf16 %v41_v43  ;;  %v292_v48 = vunpack.c.l.u8.bf16 %v42_v44 }
  0x73   :  { %v417_v49 = vunpack.c.l.u8.bf16 %v167_v45  ;;  %v418_v50 = vunpack.c.l.u8.bf16 %v168_v46 }
  0x74   :  { %v4466_v53 = vcombine.high %v291_v47, %v292_v48  ;;  %v4465_v63 = vcombine.low %v291_v47, %v292_v48 }
  0x75   :  { %v4592_v54 = vcombine.high %v417_v49, %v418_v50  ;;  %v4591_v0 = vcombine.low %v417_v49, %v418_v50 }
  0x79   :  { %1989 = vmatmul.mubr.bf16.gmra.mrb[28].mxu0 %v4453_v55  ;;  %2493 = vmatmul.mubr.bf16.gmra.mrb[28].mxu1 %v4579_v56  ;;  %v43_v55 = vld [vmem:[%s7803_s0 + $0x70] sm:$0xf]  ;;  %v44_v56 = vld [vmem:[%s7803_s0 + $0x74] sm:$0xf] }
  0x7a   :  { %1996 = vmatprep.mubr.bf16.mxu0 %v4456_v57  ;;  %2500 = vmatprep.mubr.bf16.mxu1 %v4582_v58  ;;  %v169_v57 = vld [vmem:[%s7803_s0 + $0x268] sm:$0xf]  ;;  %v170_v58 = vld [vmem:[%s7803_s0 + $0x26c] sm:$0xf]  ;;  %v293_v59 = vunpack.c.l.u8.bf16 %v43_v55  ;;  %v294_v60 = vunpack.c.l.u8.bf16 %v44_v56 }
  0x7b   :  { %v419_v61 = vunpack.c.l.u8.bf16 %v169_v57  ;;  %v420_v62 = vunpack.c.l.u8.bf16 %v170_v58 }
  0x7c   :  { %v4468_v1 = vcombine.high %v293_v59, %v294_v60  ;;  %v4467_v11 = vcombine.low %v293_v59, %v294_v60 }
  0x7d   :  { %v4594_v2 = vcombine.high %v419_v61, %v420_v62  ;;  %v4593_v12 = vcombine.low %v419_v61, %v420_v62 }
  0x81   :  { %1997 = vmatmul.mubr.bf16.gmra.mrb[32].mxu0 %v4455_v3  ;;  %2501 = vmatmul.mubr.bf16.gmra.mrb[32].mxu1 %v4581_v4  ;;  %v45_v3 = vld [vmem:[%s7803_s0 + $0x78] sm:$0xf]  ;;  %v46_v4 = vld [vmem:[%s7803_s0 + $0x7c] sm:$0xf] }
  0x82   :  { %2004 = vmatprep.mubr.bf16.mxu0 %v4458_v5  ;;  %2508 = vmatprep.mubr.bf16.mxu1 %v4584_v6  ;;  %v171_v5 = vld [vmem:[%s7803_s0 + $0x270] sm:$0xf]  ;;  %v172_v6 = vld [vmem:[%s7803_s0 + $0x274] sm:$0xf]  ;;  %v295_v7 = vunpack.c.l.u8.bf16 %v45_v3  ;;  %v296_v8 = vunpack.c.l.u8.bf16 %v46_v4 }
  0x83   :  { %v421_v9 = vunpack.c.l.u8.bf16 %v171_v5  ;;  %v422_v10 = vunpack.c.l.u8.bf16 %v172_v6 }
  0x84   :  { %v4470_v13 = vcombine.high %v295_v7, %v296_v8  ;;  %v4469_v23 = vcombine.low %v295_v7, %v296_v8 }
  0x85   :  { %v4596_v14 = vcombine.high %v421_v9, %v422_v10  ;;  %v4595_v24 = vcombine.low %v421_v9, %v422_v10 }
  0x89   :  { %2005 = vmatmul.mubr.bf16.gmra.mrb[36].mxu0 %v4457_v15  ;;  %2509 = vmatmul.mubr.bf16.gmra.mrb[36].mxu1 %v4583_v16  ;;  %v47_v15 = vld [vmem:[%s7803_s0 + $0x80] sm:$0xf]  ;;  %v48_v16 = vld [vmem:[%s7803_s0 + $0x84] sm:$0xf] }
  0x8a   :  { %2012 = vmatprep.mubr.bf16.mxu0 %v4460_v17  ;;  %2516 = vmatprep.mubr.bf16.mxu1 %v4586_v18  ;;  %v173_v17 = vld [vmem:[%s7803_s0 + $0x278] sm:$0xf]  ;;  %v174_v18 = vld [vmem:[%s7803_s0 + $0x27c] sm:$0xf]  ;;  %v297_v19 = vunpack.c.l.u8.bf16 %v47_v15  ;;  %v298_v20 = vunpack.c.l.u8.bf16 %v48_v16 }
  0x8b   :  { %v423_v21 = vunpack.c.l.u8.bf16 %v173_v17  ;;  %v424_v22 = vunpack.c.l.u8.bf16 %v174_v18 }
  0x8c   :  { %v4472_v25 = vcombine.high %v297_v19, %v298_v20  ;;  %v4471_v35 = vcombine.low %v297_v19, %v298_v20 }
  0x8d   :  { %v4598_v26 = vcombine.high %v423_v21, %v424_v22  ;;  %v4597_v36 = vcombine.low %v423_v21, %v424_v22 }
  0x91   :  { %2013 = vmatmul.mubr.bf16.gmra.mrb[40].mxu0 %v4459_v27  ;;  %2517 = vmatmul.mubr.bf16.gmra.mrb[40].mxu1 %v4585_v28  ;;  %v49_v27 = vld [vmem:[%s7803_s0 + $0x88] sm:$0xf]  ;;  %v50_v28 = vld [vmem:[%s7803_s0 + $0x8c] sm:$0xf] }
  0x92   :  { %2020 = vmatprep.mubr.bf16.mxu0 %v4462_v29  ;;  %2524 = vmatprep.mubr.bf16.mxu1 %v4588_v30  ;;  %v175_v29 = vld [vmem:[%s7803_s0 + $0x280] sm:$0xf]  ;;  %v176_v30 = vld [vmem:[%s7803_s0 + $0x284] sm:$0xf]  ;;  %v299_v31 = vunpack.c.l.u8.bf16 %v49_v27  ;;  %v300_v32 = vunpack.c.l.u8.bf16 %v50_v28 }
  0x93   :  { %v425_v33 = vunpack.c.l.u8.bf16 %v175_v29  ;;  %v426_v34 = vunpack.c.l.u8.bf16 %v176_v30 }
  0x94   :  { %v4474_v37 = vcombine.high %v299_v31, %v300_v32  ;;  %v4473_v47 = vcombine.low %v299_v31, %v300_v32 }
  0x95   :  { %v4600_v38 = vcombine.high %v425_v33, %v426_v34  ;;  %v4599_v48 = vcombine.low %v425_v33, %v426_v34 }
  0x99   :  { %2021 = vmatmul.mubr.bf16.gmra.mrb[44].mxu0 %v4461_v39  ;;  %2525 = vmatmul.mubr.bf16.gmra.mrb[44].mxu1 %v4587_v40  ;;  %v51_v39 = vld [vmem:[%s7803_s0 + $0x90] sm:$0xf]  ;;  %v52_v40 = vld [vmem:[%s7803_s0 + $0x94] sm:$0xf] }
  0x9a   :  { %2028 = vmatprep.mubr.bf16.mxu0 %v4464_v41  ;;  %2532 = vmatprep.mubr.bf16.mxu1 %v4590_v42  ;;  %v177_v41 = vld [vmem:[%s7803_s0 + $0x288] sm:$0xf]  ;;  %v178_v42 = vld [vmem:[%s7803_s0 + $0x28c] sm:$0xf]  ;;  %v301_v43 = vunpack.c.l.u8.bf16 %v51_v39  ;;  %v302_v44 = vunpack.c.l.u8.bf16 %v52_v40 }
  0x9b   :  { %v427_v45 = vunpack.c.l.u8.bf16 %v177_v41  ;;  %v428_v46 = vunpack.c.l.u8.bf16 %v178_v42 }
  0x9c   :  { %v4476_v49 = vcombine.high %v301_v43, %v302_v44  ;;  %v4475_v59 = vcombine.low %v301_v43, %v302_v44 }
  0x9d   :  { %v4602_v50 = vcombine.high %v427_v45, %v428_v46  ;;  %v4601_v60 = vcombine.low %v427_v45, %v428_v46 }
  0xa1   :  { %2029 = vmatmul.mubr.bf16.gmra.mrb[48].mxu0 %v4463_v51  ;;  %2533 = vmatmul.mubr.bf16.gmra.mrb[48].mxu1 %v4589_v52  ;;  %v53_v51 = vld [vmem:[%s7803_s0 + $0x98] sm:$0xf]  ;;  %v54_v52 = vld [vmem:[%s7803_s0 + $0x9c] sm:$0xf] }
  0xa2   :  { %2036 = vmatprep.mubr.bf16.mxu0 %v4466_v53  ;;  %2540 = vmatprep.mubr.bf16.mxu1 %v4592_v54  ;;  %v179_v53 = vld [vmem:[%s7803_s0 + $0x290] sm:$0xf]  ;;  %v180_v54 = vld [vmem:[%s7803_s0 + $0x294] sm:$0xf]  ;;  %v303_v55 = vunpack.c.l.u8.bf16 %v53_v51  ;;  %v304_v56 = vunpack.c.l.u8.bf16 %v54_v52 }
  0xa3   :  { %v429_v57 = vunpack.c.l.u8.bf16 %v179_v53  ;;  %v430_v58 = vunpack.c.l.u8.bf16 %v180_v54 }
  0xa4   :  { %v4478_v61 = vcombine.high %v303_v55, %v304_v56  ;;  %v4477_v7 = vcombine.low %v303_v55, %v304_v56 }
  0xa5   :  { %v4604_v62 = vcombine.high %v429_v57, %v430_v58  ;;  %v4603_v8 = vcombine.low %v429_v57, %v430_v58 }
  0xa9   :  { %2037 = vmatmul.mubr.bf16.gmra.mrb[52].mxu0 %v4465_v63  ;;  %2541 = vmatmul.mubr.bf16.gmra.mrb[52].mxu1 %v4591_v0  ;;  %v55_v63 = vld [vmem:[%s7803_s0 + $0xa0] sm:$0xf]  ;;  %v56_v0 = vld [vmem:[%s7803_s0 + $0xa4] sm:$0xf] }
  0xaa   :  { %2044 = vmatprep.mubr.bf16.mxu0 %v4468_v1  ;;  %2548 = vmatprep.mubr.bf16.mxu1 %v4594_v2  ;;  %v181_v1 = vld [vmem:[%s7803_s0 + $0x298] sm:$0xf]  ;;  %v182_v2 = vld [vmem:[%s7803_s0 + $0x29c] sm:$0xf]  ;;  %v305_v3 = vunpack.c.l.u8.bf16 %v55_v63  ;;  %v306_v4 = vunpack.c.l.u8.bf16 %v56_v0 }
  0xab   :  { %v431_v5 = vunpack.c.l.u8.bf16 %v181_v1  ;;  %v432_v6 = vunpack.c.l.u8.bf16 %v182_v2 }
  0xac   :  { %v4480_v9 = vcombine.high %v305_v3, %v306_v4  ;;  %v4479_v19 = vcombine.low %v305_v3, %v306_v4 }
  0xad   :  { %v4606_v10 = vcombine.high %v431_v5, %v432_v6  ;;  %v4605_v20 = vcombine.low %v431_v5, %v432_v6 }
  0xb1   :  { %2045 = vmatmul.mubr.bf16.gmra.mrb[56].mxu0 %v4467_v11  ;;  %2549 = vmatmul.mubr.bf16.gmra.mrb[56].mxu1 %v4593_v12  ;;  %v57_v11 = vld [vmem:[%s7803_s0 + $0xa8] sm:$0xf]  ;;  %v58_v12 = vld [vmem:[%s7803_s0 + $0xac] sm:$0xf] }
  0xb2   :  { %2052 = vmatprep.mubr.bf16.mxu0 %v4470_v13  ;;  %2556 = vmatprep.mubr.bf16.mxu1 %v4596_v14  ;;  %v183_v13 = vld [vmem:[%s7803_s0 + $0x2a0] sm:$0xf]  ;;  %v184_v14 = vld [vmem:[%s7803_s0 + $0x2a4] sm:$0xf]  ;;  %v307_v15 = vunpack.c.l.u8.bf16 %v57_v11  ;;  %v308_v16 = vunpack.c.l.u8.bf16 %v58_v12 }
  0xb3   :  { %v433_v17 = vunpack.c.l.u8.bf16 %v183_v13  ;;  %v434_v18 = vunpack.c.l.u8.bf16 %v184_v14 }
  0xb4   :  { %v4482_v21 = vcombine.high %v307_v15, %v308_v16  ;;  %v4481_v31 = vcombine.low %v307_v15, %v308_v16 }
  0xb5   :  { %v4608_v22 = vcombine.high %v433_v17, %v434_v18  ;;  %v4607_v32 = vcombine.low %v433_v17, %v434_v18 }
  0xb9   :  { %2053 = vmatmul.mubr.bf16.gmra.mrb[60].mxu0 %v4469_v23  ;;  %2557 = vmatmul.mubr.bf16.gmra.mrb[60].mxu1 %v4595_v24  ;;  %v59_v23 = vld [vmem:[%s7803_s0 + $0xb0] sm:$0xf]  ;;  %v60_v24 = vld [vmem:[%s7803_s0 + $0xb4] sm:$0xf] }
  0xba   :  { %2060 = vmatprep.mubr.bf16.mxu0 %v4472_v25  ;;  %2564 = vmatprep.mubr.bf16.mxu1 %v4598_v26  ;;  %v185_v25 = vld [vmem:[%s7803_s0 + $0x2a8] sm:$0xf]  ;;  %v186_v26 = vld [vmem:[%s7803_s0 + $0x2ac] sm:$0xf]  ;;  %v309_v27 = vunpack.c.l.u8.bf16 %v59_v23  ;;  %v310_v28 = vunpack.c.l.u8.bf16 %v60_v24 }
  0xbb   :  { %v435_v29 = vunpack.c.l.u8.bf16 %v185_v25  ;;  %v436_v30 = vunpack.c.l.u8.bf16 %v186_v26 }
  0xbc   :  { %v4484_v33 = vcombine.high %v309_v27, %v310_v28  ;;  %v4483_v43 = vcombine.low %v309_v27, %v310_v28 }
  0xbd   :  { %v4610_v34 = vcombine.high %v435_v29, %v436_v30  ;;  %v4609_v44 = vcombine.low %v435_v29, %v436_v30 }
  0xc1   :  { %2061 = vmatmul.mubr.bf16.gmra.mrb[64].mxu0 %v4471_v35  ;;  %2565 = vmatmul.mubr.bf16.gmra.mrb[64].mxu1 %v4597_v36  ;;  %v61_v35 = vld [vmem:[%s7803_s0 + $0xb8] sm:$0xf]  ;;  %v62_v36 = vld [vmem:[%s7803_s0 + $0xbc] sm:$0xf] }
  0xc2   :  { %2068 = vmatprep.mubr.bf16.mxu0 %v4474_v37  ;;  %2572 = vmatprep.mubr.bf16.mxu1 %v4600_v38  ;;  %v187_v37 = vld [vmem:[%s7803_s0 + $0x2b0] sm:$0xf]  ;;  %v188_v38 = vld [vmem:[%s7803_s0 + $0x2b4] sm:$0xf]  ;;  %v311_v39 = vunpack.c.l.u8.bf16 %v61_v35  ;;  %v312_v40 = vunpack.c.l.u8.bf16 %v62_v36  ;;  %v5737_v35 = vld [vmem:[%s7804_s2] ss:$0 sm:$0xff] }
  0xc3   :  { %v437_v41 = vunpack.c.l.u8.bf16 %v187_v37  ;;  %v438_v42 = vunpack.c.l.u8.bf16 %v188_v38 }
  0xc4   :  { %v4486_v45 = vcombine.high %v311_v39, %v312_v40  ;;  %v4485_v55 = vcombine.low %v311_v39, %v312_v40 }
  0xc5   :  { %v4612_v46 = vcombine.high %v437_v41, %v438_v42  ;;  %v4611_v56 = vcombine.low %v437_v41, %v438_v42 }
  0xc9   :  { %2069 = vmatmul.mubr.bf16.gmra.mrb[68].mxu0 %v4473_v47  ;;  %2573 = vmatmul.mubr.bf16.gmra.mrb[68].mxu1 %v4599_v48  ;;  %v63_v47 = vld [vmem:[%s7803_s0 + $0xc0] sm:$0xf]  ;;  %v64_v48 = vld [vmem:[%s7803_s0 + $0xc4] sm:$0xf] }
  0xca   :  { %2076 = vmatprep.mubr.bf16.mxu0 %v4476_v49  ;;  %2580 = vmatprep.mubr.bf16.mxu1 %v4602_v50  ;;  %v189_v49 = vld [vmem:[%s7803_s0 + $0x2b8] sm:$0xf]  ;;  %v190_v50 = vld [vmem:[%s7803_s0 + $0x2bc] sm:$0xf]  ;;  %v313_v51 = vunpack.c.l.u8.bf16 %v63_v47  ;;  %v314_v52 = vunpack.c.l.u8.bf16 %v64_v48  ;;  %v5744_v48 = vld [vmem:[%s7803_s0 + $0xe8] sm:$0xf] }
  0xcb   :  { %v439_v53 = vunpack.c.l.u8.bf16 %v189_v49  ;;  %v440_v54 = vunpack.c.l.u8.bf16 %v190_v50 }
  0xcc   :  { %v4488_v57 = vcombine.high %v313_v51, %v314_v52  ;;  %v4487_v3 = vcombine.low %v313_v51, %v314_v52 }
  0xcd   :  { %v4614_v58 = vcombine.high %v439_v53, %v440_v54  ;;  %v4613_v4 = vcombine.low %v439_v53, %v440_v54  ;;  %v5749_v53 = vld [vmem:[%s7803_s0 + $0xec] sm:$0xf]  ;;  %v5754_v54 = vld [vmem:[%s7803_s0 + $0x2e0] sm:$0xf] }
  0xd1   :  { %2077 = vmatmul.mubr.bf16.gmra.mrb[72].mxu0 %v4475_v59  ;;  %2581 = vmatmul.mubr.bf16.gmra.mrb[72].mxu1 %v4601_v60  ;;  %v65_v59 = vld [vmem:[%s7803_s0 + $0xc8] sm:$0xf]  ;;  %v66_v60 = vld [vmem:[%s7803_s0 + $0xcc] sm:$0xf] }
  0xd2   :  { %2084 = vmatprep.mubr.bf16.mxu0 %v4478_v61  ;;  %2588 = vmatprep.mubr.bf16.mxu1 %v4604_v62  ;;  %v191_v61 = vld [vmem:[%s7803_s0 + $0x2c0] sm:$0xf]  ;;  %v192_v62 = vld [vmem:[%s7803_s0 + $0x2c4] sm:$0xf]  ;;  %v315_v63 = vunpack.c.l.u8.bf16 %v65_v59  ;;  %v316_v0 = vunpack.c.l.u8.bf16 %v66_v60 }
  0xd3   :  { %v441_v1 = vunpack.c.l.u8.bf16 %v191_v61  ;;  %v442_v2 = vunpack.c.l.u8.bf16 %v192_v62  ;;  %v5761_v61 = vld [vmem:[%s7803_s0 + $0x2e4] sm:$0xf] }
  0xd4   :  { %v4490_v5 = vcombine.high %v315_v63, %v316_v0  ;;  %v4489_v15 = vcombine.low %v315_v63, %v316_v0 }
  0xd5   :  { %v4616_v6 = vcombine.high %v441_v1, %v442_v2  ;;  %v4615_v16 = vcombine.low %v441_v1, %v442_v2  ;;  %v323_v2 = vunpack.c.l.u8.bf16 %v5744_v48 }
  0xd9   :  { %2085 = vmatmul.mubr.bf16.gmra.mrb[76].mxu0 %v4477_v7  ;;  %2589 = vmatmul.mubr.bf16.gmra.mrb[76].mxu1 %v4603_v8  ;;  %v67_v7 = vld [vmem:[%s7803_s0 + $0xd0] sm:$0xf]  ;;  %v68_v8 = vld [vmem:[%s7803_s0 + $0xd4] sm:$0xf] }
  0xda   :  { %2092 = vmatprep.mubr.bf16.mxu0 %v4480_v9  ;;  %2596 = vmatprep.mubr.bf16.mxu1 %v4606_v10  ;;  %v193_v9 = vld [vmem:[%s7803_s0 + $0x2c8] sm:$0xf]  ;;  %v194_v10 = vld [vmem:[%s7803_s0 + $0x2cc] sm:$0xf]  ;;  %v317_v11 = vunpack.c.l.u8.bf16 %v67_v7  ;;  %v318_v12 = vunpack.c.l.u8.bf16 %v68_v8 }
  0xdb   :  { %v443_v13 = vunpack.c.l.u8.bf16 %v193_v9  ;;  %v444_v14 = vunpack.c.l.u8.bf16 %v194_v10 }
  0xdc   :  { %v4492_v17 = vcombine.high %v317_v11, %v318_v12  ;;  %v4491_v27 = vcombine.low %v317_v11, %v318_v12 }
  0xdd   :  { %v4618_v18 = vcombine.high %v443_v13, %v444_v14  ;;  %v4617_v28 = vcombine.low %v443_v13, %v444_v14 }
  0xe1   :  { %2093 = vmatmul.mubr.bf16.gmra.mrb[80].mxu0 %v4479_v19  ;;  %2597 = vmatmul.mubr.bf16.gmra.mrb[80].mxu1 %v4605_v20  ;;  %v69_v19 = vld [vmem:[%s7803_s0 + $0xd8] sm:$0xf]  ;;  %v70_v20 = vld [vmem:[%s7803_s0 + $0xdc] sm:$0xf] }
  0xe2   :  { %2100 = vmatprep.mubr.bf16.mxu0 %v4482_v21  ;;  %2604 = vmatprep.mubr.bf16.mxu1 %v4608_v22  ;;  %v195_v21 = vld [vmem:[%s7803_s0 + $0x2d0] sm:$0xf]  ;;  %v196_v22 = vld [vmem:[%s7803_s0 + $0x2d4] sm:$0xf]  ;;  %v319_v23 = vunpack.c.l.u8.bf16 %v69_v19  ;;  %v320_v24 = vunpack.c.l.u8.bf16 %v70_v20 }
  0xe3   :  { %v445_v25 = vunpack.c.l.u8.bf16 %v195_v21  ;;  %v446_v26 = vunpack.c.l.u8.bf16 %v196_v22  ;;  %v5793_v21 = vld [vmem:[%s7803_s0 + $0xf4] sm:$0xf]  ;;  %v5798_v22 = vld [vmem:[%s7803_s0 + $0x2e8] sm:$0xf] }
  0xe4   :  { %v4494_v29 = vcombine.high %v319_v23, %v320_v24 }
  0xe5   :  { %v4620_v30 = vcombine.high %v445_v25, %v446_v26  ;;  %v4619_v47 = vcombine.low %v445_v25, %v446_v26 }
  0xe9   :  { %2101 = vmatmul.mubr.bf16.gmra.mrb[84].mxu0 %v4481_v31  ;;  %2605 = vmatmul.mubr.bf16.gmra.mrb[84].mxu1 %v4607_v32  ;;  %v71_v31 = vld [vmem:[%s7803_s0 + $0xe0] sm:$0xf]  ;;  %v72_v32 = vld [vmem:[%s7803_s0 + $0xe4] sm:$0xf] }
  0xea   :  { %2108 = vmatprep.mubr.bf16.mxu0 %v4484_v33  ;;  %2612 = vmatprep.mubr.bf16.mxu1 %v4610_v34  ;;  %v197_v33 = vld [vmem:[%s7803_s0 + $0x2d8] sm:$0xf]  ;;  %v198_v34 = vld [vmem:[%s7803_s0 + $0x2dc] sm:$0xf]  ;;  %v321_v36 = vunpack.c.l.u8.bf16 %v71_v31  ;;  %v322_v37 = vunpack.c.l.u8.bf16 %v72_v32 }
  0xeb   :  { %v447_v38 = vunpack.c.l.u8.bf16 %v197_v33  ;;  %v448_v39 = vunpack.c.l.u8.bf16 %v198_v34 }
  0xec   :  { %v4496_v51 = vcombine.high %v321_v36, %v322_v37  ;;  %v4495_v12 = vcombine.low %v321_v36, %v322_v37  ;;  %v326_v36 = vunpack.c.l.u8.bf16 %v5793_v21  ;;  %v451_v37 = vunpack.c.l.u8.bf16 %v5798_v22  ;;  %v5881_v22 = vld [vmem:[%s7803_s0 + $0x104] sm:$0xf] }
  0xed   :  { %v4622_v52 = vcombine.high %v447_v38, %v448_v39 }
  0xf1   :  { %2109 = vmatmul.mubr.bf16.gmra.mrb[88].mxu0 %v4483_v43  ;;  %2613 = vmatmul.mubr.bf16.gmra.mrb[88].mxu1 %v4609_v44  ;;  %v4493_v44 = vcombine.low %v319_v23, %v320_v24 }
  0xf2   :  { %2116 = vmatprep.mubr.bf16.mxu0 %v4486_v45  ;;  %2620 = vmatprep.mubr.bf16.mxu1 %v4612_v46 }
  0xf9   :  { %2117 = vmatmul.mubr.bf16.gmra.mrb[92].mxu0 %v4485_v55  ;;  %2621 = vmatmul.mubr.bf16.gmra.mrb[92].mxu1 %v4611_v56 }
  0xfa   :  { %2124 = vmatprep.mubr.bf16.mxu0 %v4488_v57  ;;  %2628 = vmatprep.mubr.bf16.mxu1 %v4614_v58 }
 0x101   :  { %2125 = vmatmul.mubr.bf16.gmra.mrb[96].mxu0 %v4487_v3  ;;  %2629 = vmatmul.mubr.bf16.gmra.mrb[96].mxu1 %v4613_v4  ;;  %v324_v3 = vunpack.c.l.u8.bf16 %v5749_v53  ;;  %v449_v4 = vunpack.c.l.u8.bf16 %v5754_v54  ;;  %v5837_v54 = vld [vmem:[%s7803_s0 + $0xfc] sm:$0xf] }
 0x102   :  { %2132 = vmatprep.mubr.bf16.mxu0 %v4490_v5  ;;  %2636 = vmatprep.mubr.bf16.mxu1 %v4616_v6  ;;  %v450_v5 = vunpack.c.l.u8.bf16 %v5761_v61 }
 0x103   :  { %v4498_v19 = vcombine.high %v323_v2, %v324_v3 }
 0x104   :  { %v4624_v20 = vcombine.high %v449_v4, %v450_v5  ;;  %v4623_v48 = vcombine.low %v449_v4, %v450_v5  ;;  %v328_v4 = vunpack.c.l.u8.bf16 %v5837_v54 }
 0x109   :  { %2133 = vmatmul.mubr.bf16.gmra.mrb[100].mxu0 %v4489_v15  ;;  %2637 = vmatmul.mubr.bf16.gmra.mrb[100].mxu1 %v4615_v16  ;;  %v4621_v15 = vcombine.low %v447_v38, %v448_v39  ;;  %v5788_v16 = vld [vmem:[%s7803_s0 + $0xf0] sm:$0xf] }
 0x10a   :  { %2140 = vmatprep.mubr.bf16.mxu0 %v4492_v17  ;;  %2644 = vmatprep.mubr.bf16.mxu1 %v4618_v18  ;;  %v325_v34 = vunpack.c.l.u8.bf16 %v5788_v16 }
 0x111   :  { %2141 = vmatmul.mubr.bf16.gmra.mrb[104].mxu0 %v4491_v27  ;;  %2645 = vmatmul.mubr.bf16.gmra.mrb[104].mxu1 %v4617_v28 }
 0x112   :  { %2148 = vmatprep.mubr.bf16.mxu0 %v4494_v29  ;;  %2652 = vmatprep.mubr.bf16.mxu1 %v4620_v30  ;;  %v5805_v29 = vld [vmem:[%s7803_s0 + $0x2ec] sm:$0xf] }
 0x113   :  { %v452_v38 = vunpack.c.l.u8.bf16 %v5805_v29 }
 0x114   :  { %v1934_v40 = vpop.f32.mrb[0].mxu0  ;;  %v2438_v41 = vpop.f32.mrb[0].mxu1 }
 0x115   :  { %v1935_v42 = vadd.f32 %v5737_v35, %v1934_v40  ;;  %v1936_v43 = vpop.f32.mrb[1].mxu0  ;;  %v2439_v45 = vadd.f32 %v5737_v35, %v2438_v41  ;;  %v2440_v46 = vpop.f32.mrb[1].mxu1  ;;  %v4626_v53 = vcombine.high %v451_v37, %v452_v38  ;;  %v4625_v16 = vcombine.low %v451_v37, %v452_v38 }
 0x116   :  { %v1937_v49 = vpop.f32.mrb[2].mxu0  ;;  %v2441_v50 = vpop.f32.mrb[2].mxu1  ;;  %v330_v37 = vunpack.c.l.u8.bf16 %v5881_v22 }
 0x117   :  { %v2933_v55 = vmax.f32 %v1935_v42, 0.0  ;;  %v1938_v56 = vadd.f32 %v5737_v35, %v1937_v49  ;;  %v1939_v57 = vpop.f32.mrb[3].mxu0  ;;  %v3059_v58 = vmax.f32 %v2439_v45, 0.0  ;;  %v2442_v59 = vadd.f32 %v5737_v35, %v2441_v50  ;;  %v2443_v60 = vpop.f32.mrb[3].mxu1  ;;  %v5832_v49 = vld [vmem:[%s7803_s0 + $0xf8] sm:$0xf] }
 0x118   :  { %v4497_v45 = vcombine.low %v323_v2, %v324_v3  ;;  %v327_v3 = vunpack.c.l.u8.bf16 %v5832_v49 }
 0x119   :  { %v4955_v62 = vpack.c.bf16 %v2933_v55, %v2933_v55  ;;  %v2934_v63 = vmax.f32 %v1938_v56, 0.0  ;;  %2149 = vmatmul.mubr.bf16.gmra.mrb[108].mxu0 %v4493_v44  ;;  %v5081_v0 = vpack.c.bf16 %v3059_v58, %v3059_v58  ;;  %v3060_v1 = vmax.f32 %v2442_v59, 0.0  ;;  %2653 = vmatmul.mubr.bf16.gmra.mrb[108].mxu1 %v4619_v47  ;;  %v5842_v55 = vld [vmem:[%s7803_s0 + $0x2f0] sm:$0xf] }
 0x11a   :  { %2156 = vmatprep.mubr.bf16.mxu0 %v4496_v51  ;;  %2660 = vmatprep.mubr.bf16.mxu1 %v4622_v52  ;;  %v4500_v52 = vcombine.high %v325_v34, %v326_v36  ;;  %v453_v5 = vunpack.c.l.u8.bf16 %v5842_v55  ;;  %v5925_v55 = vld [vmem:[%s7803_s0 + $0x10c] sm:$0xf] }
 0x11b   :  { %4184 = vst.msk [vmem:[%s7805_s3] sm:$0xf] %vm4183_vm0, %v4955_v62  ;;  %v4956_v6 = vpack.c.bf16 %v2934_v63, %v2934_v63  ;;  %4310 = vst.msk [vmem:[%s7805_s3 + $0x1f8] sm:$0xf] %vm4183_vm0, %v5081_v0  ;;  %v5082_v7 = vpack.c.bf16 %v3060_v1, %v3060_v1  ;;  %v5849_v62 = vld [vmem:[%s7803_s0 + $0x2f4] sm:$0xf] }
 0x11c   :  { %v1942_v8 = vpop.f32.mrb[4].mxu0  ;;  %v2446_v9 = vpop.f32.mrb[4].mxu1 }
 0x11d   :  { %4185 = vst.msk [vmem:[%s7805_s3 + $0x4] sm:$0xf] %vm4183_vm0, %v4956_v6  ;;  %4311 = vst.msk [vmem:[%s7805_s3 + $0x1fc] sm:$0xf] %vm4183_vm0, %v5082_v7  ;;  %v1943_v10 = vadd.f32 %v5737_v35, %v1942_v8  ;;  %v1944_v11 = vpop.f32.mrb[5].mxu0  ;;  %v2447_v13 = vadd.f32 %v5737_v35, %v2446_v9  ;;  %v2448_v14 = vpop.f32.mrb[5].mxu1  ;;  %v454_v6 = vunpack.c.l.u8.bf16 %v5849_v62 }
 0x11e   :  { %v1945_v17 = vpop.f32.mrb[6].mxu0  ;;  %v2449_v18 = vpop.f32.mrb[6].mxu1 }
 0x11f   :  { %v2935_v23 = vmax.f32 %v1943_v10, 0.0  ;;  %v1946_v24 = vadd.f32 %v5737_v35, %v1945_v17  ;;  %v1947_v25 = vpop.f32.mrb[7].mxu0  ;;  %v3061_v26 = vmax.f32 %v2447_v13, 0.0  ;;  %v2450_v27 = vadd.f32 %v5737_v35, %v2449_v18  ;;  %v2451_v28 = vpop.f32.mrb[7].mxu1  ;;  %v5876_v17 = vld [vmem:[%s7803_s0 + $0x100] sm:$0xf] }
 0x120   :  { %v4499_v13 = vcombine.low %v325_v34, %v326_v36  ;;  %v4628_v21 = vcombine.high %v453_v5, %v454_v6  ;;  %v329_v36 = vunpack.c.l.u8.bf16 %v5876_v17  ;;  %v4627_v49 = vcombine.low %v453_v5, %v454_v6 }
 0x121   :  { %v4957_v30 = vpack.c.bf16 %v2935_v23, %v2935_v23  ;;  %v2936_v31 = vmax.f32 %v1946_v24, 0.0  ;;  %2157 = vmatmul.mubr.bf16.gmra.mrb[112].mxu0 %v4495_v12  ;;  %v5083_v32 = vpack.c.bf16 %v3061_v26, %v3061_v26  ;;  %v3062_v33 = vmax.f32 %v2450_v27, 0.0  ;;  %2661 = vmatmul.mubr.bf16.gmra.mrb[112].mxu1 %v4621_v15  ;;  %v5886_v23 = vld [vmem:[%s7803_s0 + $0x2f8] sm:$0xf] }
 0x122   :  { %2164 = vmatprep.mubr.bf16.mxu0 %v4498_v19  ;;  %2668 = vmatprep.mubr.bf16.mxu1 %v4624_v20  ;;  %v4502_v20 = vcombine.high %v327_v3, %v328_v4  ;;  %v455_v38 = vunpack.c.l.u8.bf16 %v5886_v23  ;;  %v332_v5 = vunpack.c.l.u8.bf16 %v5925_v55  ;;  %v5969_v23 = vld [vmem:[%s7803_s0 + $0x114] sm:$0xf] }
 0x123   :  { %4186 = vst.msk [vmem:[%s7805_s3 + $0x8] sm:$0xf] %vm4183_vm0, %v4957_v30  ;;  %v4958_v39 = vpack.c.bf16 %v2936_v31, %v2936_v31  ;;  %4312 = vst.msk [vmem:[%s7805_s3 + $0x200] sm:$0xf] %vm4183_vm0, %v5083_v32  ;;  %v5084_v40 = vpack.c.bf16 %v3062_v33, %v3062_v33  ;;  %v5893_v30 = vld [vmem:[%s7803_s0 + $0x2fc] sm:$0xf] }
 0x124   :  { %v1950_v41 = vpop.f32.mrb[8].mxu0  ;;  %v2454_v42 = vpop.f32.mrb[8].mxu1 }
 0x125   :  { %4187 = vst.msk [vmem:[%s7805_s3 + $0xc] sm:$0xf] %vm4183_vm0, %v4958_v39  ;;  %4313 = vst.msk [vmem:[%s7805_s3 + $0x204] sm:$0xf] %vm4183_vm0, %v5084_v40  ;;  %v1951_v43 = vadd.f32 %v5737_v35, %v1950_v41  ;;  %v1952_v44 = vpop.f32.mrb[9].mxu0  ;;  %v2455_v46 = vadd.f32 %v5737_v35, %v2454_v42  ;;  %v2456_v47 = vpop.f32.mrb[9].mxu1  ;;  %v456_v39 = vunpack.c.l.u8.bf16 %v5893_v30 }
 0x126   :  { %v1953_v50 = vpop.f32.mrb[10].mxu0  ;;  %v2457_v51 = vpop.f32.mrb[10].mxu1 }
 0x127   :  { %v2937_v56 = vmax.f32 %v1951_v43, 0.0  ;;  %v1954_v57 = vadd.f32 %v5737_v35, %v1953_v50  ;;  %v1955_v58 = vpop.f32.mrb[11].mxu0  ;;  %v3063_v59 = vmax.f32 %v2455_v46, 0.0  ;;  %v2458_v60 = vadd.f32 %v5737_v35, %v2457_v51  ;;  %v2459_v61 = vpop.f32.mrb[11].mxu1  ;;  %v5920_v50 = vld [vmem:[%s7803_s0 + $0x108] sm:$0xf] }
 0x128   :  { %v4501_v46 = vcombine.low %v327_v3, %v328_v4  ;;  %v4630_v54 = vcombine.high %v455_v38, %v456_v39  ;;  %v331_v4 = vunpack.c.l.u8.bf16 %v5920_v50  ;;  %v4629_v17 = vcombine.low %v455_v38, %v456_v39 }
 0x129   :  { %v4959_v63 = vpack.c.bf16 %v2937_v56, %v2937_v56  ;;  %v2938_v0 = vmax.f32 %v1954_v57, 0.0  ;;  %2165 = vmatmul.mubr.bf16.gmra.mrb[116].mxu0 %v4497_v45  ;;  %v5085_v1 = vpack.c.bf16 %v3063_v59, %v3063_v59  ;;  %v3064_v2 = vmax.f32 %v2458_v60, 0.0  ;;  %2669 = vmatmul.mubr.bf16.gmra.mrb[116].mxu1 %v4623_v48  ;;  %v5930_v56 = vld [vmem:[%s7803_s0 + $0x300] sm:$0xf] }
 0x12a   :  { %2172 = vmatprep.mubr.bf16.mxu0 %v4500_v52  ;;  %2676 = vmatprep.mubr.bf16.mxu1 %v4626_v53  ;;  %v4504_v53 = vcombine.high %v329_v36, %v330_v37  ;;  %v457_v6 = vunpack.c.l.u8.bf16 %v5930_v56  ;;  %v334_v38 = vunpack.c.l.u8.bf16 %v5969_v23  ;;  %v6013_v56 = vld [vmem:[%s7803_s0 + $0x11c] sm:$0xf] }
 0x12b   :  { %4188 = vst.msk [vmem:[%s7805_s3 + $0x10] sm:$0xf] %vm4183_vm0, %v4959_v63  ;;  %v4960_v7 = vpack.c.bf16 %v2938_v0, %v2938_v0  ;;  %4314 = vst.msk [vmem:[%s7805_s3 + $0x208] sm:$0xf] %vm4183_vm0, %v5085_v1  ;;  %v5086_v8 = vpack.c.bf16 %v3064_v2, %v3064_v2  ;;  %v5937_v63 = vld [vmem:[%s7803_s0 + $0x304] sm:$0xf] }
 0x12c   :  { %v1958_v9 = vpop.f32.mrb[12].mxu0  ;;  %v2462_v10 = vpop.f32.mrb[12].mxu1 }
 0x12d   :  { %4189 = vst.msk [vmem:[%s7805_s3 + $0x14] sm:$0xf] %vm4183_vm0, %v4960_v7  ;;  %4315 = vst.msk [vmem:[%s7805_s3 + $0x20c] sm:$0xf] %vm4183_vm0, %v5086_v8  ;;  %v1959_v11 = vadd.f32 %v5737_v35, %v1958_v9  ;;  %v1960_v12 = vpop.f32.mrb[13].mxu0  ;;  %v2463_v14 = vadd.f32 %v5737_v35, %v2462_v10  ;;  %v2464_v15 = vpop.f32.mrb[13].mxu1  ;;  %v458_v7 = vunpack.c.l.u8.bf16 %v5937_v63 }
 0x12e   :  { %v1961_v18 = vpop.f32.mrb[14].mxu0  ;;  %v2465_v19 = vpop.f32.mrb[14].mxu1 }
 0x12f   :  { %v2939_v24 = vmax.f32 %v1959_v11, 0.0  ;;  %v1962_v25 = vadd.f32 %v5737_v35, %v1961_v18  ;;  %v1963_v26 = vpop.f32.mrb[15].mxu0  ;;  %v3065_v27 = vmax.f32 %v2463_v14, 0.0  ;;  %v2466_v28 = vadd.f32 %v5737_v35, %v2465_v19  ;;  %v2467_v29 = vpop.f32.mrb[15].mxu1  ;;  %v5964_v18 = vld [vmem:[%s7803_s0 + $0x110] sm:$0xf] }
 0x130   :  { %v4503_v14 = vcombine.low %v329_v36, %v330_v37  ;;  %v4632_v22 = vcombine.high %v457_v6, %v458_v7  ;;  %v333_v37 = vunpack.c.l.u8.bf16 %v5964_v18  ;;  %v4631_v50 = vcombine.low %v457_v6, %v458_v7 }
 0x131   :  { %v4961_v31 = vpack.c.bf16 %v2939_v24, %v2939_v24  ;;  %v2940_v32 = vmax.f32 %v1962_v25, 0.0  ;;  %2173 = vmatmul.mubr.bf16.gmra.mrb[120].mxu0 %v4499_v13  ;;  %v5087_v33 = vpack.c.bf16 %v3065_v27, %v3065_v27  ;;  %v3066_v34 = vmax.f32 %v2466_v28, 0.0  ;;  %2677 = vmatmul.mubr.bf16.gmra.mrb[120].mxu1 %v4625_v16  ;;  %v5974_v24 = vld [vmem:[%s7803_s0 + $0x308] sm:$0xf] }
 0x132   :  { %2180 = vmatprep.mubr.bf16.mxu0 %v4502_v20  ;;  %2684 = vmatprep.mubr.bf16.mxu1 %v4628_v21  ;;  %v4506_v21 = vcombine.high %v331_v4, %v332_v5  ;;  %v459_v39 = vunpack.c.l.u8.bf16 %v5974_v24  ;;  %v336_v6 = vunpack.c.l.u8.bf16 %v6013_v56  ;;  %v6057_v24 = vld [vmem:[%s7803_s0 + $0x124] sm:$0xf] }
 0x133   :  { %4190 = vst.msk [vmem:[%s7805_s3 + $0x18] sm:$0xf] %vm4183_vm0, %v4961_v31  ;;  %v4962_v40 = vpack.c.bf16 %v2940_v32, %v2940_v32  ;;  %4316 = vst.msk [vmem:[%s7805_s3 + $0x210] sm:$0xf] %vm4183_vm0, %v5087_v33  ;;  %v5088_v41 = vpack.c.bf16 %v3066_v34, %v3066_v34  ;;  %v5981_v31 = vld [vmem:[%s7803_s0 + $0x30c] sm:$0xf] }
 0x134   :  { %v1966_v42 = vpop.f32.mrb[16].mxu0  ;;  %v2470_v43 = vpop.f32.mrb[16].mxu1 }
 0x135   :  { %4191 = vst.msk [vmem:[%s7805_s3 + $0x1c] sm:$0xf] %vm4183_vm0, %v4962_v40  ;;  %4317 = vst.msk [vmem:[%s7805_s3 + $0x214] sm:$0xf] %vm4183_vm0, %v5088_v41  ;;  %v1967_v44 = vadd.f32 %v5737_v35, %v1966_v42  ;;  %v1968_v45 = vpop.f32.mrb[17].mxu0  ;;  %v2471_v47 = vadd.f32 %v5737_v35, %v2470_v43  ;;  %v2472_v48 = vpop.f32.mrb[17].mxu1  ;;  %v460_v40 = vunpack.c.l.u8.bf16 %v5981_v31 }
 0x136   :  { %v1969_v51 = vpop.f32.mrb[18].mxu0  ;;  %v2473_v52 = vpop.f32.mrb[18].mxu1 }
 0x137   :  { %v2941_v57 = vmax.f32 %v1967_v44, 0.0  ;;  %v1970_v58 = vadd.f32 %v5737_v35, %v1969_v51  ;;  %v1971_v59 = vpop.f32.mrb[19].mxu0  ;;  %v3067_v60 = vmax.f32 %v2471_v47, 0.0  ;;  %v2474_v61 = vadd.f32 %v5737_v35, %v2473_v52  ;;  %v2475_v62 = vpop.f32.mrb[19].mxu1  ;;  %v6008_v51 = vld [vmem:[%s7803_s0 + $0x118] sm:$0xf] }
 0x138   :  { %v4505_v47 = vcombine.low %v331_v4, %v332_v5  ;;  %v4634_v55 = vcombine.high %v459_v39, %v460_v40  ;;  %v335_v5 = vunpack.c.l.u8.bf16 %v6008_v51  ;;  %v4633_v18 = vcombine.low %v459_v39, %v460_v40 }
 0x139   :  { %v4963_v0 = vpack.c.bf16 %v2941_v57, %v2941_v57  ;;  %v2942_v1 = vmax.f32 %v1970_v58, 0.0  ;;  %2181 = vmatmul.mubr.bf16.gmra.mrb[124].mxu0 %v4501_v46  ;;  %v5089_v2 = vpack.c.bf16 %v3067_v60, %v3067_v60  ;;  %v3068_v3 = vmax.f32 %v2474_v61, 0.0  ;;  %2685 = vmatmul.mubr.bf16.gmra.mrb[124].mxu1 %v4627_v49  ;;  %v6018_v57 = vld [vmem:[%s7803_s0 + $0x310] sm:$0xf] }
 0x13a   :  { %2188 = vmatprep.mubr.bf16.mxu0 %v4504_v53  ;;  %2692 = vmatprep.mubr.bf16.mxu1 %v4630_v54  ;;  %v4508_v54 = vcombine.high %v333_v37, %v334_v38  ;;  %v461_v7 = vunpack.c.l.u8.bf16 %v6018_v57  ;;  %v338_v39 = vunpack.c.l.u8.bf16 %v6057_v24  ;;  %v6101_v57 = vld [vmem:[%s7803_s0 + $0x12c] sm:$0xf] }
 0x13b   :  { %4192 = vst.msk [vmem:[%s7805_s3 + $0x20] sm:$0xf] %vm4183_vm0, %v4963_v0  ;;  %v4964_v8 = vpack.c.bf16 %v2942_v1, %v2942_v1  ;;  %4318 = vst.msk [vmem:[%s7805_s3 + $0x218] sm:$0xf] %vm4183_vm0, %v5089_v2  ;;  %v5090_v9 = vpack.c.bf16 %v3068_v3, %v3068_v3  ;;  %v6025_v0 = vld [vmem:[%s7803_s0 + $0x314] sm:$0xf] }
 0x13c   :  { %v1974_v10 = vpop.f32.mrb[20].mxu0  ;;  %v2478_v11 = vpop.f32.mrb[20].mxu1 }
 0x13d   :  { %4193 = vst.msk [vmem:[%s7805_s3 + $0x24] sm:$0xf] %vm4183_vm0, %v4964_v8  ;;  %4319 = vst.msk [vmem:[%s7805_s3 + $0x21c] sm:$0xf] %vm4183_vm0, %v5090_v9  ;;  %v1975_v12 = vadd.f32 %v5737_v35, %v1974_v10  ;;  %v1976_v13 = vpop.f32.mrb[21].mxu0  ;;  %v2479_v15 = vadd.f32 %v5737_v35, %v2478_v11  ;;  %v2480_v16 = vpop.f32.mrb[21].mxu1  ;;  %v462_v8 = vunpack.c.l.u8.bf16 %v6025_v0 }
 0x13e   :  { %v1977_v19 = vpop.f32.mrb[22].mxu0  ;;  %v2481_v20 = vpop.f32.mrb[22].mxu1 }
 0x13f   :  { %v2943_v25 = vmax.f32 %v1975_v12, 0.0  ;;  %v1978_v26 = vadd.f32 %v5737_v35, %v1977_v19  ;;  %v1979_v27 = vpop.f32.mrb[23].mxu0  ;;  %v3069_v28 = vmax.f32 %v2479_v15, 0.0  ;;  %v2482_v29 = vadd.f32 %v5737_v35, %v2481_v20  ;;  %v2483_v30 = vpop.f32.mrb[23].mxu1  ;;  %v6052_v19 = vld [vmem:[%s7803_s0 + $0x120] sm:$0xf] }
 0x140   :  { %v4507_v15 = vcombine.low %v333_v37, %v334_v38  ;;  %v4636_v23 = vcombine.high %v461_v7, %v462_v8  ;;  %v337_v38 = vunpack.c.l.u8.bf16 %v6052_v19  ;;  %v4635_v51 = vcombine.low %v461_v7, %v462_v8 }
 0x141   :  { %v4965_v32 = vpack.c.bf16 %v2943_v25, %v2943_v25  ;;  %v2944_v33 = vmax.f32 %v1978_v26, 0.0  ;;  %2189 = vmatmul.mubr.bf16.gmra.mrb[128].mxu0 %v4503_v14  ;;  %v5091_v34 = vpack.c.bf16 %v3069_v28, %v3069_v28  ;;  %v3070_v36 = vmax.f32 %v2482_v29, 0.0  ;;  %2693 = vmatmul.mubr.bf16.gmra.mrb[128].mxu1 %v4629_v17  ;;  %v6062_v25 = vld [vmem:[%s7803_s0 + $0x318] sm:$0xf] }
 0x142   :  { %2196 = vmatprep.mubr.bf16.mxu0 %v4506_v21  ;;  %2700 = vmatprep.mubr.bf16.mxu1 %v4632_v22  ;;  %v4510_v22 = vcombine.high %v335_v5, %v336_v6  ;;  %v463_v40 = vunpack.c.l.u8.bf16 %v6062_v25  ;;  %v340_v7 = vunpack.c.l.u8.bf16 %v6101_v57  ;;  %v6145_v25 = vld [vmem:[%s7803_s0 + $0x134] sm:$0xf] }
 0x143   :  { %4194 = vst.msk [vmem:[%s7805_s3 + $0x28] sm:$0xf] %vm4183_vm0, %v4965_v32  ;;  %v4966_v41 = vpack.c.bf16 %v2944_v33, %v2944_v33  ;;  %4320 = vst.msk [vmem:[%s7805_s3 + $0x220] sm:$0xf] %vm4183_vm0, %v5091_v34  ;;  %v5092_v42 = vpack.c.bf16 %v3070_v36, %v3070_v36  ;;  %v6069_v32 = vld [vmem:[%s7803_s0 + $0x31c] sm:$0xf] }
 0x144   :  { %v1982_v43 = vpop.f32.mrb[24].mxu0  ;;  %v2486_v44 = vpop.f32.mrb[24].mxu1 }
 0x145   :  { %4195 = vst.msk [vmem:[%s7805_s3 + $0x2c] sm:$0xf] %vm4183_vm0, %v4966_v41  ;;  %4321 = vst.msk [vmem:[%s7805_s3 + $0x224] sm:$0xf] %vm4183_vm0, %v5092_v42  ;;  %v1983_v45 = vadd.f32 %v5737_v35, %v1982_v43  ;;  %v1984_v46 = vpop.f32.mrb[25].mxu0  ;;  %v2487_v48 = vadd.f32 %v5737_v35, %v2486_v44  ;;  %v2488_v49 = vpop.f32.mrb[25].mxu1  ;;  %v464_v41 = vunpack.c.l.u8.bf16 %v6069_v32 }
 0x146   :  { %v1985_v52 = vpop.f32.mrb[26].mxu0  ;;  %v2489_v53 = vpop.f32.mrb[26].mxu1 }
 0x147   :  { %v2945_v58 = vmax.f32 %v1983_v45, 0.0  ;;  %v1986_v59 = vadd.f32 %v5737_v35, %v1985_v52  ;;  %v1987_v60 = vpop.f32.mrb[27].mxu0  ;;  %v3071_v61 = vmax.f32 %v2487_v48, 0.0  ;;  %v2490_v62 = vadd.f32 %v5737_v35, %v2489_v53  ;;  %v2491_v63 = vpop.f32.mrb[27].mxu1  ;;  %v6096_v52 = vld [vmem:[%s7803_s0 + $0x128] sm:$0xf] }
 0x148   :  { %v4509_v48 = vcombine.low %v335_v5, %v336_v6  ;;  %v4638_v56 = vcombine.high %v463_v40, %v464_v41  ;;  %v339_v6 = vunpack.c.l.u8.bf16 %v6096_v52  ;;  %v4637_v19 = vcombine.low %v463_v40, %v464_v41 }
 0x149   :  { %v4967_v1 = vpack.c.bf16 %v2945_v58, %v2945_v58  ;;  %v2946_v2 = vmax.f32 %v1986_v59, 0.0  ;;  %2197 = vmatmul.mubr.bf16.gmra.mrb[132].mxu0 %v4505_v47  ;;  %v5093_v3 = vpack.c.bf16 %v3071_v61, %v3071_v61  ;;  %v3072_v4 = vmax.f32 %v2490_v62, 0.0  ;;  %2701 = vmatmul.mubr.bf16.gmra.mrb[132].mxu1 %v4631_v50  ;;  %v6106_v58 = vld [vmem:[%s7803_s0 + $0x320] sm:$0xf] }
 0x14a   :  { %2204 = vmatprep.mubr.bf16.mxu0 %v4508_v54  ;;  %2708 = vmatprep.mubr.bf16.mxu1 %v4634_v55  ;;  %v4512_v55 = vcombine.high %v337_v38, %v338_v39  ;;  %v465_v8 = vunpack.c.l.u8.bf16 %v6106_v58  ;;  %v342_v40 = vunpack.c.l.u8.bf16 %v6145_v25  ;;  %v6189_v58 = vld [vmem:[%s7803_s0 + $0x13c] sm:$0xf] }
 0x14b   :  { %4196 = vst.msk [vmem:[%s7805_s3 + $0x30] sm:$0xf] %vm4183_vm0, %v4967_v1  ;;  %v4968_v9 = vpack.c.bf16 %v2946_v2, %v2946_v2  ;;  %4322 = vst.msk [vmem:[%s7805_s3 + $0x228] sm:$0xf] %vm4183_vm0, %v5093_v3  ;;  %v5094_v10 = vpack.c.bf16 %v3072_v4, %v3072_v4  ;;  %v6113_v1 = vld [vmem:[%s7803_s0 + $0x324] sm:$0xf] }
 0x14c   :  { %v1990_v11 = vpop.f32.mrb[28].mxu0  ;;  %v2494_v12 = vpop.f32.mrb[28].mxu1 }
 0x14d   :  { %4197 = vst.msk [vmem:[%s7805_s3 + $0x34] sm:$0xf] %vm4183_vm0, %v4968_v9  ;;  %4323 = vst.msk [vmem:[%s7805_s3 + $0x22c] sm:$0xf] %vm4183_vm0, %v5094_v10  ;;  %v1991_v13 = vadd.f32 %v5737_v35, %v1990_v11  ;;  %v1992_v14 = vpop.f32.mrb[29].mxu0  ;;  %v2495_v16 = vadd.f32 %v5737_v35, %v2494_v12  ;;  %v2496_v17 = vpop.f32.mrb[29].mxu1  ;;  %v466_v9 = vunpack.c.l.u8.bf16 %v6113_v1 }
 0x14e   :  { %v1993_v20 = vpop.f32.mrb[30].mxu0  ;;  %v2497_v21 = vpop.f32.mrb[30].mxu1 }
 0x14f   :  { %v2947_v26 = vmax.f32 %v1991_v13, 0.0  ;;  %v1994_v27 = vadd.f32 %v5737_v35, %v1993_v20  ;;  %v1995_v28 = vpop.f32.mrb[31].mxu0  ;;  %v3073_v29 = vmax.f32 %v2495_v16, 0.0  ;;  %v2498_v30 = vadd.f32 %v5737_v35, %v2497_v21  ;;  %v2499_v31 = vpop.f32.mrb[31].mxu1  ;;  %v6140_v20 = vld [vmem:[%s7803_s0 + $0x130] sm:$0xf] }
 0x150   :  { %v4511_v16 = vcombine.low %v337_v38, %v338_v39  ;;  %v4640_v24 = vcombine.high %v465_v8, %v466_v9  ;;  %v341_v39 = vunpack.c.l.u8.bf16 %v6140_v20  ;;  %v4639_v52 = vcombine.low %v465_v8, %v466_v9 }
 0x151   :  { %v4969_v33 = vpack.c.bf16 %v2947_v26, %v2947_v26  ;;  %v2948_v34 = vmax.f32 %v1994_v27, 0.0  ;;  %2205 = vmatmul.mubr.bf16.gmra.mrb[136].mxu0 %v4507_v15  ;;  %v5095_v36 = vpack.c.bf16 %v3073_v29, %v3073_v29  ;;  %v3074_v37 = vmax.f32 %v2498_v30, 0.0  ;;  %2709 = vmatmul.mubr.bf16.gmra.mrb[136].mxu1 %v4633_v18  ;;  %v6150_v26 = vld [vmem:[%s7803_s0 + $0x328] sm:$0xf] }
 0x152   :  { %2212 = vmatprep.mubr.bf16.mxu0 %v4510_v22  ;;  %2716 = vmatprep.mubr.bf16.mxu1 %v4636_v23  ;;  %v4514_v23 = vcombine.high %v339_v6, %v340_v7  ;;  %v467_v41 = vunpack.c.l.u8.bf16 %v6150_v26  ;;  %v344_v8 = vunpack.c.l.u8.bf16 %v6189_v58  ;;  %v6233_v26 = vld [vmem:[%s7803_s0 + $0x144] sm:$0xf] }
 0x153   :  { %4198 = vst.msk [vmem:[%s7805_s3 + $0x38] sm:$0xf] %vm4183_vm0, %v4969_v33  ;;  %v4970_v42 = vpack.c.bf16 %v2948_v34, %v2948_v34  ;;  %4324 = vst.msk [vmem:[%s7805_s3 + $0x230] sm:$0xf] %vm4183_vm0, %v5095_v36  ;;  %v5096_v43 = vpack.c.bf16 %v3074_v37, %v3074_v37  ;;  %v6157_v33 = vld [vmem:[%s7803_s0 + $0x32c] sm:$0xf] }
 0x154   :  { %v1998_v44 = vpop.f32.mrb[32].mxu0  ;;  %v2502_v45 = vpop.f32.mrb[32].mxu1 }
 0x155   :  { %4199 = vst.msk [vmem:[%s7805_s3 + $0x3c] sm:$0xf] %vm4183_vm0, %v4970_v42  ;;  %4325 = vst.msk [vmem:[%s7805_s3 + $0x234] sm:$0xf] %vm4183_vm0, %v5096_v43  ;;  %v1999_v46 = vadd.f32 %v5737_v35, %v1998_v44  ;;  %v2000_v47 = vpop.f32.mrb[33].mxu0  ;;  %v2503_v49 = vadd.f32 %v5737_v35, %v2502_v45  ;;  %v2504_v50 = vpop.f32.mrb[33].mxu1  ;;  %v468_v42 = vunpack.c.l.u8.bf16 %v6157_v33 }
 0x156   :  { %v2001_v53 = vpop.f32.mrb[34].mxu0  ;;  %v2505_v54 = vpop.f32.mrb[34].mxu1 }
 0x157   :  { %v2949_v59 = vmax.f32 %v1999_v46, 0.0  ;;  %v2002_v60 = vadd.f32 %v5737_v35, %v2001_v53  ;;  %v2003_v61 = vpop.f32.mrb[35].mxu0  ;;  %v3075_v62 = vmax.f32 %v2503_v49, 0.0  ;;  %v2506_v63 = vadd.f32 %v5737_v35, %v2505_v54  ;;  %v2507_v0 = vpop.f32.mrb[35].mxu1  ;;  %v6184_v53 = vld [vmem:[%s7803_s0 + $0x138] sm:$0xf] }
 0x158   :  { %v4513_v49 = vcombine.low %v339_v6, %v340_v7  ;;  %v4642_v57 = vcombine.high %v467_v41, %v468_v42  ;;  %v343_v7 = vunpack.c.l.u8.bf16 %v6184_v53  ;;  %v4641_v20 = vcombine.low %v467_v41, %v468_v42 }
 0x159   :  { %v4971_v2 = vpack.c.bf16 %v2949_v59, %v2949_v59  ;;  %v2950_v3 = vmax.f32 %v2002_v60, 0.0  ;;  %2213 = vmatmul.mubr.bf16.gmra.mrb[140].mxu0 %v4509_v48  ;;  %v5097_v4 = vpack.c.bf16 %v3075_v62, %v3075_v62  ;;  %v3076_v5 = vmax.f32 %v2506_v63, 0.0  ;;  %2717 = vmatmul.mubr.bf16.gmra.mrb[140].mxu1 %v4635_v51  ;;  %v6194_v59 = vld [vmem:[%s7803_s0 + $0x330] sm:$0xf] }
 0x15a   :  { %2220 = vmatprep.mubr.bf16.mxu0 %v4512_v55  ;;  %2724 = vmatprep.mubr.bf16.mxu1 %v4638_v56  ;;  %v4516_v56 = vcombine.high %v341_v39, %v342_v40  ;;  %v469_v9 = vunpack.c.l.u8.bf16 %v6194_v59  ;;  %v346_v41 = vunpack.c.l.u8.bf16 %v6233_v26  ;;  %v6277_v59 = vld [vmem:[%s7803_s0 + $0x14c] sm:$0xf] }
 0x15b   :  { %4200 = vst.msk [vmem:[%s7805_s3 + $0x40] sm:$0xf] %vm4183_vm0, %v4971_v2  ;;  %v4972_v10 = vpack.c.bf16 %v2950_v3, %v2950_v3  ;;  %4326 = vst.msk [vmem:[%s7805_s3 + $0x238] sm:$0xf] %vm4183_vm0, %v5097_v4  ;;  %v5098_v11 = vpack.c.bf16 %v3076_v5, %v3076_v5  ;;  %v6201_v2 = vld [vmem:[%s7803_s0 + $0x334] sm:$0xf] }
 0x15c   :  { %v2006_v12 = vpop.f32.mrb[36].mxu0  ;;  %v2510_v13 = vpop.f32.mrb[36].mxu1 }
 0x15d   :  { %4201 = vst.msk [vmem:[%s7805_s3 + $0x44] sm:$0xf] %vm4183_vm0, %v4972_v10  ;;  %4327 = vst.msk [vmem:[%s7805_s3 + $0x23c] sm:$0xf] %vm4183_vm0, %v5098_v11  ;;  %v2007_v14 = vadd.f32 %v5737_v35, %v2006_v12  ;;  %v2008_v15 = vpop.f32.mrb[37].mxu0  ;;  %v2511_v17 = vadd.f32 %v5737_v35, %v2510_v13  ;;  %v2512_v18 = vpop.f32.mrb[37].mxu1  ;;  %v470_v10 = vunpack.c.l.u8.bf16 %v6201_v2 }
 0x15e   :  { %v2009_v21 = vpop.f32.mrb[38].mxu0  ;;  %v2513_v22 = vpop.f32.mrb[38].mxu1 }
 0x15f   :  { %v2951_v27 = vmax.f32 %v2007_v14, 0.0  ;;  %v2010_v28 = vadd.f32 %v5737_v35, %v2009_v21  ;;  %v2011_v29 = vpop.f32.mrb[39].mxu0  ;;  %v3077_v30 = vmax.f32 %v2511_v17, 0.0  ;;  %v2514_v31 = vadd.f32 %v5737_v35, %v2513_v22  ;;  %v2515_v32 = vpop.f32.mrb[39].mxu1  ;;  %v6228_v21 = vld [vmem:[%s7803_s0 + $0x140] sm:$0xf] }
 0x160   :  { %v4515_v17 = vcombine.low %v341_v39, %v342_v40  ;;  %v4644_v25 = vcombine.high %v469_v9, %v470_v10  ;;  %v345_v40 = vunpack.c.l.u8.bf16 %v6228_v21  ;;  %v4643_v53 = vcombine.low %v469_v9, %v470_v10 }
 0x161   :  { %v4973_v34 = vpack.c.bf16 %v2951_v27, %v2951_v27  ;;  %v2952_v36 = vmax.f32 %v2010_v28, 0.0  ;;  %2221 = vmatmul.mubr.bf16.gmra.mrb[144].mxu0 %v4511_v16  ;;  %v5099_v37 = vpack.c.bf16 %v3077_v30, %v3077_v30  ;;  %v3078_v38 = vmax.f32 %v2514_v31, 0.0  ;;  %2725 = vmatmul.mubr.bf16.gmra.mrb[144].mxu1 %v4637_v19  ;;  %v6238_v27 = vld [vmem:[%s7803_s0 + $0x338] sm:$0xf] }
 0x162   :  { %2228 = vmatprep.mubr.bf16.mxu0 %v4514_v23  ;;  %2732 = vmatprep.mubr.bf16.mxu1 %v4640_v24  ;;  %v4518_v24 = vcombine.high %v343_v7, %v344_v8  ;;  %v471_v42 = vunpack.c.l.u8.bf16 %v6238_v27  ;;  %v348_v9 = vunpack.c.l.u8.bf16 %v6277_v59  ;;  %v6326_v27 = vld [vmem:[%s7803_s0 + $0x154] sm:$0xf] }
 0x163   :  { %4202 = vst.msk [vmem:[%s7805_s3 + $0x48] sm:$0xf] %vm4183_vm0, %v4973_v34  ;;  %v4974_v43 = vpack.c.bf16 %v2952_v36, %v2952_v36  ;;  %4328 = vst.msk [vmem:[%s7805_s3 + $0x240] sm:$0xf] %vm4183_vm0, %v5099_v37  ;;  %v5100_v44 = vpack.c.bf16 %v3078_v38, %v3078_v38  ;;  %v6245_v34 = vld [vmem:[%s7803_s0 + $0x33c] sm:$0xf] }
 0x164   :  { %v2014_v45 = vpop.f32.mrb[40].mxu0  ;;  %v2518_v46 = vpop.f32.mrb[40].mxu1 }
 0x165   :  { %4203 = vst.msk [vmem:[%s7805_s3 + $0x4c] sm:$0xf] %vm4183_vm0, %v4974_v43  ;;  %4329 = vst.msk [vmem:[%s7805_s3 + $0x244] sm:$0xf] %vm4183_vm0, %v5100_v44  ;;  %v2015_v47 = vadd.f32 %v5737_v35, %v2014_v45  ;;  %v2016_v48 = vpop.f32.mrb[41].mxu0  ;;  %v2519_v50 = vadd.f32 %v5737_v35, %v2518_v46  ;;  %v2520_v51 = vpop.f32.mrb[41].mxu1  ;;  %v472_v43 = vunpack.c.l.u8.bf16 %v6245_v34 }
 0x166   :  { %v2017_v54 = vpop.f32.mrb[42].mxu0  ;;  %v2521_v55 = vpop.f32.mrb[42].mxu1 }
 0x167   :  { %v2953_v60 = vmax.f32 %v2015_v47, 0.0  ;;  %v2018_v61 = vadd.f32 %v5737_v35, %v2017_v54  ;;  %v2019_v62 = vpop.f32.mrb[43].mxu0  ;;  %v3079_v63 = vmax.f32 %v2519_v50, 0.0  ;;  %v2522_v0 = vadd.f32 %v5737_v35, %v2521_v55  ;;  %v2523_v1 = vpop.f32.mrb[43].mxu1  ;;  %v6272_v54 = vld [vmem:[%s7803_s0 + $0x148] sm:$0xf] }
 0x168   :  { %v4517_v50 = vcombine.low %v343_v7, %v344_v8  ;;  %v4646_v58 = vcombine.high %v471_v42, %v472_v43  ;;  %v347_v8 = vunpack.c.l.u8.bf16 %v6272_v54  ;;  %v4645_v21 = vcombine.low %v471_v42, %v472_v43 }
 0x169   :  { %v4975_v3 = vpack.c.bf16 %v2953_v60, %v2953_v60  ;;  %v2954_v4 = vmax.f32 %v2018_v61, 0.0  ;;  %2229 = vmatmul.mubr.bf16.gmra.mrb[148].mxu0 %v4513_v49  ;;  %v5101_v5 = vpack.c.bf16 %v3079_v63, %v3079_v63  ;;  %v3080_v6 = vmax.f32 %v2522_v0, 0.0  ;;  %2733 = vmatmul.mubr.bf16.gmra.mrb[148].mxu1 %v4639_v52  ;;  %v6282_v60 = vld [vmem:[%s7803_s0 + $0x340] sm:$0xf] }
 0x16a   :  { %2236 = vmatprep.mubr.bf16.mxu0 %v4516_v56  ;;  %2740 = vmatprep.mubr.bf16.mxu1 %v4642_v57  ;;  %v4520_v57 = vcombine.high %v345_v40, %v346_v41  ;;  %v350_v42 = vunpack.c.l.u8.bf16 %v6326_v27 }
 0x16b   :  { %4204 = vst.msk [vmem:[%s7805_s3 + $0x50] sm:$0xf] %vm4183_vm0, %v4975_v3  ;;  %v4976_v11 = vpack.c.bf16 %v2954_v4, %v2954_v4  ;;  %4330 = vst.msk [vmem:[%s7805_s3 + $0x248] sm:$0xf] %vm4183_vm0, %v5101_v5  ;;  %v5102_v12 = vpack.c.bf16 %v3080_v6, %v3080_v6  ;;  %v6289_v3 = vld [vmem:[%s7803_s0 + $0x344] sm:$0xf] }
 0x16c   :  { %v2022_v13 = vpop.f32.mrb[44].mxu0  ;;  %v2526_v14 = vpop.f32.mrb[44].mxu1  ;;  %v474_v10 = vunpack.c.l.u8.bf16 %v6289_v3 }
 0x16d   :  { %4205 = vst.msk [vmem:[%s7805_s3 + $0x54] sm:$0xf] %vm4183_vm0, %v4976_v11  ;;  %4331 = vst.msk [vmem:[%s7805_s3 + $0x24c] sm:$0xf] %vm4183_vm0, %v5102_v12  ;;  %v2023_v15 = vadd.f32 %v5737_v35, %v2022_v13  ;;  %v2024_v16 = vpop.f32.mrb[45].mxu0  ;;  %v2527_v18 = vadd.f32 %v5737_v35, %v2526_v14  ;;  %v2528_v19 = vpop.f32.mrb[45].mxu1 }
 0x16e   :  { %v2025_v22 = vpop.f32.mrb[46].mxu0  ;;  %v2529_v23 = vpop.f32.mrb[46].mxu1 }
 0x16f   :  { %v2955_v28 = vmax.f32 %v2023_v15, 0.0  ;;  %v2026_v29 = vadd.f32 %v5737_v35, %v2025_v22  ;;  %v2027_v30 = vpop.f32.mrb[47].mxu0  ;;  %v3081_v31 = vmax.f32 %v2527_v18, 0.0  ;;  %v2530_v32 = vadd.f32 %v5737_v35, %v2529_v23  ;;  %v2531_v33 = vpop.f32.mrb[47].mxu1  ;;  %v6314_v15 = vld [vmem:[%s7804_s2] ss:$0 sm:$0xff] }
 0x170   :  { %v4519_v18 = vcombine.low %v345_v40, %v346_v41  ;;  %v6321_v22 = vld [vmem:[%s7803_s0 + $0x150] sm:$0xf] }
 0x171   :  { %v4977_v36 = vpack.c.bf16 %v2955_v28, %v2955_v28  ;;  %v2956_v37 = vmax.f32 %v2026_v29, 0.0  ;;  %2237 = vmatmul.mubr.bf16.gmra.mrb[152].mxu0 %v4515_v17  ;;  %v5103_v38 = vpack.c.bf16 %v3081_v31, %v3081_v31  ;;  %v3082_v39 = vmax.f32 %v2530_v32, 0.0  ;;  %2741 = vmatmul.mubr.bf16.gmra.mrb[152].mxu1 %v4641_v20  ;;  %v6331_v28 = vld [vmem:[%s7803_s0 + $0x348] sm:$0xf] }
 0x172   :  { %2244 = vmatprep.mubr.bf16.mxu0 %v4518_v24  ;;  %2748 = vmatprep.mubr.bf16.mxu1 %v4644_v25  ;;  %v4522_v25 = vcombine.high %v347_v8, %v348_v9  ;;  %v349_v41 = vunpack.c.l.u8.bf16 %v6321_v22  ;;  %v475_v43 = vunpack.c.l.u8.bf16 %v6331_v28  ;;  %v6414_v28 = vld [vmem:[%s7803_s0 + $0x164] sm:$0xf] }
 0x173   :  { %4206 = vst.msk [vmem:[%s7805_s3 + $0x58] sm:$0xf] %vm4183_vm0, %v4977_v36  ;;  %v4978_v44 = vpack.c.bf16 %v2956_v37, %v2956_v37  ;;  %4332 = vst.msk [vmem:[%s7805_s3 + $0x250] sm:$0xf] %vm4183_vm0, %v5103_v38  ;;  %v5104_v45 = vpack.c.bf16 %v3082_v39, %v3082_v39  ;;  %v6338_v36 = vld [vmem:[%s7803_s0 + $0x34c] sm:$0xf] }
 0x174   :  { %v2030_v46 = vpop.f32.mrb[48].mxu0  ;;  %v2534_v47 = vpop.f32.mrb[48].mxu1 }
 0x175   :  { %4207 = vst.msk [vmem:[%s7805_s3 + $0x5c] sm:$0xf] %vm4183_vm0, %v4978_v44  ;;  %4333 = vst.msk [vmem:[%s7805_s3 + $0x254] sm:$0xf] %vm4183_vm0, %v5104_v45  ;;  %v2031_v48 = vadd.f32 %v5737_v35, %v2030_v46  ;;  %v2032_v49 = vpop.f32.mrb[49].mxu0  ;;  %v2535_v51 = vadd.f32 %v5737_v35, %v2534_v47  ;;  %v2536_v52 = vpop.f32.mrb[49].mxu1  ;;  %v476_v44 = vunpack.c.l.u8.bf16 %v6338_v36 }
 0x176   :  { %v2033_v55 = vpop.f32.mrb[50].mxu0  ;;  %v2537_v56 = vpop.f32.mrb[50].mxu1 }
 0x177   :  { %v2957_v61 = vmax.f32 %v2031_v48, 0.0  ;;  %v2034_v62 = vadd.f32 %v5737_v35, %v2033_v55  ;;  %v2035_v63 = vpop.f32.mrb[51].mxu0  ;;  %v3083_v0 = vmax.f32 %v2535_v51, 0.0  ;;  %v2538_v1 = vadd.f32 %v5737_v35, %v2537_v56  ;;  %v2539_v2 = vpop.f32.mrb[51].mxu1  ;;  %v6365_v55 = vld [vmem:[%s7803_s0 + $0x158] sm:$0xf] }
 0x178   :  { %v473_v35 = vunpack.c.l.u8.bf16 %v6282_v60  ;;  %v4521_v51 = vcombine.low %v347_v8, %v348_v9  ;;  %v4650_v59 = vcombine.high %v475_v43, %v476_v44  ;;  %v6370_v60 = vld [vmem:[%s7803_s0 + $0x15c] sm:$0xf]  ;;  %v351_v9 = vunpack.c.l.u8.bf16 %v6365_v55 }
 0x179   :  { %v4979_v4 = vpack.c.bf16 %v2957_v61, %v2957_v61  ;;  %v2958_v5 = vmax.f32 %v2034_v62, 0.0  ;;  %2245 = vmatmul.mubr.bf16.gmra.mrb[156].mxu0 %v4517_v50  ;;  %v5105_v6 = vpack.c.bf16 %v3083_v0, %v3083_v0  ;;  %v3084_v7 = vmax.f32 %v2538_v1, 0.0  ;;  %2749 = vmatmul.mubr.bf16.gmra.mrb[156].mxu1 %v4643_v53  ;;  %v6375_v61 = vld [vmem:[%s7803_s0 + $0x350] sm:$0xf] }
 0x17a   :  { %2252 = vmatprep.mubr.bf16.mxu0 %v4520_v57  ;;  %2756 = vmatprep.mubr.bf16.mxu1 %v4646_v58  ;;  %v4648_v26 = vcombine.high %v473_v35, %v474_v10  ;;  %v4647_v54 = vcombine.low %v473_v35, %v474_v10  ;;  %v4524_v58 = vcombine.high %v349_v41, %v350_v42  ;;  %v352_v35 = vunpack.c.l.u8.bf16 %v6370_v60 }
 0x17b   :  { %4208 = vst.msk [vmem:[%s7805_s3 + $0x60] sm:$0xf] %vm4183_vm0, %v4979_v4  ;;  %v4980_v11 = vpack.c.bf16 %v2958_v5, %v2958_v5  ;;  %4334 = vst.msk [vmem:[%s7805_s3 + $0x258] sm:$0xf] %vm4183_vm0, %v5105_v6  ;;  %v5106_v12 = vpack.c.bf16 %v3084_v7, %v3084_v7  ;;  %v6382_v4 = vld [vmem:[%s7803_s0 + $0x354] sm:$0xf]  ;;  %v477_v10 = vunpack.c.l.u8.bf16 %v6375_v61  ;;  %v4649_v22 = vcombine.low %v475_v43, %v476_v44 }
 0x17c   :  { %v2038_v13 = vpop.f32.mrb[52].mxu0  ;;  %v2542_v14 = vpop.f32.mrb[52].mxu1  ;;  %v354_v43 = vunpack.c.l.u8.bf16 %v6414_v28  ;;  %v6458_v61 = vld [vmem:[%s7803_s0 + $0x16c] sm:$0xf] }
 0x17d   :  { %4209 = vst.msk [vmem:[%s7805_s3 + $0x64] sm:$0xf] %vm4183_vm0, %v4980_v11  ;;  %4335 = vst.msk [vmem:[%s7805_s3 + $0x25c] sm:$0xf] %vm4183_vm0, %v5106_v12  ;;  %v2039_v16 = vadd.f32 %v6314_v15, %v2038_v13  ;;  %v2040_v17 = vpop.f32.mrb[53].mxu0  ;;  %v2543_v19 = vadd.f32 %v6314_v15, %v2542_v14  ;;  %v2544_v20 = vpop.f32.mrb[53].mxu1  ;;  %v478_v11 = vunpack.c.l.u8.bf16 %v6382_v4 }
 0x17e   :  { %v2041_v23 = vpop.f32.mrb[54].mxu0  ;;  %v2545_v24 = vpop.f32.mrb[54].mxu1 }
 0x17f   :  { %v2959_v29 = vmax.f32 %v2039_v16, 0.0  ;;  %v2042_v30 = vadd.f32 %v6314_v15, %v2041_v23  ;;  %v2043_v31 = vpop.f32.mrb[55].mxu0  ;;  %v3085_v32 = vmax.f32 %v2543_v19, 0.0  ;;  %v2546_v33 = vadd.f32 %v6314_v15, %v2545_v24  ;;  %v2547_v34 = vpop.f32.mrb[55].mxu1  ;;  %v6409_v23 = vld [vmem:[%s7803_s0 + $0x160] sm:$0xf] }
 0x180   :  { %v4523_v19 = vcombine.low %v349_v41, %v350_v42  ;;  %v4652_v27 = vcombine.high %v477_v10, %v478_v11  ;;  %v353_v42 = vunpack.c.l.u8.bf16 %v6409_v23  ;;  %v4651_v55 = vcombine.low %v477_v10, %v478_v11 }
 0x181   :  { %v4981_v37 = vpack.c.bf16 %v2959_v29, %v2959_v29  ;;  %v2960_v38 = vmax.f32 %v2042_v30, 0.0  ;;  %2253 = vmatmul.mubr.bf16.gmra.mrb[160].mxu0 %v4519_v18  ;;  %v5107_v39 = vpack.c.bf16 %v3085_v32, %v3085_v32  ;;  %v3086_v40 = vmax.f32 %v2546_v33, 0.0  ;;  %2757 = vmatmul.mubr.bf16.gmra.mrb[160].mxu1 %v4645_v21  ;;  %v6419_v29 = vld [vmem:[%s7803_s0 + $0x358] sm:$0xf] }
 0x182   :  { %2260 = vmatprep.mubr.bf16.mxu0 %v4522_v25  ;;  %2764 = vmatprep.mubr.bf16.mxu1 %v4648_v26  ;;  %v4526_v26 = vcombine.high %v351_v9, %v352_v35  ;;  %v479_v44 = vunpack.c.l.u8.bf16 %v6419_v29  ;;  %v356_v10 = vunpack.c.l.u8.bf16 %v6458_v61  ;;  %v6502_v29 = vld [vmem:[%s7803_s0 + $0x174] sm:$0xf] }
 0x183   :  { %4210 = vst.msk [vmem:[%s7805_s3 + $0x68] sm:$0xf] %vm4183_vm0, %v4981_v37  ;;  %v4982_v45 = vpack.c.bf16 %v2960_v38, %v2960_v38  ;;  %4336 = vst.msk [vmem:[%s7805_s3 + $0x260] sm:$0xf] %vm4183_vm0, %v5107_v39  ;;  %v5108_v46 = vpack.c.bf16 %v3086_v40, %v3086_v40  ;;  %v6426_v37 = vld [vmem:[%s7803_s0 + $0x35c] sm:$0xf] }
 0x184   :  { %v2046_v47 = vpop.f32.mrb[56].mxu0  ;;  %v2550_v48 = vpop.f32.mrb[56].mxu1 }
 0x185   :  { %4211 = vst.msk [vmem:[%s7805_s3 + $0x6c] sm:$0xf] %vm4183_vm0, %v4982_v45  ;;  %4337 = vst.msk [vmem:[%s7805_s3 + $0x264] sm:$0xf] %vm4183_vm0, %v5108_v46  ;;  %v2047_v49 = vadd.f32 %v6314_v15, %v2046_v47  ;;  %v2048_v50 = vpop.f32.mrb[57].mxu0  ;;  %v2551_v52 = vadd.f32 %v6314_v15, %v2550_v48  ;;  %v2552_v53 = vpop.f32.mrb[57].mxu1  ;;  %v480_v45 = vunpack.c.l.u8.bf16 %v6426_v37 }
 0x186   :  { %v2049_v56 = vpop.f32.mrb[58].mxu0  ;;  %v2553_v57 = vpop.f32.mrb[58].mxu1 }
 0x187   :  { %v2961_v62 = vmax.f32 %v2047_v49, 0.0  ;;  %v2050_v63 = vadd.f32 %v6314_v15, %v2049_v56  ;;  %v2051_v0 = vpop.f32.mrb[59].mxu0  ;;  %v3087_v1 = vmax.f32 %v2551_v52, 0.0  ;;  %v2554_v2 = vadd.f32 %v6314_v15, %v2553_v57  ;;  %v2555_v3 = vpop.f32.mrb[59].mxu1  ;;  %v6453_v56 = vld [vmem:[%s7803_s0 + $0x168] sm:$0xf] }
 0x188   :  { %v4525_v52 = vcombine.low %v351_v9, %v352_v35  ;;  %v4654_v60 = vcombine.high %v479_v44, %v480_v45  ;;  %v355_v35 = vunpack.c.l.u8.bf16 %v6453_v56  ;;  %v4653_v23 = vcombine.low %v479_v44, %v480_v45 }
 0x189   :  { %v4983_v5 = vpack.c.bf16 %v2961_v62, %v2961_v62  ;;  %v2962_v6 = vmax.f32 %v2050_v63, 0.0  ;;  %2261 = vmatmul.mubr.bf16.gmra.mrb[164].mxu0 %v4521_v51  ;;  %v5109_v7 = vpack.c.bf16 %v3087_v1, %v3087_v1  ;;  %v3088_v8 = vmax.f32 %v2554_v2, 0.0  ;;  %2765 = vmatmul.mubr.bf16.gmra.mrb[164].mxu1 %v4647_v54  ;;  %v6463_v62 = vld [vmem:[%s7803_s0 + $0x360] sm:$0xf] }
 0x18a   :  { %2268 = vmatprep.mubr.bf16.mxu0 %v4524_v58  ;;  %2772 = vmatprep.mubr.bf16.mxu1 %v4650_v59  ;;  %v4528_v59 = vcombine.high %v353_v42, %v354_v43  ;;  %v481_v11 = vunpack.c.l.u8.bf16 %v6463_v62  ;;  %v358_v44 = vunpack.c.l.u8.bf16 %v6502_v29  ;;  %v6546_v62 = vld [vmem:[%s7803_s0 + $0x17c] sm:$0xf] }
 0x18b   :  { %4212 = vst.msk [vmem:[%s7805_s3 + $0x70] sm:$0xf] %vm4183_vm0, %v4983_v5  ;;  %v4984_v12 = vpack.c.bf16 %v2962_v6, %v2962_v6  ;;  %4338 = vst.msk [vmem:[%s7805_s3 + $0x268] sm:$0xf] %vm4183_vm0, %v5109_v7  ;;  %v5110_v13 = vpack.c.bf16 %v3088_v8, %v3088_v8  ;;  %v6470_v5 = vld [vmem:[%s7803_s0 + $0x364] sm:$0xf] }
 0x18c   :  { %v2054_v14 = vpop.f32.mrb[60].mxu0  ;;  %v2558_v16 = vpop.f32.mrb[60].mxu1 }
 0x18d   :  { %4213 = vst.msk [vmem:[%s7805_s3 + $0x74] sm:$0xf] %vm4183_vm0, %v4984_v12  ;;  %4339 = vst.msk [vmem:[%s7805_s3 + $0x26c] sm:$0xf] %vm4183_vm0, %v5110_v13  ;;  %v2055_v17 = vadd.f32 %v6314_v15, %v2054_v14  ;;  %v2056_v18 = vpop.f32.mrb[61].mxu0  ;;  %v2559_v20 = vadd.f32 %v6314_v15, %v2558_v16  ;;  %v2560_v21 = vpop.f32.mrb[61].mxu1  ;;  %v482_v12 = vunpack.c.l.u8.bf16 %v6470_v5 }
 0x18e   :  { %v2057_v24 = vpop.f32.mrb[62].mxu0  ;;  %v2561_v25 = vpop.f32.mrb[62].mxu1 }
 0x18f   :  { %v2963_v30 = vmax.f32 %v2055_v17, 0.0  ;;  %v2058_v31 = vadd.f32 %v6314_v15, %v2057_v24  ;;  %v2059_v32 = vpop.f32.mrb[63].mxu0  ;;  %v3089_v33 = vmax.f32 %v2559_v20, 0.0  ;;  %v2562_v34 = vadd.f32 %v6314_v15, %v2561_v25  ;;  %v2563_v36 = vpop.f32.mrb[63].mxu1  ;;  %v6497_v24 = vld [vmem:[%s7803_s0 + $0x170] sm:$0xf] }
 0x190   :  { %v4527_v20 = vcombine.low %v353_v42, %v354_v43  ;;  %v4656_v28 = vcombine.high %v481_v11, %v482_v12  ;;  %v357_v43 = vunpack.c.l.u8.bf16 %v6497_v24  ;;  %v4655_v56 = vcombine.low %v481_v11, %v482_v12 }
 0x191   :  { %v4985_v38 = vpack.c.bf16 %v2963_v30, %v2963_v30  ;;  %v2964_v39 = vmax.f32 %v2058_v31, 0.0  ;;  %2269 = vmatmul.mubr.bf16.gmra.mrb[168].mxu0 %v4523_v19  ;;  %v5111_v40 = vpack.c.bf16 %v3089_v33, %v3089_v33  ;;  %v3090_v41 = vmax.f32 %v2562_v34, 0.0  ;;  %2773 = vmatmul.mubr.bf16.gmra.mrb[168].mxu1 %v4649_v22  ;;  %v6507_v30 = vld [vmem:[%s7803_s0 + $0x368] sm:$0xf] }
 0x192   :  { %2276 = vmatprep.mubr.bf16.mxu0 %v4526_v26  ;;  %2780 = vmatprep.mubr.bf16.mxu1 %v4652_v27  ;;  %v4530_v27 = vcombine.high %v355_v35, %v356_v10  ;;  %v483_v45 = vunpack.c.l.u8.bf16 %v6507_v30  ;;  %v360_v11 = vunpack.c.l.u8.bf16 %v6546_v62  ;;  %v6590_v30 = vld [vmem:[%s7803_s0 + $0x184] sm:$0xf] }
 0x193   :  { %4214 = vst.msk [vmem:[%s7805_s3 + $0x78] sm:$0xf] %vm4183_vm0, %v4985_v38  ;;  %v4986_v46 = vpack.c.bf16 %v2964_v39, %v2964_v39  ;;  %4340 = vst.msk [vmem:[%s7805_s3 + $0x270] sm:$0xf] %vm4183_vm0, %v5111_v40  ;;  %v5112_v47 = vpack.c.bf16 %v3090_v41, %v3090_v41  ;;  %v6514_v38 = vld [vmem:[%s7803_s0 + $0x36c] sm:$0xf] }
 0x194   :  { %v2062_v48 = vpop.f32.mrb[64].mxu0  ;;  %v2566_v49 = vpop.f32.mrb[64].mxu1 }
 0x195   :  { %4215 = vst.msk [vmem:[%s7805_s3 + $0x7c] sm:$0xf] %vm4183_vm0, %v4986_v46  ;;  %4341 = vst.msk [vmem:[%s7805_s3 + $0x274] sm:$0xf] %vm4183_vm0, %v5112_v47  ;;  %v2063_v50 = vadd.f32 %v6314_v15, %v2062_v48  ;;  %v2064_v51 = vpop.f32.mrb[65].mxu0  ;;  %v2567_v53 = vadd.f32 %v6314_v15, %v2566_v49  ;;  %v2568_v54 = vpop.f32.mrb[65].mxu1  ;;  %v484_v46 = vunpack.c.l.u8.bf16 %v6514_v38 }
 0x196   :  { %v2065_v57 = vpop.f32.mrb[66].mxu0  ;;  %v2569_v58 = vpop.f32.mrb[66].mxu1 }
 0x197   :  { %v2965_v63 = vmax.f32 %v2063_v50, 0.0  ;;  %v2066_v0 = vadd.f32 %v6314_v15, %v2065_v57  ;;  %v2067_v1 = vpop.f32.mrb[67].mxu0  ;;  %v3091_v2 = vmax.f32 %v2567_v53, 0.0  ;;  %v2570_v3 = vadd.f32 %v6314_v15, %v2569_v58  ;;  %v2571_v4 = vpop.f32.mrb[67].mxu1  ;;  %v6541_v57 = vld [vmem:[%s7803_s0 + $0x178] sm:$0xf] }
 0x198   :  { %v4529_v53 = vcombine.low %v355_v35, %v356_v10  ;;  %v4658_v61 = vcombine.high %v483_v45, %v484_v46  ;;  %v359_v10 = vunpack.c.l.u8.bf16 %v6541_v57  ;;  %v4657_v24 = vcombine.low %v483_v45, %v484_v46 }
 0x199   :  { %v4987_v6 = vpack.c.bf16 %v2965_v63, %v2965_v63  ;;  %v2966_v7 = vmax.f32 %v2066_v0, 0.0  ;;  %2277 = vmatmul.mubr.bf16.gmra.mrb[172].mxu0 %v4525_v52  ;;  %v5113_v8 = vpack.c.bf16 %v3091_v2, %v3091_v2  ;;  %v3092_v9 = vmax.f32 %v2570_v3, 0.0  ;;  %2781 = vmatmul.mubr.bf16.gmra.mrb[172].mxu1 %v4651_v55  ;;  %v6551_v63 = vld [vmem:[%s7803_s0 + $0x370] sm:$0xf] }
 0x19a   :  { %2284 = vmatprep.mubr.bf16.mxu0 %v4528_v59  ;;  %2788 = vmatprep.mubr.bf16.mxu1 %v4654_v60  ;;  %v4532_v60 = vcombine.high %v357_v43, %v358_v44  ;;  %v485_v12 = vunpack.c.l.u8.bf16 %v6551_v63  ;;  %v362_v45 = vunpack.c.l.u8.bf16 %v6590_v30  ;;  %v6634_v63 = vld [vmem:[%s7803_s0 + $0x18c] sm:$0xf] }
 0x19b   :  { %4216 = vst.msk [vmem:[%s7805_s3 + $0x80] sm:$0xf] %vm4183_vm0, %v4987_v6  ;;  %v4988_v13 = vpack.c.bf16 %v2966_v7, %v2966_v7  ;;  %4342 = vst.msk [vmem:[%s7805_s3 + $0x278] sm:$0xf] %vm4183_vm0, %v5113_v8  ;;  %v5114_v14 = vpack.c.bf16 %v3092_v9, %v3092_v9  ;;  %v6558_v6 = vld [vmem:[%s7803_s0 + $0x374] sm:$0xf] }
 0x19c   :  { %v2070_v16 = vpop.f32.mrb[68].mxu0  ;;  %v2574_v17 = vpop.f32.mrb[68].mxu1 }
 0x19d   :  { %4217 = vst.msk [vmem:[%s7805_s3 + $0x84] sm:$0xf] %vm4183_vm0, %v4988_v13  ;;  %4343 = vst.msk [vmem:[%s7805_s3 + $0x27c] sm:$0xf] %vm4183_vm0, %v5114_v14  ;;  %v2071_v18 = vadd.f32 %v6314_v15, %v2070_v16  ;;  %v2072_v19 = vpop.f32.mrb[69].mxu0  ;;  %v2575_v21 = vadd.f32 %v6314_v15, %v2574_v17  ;;  %v2576_v22 = vpop.f32.mrb[69].mxu1  ;;  %v486_v13 = vunpack.c.l.u8.bf16 %v6558_v6 }
 0x19e   :  { %v2073_v25 = vpop.f32.mrb[70].mxu0  ;;  %v2577_v26 = vpop.f32.mrb[70].mxu1 }
 0x19f   :  { %v2967_v31 = vmax.f32 %v2071_v18, 0.0  ;;  %v2074_v32 = vadd.f32 %v6314_v15, %v2073_v25  ;;  %v2075_v33 = vpop.f32.mrb[71].mxu0  ;;  %v3093_v34 = vmax.f32 %v2575_v21, 0.0  ;;  %v2578_v36 = vadd.f32 %v6314_v15, %v2577_v26  ;;  %v2579_v37 = vpop.f32.mrb[71].mxu1  ;;  %v6585_v25 = vld [vmem:[%s7803_s0 + $0x180] sm:$0xf] }
 0x1a0   :  { %v4531_v21 = vcombine.low %v357_v43, %v358_v44  ;;  %v4660_v29 = vcombine.high %v485_v12, %v486_v13  ;;  %v361_v44 = vunpack.c.l.u8.bf16 %v6585_v25  ;;  %v4659_v57 = vcombine.low %v485_v12, %v486_v13 }
 0x1a1   :  { %v4989_v39 = vpack.c.bf16 %v2967_v31, %v2967_v31  ;;  %v2968_v40 = vmax.f32 %v2074_v32, 0.0  ;;  %2285 = vmatmul.mubr.bf16.gmra.mrb[176].mxu0 %v4527_v20  ;;  %v5115_v41 = vpack.c.bf16 %v3093_v34, %v3093_v34  ;;  %v3094_v42 = vmax.f32 %v2578_v36, 0.0  ;;  %2789 = vmatmul.mubr.bf16.gmra.mrb[176].mxu1 %v4653_v23  ;;  %v6595_v31 = vld [vmem:[%s7803_s0 + $0x378] sm:$0xf] }
 0x1a2   :  { %2292 = vmatprep.mubr.bf16.mxu0 %v4530_v27  ;;  %2796 = vmatprep.mubr.bf16.mxu1 %v4656_v28  ;;  %v4534_v28 = vcombine.high %v359_v10, %v360_v11  ;;  %v487_v46 = vunpack.c.l.u8.bf16 %v6595_v31  ;;  %v364_v12 = vunpack.c.l.u8.bf16 %v6634_v63  ;;  %v6678_v31 = vld [vmem:[%s7803_s0 + $0x194] sm:$0xf] }
 0x1a3   :  { %4218 = vst.msk [vmem:[%s7805_s3 + $0x88] sm:$0xf] %vm4183_vm0, %v4989_v39  ;;  %v4990_v47 = vpack.c.bf16 %v2968_v40, %v2968_v40  ;;  %4344 = vst.msk [vmem:[%s7805_s3 + $0x280] sm:$0xf] %vm4183_vm0, %v5115_v41  ;;  %v5116_v48 = vpack.c.bf16 %v3094_v42, %v3094_v42  ;;  %v6602_v39 = vld [vmem:[%s7803_s0 + $0x37c] sm:$0xf] }
 0x1a4   :  { %v2078_v49 = vpop.f32.mrb[72].mxu0  ;;  %v2582_v50 = vpop.f32.mrb[72].mxu1 }
 0x1a5   :  { %4219 = vst.msk [vmem:[%s7805_s3 + $0x8c] sm:$0xf] %vm4183_vm0, %v4990_v47  ;;  %4345 = vst.msk [vmem:[%s7805_s3 + $0x284] sm:$0xf] %vm4183_vm0, %v5116_v48  ;;  %v2079_v51 = vadd.f32 %v6314_v15, %v2078_v49  ;;  %v2080_v52 = vpop.f32.mrb[73].mxu0  ;;  %v2583_v54 = vadd.f32 %v6314_v15, %v2582_v50  ;;  %v2584_v55 = vpop.f32.mrb[73].mxu1  ;;  %v488_v47 = vunpack.c.l.u8.bf16 %v6602_v39 }
 0x1a6   :  { %v2081_v58 = vpop.f32.mrb[74].mxu0  ;;  %v2585_v59 = vpop.f32.mrb[74].mxu1 }
 0x1a7   :  { %v2969_v0 = vmax.f32 %v2079_v51, 0.0  ;;  %v2082_v1 = vadd.f32 %v6314_v15, %v2081_v58  ;;  %v2083_v2 = vpop.f32.mrb[75].mxu0  ;;  %v3095_v3 = vmax.f32 %v2583_v54, 0.0  ;;  %v2586_v4 = vadd.f32 %v6314_v15, %v2585_v59  ;;  %v2587_v5 = vpop.f32.mrb[75].mxu1  ;;  %v6629_v58 = vld [vmem:[%s7803_s0 + $0x188] sm:$0xf] }
 0x1a8   :  { %v4533_v54 = vcombine.low %v359_v10, %v360_v11  ;;  %v4662_v62 = vcombine.high %v487_v46, %v488_v47  ;;  %v363_v11 = vunpack.c.l.u8.bf16 %v6629_v58  ;;  %v4661_v25 = vcombine.low %v487_v46, %v488_v47 }
 0x1a9   :  { %v4991_v7 = vpack.c.bf16 %v2969_v0, %v2969_v0  ;;  %v2970_v8 = vmax.f32 %v2082_v1, 0.0  ;;  %2293 = vmatmul.mubr.bf16.gmra.mrb[180].mxu0 %v4529_v53  ;;  %v5117_v9 = vpack.c.bf16 %v3095_v3, %v3095_v3  ;;  %v3096_v35 = vmax.f32 %v2586_v4, 0.0  ;;  %2797 = vmatmul.mubr.bf16.gmra.mrb[180].mxu1 %v4655_v56  ;;  %v6639_v0 = vld [vmem:[%s7803_s0 + $0x380] sm:$0xf] }
 0x1aa   :  { %2300 = vmatprep.mubr.bf16.mxu0 %v4532_v60  ;;  %2804 = vmatprep.mubr.bf16.mxu1 %v4658_v61  ;;  %v4536_v61 = vcombine.high %v361_v44, %v362_v45  ;;  %v489_v13 = vunpack.c.l.u8.bf16 %v6639_v0  ;;  %v366_v46 = vunpack.c.l.u8.bf16 %v6678_v31  ;;  %v6722_v0 = vld [vmem:[%s7803_s0 + $0x19c] sm:$0xf] }
 0x1ab   :  { %4220 = vst.msk [vmem:[%s7805_s3 + $0x90] sm:$0xf] %vm4183_vm0, %v4991_v7  ;;  %v4992_v14 = vpack.c.bf16 %v2970_v8, %v2970_v8  ;;  %4346 = vst.msk [vmem:[%s7805_s3 + $0x288] sm:$0xf] %vm4183_vm0, %v5117_v9  ;;  %v5118_v16 = vpack.c.bf16 %v3096_v35, %v3096_v35  ;;  %v6646_v7 = vld [vmem:[%s7803_s0 + $0x384] sm:$0xf] }
 0x1ac   :  { %v2086_v17 = vpop.f32.mrb[76].mxu0  ;;  %v2590_v18 = vpop.f32.mrb[76].mxu1 }
 0x1ad   :  { %4221 = vst.msk [vmem:[%s7805_s3 + $0x94] sm:$0xf] %vm4183_vm0, %v4992_v14  ;;  %4347 = vst.msk [vmem:[%s7805_s3 + $0x28c] sm:$0xf] %vm4183_vm0, %v5118_v16  ;;  %v2087_v19 = vadd.f32 %v6314_v15, %v2086_v17  ;;  %v2088_v20 = vpop.f32.mrb[77].mxu0  ;;  %v2591_v22 = vadd.f32 %v6314_v15, %v2590_v18  ;;  %v2592_v23 = vpop.f32.mrb[77].mxu1  ;;  %v490_v14 = vunpack.c.l.u8.bf16 %v6646_v7 }
 0x1ae   :  { %v2089_v26 = vpop.f32.mrb[78].mxu0  ;;  %v2593_v27 = vpop.f32.mrb[78].mxu1 }
 0x1af   :  { %v2971_v32 = vmax.f32 %v2087_v19, 0.0  ;;  %v2090_v33 = vadd.f32 %v6314_v15, %v2089_v26  ;;  %v2091_v34 = vpop.f32.mrb[79].mxu0  ;;  %v3097_v36 = vmax.f32 %v2591_v22, 0.0  ;;  %v2594_v37 = vadd.f32 %v6314_v15, %v2593_v27  ;;  %v2595_v38 = vpop.f32.mrb[79].mxu1  ;;  %v6673_v26 = vld [vmem:[%s7803_s0 + $0x190] sm:$0xf] }
 0x1b0   :  { %v4535_v22 = vcombine.low %v361_v44, %v362_v45  ;;  %v4664_v30 = vcombine.high %v489_v13, %v490_v14  ;;  %v365_v45 = vunpack.c.l.u8.bf16 %v6673_v26  ;;  %v4663_v58 = vcombine.low %v489_v13, %v490_v14 }
 0x1b1   :  { %v4993_v40 = vpack.c.bf16 %v2971_v32, %v2971_v32  ;;  %v2972_v41 = vmax.f32 %v2090_v33, 0.0  ;;  %2301 = vmatmul.mubr.bf16.gmra.mrb[184].mxu0 %v4531_v21  ;;  %v5119_v42 = vpack.c.bf16 %v3097_v36, %v3097_v36  ;;  %v3098_v43 = vmax.f32 %v2594_v37, 0.0  ;;  %2805 = vmatmul.mubr.bf16.gmra.mrb[184].mxu1 %v4657_v24  ;;  %v6683_v32 = vld [vmem:[%s7803_s0 + $0x388] sm:$0xf] }
 0x1b2   :  { %2308 = vmatprep.mubr.bf16.mxu0 %v4534_v28  ;;  %2812 = vmatprep.mubr.bf16.mxu1 %v4660_v29  ;;  %v4538_v29 = vcombine.high %v363_v11, %v364_v12  ;;  %v491_v47 = vunpack.c.l.u8.bf16 %v6683_v32  ;;  %v368_v13 = vunpack.c.l.u8.bf16 %v6722_v0  ;;  %v6766_v32 = vld [vmem:[%s7803_s0 + $0x1a4] sm:$0xf] }
 0x1b3   :  { %4222 = vst.msk [vmem:[%s7805_s3 + $0x98] sm:$0xf] %vm4183_vm0, %v4993_v40  ;;  %v4994_v48 = vpack.c.bf16 %v2972_v41, %v2972_v41  ;;  %4348 = vst.msk [vmem:[%s7805_s3 + $0x290] sm:$0xf] %vm4183_vm0, %v5119_v42  ;;  %v5120_v49 = vpack.c.bf16 %v3098_v43, %v3098_v43  ;;  %v6690_v40 = vld [vmem:[%s7803_s0 + $0x38c] sm:$0xf] }
 0x1b4   :  { %v2094_v50 = vpop.f32.mrb[80].mxu0  ;;  %v2598_v51 = vpop.f32.mrb[80].mxu1 }
 0x1b5   :  { %4223 = vst.msk [vmem:[%s7805_s3 + $0x9c] sm:$0xf] %vm4183_vm0, %v4994_v48  ;;  %4349 = vst.msk [vmem:[%s7805_s3 + $0x294] sm:$0xf] %vm4183_vm0, %v5120_v49  ;;  %v2095_v52 = vadd.f32 %v6314_v15, %v2094_v50  ;;  %v2096_v53 = vpop.f32.mrb[81].mxu0  ;;  %v2599_v55 = vadd.f32 %v6314_v15, %v2598_v51  ;;  %v2600_v56 = vpop.f32.mrb[81].mxu1  ;;  %v492_v48 = vunpack.c.l.u8.bf16 %v6690_v40 }
 0x1b6   :  { %v2097_v59 = vpop.f32.mrb[82].mxu0  ;;  %v2601_v60 = vpop.f32.mrb[82].mxu1 }
 0x1b7   :  { %v2973_v1 = vmax.f32 %v2095_v52, 0.0  ;;  %v2098_v2 = vadd.f32 %v6314_v15, %v2097_v59  ;;  %v2099_v3 = vpop.f32.mrb[83].mxu0  ;;  %v3099_v4 = vmax.f32 %v2599_v55, 0.0  ;;  %v2602_v5 = vadd.f32 %v6314_v15, %v2601_v60  ;;  %v2603_v6 = vpop.f32.mrb[83].mxu1  ;;  %v6717_v59 = vld [vmem:[%s7803_s0 + $0x198] sm:$0xf] }
 0x1b8   :  { %v4537_v55 = vcombine.low %v363_v11, %v364_v12  ;;  %v4666_v63 = vcombine.high %v491_v47, %v492_v48  ;;  %v367_v12 = vunpack.c.l.u8.bf16 %v6717_v59  ;;  %v4665_v26 = vcombine.low %v491_v47, %v492_v48 }
 0x1b9   :  { %v4995_v8 = vpack.c.bf16 %v2973_v1, %v2973_v1  ;;  %v2974_v9 = vmax.f32 %v2098_v2, 0.0  ;;  %2309 = vmatmul.mubr.bf16.gmra.mrb[188].mxu0 %v4533_v54  ;;  %v5121_v35 = vpack.c.bf16 %v3099_v4, %v3099_v4  ;;  %v3100_v10 = vmax.f32 %v2602_v5, 0.0  ;;  %2813 = vmatmul.mubr.bf16.gmra.mrb[188].mxu1 %v4659_v57  ;;  %v6727_v1 = vld [vmem:[%s7803_s0 + $0x390] sm:$0xf] }
 0x1ba   :  { %2316 = vmatprep.mubr.bf16.mxu0 %v4536_v61  ;;  %2820 = vmatprep.mubr.bf16.mxu1 %v4662_v62  ;;  %v4540_v62 = vcombine.high %v365_v45, %v366_v46  ;;  %v493_v14 = vunpack.c.l.u8.bf16 %v6727_v1  ;;  %v370_v47 = vunpack.c.l.u8.bf16 %v6766_v32  ;;  %v6810_v1 = vld [vmem:[%s7803_s0 + $0x1ac] sm:$0xf] }
 0x1bb   :  { %4224 = vst.msk [vmem:[%s7805_s3 + $0xa0] sm:$0xf] %vm4183_vm0, %v4995_v8  ;;  %v4996_v16 = vpack.c.bf16 %v2974_v9, %v2974_v9  ;;  %4350 = vst.msk [vmem:[%s7805_s3 + $0x298] sm:$0xf] %vm4183_vm0, %v5121_v35  ;;  %v5122_v17 = vpack.c.bf16 %v3100_v10, %v3100_v10  ;;  %v6734_v8 = vld [vmem:[%s7803_s0 + $0x394] sm:$0xf] }
 0x1bc   :  { %v2102_v18 = vpop.f32.mrb[84].mxu0  ;;  %v2606_v19 = vpop.f32.mrb[84].mxu1 }
 0x1bd   :  { %4225 = vst.msk [vmem:[%s7805_s3 + $0xa4] sm:$0xf] %vm4183_vm0, %v4996_v16  ;;  %4351 = vst.msk [vmem:[%s7805_s3 + $0x29c] sm:$0xf] %vm4183_vm0, %v5122_v17  ;;  %v2103_v20 = vadd.f32 %v6314_v15, %v2102_v18  ;;  %v2104_v21 = vpop.f32.mrb[85].mxu0  ;;  %v2607_v23 = vadd.f32 %v6314_v15, %v2606_v19  ;;  %v2608_v24 = vpop.f32.mrb[85].mxu1  ;;  %v494_v16 = vunpack.c.l.u8.bf16 %v6734_v8 }
 0x1be   :  { %v2105_v27 = vpop.f32.mrb[86].mxu0  ;;  %v2609_v28 = vpop.f32.mrb[86].mxu1 }
 0x1bf   :  { %v2975_v33 = vmax.f32 %v2103_v20, 0.0  ;;  %v2106_v34 = vadd.f32 %v6314_v15, %v2105_v27  ;;  %v2107_v36 = vpop.f32.mrb[87].mxu0  ;;  %v3101_v37 = vmax.f32 %v2607_v23, 0.0  ;;  %v2610_v38 = vadd.f32 %v6314_v15, %v2609_v28  ;;  %v2611_v39 = vpop.f32.mrb[87].mxu1  ;;  %v6761_v27 = vld [vmem:[%s7803_s0 + $0x1a0] sm:$0xf] }
 0x1c0   :  { %v4539_v23 = vcombine.low %v365_v45, %v366_v46  ;;  %v4668_v31 = vcombine.high %v493_v14, %v494_v16  ;;  %v369_v46 = vunpack.c.l.u8.bf16 %v6761_v27  ;;  %v4667_v59 = vcombine.low %v493_v14, %v494_v16 }
 0x1c1   :  { %v4997_v41 = vpack.c.bf16 %v2975_v33, %v2975_v33  ;;  %v2976_v42 = vmax.f32 %v2106_v34, 0.0  ;;  %2317 = vmatmul.mubr.bf16.gmra.mrb[192].mxu0 %v4535_v22  ;;  %v5123_v43 = vpack.c.bf16 %v3101_v37, %v3101_v37  ;;  %v3102_v44 = vmax.f32 %v2610_v38, 0.0  ;;  %2821 = vmatmul.mubr.bf16.gmra.mrb[192].mxu1 %v4661_v25  ;;  %v6771_v33 = vld [vmem:[%s7803_s0 + $0x398] sm:$0xf] }
 0x1c2   :  { %2324 = vmatprep.mubr.bf16.mxu0 %v4538_v29  ;;  %2828 = vmatprep.mubr.bf16.mxu1 %v4664_v30  ;;  %v4542_v30 = vcombine.high %v367_v12, %v368_v13  ;;  %v495_v48 = vunpack.c.l.u8.bf16 %v6771_v33  ;;  %v372_v14 = vunpack.c.l.u8.bf16 %v6810_v1  ;;  %v6854_v33 = vld [vmem:[%s7803_s0 + $0x1b4] sm:$0xf] }
 0x1c3   :  { %4226 = vst.msk [vmem:[%s7805_s3 + $0xa8] sm:$0xf] %vm4183_vm0, %v4997_v41  ;;  %v4998_v49 = vpack.c.bf16 %v2976_v42, %v2976_v42  ;;  %4352 = vst.msk [vmem:[%s7805_s3 + $0x2a0] sm:$0xf] %vm4183_vm0, %v5123_v43  ;;  %v5124_v50 = vpack.c.bf16 %v3102_v44, %v3102_v44  ;;  %v6778_v41 = vld [vmem:[%s7803_s0 + $0x39c] sm:$0xf] }
 0x1c4   :  { %v2110_v51 = vpop.f32.mrb[88].mxu0  ;;  %v2614_v52 = vpop.f32.mrb[88].mxu1 }
 0x1c5   :  { %4227 = vst.msk [vmem:[%s7805_s3 + $0xac] sm:$0xf] %vm4183_vm0, %v4998_v49  ;;  %4353 = vst.msk [vmem:[%s7805_s3 + $0x2a4] sm:$0xf] %vm4183_vm0, %v5124_v50  ;;  %v2111_v53 = vadd.f32 %v6314_v15, %v2110_v51  ;;  %v2112_v54 = vpop.f32.mrb[89].mxu0  ;;  %v2615_v56 = vadd.f32 %v6314_v15, %v2614_v52  ;;  %v2616_v57 = vpop.f32.mrb[89].mxu1  ;;  %v496_v49 = vunpack.c.l.u8.bf16 %v6778_v41 }
 0x1c6   :  { %v2113_v60 = vpop.f32.mrb[90].mxu0  ;;  %v2617_v61 = vpop.f32.mrb[90].mxu1 }
 0x1c7   :  { %v2977_v2 = vmax.f32 %v2111_v53, 0.0  ;;  %v2114_v3 = vadd.f32 %v6314_v15, %v2113_v60  ;;  %v2115_v4 = vpop.f32.mrb[91].mxu0  ;;  %v3103_v5 = vmax.f32 %v2615_v56, 0.0  ;;  %v2618_v6 = vadd.f32 %v6314_v15, %v2617_v61  ;;  %v2619_v7 = vpop.f32.mrb[91].mxu1  ;;  %v6805_v60 = vld [vmem:[%s7803_s0 + $0x1a8] sm:$0xf] }
 0x1c8   :  { %v4541_v56 = vcombine.low %v367_v12, %v368_v13  ;;  %v4670_v0 = vcombine.high %v495_v48, %v496_v49  ;;  %v371_v13 = vunpack.c.l.u8.bf16 %v6805_v60  ;;  %v4669_v27 = vcombine.low %v495_v48, %v496_v49 }
 0x1c9   :  { %v4999_v9 = vpack.c.bf16 %v2977_v2, %v2977_v2  ;;  %v2978_v35 = vmax.f32 %v2114_v3, 0.0  ;;  %2325 = vmatmul.mubr.bf16.gmra.mrb[196].mxu0 %v4537_v55  ;;  %v5125_v10 = vpack.c.bf16 %v3103_v5, %v3103_v5  ;;  %v3104_v11 = vmax.f32 %v2618_v6, 0.0  ;;  %2829 = vmatmul.mubr.bf16.gmra.mrb[196].mxu1 %v4663_v58  ;;  %v6815_v2 = vld [vmem:[%s7803_s0 + $0x3a0] sm:$0xf] }
 0x1ca   :  { %2332 = vmatprep.mubr.bf16.mxu0 %v4540_v62  ;;  %2836 = vmatprep.mubr.bf16.mxu1 %v4666_v63  ;;  %v4544_v63 = vcombine.high %v369_v46, %v370_v47  ;;  %v497_v16 = vunpack.c.l.u8.bf16 %v6815_v2  ;;  %v374_v48 = vunpack.c.l.u8.bf16 %v6854_v33  ;;  %v6903_v2 = vld [vmem:[%s7803_s0 + $0x1bc] sm:$0xf] }
 0x1cb   :  { %4228 = vst.msk [vmem:[%s7805_s3 + $0xb0] sm:$0xf] %vm4183_vm0, %v4999_v9  ;;  %v5000_v17 = vpack.c.bf16 %v2978_v35, %v2978_v35  ;;  %4354 = vst.msk [vmem:[%s7805_s3 + $0x2a8] sm:$0xf] %vm4183_vm0, %v5125_v10  ;;  %v5126_v18 = vpack.c.bf16 %v3104_v11, %v3104_v11  ;;  %v6822_v9 = vld [vmem:[%s7803_s0 + $0x3a4] sm:$0xf] }
 0x1cc   :  { %v2118_v19 = vpop.f32.mrb[92].mxu0  ;;  %v2622_v20 = vpop.f32.mrb[92].mxu1 }
 0x1cd   :  { %4229 = vst.msk [vmem:[%s7805_s3 + $0xb4] sm:$0xf] %vm4183_vm0, %v5000_v17  ;;  %4355 = vst.msk [vmem:[%s7805_s3 + $0x2ac] sm:$0xf] %vm4183_vm0, %v5126_v18  ;;  %v2119_v21 = vadd.f32 %v6314_v15, %v2118_v19  ;;  %v2120_v22 = vpop.f32.mrb[93].mxu0  ;;  %v2623_v24 = vadd.f32 %v6314_v15, %v2622_v20  ;;  %v2624_v25 = vpop.f32.mrb[93].mxu1  ;;  %v498_v17 = vunpack.c.l.u8.bf16 %v6822_v9 }
 0x1ce   :  { %v2121_v28 = vpop.f32.mrb[94].mxu0  ;;  %v2625_v29 = vpop.f32.mrb[94].mxu1 }
 0x1cf   :  { %v2979_v34 = vmax.f32 %v2119_v21, 0.0  ;;  %v2122_v36 = vadd.f32 %v6314_v15, %v2121_v28  ;;  %v2123_v37 = vpop.f32.mrb[95].mxu0  ;;  %v3105_v38 = vmax.f32 %v2623_v24, 0.0  ;;  %v2626_v39 = vadd.f32 %v6314_v15, %v2625_v29  ;;  %v2627_v40 = vpop.f32.mrb[95].mxu1  ;;  %v6849_v28 = vld [vmem:[%s7803_s0 + $0x1b0] sm:$0xf] }
 0x1d0   :  { %v4543_v24 = vcombine.low %v369_v46, %v370_v47  ;;  %v4672_v32 = vcombine.high %v497_v16, %v498_v17  ;;  %v373_v47 = vunpack.c.l.u8.bf16 %v6849_v28  ;;  %v4671_v60 = vcombine.low %v497_v16, %v498_v17 }
 0x1d1   :  { %v5001_v42 = vpack.c.bf16 %v2979_v34, %v2979_v34  ;;  %v2980_v43 = vmax.f32 %v2122_v36, 0.0  ;;  %2333 = vmatmul.mubr.bf16.gmra.mrb[200].mxu0 %v4539_v23  ;;  %v5127_v44 = vpack.c.bf16 %v3105_v38, %v3105_v38  ;;  %v3106_v45 = vmax.f32 %v2626_v39, 0.0  ;;  %2837 = vmatmul.mubr.bf16.gmra.mrb[200].mxu1 %v4665_v26  ;;  %v6859_v34 = vld [vmem:[%s7803_s0 + $0x3a8] sm:$0xf] }
 0x1d2   :  { %2340 = vmatprep.mubr.bf16.mxu0 %v4542_v30  ;;  %2844 = vmatprep.mubr.bf16.mxu1 %v4668_v31  ;;  %v4546_v31 = vcombine.high %v371_v13, %v372_v14  ;;  %v376_v16 = vunpack.c.l.u8.bf16 %v6903_v2 }
 0x1d3   :  { %4230 = vst.msk [vmem:[%s7805_s3 + $0xb8] sm:$0xf] %vm4183_vm0, %v5001_v42  ;;  %v5002_v50 = vpack.c.bf16 %v2980_v43, %v2980_v43  ;;  %4356 = vst.msk [vmem:[%s7805_s3 + $0x2b0] sm:$0xf] %vm4183_vm0, %v5127_v44  ;;  %v5128_v51 = vpack.c.bf16 %v3106_v45, %v3106_v45  ;;  %v6866_v42 = vld [vmem:[%s7803_s0 + $0x3ac] sm:$0xf] }
 0x1d4   :  { %v2126_v52 = vpop.f32.mrb[96].mxu0  ;;  %v2630_v53 = vpop.f32.mrb[96].mxu1  ;;  %v500_v49 = vunpack.c.l.u8.bf16 %v6866_v42 }
 0x1d5   :  { %4231 = vst.msk [vmem:[%s7805_s3 + $0xbc] sm:$0xf] %vm4183_vm0, %v5002_v50  ;;  %4357 = vst.msk [vmem:[%s7805_s3 + $0x2b4] sm:$0xf] %vm4183_vm0, %v5128_v51  ;;  %v2127_v54 = vadd.f32 %v6314_v15, %v2126_v52  ;;  %v2128_v55 = vpop.f32.mrb[97].mxu0  ;;  %v2631_v57 = vadd.f32 %v6314_v15, %v2630_v53  ;;  %v2632_v58 = vpop.f32.mrb[97].mxu1 }
 0x1d6   :  { %v2129_v61 = vpop.f32.mrb[98].mxu0  ;;  %v2633_v62 = vpop.f32.mrb[98].mxu1 }
 0x1d7   :  { %v2981_v3 = vmax.f32 %v2127_v54, 0.0  ;;  %v2130_v4 = vadd.f32 %v6314_v15, %v2129_v61  ;;  %v2131_v5 = vpop.f32.mrb[99].mxu0  ;;  %v3107_v6 = vmax.f32 %v2631_v57, 0.0  ;;  %v2634_v7 = vadd.f32 %v6314_v15, %v2633_v62  ;;  %v2635_v8 = vpop.f32.mrb[99].mxu1  ;;  %v6891_v54 = vld [vmem:[%s7804_s2] ss:$0 sm:$0xff] }
 0x1d8   :  { %v4545_v57 = vcombine.low %v371_v13, %v372_v14  ;;  %v6898_v61 = vld [vmem:[%s7803_s0 + $0x1b8] sm:$0xf] }
 0x1d9   :  { %v5003_v35 = vpack.c.bf16 %v2981_v3, %v2981_v3  ;;  %v2982_v10 = vmax.f32 %v2130_v4, 0.0  ;;  %2341 = vmatmul.mubr.bf16.gmra.mrb[204].mxu0 %v4541_v56  ;;  %v5129_v11 = vpack.c.bf16 %v3107_v6, %v3107_v6  ;;  %v3108_v12 = vmax.f32 %v2634_v7, 0.0  ;;  %2845 = vmatmul.mubr.bf16.gmra.mrb[204].mxu1 %v4667_v59  ;;  %v6908_v3 = vld [vmem:[%s7803_s0 + $0x3b0] sm:$0xf] }
 0x1da   :  { %2348 = vmatprep.mubr.bf16.mxu0 %v4544_v63  ;;  %2852 = vmatprep.mubr.bf16.mxu1 %v4670_v0  ;;  %v4548_v0 = vcombine.high %v373_v47, %v374_v48  ;;  %v375_v14 = vunpack.c.l.u8.bf16 %v6898_v61  ;;  %v501_v17 = vunpack.c.l.u8.bf16 %v6908_v3  ;;  %v6991_v3 = vld [vmem:[%s7803_s0 + $0x1cc] sm:$0xf] }
 0x1db   :  { %4232 = vst.msk [vmem:[%s7805_s3 + $0xc0] sm:$0xf] %vm4183_vm0, %v5003_v35  ;;  %v5004_v18 = vpack.c.bf16 %v2982_v10, %v2982_v10  ;;  %4358 = vst.msk [vmem:[%s7805_s3 + $0x2b8] sm:$0xf] %vm4183_vm0, %v5129_v11  ;;  %v5130_v19 = vpack.c.bf16 %v3108_v12, %v3108_v12  ;;  %v6915_v35 = vld [vmem:[%s7803_s0 + $0x3b4] sm:$0xf] }
 0x1dc   :  { %v2134_v20 = vpop.f32.mrb[100].mxu0  ;;  %v2638_v21 = vpop.f32.mrb[100].mxu1 }
 0x1dd   :  { %4233 = vst.msk [vmem:[%s7805_s3 + $0xc4] sm:$0xf] %vm4183_vm0, %v5004_v18  ;;  %4359 = vst.msk [vmem:[%s7805_s3 + $0x2bc] sm:$0xf] %vm4183_vm0, %v5130_v19  ;;  %v2135_v22 = vadd.f32 %v6314_v15, %v2134_v20  ;;  %v2136_v23 = vpop.f32.mrb[101].mxu0  ;;  %v2639_v25 = vadd.f32 %v6314_v15, %v2638_v21  ;;  %v2640_v26 = vpop.f32.mrb[101].mxu1  ;;  %v502_v18 = vunpack.c.l.u8.bf16 %v6915_v35 }
 0x1de   :  { %v2137_v29 = vpop.f32.mrb[102].mxu0  ;;  %v2641_v30 = vpop.f32.mrb[102].mxu1 }
 0x1df   :  { %v2983_v36 = vmax.f32 %v2135_v22, 0.0  ;;  %v2138_v37 = vadd.f32 %v6314_v15, %v2137_v29  ;;  %v2139_v38 = vpop.f32.mrb[103].mxu0  ;;  %v3109_v39 = vmax.f32 %v2639_v25, 0.0  ;;  %v2642_v40 = vadd.f32 %v6314_v15, %v2641_v30  ;;  %v2643_v41 = vpop.f32.mrb[103].mxu1  ;;  %v6942_v29 = vld [vmem:[%s7803_s0 + $0x1c0] sm:$0xf] }
 0x1e0   :  { %v499_v15 = vunpack.c.l.u8.bf16 %v6859_v34  ;;  %v4547_v25 = vcombine.low %v373_v47, %v374_v48  ;;  %v4676_v33 = vcombine.high %v501_v17, %v502_v18  ;;  %v6947_v34 = vld [vmem:[%s7803_s0 + $0x1c4] sm:$0xf]  ;;  %v377_v48 = vunpack.c.l.u8.bf16 %v6942_v29 }
 0x1e1   :  { %v5005_v43 = vpack.c.bf16 %v2983_v36, %v2983_v36  ;;  %v2984_v44 = vmax.f32 %v2138_v37, 0.0  ;;  %2349 = vmatmul.mubr.bf16.gmra.mrb[208].mxu0 %v4543_v24  ;;  %v5131_v45 = vpack.c.bf16 %v3109_v39, %v3109_v39  ;;  %v3110_v46 = vmax.f32 %v2642_v40, 0.0  ;;  %2853 = vmatmul.mubr.bf16.gmra.mrb[208].mxu1 %v4669_v27  ;;  %v6952_v36 = vld [vmem:[%s7803_s0 + $0x3b8] sm:$0xf] }
 0x1e2   :  { %2356 = vmatprep.mubr.bf16.mxu0 %v4546_v31  ;;  %2860 = vmatprep.mubr.bf16.mxu1 %v4672_v32  ;;  %v4674_v1 = vcombine.high %v499_v15, %v500_v49  ;;  %v4673_v28 = vcombine.low %v499_v15, %v500_v49  ;;  %v4550_v32 = vcombine.high %v375_v14, %v376_v16  ;;  %v378_v15 = vunpack.c.l.u8.bf16 %v6947_v34 }
 0x1e3   :  { %4234 = vst.msk [vmem:[%s7805_s3 + $0xc8] sm:$0xf] %vm4183_vm0, %v5005_v43  ;;  %v5006_v50 = vpack.c.bf16 %v2984_v44, %v2984_v44  ;;  %4360 = vst.msk [vmem:[%s7805_s3 + $0x2c0] sm:$0xf] %vm4183_vm0, %v5131_v45  ;;  %v5132_v51 = vpack.c.bf16 %v3110_v46, %v3110_v46  ;;  %v6959_v43 = vld [vmem:[%s7803_s0 + $0x3bc] sm:$0xf]  ;;  %v503_v49 = vunpack.c.l.u8.bf16 %v6952_v36  ;;  %v4675_v61 = vcombine.low %v501_v17, %v502_v18 }
 0x1e4   :  { %v2142_v52 = vpop.f32.mrb[104].mxu0  ;;  %v2646_v53 = vpop.f32.mrb[104].mxu1  ;;  %v380_v17 = vunpack.c.l.u8.bf16 %v6991_v3  ;;  %v7035_v36 = vld [vmem:[%s7803_s0 + $0x1d4] sm:$0xf] }
 0x1e5   :  { %4235 = vst.msk [vmem:[%s7805_s3 + $0xcc] sm:$0xf] %vm4183_vm0, %v5006_v50  ;;  %4361 = vst.msk [vmem:[%s7805_s3 + $0x2c4] sm:$0xf] %vm4183_vm0, %v5132_v51  ;;  %v2143_v55 = vadd.f32 %v6891_v54, %v2142_v52  ;;  %v2144_v56 = vpop.f32.mrb[105].mxu0  ;;  %v2647_v58 = vadd.f32 %v6891_v54, %v2646_v53  ;;  %v2648_v59 = vpop.f32.mrb[105].mxu1  ;;  %v504_v50 = vunpack.c.l.u8.bf16 %v6959_v43 }
 0x1e6   :  { %v2145_v62 = vpop.f32.mrb[106].mxu0  ;;  %v2649_v63 = vpop.f32.mrb[106].mxu1 }
 0x1e7   :  { %v2985_v4 = vmax.f32 %v2143_v55, 0.0  ;;  %v2146_v5 = vadd.f32 %v6891_v54, %v2145_v62  ;;  %v2147_v6 = vpop.f32.mrb[107].mxu0  ;;  %v3111_v7 = vmax.f32 %v2647_v58, 0.0  ;;  %v2650_v8 = vadd.f32 %v6891_v54, %v2649_v63  ;;  %v2651_v9 = vpop.f32.mrb[107].mxu1  ;;  %v6986_v62 = vld [vmem:[%s7803_s0 + $0x1c8] sm:$0xf] }
 0x1e8   :  { %v4549_v58 = vcombine.low %v375_v14, %v376_v16  ;;  %v4678_v2 = vcombine.high %v503_v49, %v504_v50  ;;  %v379_v16 = vunpack.c.l.u8.bf16 %v6986_v62  ;;  %v4677_v29 = vcombine.low %v503_v49, %v504_v50 }
 0x1e9   :  { %v5007_v10 = vpack.c.bf16 %v2985_v4, %v2985_v4  ;;  %v2986_v11 = vmax.f32 %v2146_v5, 0.0  ;;  %2357 = vmatmul.mubr.bf16.gmra.mrb[212].mxu0 %v4545_v57  ;;  %v5133_v12 = vpack.c.bf16 %v3111_v7, %v3111_v7  ;;  %v3112_v13 = vmax.f32 %v2650_v8, 0.0  ;;  %2861 = vmatmul.mubr.bf16.gmra.mrb[212].mxu1 %v4671_v60  ;;  %v6996_v4 = vld [vmem:[%s7803_s0 + $0x3c0] sm:$0xf] }
 0x1ea   :  { %2364 = vmatprep.mubr.bf16.mxu0 %v4548_v0  ;;  %2868 = vmatprep.mubr.bf16.mxu1 %v4674_v1  ;;  %v4552_v1 = vcombine.high %v377_v48, %v378_v15  ;;  %v505_v18 = vunpack.c.l.u8.bf16 %v6996_v4  ;;  %v382_v49 = vunpack.c.l.u8.bf16 %v7035_v36  ;;  %v7079_v4 = vld [vmem:[%s7803_s0 + $0x1dc] sm:$0xf] }
 0x1eb   :  { %4236 = vst.msk [vmem:[%s7805_s3 + $0xd0] sm:$0xf] %vm4183_vm0, %v5007_v10  ;;  %v5008_v19 = vpack.c.bf16 %v2986_v11, %v2986_v11  ;;  %4362 = vst.msk [vmem:[%s7805_s3 + $0x2c8] sm:$0xf] %vm4183_vm0, %v5133_v12  ;;  %v5134_v20 = vpack.c.bf16 %v3112_v13, %v3112_v13  ;;  %v7003_v10 = vld [vmem:[%s7803_s0 + $0x3c4] sm:$0xf] }
 0x1ec   :  { %v2150_v21 = vpop.f32.mrb[108].mxu0  ;;  %v2654_v22 = vpop.f32.mrb[108].mxu1 }
 0x1ed   :  { %4237 = vst.msk [vmem:[%s7805_s3 + $0xd4] sm:$0xf] %vm4183_vm0, %v5008_v19  ;;  %4363 = vst.msk [vmem:[%s7805_s3 + $0x2cc] sm:$0xf] %vm4183_vm0, %v5134_v20  ;;  %v2151_v23 = vadd.f32 %v6891_v54, %v2150_v21  ;;  %v2152_v24 = vpop.f32.mrb[109].mxu0  ;;  %v2655_v26 = vadd.f32 %v6891_v54, %v2654_v22  ;;  %v2656_v27 = vpop.f32.mrb[109].mxu1  ;;  %v506_v19 = vunpack.c.l.u8.bf16 %v7003_v10 }
 0x1ee   :  { %v2153_v30 = vpop.f32.mrb[110].mxu0  ;;  %v2657_v31 = vpop.f32.mrb[110].mxu1 }
 0x1ef   :  { %v2987_v37 = vmax.f32 %v2151_v23, 0.0  ;;  %v2154_v38 = vadd.f32 %v6891_v54, %v2153_v30  ;;  %v2155_v39 = vpop.f32.mrb[111].mxu0  ;;  %v3113_v40 = vmax.f32 %v2655_v26, 0.0  ;;  %v2658_v41 = vadd.f32 %v6891_v54, %v2657_v31  ;;  %v2659_v42 = vpop.f32.mrb[111].mxu1  ;;  %v7030_v30 = vld [vmem:[%s7803_s0 + $0x1d0] sm:$0xf] }
 0x1f0   :  { %v4551_v26 = vcombine.low %v377_v48, %v378_v15  ;;  %v4680_v34 = vcombine.high %v505_v18, %v506_v19  ;;  %v381_v15 = vunpack.c.l.u8.bf16 %v7030_v30  ;;  %v4679_v62 = vcombine.low %v505_v18, %v506_v19 }
 0x1f1   :  { %v5009_v44 = vpack.c.bf16 %v2987_v37, %v2987_v37  ;;  %v2988_v45 = vmax.f32 %v2154_v38, 0.0  ;;  %2365 = vmatmul.mubr.bf16.gmra.mrb[216].mxu0 %v4547_v25  ;;  %v5135_v46 = vpack.c.bf16 %v3113_v40, %v3113_v40  ;;  %v3114_v47 = vmax.f32 %v2658_v41, 0.0  ;;  %2869 = vmatmul.mubr.bf16.gmra.mrb[216].mxu1 %v4673_v28  ;;  %v7040_v37 = vld [vmem:[%s7803_s0 + $0x3c8] sm:$0xf] }
 0x1f2   :  { %2372 = vmatprep.mubr.bf16.mxu0 %v4550_v32  ;;  %2876 = vmatprep.mubr.bf16.mxu1 %v4676_v33  ;;  %v4554_v33 = vcombine.high %v379_v16, %v380_v17  ;;  %v507_v50 = vunpack.c.l.u8.bf16 %v7040_v37  ;;  %v384_v18 = vunpack.c.l.u8.bf16 %v7079_v4  ;;  %v7123_v37 = vld [vmem:[%s7803_s0 + $0x1e4] sm:$0xf] }
 0x1f3   :  { %4238 = vst.msk [vmem:[%s7805_s3 + $0xd8] sm:$0xf] %vm4183_vm0, %v5009_v44  ;;  %v5010_v51 = vpack.c.bf16 %v2988_v45, %v2988_v45  ;;  %4364 = vst.msk [vmem:[%s7805_s3 + $0x2d0] sm:$0xf] %vm4183_vm0, %v5135_v46  ;;  %v5136_v52 = vpack.c.bf16 %v3114_v47, %v3114_v47  ;;  %v7047_v44 = vld [vmem:[%s7803_s0 + $0x3cc] sm:$0xf] }
 0x1f4   :  { %v2158_v53 = vpop.f32.mrb[112].mxu0  ;;  %v2662_v55 = vpop.f32.mrb[112].mxu1 }
 0x1f5   :  { %4239 = vst.msk [vmem:[%s7805_s3 + $0xdc] sm:$0xf] %vm4183_vm0, %v5010_v51  ;;  %4365 = vst.msk [vmem:[%s7805_s3 + $0x2d4] sm:$0xf] %vm4183_vm0, %v5136_v52  ;;  %v2159_v56 = vadd.f32 %v6891_v54, %v2158_v53  ;;  %v2160_v57 = vpop.f32.mrb[113].mxu0  ;;  %v2663_v59 = vadd.f32 %v6891_v54, %v2662_v55  ;;  %v2664_v60 = vpop.f32.mrb[113].mxu1  ;;  %v508_v51 = vunpack.c.l.u8.bf16 %v7047_v44 }
 0x1f6   :  { %v2161_v63 = vpop.f32.mrb[114].mxu0  ;;  %v2665_v0 = vpop.f32.mrb[114].mxu1 }
 0x1f7   :  { %v2989_v5 = vmax.f32 %v2159_v56, 0.0  ;;  %v2162_v6 = vadd.f32 %v6891_v54, %v2161_v63  ;;  %v2163_v7 = vpop.f32.mrb[115].mxu0  ;;  %v3115_v8 = vmax.f32 %v2663_v59, 0.0  ;;  %v2666_v9 = vadd.f32 %v6891_v54, %v2665_v0  ;;  %v2667_v35 = vpop.f32.mrb[115].mxu1  ;;  %v7074_v63 = vld [vmem:[%s7803_s0 + $0x1d8] sm:$0xf] }
 0x1f8   :  { %v4553_v59 = vcombine.low %v379_v16, %v380_v17  ;;  %v4682_v3 = vcombine.high %v507_v50, %v508_v51  ;;  %v383_v17 = vunpack.c.l.u8.bf16 %v7074_v63  ;;  %v4681_v30 = vcombine.low %v507_v50, %v508_v51 }
 0x1f9   :  { %v5011_v11 = vpack.c.bf16 %v2989_v5, %v2989_v5  ;;  %v2990_v12 = vmax.f32 %v2162_v6, 0.0  ;;  %2373 = vmatmul.mubr.bf16.gmra.mrb[220].mxu0 %v4549_v58  ;;  %v5137_v13 = vpack.c.bf16 %v3115_v8, %v3115_v8  ;;  %v3116_v14 = vmax.f32 %v2666_v9, 0.0  ;;  %2877 = vmatmul.mubr.bf16.gmra.mrb[220].mxu1 %v4675_v61  ;;  %v7084_v5 = vld [vmem:[%s7803_s0 + $0x3d0] sm:$0xf] }
 0x1fa   :  { %2380 = vmatprep.mubr.bf16.mxu0 %v4552_v1  ;;  %2884 = vmatprep.mubr.bf16.mxu1 %v4678_v2  ;;  %v4556_v2 = vcombine.high %v381_v15, %v382_v49  ;;  %v509_v19 = vunpack.c.l.u8.bf16 %v7084_v5  ;;  %v386_v50 = vunpack.c.l.u8.bf16 %v7123_v37  ;;  %v7167_v5 = vld [vmem:[%s7803_s0 + $0x1ec] sm:$0xf]  ;;  %v139_v37 = vld [vmem:[%s7803_s0 + $0x1f0] sm:$0xf] }
 0x1fb   :  { %4240 = vst.msk [vmem:[%s7805_s3 + $0xe0] sm:$0xf] %vm4183_vm0, %v5011_v11  ;;  %v5012_v20 = vpack.c.bf16 %v2990_v12, %v2990_v12  ;;  %4366 = vst.msk [vmem:[%s7805_s3 + $0x2d8] sm:$0xf] %vm4183_vm0, %v5137_v13  ;;  %v5138_v21 = vpack.c.bf16 %v3116_v14, %v3116_v14  ;;  %v7091_v11 = vld [vmem:[%s7803_s0 + $0x3d4] sm:$0xf] }
 0x1fc   :  { %v2166_v22 = vpop.f32.mrb[116].mxu0  ;;  %v2670_v23 = vpop.f32.mrb[116].mxu1 }
 0x1fd   :  { %4241 = vst.msk [vmem:[%s7805_s3 + $0xe4] sm:$0xf] %vm4183_vm0, %v5012_v20  ;;  %4367 = vst.msk [vmem:[%s7805_s3 + $0x2dc] sm:$0xf] %vm4183_vm0, %v5138_v21  ;;  %v2167_v24 = vadd.f32 %v6891_v54, %v2166_v22  ;;  %v2168_v25 = vpop.f32.mrb[117].mxu0  ;;  %v2671_v27 = vadd.f32 %v6891_v54, %v2670_v23  ;;  %v2672_v28 = vpop.f32.mrb[117].mxu1  ;;  %v510_v20 = vunpack.c.l.u8.bf16 %v7091_v11 }
 0x1fe   :  { %v2169_v31 = vpop.f32.mrb[118].mxu0  ;;  %v2673_v32 = vpop.f32.mrb[118].mxu1 }
 0x1ff   :  { %v2991_v38 = vmax.f32 %v2167_v24, 0.0  ;;  %v2170_v39 = vadd.f32 %v6891_v54, %v2169_v31  ;;  %v2171_v40 = vpop.f32.mrb[119].mxu0  ;;  %v3117_v41 = vmax.f32 %v2671_v27, 0.0  ;;  %v2674_v42 = vadd.f32 %v6891_v54, %v2673_v32  ;;  %v2675_v43 = vpop.f32.mrb[119].mxu1  ;;  %v7118_v31 = vld [vmem:[%s7803_s0 + $0x1e0] sm:$0xf] }
 0x200   :  { %v4555_v27 = vcombine.low %v381_v15, %v382_v49  ;;  %v4684_v36 = vcombine.high %v509_v19, %v510_v20  ;;  %v385_v49 = vunpack.c.l.u8.bf16 %v7118_v31  ;;  %v4683_v63 = vcombine.low %v509_v19, %v510_v20 }
 0x201   :  { %v5013_v45 = vpack.c.bf16 %v2991_v38, %v2991_v38  ;;  %v2992_v46 = vmax.f32 %v2170_v39, 0.0  ;;  %2381 = vmatmul.mubr.bf16.gmra.mrb[224].mxu0 %v4551_v26  ;;  %v5139_v47 = vpack.c.bf16 %v3117_v41, %v3117_v41  ;;  %v3118_v48 = vmax.f32 %v2674_v42, 0.0  ;;  %2885 = vmatmul.mubr.bf16.gmra.mrb[224].mxu1 %v4677_v29  ;;  %v7128_v38 = vld [vmem:[%s7803_s0 + $0x3d8] sm:$0xf] }
 0x202   :  { %2388 = vmatprep.mubr.bf16.mxu0 %v4554_v33  ;;  %2892 = vmatprep.mubr.bf16.mxu1 %v4680_v34  ;;  %v4558_v34 = vcombine.high %v383_v17, %v384_v18  ;;  %v511_v51 = vunpack.c.l.u8.bf16 %v7128_v38  ;;  %v388_v19 = vunpack.c.l.u8.bf16 %v7167_v5 }
 0x203   :  { %4242 = vst.msk [vmem:[%s7805_s3 + $0xe8] sm:$0xf] %vm4183_vm0, %v5013_v45  ;;  %v5014_v52 = vpack.c.bf16 %v2992_v46, %v2992_v46  ;;  %4368 = vst.msk [vmem:[%s7805_s3 + $0x2e0] sm:$0xf] %vm4183_vm0, %v5139_v47  ;;  %v5140_v53 = vpack.c.bf16 %v3118_v48, %v3118_v48  ;;  %v7135_v45 = vld [vmem:[%s7803_s0 + $0x3dc] sm:$0xf] }
 0x204   :  { %v2174_v55 = vpop.f32.mrb[120].mxu0  ;;  %v2678_v56 = vpop.f32.mrb[120].mxu1 }
 0x205   :  { %4243 = vst.msk [vmem:[%s7805_s3 + $0xec] sm:$0xf] %vm4183_vm0, %v5014_v52  ;;  %4369 = vst.msk [vmem:[%s7805_s3 + $0x2e4] sm:$0xf] %vm4183_vm0, %v5140_v53  ;;  %v2175_v57 = vadd.f32 %v6891_v54, %v2174_v55  ;;  %v2176_v58 = vpop.f32.mrb[121].mxu0  ;;  %v2679_v60 = vadd.f32 %v6891_v54, %v2678_v56  ;;  %v2680_v61 = vpop.f32.mrb[121].mxu1  ;;  %v512_v52 = vunpack.c.l.u8.bf16 %v7135_v45 }
 0x206   :  { %v2177_v0 = vpop.f32.mrb[122].mxu0  ;;  %v2681_v1 = vpop.f32.mrb[122].mxu1 }
 0x207   :  { %v2993_v6 = vmax.f32 %v2175_v57, 0.0  ;;  %v2178_v7 = vadd.f32 %v6891_v54, %v2177_v0  ;;  %v2179_v8 = vpop.f32.mrb[123].mxu0  ;;  %v3119_v9 = vmax.f32 %v2679_v60, 0.0  ;;  %v2682_v35 = vadd.f32 %v6891_v54, %v2681_v1  ;;  %v2683_v10 = vpop.f32.mrb[123].mxu1  ;;  %v7162_v0 = vld [vmem:[%s7803_s0 + $0x1e8] sm:$0xf] }
 0x208   :  { %v4557_v60 = vcombine.low %v383_v17, %v384_v18  ;;  %v4686_v4 = vcombine.high %v511_v51, %v512_v52  ;;  %v387_v18 = vunpack.c.l.u8.bf16 %v7162_v0  ;;  %v4685_v31 = vcombine.low %v511_v51, %v512_v52 }
 0x209   :  { %v5015_v12 = vpack.c.bf16 %v2993_v6, %v2993_v6  ;;  %v2994_v13 = vmax.f32 %v2178_v7, 0.0  ;;  %2389 = vmatmul.mubr.bf16.gmra.mrb[228].mxu0 %v4553_v59  ;;  %v5141_v14 = vpack.c.bf16 %v3119_v9, %v3119_v9  ;;  %v3120_v16 = vmax.f32 %v2682_v35, 0.0  ;;  %2893 = vmatmul.mubr.bf16.gmra.mrb[228].mxu1 %v4679_v62  ;;  %v7172_v6 = vld [vmem:[%s7803_s0 + $0x3e0] sm:$0xf] }
 0x20a   :  { %2396 = vmatprep.mubr.bf16.mxu0 %v4556_v2  ;;  %2900 = vmatprep.mubr.bf16.mxu1 %v4682_v3  ;;  %v4560_v3 = vcombine.high %v385_v49, %v386_v50  ;;  %v513_v20 = vunpack.c.l.u8.bf16 %v7172_v6 }
 0x20b   :  { %4244 = vst.msk [vmem:[%s7805_s3 + $0xf0] sm:$0xf] %vm4183_vm0, %v5015_v12  ;;  %v5016_v21 = vpack.c.bf16 %v2994_v13, %v2994_v13  ;;  %4370 = vst.msk [vmem:[%s7805_s3 + $0x2e8] sm:$0xf] %vm4183_vm0, %v5141_v14  ;;  %v5142_v22 = vpack.c.bf16 %v3120_v16, %v3120_v16  ;;  %v7179_v12 = vld [vmem:[%s7803_s0 + $0x3e4] sm:$0xf] }
 0x20c   :  { %v2182_v23 = vpop.f32.mrb[124].mxu0  ;;  %v2686_v24 = vpop.f32.mrb[124].mxu1 }
 0x20d   :  { %4245 = vst.msk [vmem:[%s7805_s3 + $0xf4] sm:$0xf] %vm4183_vm0, %v5016_v21  ;;  %4371 = vst.msk [vmem:[%s7805_s3 + $0x2ec] sm:$0xf] %vm4183_vm0, %v5142_v22  ;;  %v2183_v25 = vadd.f32 %v6891_v54, %v2182_v23  ;;  %v2184_v26 = vpop.f32.mrb[125].mxu0  ;;  %v2687_v28 = vadd.f32 %v6891_v54, %v2686_v24  ;;  %v2688_v29 = vpop.f32.mrb[125].mxu1  ;;  %v514_v21 = vunpack.c.l.u8.bf16 %v7179_v12 }
 0x20e   :  { %v2185_v32 = vpop.f32.mrb[126].mxu0  ;;  %v2689_v33 = vpop.f32.mrb[126].mxu1 }
 0x20f   :  { %v2995_v39 = vmax.f32 %v2183_v25, 0.0  ;;  %v2186_v40 = vadd.f32 %v6891_v54, %v2185_v32  ;;  %v2187_v41 = vpop.f32.mrb[127].mxu0  ;;  %v3121_v42 = vmax.f32 %v2687_v28, 0.0  ;;  %v2690_v43 = vadd.f32 %v6891_v54, %v2689_v33  ;;  %v2691_v44 = vpop.f32.mrb[127].mxu1 }
 0x210   :  { %v4559_v28 = vcombine.low %v385_v49, %v386_v50  ;;  %v140_v44 = vld [vmem:[%s7803_s0 + $0x1f4] sm:$0xf] }
 0x211   :  { %v5017_v46 = vpack.c.bf16 %v2995_v39, %v2995_v39  ;;  %v2996_v47 = vmax.f32 %v2186_v40, 0.0  ;;  %2397 = vmatmul.mubr.bf16.gmra.mrb[232].mxu0 %v4555_v27  ;;  %v5143_v48 = vpack.c.bf16 %v3121_v42, %v3121_v42  ;;  %v3122_v15 = vmax.f32 %v2690_v43, 0.0  ;;  %2901 = vmatmul.mubr.bf16.gmra.mrb[232].mxu1 %v4681_v30 }
 0x212   :  { %2404 = vmatprep.mubr.bf16.mxu0 %v4558_v34  ;;  %2908 = vmatprep.mubr.bf16.mxu1 %v4684_v36  ;;  %v4562_v34 = vcombine.high %v387_v18, %v388_v19  ;;  %v4688_v36 = vcombine.high %v513_v20, %v514_v21  ;;  %v390_v49 = vunpack.c.l.u8.bf16 %v140_v44 }
 0x213   :  { %4246 = vst.msk [vmem:[%s7805_s3 + $0xf8] sm:$0xf] %vm4183_vm0, %v5017_v46  ;;  %v5018_v53 = vpack.c.bf16 %v2996_v47, %v2996_v47  ;;  %4372 = vst.msk [vmem:[%s7805_s3 + $0x2f0] sm:$0xf] %vm4183_vm0, %v5143_v48  ;;  %v5144_v55 = vpack.c.bf16 %v3122_v15, %v3122_v15  ;;  %v389_v15 = vunpack.c.l.u8.bf16 %v139_v37 }
 0x214   :  { %v2190_v56 = vpop.f32.mrb[128].mxu0  ;;  %v2694_v57 = vpop.f32.mrb[128].mxu1 }
 0x215   :  { %4247 = vst.msk [vmem:[%s7805_s3 + $0xfc] sm:$0xf] %vm4183_vm0, %v5018_v53  ;;  %4373 = vst.msk [vmem:[%s7805_s3 + $0x2f4] sm:$0xf] %vm4183_vm0, %v5144_v55  ;;  %v2191_v58 = vadd.f32 %v6891_v54, %v2190_v56  ;;  %v2192_v59 = vpop.f32.mrb[129].mxu0  ;;  %v2695_v61 = vadd.f32 %v6891_v54, %v2694_v57  ;;  %v2696_v62 = vpop.f32.mrb[129].mxu1  ;;  %v4561_v57 = vcombine.low %v387_v18, %v388_v19 }
 0x216   :  { %v2193_v1 = vpop.f32.mrb[130].mxu0  ;;  %v2697_v2 = vpop.f32.mrb[130].mxu1 }
 0x217   :  { %v2997_v7 = vmax.f32 %v2191_v58, 0.0  ;;  %v2194_v8 = vadd.f32 %v6891_v54, %v2193_v1  ;;  %v2195_v9 = vpop.f32.mrb[131].mxu0  ;;  %v3123_v35 = vmax.f32 %v2695_v61, 0.0  ;;  %v2698_v10 = vadd.f32 %v6891_v54, %v2697_v2  ;;  %v2699_v11 = vpop.f32.mrb[131].mxu1 }
 0x219   :  { %v5019_v13 = vpack.c.bf16 %v2997_v7, %v2997_v7  ;;  %v2998_v14 = vmax.f32 %v2194_v8, 0.0  ;;  %2405 = vmatmul.mubr.bf16.gmra.mrb[236].mxu0 %v4557_v60  ;;  %v5145_v16 = vpack.c.bf16 %v3123_v35, %v3123_v35  ;;  %v3124_v17 = vmax.f32 %v2698_v10, 0.0  ;;  %2909 = vmatmul.mubr.bf16.gmra.mrb[236].mxu1 %v4683_v63 }
 0x21a   :  { %2412 = vmatprep.mubr.bf16.mxu0 %v4560_v3  ;;  %2916 = vmatprep.mubr.bf16.mxu1 %v4686_v4  ;;  %v4687_v60 = vcombine.low %v513_v20, %v514_v21  ;;  %v4564_v63 = vcombine.high %v389_v15, %v390_v49 }
 0x21b   :  { %4248 = vst.msk [vmem:[%s7805_s3 + $0x100] sm:$0xf] %vm4183_vm0, %v5019_v13  ;;  %v5020_v22 = vpack.c.bf16 %v2998_v14, %v2998_v14  ;;  %4374 = vst.msk [vmem:[%s7805_s3 + $0x2f8] sm:$0xf] %vm4183_vm0, %v5145_v16  ;;  %v5146_v23 = vpack.c.bf16 %v3124_v17, %v3124_v17  ;;  %v4563_v16 = vcombine.low %v389_v15, %v390_v49 }
 0x21c   :  { %v2198_v24 = vpop.f32.mrb[132].mxu0  ;;  %v2702_v25 = vpop.f32.mrb[132].mxu1 }
 0x21d   :  { %4249 = vst.msk [vmem:[%s7805_s3 + $0x104] sm:$0xf] %vm4183_vm0, %v5020_v22  ;;  %4375 = vst.msk [vmem:[%s7805_s3 + $0x2fc] sm:$0xf] %vm4183_vm0, %v5146_v23  ;;  %v2199_v26 = vadd.f32 %v6891_v54, %v2198_v24  ;;  %v2200_v27 = vpop.f32.mrb[133].mxu0  ;;  %v2703_v29 = vadd.f32 %v6891_v54, %v2702_v25  ;;  %v2704_v30 = vpop.f32.mrb[133].mxu1 }
 0x21e   :  { %v2201_v32 = vpop.f32.mrb[134].mxu0  ;;  %v2705_v33 = vpop.f32.mrb[134].mxu1 }
 0x21f   :  { %v2999_v38 = vmax.f32 %v2199_v26, 0.0  ;;  %v2202_v39 = vadd.f32 %v6891_v54, %v2201_v32  ;;  %v2203_v40 = vpop.f32.mrb[135].mxu0  ;;  %v3125_v41 = vmax.f32 %v2703_v29, 0.0  ;;  %v2706_v42 = vadd.f32 %v6891_v54, %v2705_v33  ;;  %v2707_v43 = vpop.f32.mrb[135].mxu1 }
 0x221   :  { %v5021_v45 = vpack.c.bf16 %v2999_v38, %v2999_v38  ;;  %v3000_v46 = vmax.f32 %v2202_v39, 0.0  ;;  %2413 = vmatmul.mubr.bf16.gmra.mrb[240].mxu0 %v4559_v28  ;;  %v5147_v47 = vpack.c.bf16 %v3125_v41, %v3125_v41  ;;  %v3126_v48 = vmax.f32 %v2706_v42, 0.0  ;;  %2917 = vmatmul.mubr.bf16.gmra.mrb[240].mxu1 %v4685_v31 }
 0x222   :  { %2420 = vmatprep.mubr.bf16.mxu0 %v4562_v34  ;;  %2924 = vmatprep.mubr.bf16.mxu1 %v4688_v36 }
 0x223   :  { %4250 = vst.msk [vmem:[%s7805_s3 + $0x108] sm:$0xf] %vm4183_vm0, %v5021_v45  ;;  %v5022_v50 = vpack.c.bf16 %v3000_v46, %v3000_v46  ;;  %4376 = vst.msk [vmem:[%s7805_s3 + $0x300] sm:$0xf] %vm4183_vm0, %v5147_v47  ;;  %v5148_v51 = vpack.c.bf16 %v3126_v48, %v3126_v48 }
 0x224   :  { %v2206_v52 = vpop.f32.mrb[136].mxu0  ;;  %v2710_v53 = vpop.f32.mrb[136].mxu1 }
 0x225   :  { %4251 = vst.msk [vmem:[%s7805_s3 + $0x10c] sm:$0xf] %vm4183_vm0, %v5022_v50  ;;  %4377 = vst.msk [vmem:[%s7805_s3 + $0x304] sm:$0xf] %vm4183_vm0, %v5148_v51  ;;  %v2207_v55 = vadd.f32 %v6891_v54, %v2206_v52  ;;  %v2208_v56 = vpop.f32.mrb[137].mxu0  ;;  %v2711_v58 = vadd.f32 %v6891_v54, %v2710_v53  ;;  %v2712_v59 = vpop.f32.mrb[137].mxu1 }
 0x226   :  { %v2209_v61 = vpop.f32.mrb[138].mxu0  ;;  %v2713_v62 = vpop.f32.mrb[138].mxu1 }
 0x227   :  { %v3001_v0 = vmax.f32 %v2207_v55, 0.0  ;;  %v2210_v1 = vadd.f32 %v6891_v54, %v2209_v61  ;;  %v2211_v2 = vpop.f32.mrb[139].mxu0  ;;  %v3127_v3 = vmax.f32 %v2711_v58, 0.0  ;;  %v2714_v4 = vadd.f32 %v6891_v54, %v2713_v62  ;;  %v2715_v5 = vpop.f32.mrb[139].mxu1 }
 0x229   :  { %v5023_v6 = vpack.c.bf16 %v3001_v0, %v3001_v0  ;;  %v3002_v7 = vmax.f32 %v2210_v1, 0.0  ;;  %2421 = vmatmul.mubr.bf16.gmra.mrb[244].mxu0 %v4561_v57  ;;  %v5149_v8 = vpack.c.bf16 %v3127_v3, %v3127_v3  ;;  %v3128_v9 = vmax.f32 %v2714_v4, 0.0  ;;  %2925 = vmatmul.mubr.bf16.gmra.mrb[244].mxu1 %v4687_v60 }
 0x22a   :  { %2428 = vmatprep.mubr.bf16.mxu0 %v4564_v63 }
 0x22b   :  { %4252 = vst.msk [vmem:[%s7805_s3 + $0x110] sm:$0xf] %vm4183_vm0, %v5023_v6  ;;  %v5024_v35 = vpack.c.bf16 %v3002_v7, %v3002_v7  ;;  %4378 = vst.msk [vmem:[%s7805_s3 + $0x308] sm:$0xf] %vm4183_vm0, %v5149_v8  ;;  %v5150_v10 = vpack.c.bf16 %v3128_v9, %v3128_v9 }
 0x22c   :  { %v2214_v11 = vpop.f32.mrb[140].mxu0  ;;  %v2718_v12 = vpop.f32.mrb[140].mxu1 }
 0x22d   :  { %4253 = vst.msk [vmem:[%s7805_s3 + $0x114] sm:$0xf] %vm4183_vm0, %v5024_v35  ;;  %4379 = vst.msk [vmem:[%s7805_s3 + $0x30c] sm:$0xf] %vm4183_vm0, %v5150_v10  ;;  %v2215_v13 = vadd.f32 %v6891_v54, %v2214_v11  ;;  %v2216_v14 = vpop.f32.mrb[141].mxu0  ;;  %v2719_v17 = vadd.f32 %v6891_v54, %v2718_v12  ;;  %v2720_v18 = vpop.f32.mrb[141].mxu1 }
 0x22e   :  { %v2217_v19 = vpop.f32.mrb[142].mxu0  ;;  %v2721_v20 = vpop.f32.mrb[142].mxu1 }
 0x22f   :  { %v3003_v21 = vmax.f32 %v2215_v13, 0.0  ;;  %v2218_v22 = vadd.f32 %v6891_v54, %v2217_v19  ;;  %v2219_v23 = vpop.f32.mrb[143].mxu0  ;;  %v3129_v24 = vmax.f32 %v2719_v17, 0.0  ;;  %v2722_v25 = vadd.f32 %v6891_v54, %v2721_v20  ;;  %v2723_v26 = vpop.f32.mrb[143].mxu1 }
 0x231   :  { %v5025_v27 = vpack.c.bf16 %v3003_v21, %v3003_v21  ;;  %v3004_v28 = vmax.f32 %v2218_v22, 0.0  ;;  %2429 = vmatmul.mubr.bf16.gmra.mrb[248].mxu0 %v4563_v16  ;;  %v5151_v29 = vpack.c.bf16 %v3129_v24, %v3129_v24  ;;  %v3130_v30 = vmax.f32 %v2722_v25, 0.0 }
 0x233   :  { %4254 = vst.msk [vmem:[%s7805_s3 + $0x118] sm:$0xf] %vm4183_vm0, %v5025_v27  ;;  %v5026_v31 = vpack.c.bf16 %v3004_v28, %v3004_v28  ;;  %4380 = vst.msk [vmem:[%s7805_s3 + $0x310] sm:$0xf] %vm4183_vm0, %v5151_v29  ;;  %v5152_v32 = vpack.c.bf16 %v3130_v30, %v3130_v30 }
 0x234   :  { %v2222_v33 = vpop.f32.mrb[144].mxu0  ;;  %v2726_v34 = vpop.f32.mrb[144].mxu1 }
 0x235   :  { %4255 = vst.msk [vmem:[%s7805_s3 + $0x11c] sm:$0xf] %vm4183_vm0, %v5026_v31  ;;  %4381 = vst.msk [vmem:[%s7805_s3 + $0x314] sm:$0xf] %vm4183_vm0, %v5152_v32  ;;  %v2223_v36 = vadd.f32 %v6891_v54, %v2222_v33  ;;  %v2224_v37 = vpop.f32.mrb[145].mxu0  ;;  %v2727_v38 = vadd.f32 %v6891_v54, %v2726_v34  ;;  %v2728_v39 = vpop.f32.mrb[145].mxu1 }
 0x236   :  { %v2225_v40 = vpop.f32.mrb[146].mxu0  ;;  %v2729_v41 = vpop.f32.mrb[146].mxu1 }
 0x237   :  { %v3005_v42 = vmax.f32 %v2223_v36, 0.0  ;;  %v2226_v43 = vadd.f32 %v6891_v54, %v2225_v40  ;;  %v2227_v44 = vpop.f32.mrb[147].mxu0  ;;  %v3131_v45 = vmax.f32 %v2727_v38, 0.0  ;;  %v2730_v46 = vadd.f32 %v6891_v54, %v2729_v41  ;;  %v2731_v47 = vpop.f32.mrb[147].mxu1 }
 0x239   :  { %v5027_v48 = vpack.c.bf16 %v3005_v42, %v3005_v42  ;;  %v3006_v15 = vmax.f32 %v2226_v43, 0.0  ;;  %v5153_v49 = vpack.c.bf16 %v3131_v45, %v3131_v45  ;;  %v3132_v50 = vmax.f32 %v2730_v46, 0.0 }
 0x23b   :  { %4256 = vst.msk [vmem:[%s7805_s3 + $0x120] sm:$0xf] %vm4183_vm0, %v5027_v48  ;;  %v5028_v51 = vpack.c.bf16 %v3006_v15, %v3006_v15  ;;  %4382 = vst.msk [vmem:[%s7805_s3 + $0x318] sm:$0xf] %vm4183_vm0, %v5153_v49  ;;  %v5154_v52 = vpack.c.bf16 %v3132_v50, %v3132_v50 }
 0x23c   :  { %v2230_v53 = vpop.f32.mrb[148].mxu0  ;;  %v2734_v55 = vpop.f32.mrb[148].mxu1 }
 0x23d   :  { %4257 = vst.msk [vmem:[%s7805_s3 + $0x124] sm:$0xf] %vm4183_vm0, %v5028_v51  ;;  %4383 = vst.msk [vmem:[%s7805_s3 + $0x31c] sm:$0xf] %vm4183_vm0, %v5154_v52  ;;  %v2231_v56 = vadd.f32 %v6891_v54, %v2230_v53  ;;  %v2232_v57 = vpop.f32.mrb[149].mxu0  ;;  %v2735_v58 = vadd.f32 %v6891_v54, %v2734_v55  ;;  %v2736_v59 = vpop.f32.mrb[149].mxu1 }
 0x23e   :  { %v2233_v60 = vpop.f32.mrb[150].mxu0  ;;  %v2737_v61 = vpop.f32.mrb[150].mxu1 }
 0x23f   :  { %v3007_v62 = vmax.f32 %v2231_v56, 0.0  ;;  %v2234_v63 = vadd.f32 %v6891_v54, %v2233_v60  ;;  %v2235_v0 = vpop.f32.mrb[151].mxu0  ;;  %v3133_v1 = vmax.f32 %v2735_v58, 0.0  ;;  %v2738_v2 = vadd.f32 %v6891_v54, %v2737_v61  ;;  %v2739_v3 = vpop.f32.mrb[151].mxu1 }
 0x241   :  { %v5029_v4 = vpack.c.bf16 %v3007_v62, %v3007_v62  ;;  %v3008_v5 = vmax.f32 %v2234_v63, 0.0  ;;  %v5155_v6 = vpack.c.bf16 %v3133_v1, %v3133_v1  ;;  %v3134_v7 = vmax.f32 %v2738_v2, 0.0 }
 0x243   :  { %4258 = vst.msk [vmem:[%s7805_s3 + $0x128] sm:$0xf] %vm4183_vm0, %v5029_v4  ;;  %v5030_v8 = vpack.c.bf16 %v3008_v5, %v3008_v5  ;;  %4384 = vst.msk [vmem:[%s7805_s3 + $0x320] sm:$0xf] %vm4183_vm0, %v5155_v6  ;;  %v5156_v9 = vpack.c.bf16 %v3134_v7, %v3134_v7 }
 0x244   :  { %v2238_v35 = vpop.f32.mrb[152].mxu0  ;;  %v2742_v10 = vpop.f32.mrb[152].mxu1 }
 0x245   :  { %4259 = vst.msk [vmem:[%s7805_s3 + $0x12c] sm:$0xf] %vm4183_vm0, %v5030_v8  ;;  %4385 = vst.msk [vmem:[%s7805_s3 + $0x324] sm:$0xf] %vm4183_vm0, %v5156_v9  ;;  %v2239_v11 = vadd.f32 %v6891_v54, %v2238_v35  ;;  %v2240_v12 = vpop.f32.mrb[153].mxu0  ;;  %v2743_v13 = vadd.f32 %v6891_v54, %v2742_v10  ;;  %v2744_v14 = vpop.f32.mrb[153].mxu1 }
 0x246   :  { %v2241_v16 = vpop.f32.mrb[154].mxu0  ;;  %v2745_v17 = vpop.f32.mrb[154].mxu1 }
 0x247   :  { %v3009_v18 = vmax.f32 %v2239_v11, 0.0  ;;  %v2242_v19 = vadd.f32 %v6891_v54, %v2241_v16  ;;  %v2243_v20 = vpop.f32.mrb[155].mxu0  ;;  %v3135_v21 = vmax.f32 %v2743_v13, 0.0  ;;  %v2746_v22 = vadd.f32 %v6891_v54, %v2745_v17  ;;  %v2747_v23 = vpop.f32.mrb[155].mxu1 }
 0x249   :  { %v5031_v24 = vpack.c.bf16 %v3009_v18, %v3009_v18  ;;  %v3010_v25 = vmax.f32 %v2242_v19, 0.0  ;;  %v5157_v26 = vpack.c.bf16 %v3135_v21, %v3135_v21  ;;  %v3136_v27 = vmax.f32 %v2746_v22, 0.0 }
 0x24b   :  { %4260 = vst.msk [vmem:[%s7805_s3 + $0x130] sm:$0xf] %vm4183_vm0, %v5031_v24  ;;  %v5032_v28 = vpack.c.bf16 %v3010_v25, %v3010_v25  ;;  %4386 = vst.msk [vmem:[%s7805_s3 + $0x328] sm:$0xf] %vm4183_vm0, %v5157_v26  ;;  %v5158_v29 = vpack.c.bf16 %v3136_v27, %v3136_v27 }
 0x24c   :  { %v2246_v30 = vpop.f32.mrb[156].mxu0  ;;  %v2750_v31 = vpop.f32.mrb[156].mxu1 }
 0x24d   :  { %4261 = vst.msk [vmem:[%s7805_s3 + $0x134] sm:$0xf] %vm4183_vm0, %v5032_v28  ;;  %4387 = vst.msk [vmem:[%s7805_s3 + $0x32c] sm:$0xf] %vm4183_vm0, %v5158_v29  ;;  %v2247_v32 = vadd.f32 %v6891_v54, %v2246_v30  ;;  %v2248_v33 = vpop.f32.mrb[157].mxu0  ;;  %v2751_v34 = vadd.f32 %v6891_v54, %v2750_v31  ;;  %v2752_v36 = vpop.f32.mrb[157].mxu1 }
 0x24e   :  { %v2249_v37 = vpop.f32.mrb[158].mxu0  ;;  %v2753_v38 = vpop.f32.mrb[158].mxu1 }
 0x24f   :  { %v3011_v39 = vmax.f32 %v2247_v32, 0.0  ;;  %v2250_v40 = vadd.f32 %v6891_v54, %v2249_v37  ;;  %v2251_v41 = vpop.f32.mrb[159].mxu0  ;;  %v3137_v42 = vmax.f32 %v2751_v34, 0.0  ;;  %v2754_v43 = vadd.f32 %v6891_v54, %v2753_v38  ;;  %v2755_v44 = vpop.f32.mrb[159].mxu1 }
 0x251   :  { %v5033_v45 = vpack.c.bf16 %v3011_v39, %v3011_v39  ;;  %v3012_v46 = vmax.f32 %v2250_v40, 0.0  ;;  %v5159_v47 = vpack.c.bf16 %v3137_v42, %v3137_v42  ;;  %v3138_v48 = vmax.f32 %v2754_v43, 0.0 }
 0x253   :  { %4262 = vst.msk [vmem:[%s7805_s3 + $0x138] sm:$0xf] %vm4183_vm0, %v5033_v45  ;;  %v5034_v15 = vpack.c.bf16 %v3012_v46, %v3012_v46  ;;  %4388 = vst.msk [vmem:[%s7805_s3 + $0x330] sm:$0xf] %vm4183_vm0, %v5159_v47  ;;  %v5160_v49 = vpack.c.bf16 %v3138_v48, %v3138_v48 }
 0x254   :  { %v2254_v50 = vpop.f32.mrb[160].mxu0  ;;  %v2758_v51 = vpop.f32.mrb[160].mxu1 }
 0x255   :  { %4263 = vst.msk [vmem:[%s7805_s3 + $0x13c] sm:$0xf] %vm4183_vm0, %v5034_v15  ;;  %4389 = vst.msk [vmem:[%s7805_s3 + $0x334] sm:$0xf] %vm4183_vm0, %v5160_v49  ;;  %v2255_v52 = vadd.f32 %v6891_v54, %v2254_v50  ;;  %v2256_v53 = vpop.f32.mrb[161].mxu0  ;;  %v2759_v55 = vadd.f32 %v6891_v54, %v2758_v51  ;;  %v2760_v56 = vpop.f32.mrb[161].mxu1 }
 0x256   :  { %v2257_v57 = vpop.f32.mrb[162].mxu0  ;;  %v2761_v58 = vpop.f32.mrb[162].mxu1 }
 0x257   :  { %v3013_v59 = vmax.f32 %v2255_v52, 0.0  ;;  %v2258_v60 = vadd.f32 %v6891_v54, %v2257_v57  ;;  %v2259_v61 = vpop.f32.mrb[163].mxu0  ;;  %v3139_v62 = vmax.f32 %v2759_v55, 0.0  ;;  %v2762_v63 = vadd.f32 %v6891_v54, %v2761_v58  ;;  %v2763_v0 = vpop.f32.mrb[163].mxu1 }
 0x259   :  { %v5035_v1 = vpack.c.bf16 %v3013_v59, %v3013_v59  ;;  %v3014_v2 = vmax.f32 %v2258_v60, 0.0  ;;  %v5161_v3 = vpack.c.bf16 %v3139_v62, %v3139_v62  ;;  %v3140_v4 = vmax.f32 %v2762_v63, 0.0 }
 0x25b   :  { %4264 = vst.msk [vmem:[%s7805_s3 + $0x140] sm:$0xf] %vm4183_vm0, %v5035_v1  ;;  %v5036_v5 = vpack.c.bf16 %v3014_v2, %v3014_v2  ;;  %4390 = vst.msk [vmem:[%s7805_s3 + $0x338] sm:$0xf] %vm4183_vm0, %v5161_v3  ;;  %v5162_v6 = vpack.c.bf16 %v3140_v4, %v3140_v4 }
 0x25c   :  { %v2262_v7 = vpop.f32.mrb[164].mxu0  ;;  %v2766_v8 = vpop.f32.mrb[164].mxu1 }
 0x25d   :  { %4265 = vst.msk [vmem:[%s7805_s3 + $0x144] sm:$0xf] %vm4183_vm0, %v5036_v5  ;;  %4391 = vst.msk [vmem:[%s7805_s3 + $0x33c] sm:$0xf] %vm4183_vm0, %v5162_v6  ;;  %v2263_v9 = vadd.f32 %v6891_v54, %v2262_v7  ;;  %v2264_v35 = vpop.f32.mrb[165].mxu0  ;;  %v2767_v10 = vadd.f32 %v6891_v54, %v2766_v8  ;;  %v2768_v11 = vpop.f32.mrb[165].mxu1 }
 0x25e   :  { %v2265_v12 = vpop.f32.mrb[166].mxu0  ;;  %v2769_v13 = vpop.f32.mrb[166].mxu1 }
 0x25f   :  { %v3015_v14 = vmax.f32 %v2263_v9, 0.0  ;;  %v2266_v16 = vadd.f32 %v6891_v54, %v2265_v12  ;;  %v2267_v17 = vpop.f32.mrb[167].mxu0  ;;  %v3141_v18 = vmax.f32 %v2767_v10, 0.0  ;;  %v2770_v19 = vadd.f32 %v6891_v54, %v2769_v13  ;;  %v2771_v20 = vpop.f32.mrb[167].mxu1  ;;  %v7390_v54 = vld [vmem:[%s7804_s2] ss:$0 sm:$0xff] }
 0x261   :  { %v5037_v21 = vpack.c.bf16 %v3015_v14, %v3015_v14  ;;  %v3016_v22 = vmax.f32 %v2266_v16, 0.0  ;;  %v5163_v23 = vpack.c.bf16 %v3141_v18, %v3141_v18  ;;  %v3142_v24 = vmax.f32 %v2770_v19, 0.0 }
 0x263   :  { %4266 = vst.msk [vmem:[%s7805_s3 + $0x148] sm:$0xf] %vm4183_vm0, %v5037_v21  ;;  %v5038_v25 = vpack.c.bf16 %v3016_v22, %v3016_v22  ;;  %4392 = vst.msk [vmem:[%s7805_s3 + $0x340] sm:$0xf] %vm4183_vm0, %v5163_v23  ;;  %v5164_v26 = vpack.c.bf16 %v3142_v24, %v3142_v24 }
 0x264   :  { %v2270_v27 = vpop.f32.mrb[168].mxu0  ;;  %v2774_v28 = vpop.f32.mrb[168].mxu1 }
 0x265   :  { %4267 = vst.msk [vmem:[%s7805_s3 + $0x14c] sm:$0xf] %vm4183_vm0, %v5038_v25  ;;  %4393 = vst.msk [vmem:[%s7805_s3 + $0x344] sm:$0xf] %vm4183_vm0, %v5164_v26  ;;  %v2271_v29 = vadd.f32 %v7390_v54, %v2270_v27  ;;  %v2272_v30 = vpop.f32.mrb[169].mxu0  ;;  %v2775_v31 = vadd.f32 %v7390_v54, %v2774_v28  ;;  %v2776_v32 = vpop.f32.mrb[169].mxu1 }
 0x266   :  { %v2273_v33 = vpop.f32.mrb[170].mxu0  ;;  %v2777_v34 = vpop.f32.mrb[170].mxu1 }
 0x267   :  { %v3017_v36 = vmax.f32 %v2271_v29, 0.0  ;;  %v2274_v37 = vadd.f32 %v7390_v54, %v2273_v33  ;;  %v2275_v38 = vpop.f32.mrb[171].mxu0  ;;  %v3143_v39 = vmax.f32 %v2775_v31, 0.0  ;;  %v2778_v40 = vadd.f32 %v7390_v54, %v2777_v34  ;;  %v2779_v41 = vpop.f32.mrb[171].mxu1 }
 0x269   :  { %v5039_v42 = vpack.c.bf16 %v3017_v36, %v3017_v36  ;;  %v3018_v43 = vmax.f32 %v2274_v37, 0.0  ;;  %v5165_v44 = vpack.c.bf16 %v3143_v39, %v3143_v39  ;;  %v3144_v45 = vmax.f32 %v2778_v40, 0.0 }
 0x26b   :  { %4268 = vst.msk [vmem:[%s7805_s3 + $0x150] sm:$0xf] %vm4183_vm0, %v5039_v42  ;;  %v5040_v46 = vpack.c.bf16 %v3018_v43, %v3018_v43  ;;  %4394 = vst.msk [vmem:[%s7805_s3 + $0x348] sm:$0xf] %vm4183_vm0, %v5165_v44  ;;  %v5166_v47 = vpack.c.bf16 %v3144_v45, %v3144_v45 }
 0x26c   :  { %v2278_v48 = vpop.f32.mrb[172].mxu0  ;;  %v2782_v15 = vpop.f32.mrb[172].mxu1 }
 0x26d   :  { %4269 = vst.msk [vmem:[%s7805_s3 + $0x154] sm:$0xf] %vm4183_vm0, %v5040_v46  ;;  %4395 = vst.msk [vmem:[%s7805_s3 + $0x34c] sm:$0xf] %vm4183_vm0, %v5166_v47  ;;  %v2279_v49 = vadd.f32 %v7390_v54, %v2278_v48  ;;  %v2280_v50 = vpop.f32.mrb[173].mxu0  ;;  %v2783_v51 = vadd.f32 %v7390_v54, %v2782_v15  ;;  %v2784_v52 = vpop.f32.mrb[173].mxu1 }
 0x26e   :  { %v2281_v53 = vpop.f32.mrb[174].mxu0  ;;  %v2785_v55 = vpop.f32.mrb[174].mxu1 }
 0x26f   :  { %v3019_v56 = vmax.f32 %v2279_v49, 0.0  ;;  %v2282_v57 = vadd.f32 %v7390_v54, %v2281_v53  ;;  %v2283_v58 = vpop.f32.mrb[175].mxu0  ;;  %v3145_v59 = vmax.f32 %v2783_v51, 0.0  ;;  %v2786_v60 = vadd.f32 %v7390_v54, %v2785_v55  ;;  %v2787_v61 = vpop.f32.mrb[175].mxu1 }
 0x271   :  { %v5041_v62 = vpack.c.bf16 %v3019_v56, %v3019_v56  ;;  %v3020_v63 = vmax.f32 %v2282_v57, 0.0  ;;  %v5167_v0 = vpack.c.bf16 %v3145_v59, %v3145_v59  ;;  %v3146_v1 = vmax.f32 %v2786_v60, 0.0 }
 0x273   :  { %4270 = vst.msk [vmem:[%s7805_s3 + $0x158] sm:$0xf] %vm4183_vm0, %v5041_v62  ;;  %v5042_v2 = vpack.c.bf16 %v3020_v63, %v3020_v63  ;;  %4396 = vst.msk [vmem:[%s7805_s3 + $0x350] sm:$0xf] %vm4183_vm0, %v5167_v0  ;;  %v5168_v3 = vpack.c.bf16 %v3146_v1, %v3146_v1 }
 0x274   :  { %v2286_v4 = vpop.f32.mrb[176].mxu0  ;;  %v2790_v5 = vpop.f32.mrb[176].mxu1 }
 0x275   :  { %4271 = vst.msk [vmem:[%s7805_s3 + $0x15c] sm:$0xf] %vm4183_vm0, %v5042_v2  ;;  %4397 = vst.msk [vmem:[%s7805_s3 + $0x354] sm:$0xf] %vm4183_vm0, %v5168_v3  ;;  %v2287_v6 = vadd.f32 %v7390_v54, %v2286_v4  ;;  %v2288_v7 = vpop.f32.mrb[177].mxu0  ;;  %v2791_v8 = vadd.f32 %v7390_v54, %v2790_v5  ;;  %v2792_v9 = vpop.f32.mrb[177].mxu1 }
 0x276   :  { %v2289_v35 = vpop.f32.mrb[178].mxu0  ;;  %v2793_v10 = vpop.f32.mrb[178].mxu1 }
 0x277   :  { %v3021_v11 = vmax.f32 %v2287_v6, 0.0  ;;  %v2290_v12 = vadd.f32 %v7390_v54, %v2289_v35  ;;  %v2291_v13 = vpop.f32.mrb[179].mxu0  ;;  %v3147_v14 = vmax.f32 %v2791_v8, 0.0  ;;  %v2794_v16 = vadd.f32 %v7390_v54, %v2793_v10  ;;  %v2795_v17 = vpop.f32.mrb[179].mxu1 }
 0x279   :  { %v5043_v18 = vpack.c.bf16 %v3021_v11, %v3021_v11  ;;  %v3022_v19 = vmax.f32 %v2290_v12, 0.0  ;;  %v5169_v20 = vpack.c.bf16 %v3147_v14, %v3147_v14  ;;  %v3148_v21 = vmax.f32 %v2794_v16, 0.0 }
 0x27b   :  { %4272 = vst.msk [vmem:[%s7805_s3 + $0x160] sm:$0xf] %vm4183_vm0, %v5043_v18  ;;  %v5044_v22 = vpack.c.bf16 %v3022_v19, %v3022_v19  ;;  %4398 = vst.msk [vmem:[%s7805_s3 + $0x358] sm:$0xf] %vm4183_vm0, %v5169_v20  ;;  %v5170_v23 = vpack.c.bf16 %v3148_v21, %v3148_v21 }
 0x27c   :  { %v2294_v24 = vpop.f32.mrb[180].mxu0  ;;  %v2798_v25 = vpop.f32.mrb[180].mxu1 }
 0x27d   :  { %4273 = vst.msk [vmem:[%s7805_s3 + $0x164] sm:$0xf] %vm4183_vm0, %v5044_v22  ;;  %4399 = vst.msk [vmem:[%s7805_s3 + $0x35c] sm:$0xf] %vm4183_vm0, %v5170_v23  ;;  %v2295_v26 = vadd.f32 %v7390_v54, %v2294_v24  ;;  %v2296_v27 = vpop.f32.mrb[181].mxu0  ;;  %v2799_v28 = vadd.f32 %v7390_v54, %v2798_v25  ;;  %v2800_v29 = vpop.f32.mrb[181].mxu1 }
 0x27e   :  { %v2297_v30 = vpop.f32.mrb[182].mxu0  ;;  %v2801_v31 = vpop.f32.mrb[182].mxu1 }
 0x27f   :  { %v3023_v32 = vmax.f32 %v2295_v26, 0.0  ;;  %v2298_v33 = vadd.f32 %v7390_v54, %v2297_v30  ;;  %v2299_v34 = vpop.f32.mrb[183].mxu0  ;;  %v3149_v36 = vmax.f32 %v2799_v28, 0.0  ;;  %v2802_v37 = vadd.f32 %v7390_v54, %v2801_v31  ;;  %v2803_v38 = vpop.f32.mrb[183].mxu1 }
 0x281   :  { %v5045_v39 = vpack.c.bf16 %v3023_v32, %v3023_v32  ;;  %v3024_v40 = vmax.f32 %v2298_v33, 0.0  ;;  %v5171_v41 = vpack.c.bf16 %v3149_v36, %v3149_v36  ;;  %v3150_v42 = vmax.f32 %v2802_v37, 0.0 }
 0x283   :  { %4274 = vst.msk [vmem:[%s7805_s3 + $0x168] sm:$0xf] %vm4183_vm0, %v5045_v39  ;;  %v5046_v43 = vpack.c.bf16 %v3024_v40, %v3024_v40  ;;  %4400 = vst.msk [vmem:[%s7805_s3 + $0x360] sm:$0xf] %vm4183_vm0, %v5171_v41  ;;  %v5172_v44 = vpack.c.bf16 %v3150_v42, %v3150_v42 }
 0x284   :  { %v2302_v45 = vpop.f32.mrb[184].mxu0  ;;  %v2806_v46 = vpop.f32.mrb[184].mxu1 }
 0x285   :  { %4275 = vst.msk [vmem:[%s7805_s3 + $0x16c] sm:$0xf] %vm4183_vm0, %v5046_v43  ;;  %4401 = vst.msk [vmem:[%s7805_s3 + $0x364] sm:$0xf] %vm4183_vm0, %v5172_v44  ;;  %v2303_v47 = vadd.f32 %v7390_v54, %v2302_v45  ;;  %v2304_v48 = vpop.f32.mrb[185].mxu0  ;;  %v2807_v15 = vadd.f32 %v7390_v54, %v2806_v46  ;;  %v2808_v49 = vpop.f32.mrb[185].mxu1 }
 0x286   :  { %v2305_v50 = vpop.f32.mrb[186].mxu0  ;;  %v2809_v51 = vpop.f32.mrb[186].mxu1 }
 0x287   :  { %v3025_v52 = vmax.f32 %v2303_v47, 0.0  ;;  %v2306_v53 = vadd.f32 %v7390_v54, %v2305_v50  ;;  %v2307_v55 = vpop.f32.mrb[187].mxu0  ;;  %v3151_v56 = vmax.f32 %v2807_v15, 0.0  ;;  %v2810_v57 = vadd.f32 %v7390_v54, %v2809_v51  ;;  %v2811_v58 = vpop.f32.mrb[187].mxu1 }
 0x289   :  { %v5047_v59 = vpack.c.bf16 %v3025_v52, %v3025_v52  ;;  %v3026_v60 = vmax.f32 %v2306_v53, 0.0  ;;  %v5173_v61 = vpack.c.bf16 %v3151_v56, %v3151_v56  ;;  %v3152_v62 = vmax.f32 %v2810_v57, 0.0 }
 0x28b   :  { %4276 = vst.msk [vmem:[%s7805_s3 + $0x170] sm:$0xf] %vm4183_vm0, %v5047_v59  ;;  %v5048_v63 = vpack.c.bf16 %v3026_v60, %v3026_v60  ;;  %4402 = vst.msk [vmem:[%s7805_s3 + $0x368] sm:$0xf] %vm4183_vm0, %v5173_v61  ;;  %v5174_v0 = vpack.c.bf16 %v3152_v62, %v3152_v62 }
 0x28c   :  { %v2310_v1 = vpop.f32.mrb[188].mxu0  ;;  %v2814_v2 = vpop.f32.mrb[188].mxu1 }
 0x28d   :  { %4277 = vst.msk [vmem:[%s7805_s3 + $0x174] sm:$0xf] %vm4183_vm0, %v5048_v63  ;;  %4403 = vst.msk [vmem:[%s7805_s3 + $0x36c] sm:$0xf] %vm4183_vm0, %v5174_v0  ;;  %v2311_v3 = vadd.f32 %v7390_v54, %v2310_v1  ;;  %v2312_v4 = vpop.f32.mrb[189].mxu0  ;;  %v2815_v5 = vadd.f32 %v7390_v54, %v2814_v2  ;;  %v2816_v6 = vpop.f32.mrb[189].mxu1 }
 0x28e   :  { %v2313_v7 = vpop.f32.mrb[190].mxu0  ;;  %v2817_v8 = vpop.f32.mrb[190].mxu1 }
 0x28f   :  { %v3027_v9 = vmax.f32 %v2311_v3, 0.0  ;;  %v2314_v35 = vadd.f32 %v7390_v54, %v2313_v7  ;;  %v2315_v10 = vpop.f32.mrb[191].mxu0  ;;  %v3153_v11 = vmax.f32 %v2815_v5, 0.0  ;;  %v2818_v12 = vadd.f32 %v7390_v54, %v2817_v8  ;;  %v2819_v13 = vpop.f32.mrb[191].mxu1 }
 0x291   :  { %v5049_v14 = vpack.c.bf16 %v3027_v9, %v3027_v9  ;;  %v3028_v16 = vmax.f32 %v2314_v35, 0.0  ;;  %v5175_v17 = vpack.c.bf16 %v3153_v11, %v3153_v11  ;;  %v3154_v18 = vmax.f32 %v2818_v12, 0.0 }
 0x293   :  { %4278 = vst.msk [vmem:[%s7805_s3 + $0x178] sm:$0xf] %vm4183_vm0, %v5049_v14  ;;  %v5050_v19 = vpack.c.bf16 %v3028_v16, %v3028_v16  ;;  %4404 = vst.msk [vmem:[%s7805_s3 + $0x370] sm:$0xf] %vm4183_vm0, %v5175_v17  ;;  %v5176_v20 = vpack.c.bf16 %v3154_v18, %v3154_v18 }
 0x294   :  { %v2318_v21 = vpop.f32.mrb[192].mxu0  ;;  %v2822_v22 = vpop.f32.mrb[192].mxu1 }
 0x295   :  { %4279 = vst.msk [vmem:[%s7805_s3 + $0x17c] sm:$0xf] %vm4183_vm0, %v5050_v19  ;;  %4405 = vst.msk [vmem:[%s7805_s3 + $0x374] sm:$0xf] %vm4183_vm0, %v5176_v20  ;;  %v2319_v23 = vadd.f32 %v7390_v54, %v2318_v21  ;;  %v2320_v24 = vpop.f32.mrb[193].mxu0  ;;  %v2823_v25 = vadd.f32 %v7390_v54, %v2822_v22  ;;  %v2824_v26 = vpop.f32.mrb[193].mxu1 }
 0x296   :  { %v2321_v27 = vpop.f32.mrb[194].mxu0  ;;  %v2825_v28 = vpop.f32.mrb[194].mxu1 }
 0x297   :  { %v3029_v29 = vmax.f32 %v2319_v23, 0.0  ;;  %v2322_v30 = vadd.f32 %v7390_v54, %v2321_v27  ;;  %v2323_v31 = vpop.f32.mrb[195].mxu0  ;;  %v3155_v32 = vmax.f32 %v2823_v25, 0.0  ;;  %v2826_v33 = vadd.f32 %v7390_v54, %v2825_v28  ;;  %v2827_v34 = vpop.f32.mrb[195].mxu1 }
 0x299   :  { %v5051_v36 = vpack.c.bf16 %v3029_v29, %v3029_v29  ;;  %v3030_v37 = vmax.f32 %v2322_v30, 0.0  ;;  %v5177_v38 = vpack.c.bf16 %v3155_v32, %v3155_v32  ;;  %v3156_v39 = vmax.f32 %v2826_v33, 0.0 }
 0x29b   :  { %4280 = vst.msk [vmem:[%s7805_s3 + $0x180] sm:$0xf] %vm4183_vm0, %v5051_v36  ;;  %v5052_v40 = vpack.c.bf16 %v3030_v37, %v3030_v37  ;;  %4406 = vst.msk [vmem:[%s7805_s3 + $0x378] sm:$0xf] %vm4183_vm0, %v5177_v38  ;;  %v5178_v41 = vpack.c.bf16 %v3156_v39, %v3156_v39 }
 0x29c   :  { %v2326_v42 = vpop.f32.mrb[196].mxu0  ;;  %v2830_v43 = vpop.f32.mrb[196].mxu1 }
 0x29d   :  { %4281 = vst.msk [vmem:[%s7805_s3 + $0x184] sm:$0xf] %vm4183_vm0, %v5052_v40  ;;  %4407 = vst.msk [vmem:[%s7805_s3 + $0x37c] sm:$0xf] %vm4183_vm0, %v5178_v41  ;;  %v2327_v44 = vadd.f32 %v7390_v54, %v2326_v42  ;;  %v2328_v45 = vpop.f32.mrb[197].mxu0  ;;  %v2831_v46 = vadd.f32 %v7390_v54, %v2830_v43  ;;  %v2832_v47 = vpop.f32.mrb[197].mxu1 }
 0x29e   :  { %v2329_v48 = vpop.f32.mrb[198].mxu0  ;;  %v2833_v15 = vpop.f32.mrb[198].mxu1 }
 0x29f   :  { %v3031_v49 = vmax.f32 %v2327_v44, 0.0  ;;  %v2330_v50 = vadd.f32 %v7390_v54, %v2329_v48  ;;  %v2331_v51 = vpop.f32.mrb[199].mxu0  ;;  %v3157_v52 = vmax.f32 %v2831_v46, 0.0  ;;  %v2834_v53 = vadd.f32 %v7390_v54, %v2833_v15  ;;  %v2835_v55 = vpop.f32.mrb[199].mxu1 }
 0x2a1   :  { %v5053_v56 = vpack.c.bf16 %v3031_v49, %v3031_v49  ;;  %v3032_v57 = vmax.f32 %v2330_v50, 0.0  ;;  %v5179_v58 = vpack.c.bf16 %v3157_v52, %v3157_v52  ;;  %v3158_v59 = vmax.f32 %v2834_v53, 0.0 }
 0x2a3   :  { %4282 = vst.msk [vmem:[%s7805_s3 + $0x188] sm:$0xf] %vm4183_vm0, %v5053_v56  ;;  %v5054_v60 = vpack.c.bf16 %v3032_v57, %v3032_v57  ;;  %4408 = vst.msk [vmem:[%s7805_s3 + $0x380] sm:$0xf] %vm4183_vm0, %v5179_v58  ;;  %v5180_v61 = vpack.c.bf16 %v3158_v59, %v3158_v59 }
 0x2a4   :  { %v2334_v62 = vpop.f32.mrb[200].mxu0  ;;  %v2838_v63 = vpop.f32.mrb[200].mxu1 }
 0x2a5   :  { %4283 = vst.msk [vmem:[%s7805_s3 + $0x18c] sm:$0xf] %vm4183_vm0, %v5054_v60  ;;  %4409 = vst.msk [vmem:[%s7805_s3 + $0x384] sm:$0xf] %vm4183_vm0, %v5180_v61  ;;  %v2335_v0 = vadd.f32 %v7390_v54, %v2334_v62  ;;  %v2336_v1 = vpop.f32.mrb[201].mxu0  ;;  %v2839_v2 = vadd.f32 %v7390_v54, %v2838_v63  ;;  %v2840_v3 = vpop.f32.mrb[201].mxu1 }
 0x2a6   :  { %v2337_v4 = vpop.f32.mrb[202].mxu0  ;;  %v2841_v5 = vpop.f32.mrb[202].mxu1 }
 0x2a7   :  { %v3033_v6 = vmax.f32 %v2335_v0, 0.0  ;;  %v2338_v7 = vadd.f32 %v7390_v54, %v2337_v4  ;;  %v2339_v8 = vpop.f32.mrb[203].mxu0  ;;  %v3159_v9 = vmax.f32 %v2839_v2, 0.0  ;;  %v2842_v35 = vadd.f32 %v7390_v54, %v2841_v5  ;;  %v2843_v10 = vpop.f32.mrb[203].mxu1 }
 0x2a9   :  { %v5055_v11 = vpack.c.bf16 %v3033_v6, %v3033_v6  ;;  %v3034_v12 = vmax.f32 %v2338_v7, 0.0  ;;  %v5181_v13 = vpack.c.bf16 %v3159_v9, %v3159_v9  ;;  %v3160_v14 = vmax.f32 %v2842_v35, 0.0 }
 0x2ab   :  { %4284 = vst.msk [vmem:[%s7805_s3 + $0x190] sm:$0xf] %vm4183_vm0, %v5055_v11  ;;  %v5056_v16 = vpack.c.bf16 %v3034_v12, %v3034_v12  ;;  %4410 = vst.msk [vmem:[%s7805_s3 + $0x388] sm:$0xf] %vm4183_vm0, %v5181_v13  ;;  %v5182_v17 = vpack.c.bf16 %v3160_v14, %v3160_v14 }
 0x2ac   :  { %v2342_v18 = vpop.f32.mrb[204].mxu0  ;;  %v2846_v19 = vpop.f32.mrb[204].mxu1 }
 0x2ad   :  { %4285 = vst.msk [vmem:[%s7805_s3 + $0x194] sm:$0xf] %vm4183_vm0, %v5056_v16  ;;  %4411 = vst.msk [vmem:[%s7805_s3 + $0x38c] sm:$0xf] %vm4183_vm0, %v5182_v17  ;;  %v2343_v20 = vadd.f32 %v7390_v54, %v2342_v18  ;;  %v2344_v21 = vpop.f32.mrb[205].mxu0  ;;  %v2847_v22 = vadd.f32 %v7390_v54, %v2846_v19  ;;  %v2848_v23 = vpop.f32.mrb[205].mxu1 }
 0x2ae   :  { %v2345_v24 = vpop.f32.mrb[206].mxu0  ;;  %v2849_v25 = vpop.f32.mrb[206].mxu1 }
 0x2af   :  { %v3035_v26 = vmax.f32 %v2343_v20, 0.0  ;;  %v2346_v27 = vadd.f32 %v7390_v54, %v2345_v24  ;;  %v2347_v28 = vpop.f32.mrb[207].mxu0  ;;  %v3161_v29 = vmax.f32 %v2847_v22, 0.0  ;;  %v2850_v30 = vadd.f32 %v7390_v54, %v2849_v25  ;;  %v2851_v31 = vpop.f32.mrb[207].mxu1 }
 0x2b1   :  { %v5057_v32 = vpack.c.bf16 %v3035_v26, %v3035_v26  ;;  %v3036_v33 = vmax.f32 %v2346_v27, 0.0  ;;  %v5183_v34 = vpack.c.bf16 %v3161_v29, %v3161_v29  ;;  %v3162_v36 = vmax.f32 %v2850_v30, 0.0 }
 0x2b3   :  { %4286 = vst.msk [vmem:[%s7805_s3 + $0x198] sm:$0xf] %vm4183_vm0, %v5057_v32  ;;  %v5058_v37 = vpack.c.bf16 %v3036_v33, %v3036_v33  ;;  %4412 = vst.msk [vmem:[%s7805_s3 + $0x390] sm:$0xf] %vm4183_vm0, %v5183_v34  ;;  %v5184_v38 = vpack.c.bf16 %v3162_v36, %v3162_v36 }
 0x2b4   :  { %v2350_v39 = vpop.f32.mrb[208].mxu0  ;;  %v2854_v40 = vpop.f32.mrb[208].mxu1 }
 0x2b5   :  { %4287 = vst.msk [vmem:[%s7805_s3 + $0x19c] sm:$0xf] %vm4183_vm0, %v5058_v37  ;;  %4413 = vst.msk [vmem:[%s7805_s3 + $0x394] sm:$0xf] %vm4183_vm0, %v5184_v38  ;;  %v2351_v41 = vadd.f32 %v7390_v54, %v2350_v39  ;;  %v2352_v42 = vpop.f32.mrb[209].mxu0  ;;  %v2855_v43 = vadd.f32 %v7390_v54, %v2854_v40  ;;  %v2856_v44 = vpop.f32.mrb[209].mxu1 }
 0x2b6   :  { %v2353_v45 = vpop.f32.mrb[210].mxu0  ;;  %v2857_v46 = vpop.f32.mrb[210].mxu1 }
 0x2b7   :  { %v3037_v47 = vmax.f32 %v2351_v41, 0.0  ;;  %v2354_v48 = vadd.f32 %v7390_v54, %v2353_v45  ;;  %v2355_v15 = vpop.f32.mrb[211].mxu0  ;;  %v3163_v49 = vmax.f32 %v2855_v43, 0.0  ;;  %v2858_v50 = vadd.f32 %v7390_v54, %v2857_v46  ;;  %v2859_v51 = vpop.f32.mrb[211].mxu1 }
 0x2b9   :  { %v5059_v52 = vpack.c.bf16 %v3037_v47, %v3037_v47  ;;  %v3038_v53 = vmax.f32 %v2354_v48, 0.0  ;;  %v5185_v55 = vpack.c.bf16 %v3163_v49, %v3163_v49  ;;  %v3164_v56 = vmax.f32 %v2858_v50, 0.0 }
 0x2bb   :  { %4288 = vst.msk [vmem:[%s7805_s3 + $0x1a0] sm:$0xf] %vm4183_vm0, %v5059_v52  ;;  %v5060_v57 = vpack.c.bf16 %v3038_v53, %v3038_v53  ;;  %4414 = vst.msk [vmem:[%s7805_s3 + $0x398] sm:$0xf] %vm4183_vm0, %v5185_v55  ;;  %v5186_v58 = vpack.c.bf16 %v3164_v56, %v3164_v56 }
 0x2bc   :  { %v2358_v59 = vpop.f32.mrb[212].mxu0  ;;  %v2862_v60 = vpop.f32.mrb[212].mxu1 }
 0x2bd   :  { %4289 = vst.msk [vmem:[%s7805_s3 + $0x1a4] sm:$0xf] %vm4183_vm0, %v5060_v57  ;;  %4415 = vst.msk [vmem:[%s7805_s3 + $0x39c] sm:$0xf] %vm4183_vm0, %v5186_v58  ;;  %v2359_v61 = vadd.f32 %v7390_v54, %v2358_v59  ;;  %v2360_v62 = vpop.f32.mrb[213].mxu0  ;;  %v2863_v63 = vadd.f32 %v7390_v54, %v2862_v60  ;;  %v2864_v0 = vpop.f32.mrb[213].mxu1 }
 0x2be   :  { %v2361_v1 = vpop.f32.mrb[214].mxu0  ;;  %v2865_v2 = vpop.f32.mrb[214].mxu1 }
 0x2bf   :  { %v3039_v3 = vmax.f32 %v2359_v61, 0.0  ;;  %v2362_v4 = vadd.f32 %v7390_v54, %v2361_v1  ;;  %v2363_v5 = vpop.f32.mrb[215].mxu0  ;;  %v3165_v6 = vmax.f32 %v2863_v63, 0.0  ;;  %v2866_v7 = vadd.f32 %v7390_v54, %v2865_v2  ;;  %v2867_v8 = vpop.f32.mrb[215].mxu1 }
 0x2c1   :  { %v5061_v9 = vpack.c.bf16 %v3039_v3, %v3039_v3  ;;  %v3040_v35 = vmax.f32 %v2362_v4, 0.0  ;;  %v5187_v10 = vpack.c.bf16 %v3165_v6, %v3165_v6  ;;  %v3166_v11 = vmax.f32 %v2866_v7, 0.0 }
 0x2c3   :  { %4290 = vst.msk [vmem:[%s7805_s3 + $0x1a8] sm:$0xf] %vm4183_vm0, %v5061_v9  ;;  %v5062_v12 = vpack.c.bf16 %v3040_v35, %v3040_v35  ;;  %4416 = vst.msk [vmem:[%s7805_s3 + $0x3a0] sm:$0xf] %vm4183_vm0, %v5187_v10  ;;  %v5188_v13 = vpack.c.bf16 %v3166_v11, %v3166_v11 }
 0x2c4   :  { %v2366_v14 = vpop.f32.mrb[216].mxu0  ;;  %v2870_v16 = vpop.f32.mrb[216].mxu1 }
 0x2c5   :  { %4291 = vst.msk [vmem:[%s7805_s3 + $0x1ac] sm:$0xf] %vm4183_vm0, %v5062_v12  ;;  %4417 = vst.msk [vmem:[%s7805_s3 + $0x3a4] sm:$0xf] %vm4183_vm0, %v5188_v13  ;;  %v2367_v17 = vadd.f32 %v7390_v54, %v2366_v14  ;;  %v2368_v18 = vpop.f32.mrb[217].mxu0  ;;  %v2871_v19 = vadd.f32 %v7390_v54, %v2870_v16  ;;  %v2872_v20 = vpop.f32.mrb[217].mxu1 }
 0x2c6   :  { %v2369_v21 = vpop.f32.mrb[218].mxu0  ;;  %v2873_v22 = vpop.f32.mrb[218].mxu1 }
 0x2c7   :  { %v3041_v23 = vmax.f32 %v2367_v17, 0.0  ;;  %v2370_v24 = vadd.f32 %v7390_v54, %v2369_v21  ;;  %v2371_v25 = vpop.f32.mrb[219].mxu0  ;;  %v3167_v26 = vmax.f32 %v2871_v19, 0.0  ;;  %v2874_v27 = vadd.f32 %v7390_v54, %v2873_v22  ;;  %v2875_v28 = vpop.f32.mrb[219].mxu1 }
 0x2c9   :  { %v5063_v29 = vpack.c.bf16 %v3041_v23, %v3041_v23  ;;  %v3042_v30 = vmax.f32 %v2370_v24, 0.0  ;;  %v5189_v31 = vpack.c.bf16 %v3167_v26, %v3167_v26  ;;  %v3168_v32 = vmax.f32 %v2874_v27, 0.0 }
 0x2cb   :  { %4292 = vst.msk [vmem:[%s7805_s3 + $0x1b0] sm:$0xf] %vm4183_vm0, %v5063_v29  ;;  %v5064_v33 = vpack.c.bf16 %v3042_v30, %v3042_v30  ;;  %4418 = vst.msk [vmem:[%s7805_s3 + $0x3a8] sm:$0xf] %vm4183_vm0, %v5189_v31  ;;  %v5190_v34 = vpack.c.bf16 %v3168_v32, %v3168_v32 }
 0x2cc   :  { %v2374_v36 = vpop.f32.mrb[220].mxu0  ;;  %v2878_v37 = vpop.f32.mrb[220].mxu1 }
 0x2cd   :  { %4293 = vst.msk [vmem:[%s7805_s3 + $0x1b4] sm:$0xf] %vm4183_vm0, %v5064_v33  ;;  %4419 = vst.msk [vmem:[%s7805_s3 + $0x3ac] sm:$0xf] %vm4183_vm0, %v5190_v34  ;;  %v2375_v38 = vadd.f32 %v7390_v54, %v2374_v36  ;;  %v2376_v39 = vpop.f32.mrb[221].mxu0  ;;  %v2879_v40 = vadd.f32 %v7390_v54, %v2878_v37  ;;  %v2880_v41 = vpop.f32.mrb[221].mxu1 }
 0x2ce   :  { %v2377_v42 = vpop.f32.mrb[222].mxu0  ;;  %v2881_v43 = vpop.f32.mrb[222].mxu1 }
 0x2cf   :  { %v3043_v44 = vmax.f32 %v2375_v38, 0.0  ;;  %v2378_v45 = vadd.f32 %v7390_v54, %v2377_v42  ;;  %v2379_v46 = vpop.f32.mrb[223].mxu0  ;;  %v3169_v47 = vmax.f32 %v2879_v40, 0.0  ;;  %v2882_v48 = vadd.f32 %v7390_v54, %v2881_v43  ;;  %v2883_v15 = vpop.f32.mrb[223].mxu1 }
 0x2d1   :  { %v5065_v49 = vpack.c.bf16 %v3043_v44, %v3043_v44  ;;  %v3044_v50 = vmax.f32 %v2378_v45, 0.0  ;;  %v5191_v51 = vpack.c.bf16 %v3169_v47, %v3169_v47  ;;  %v3170_v52 = vmax.f32 %v2882_v48, 0.0 }
 0x2d3   :  { %4294 = vst.msk [vmem:[%s7805_s3 + $0x1b8] sm:$0xf] %vm4183_vm0, %v5065_v49  ;;  %v5066_v53 = vpack.c.bf16 %v3044_v50, %v3044_v50  ;;  %4420 = vst.msk [vmem:[%s7805_s3 + $0x3b0] sm:$0xf] %vm4183_vm0, %v5191_v51  ;;  %v5192_v55 = vpack.c.bf16 %v3170_v52, %v3170_v52 }
 0x2d4   :  { %v2382_v56 = vpop.f32.mrb[224].mxu0  ;;  %v2886_v57 = vpop.f32.mrb[224].mxu1 }
 0x2d5   :  { %4295 = vst.msk [vmem:[%s7805_s3 + $0x1bc] sm:$0xf] %vm4183_vm0, %v5066_v53  ;;  %4421 = vst.msk [vmem:[%s7805_s3 + $0x3b4] sm:$0xf] %vm4183_vm0, %v5192_v55  ;;  %v2383_v58 = vadd.f32 %v7390_v54, %v2382_v56  ;;  %v2384_v59 = vpop.f32.mrb[225].mxu0  ;;  %v2887_v60 = vadd.f32 %v7390_v54, %v2886_v57  ;;  %v2888_v61 = vpop.f32.mrb[225].mxu1 }
 0x2d6   :  { %v2385_v62 = vpop.f32.mrb[226].mxu0  ;;  %v2889_v63 = vpop.f32.mrb[226].mxu1 }
 0x2d7   :  { %v3045_v0 = vmax.f32 %v2383_v58, 0.0  ;;  %v2386_v1 = vadd.f32 %v7390_v54, %v2385_v62  ;;  %v2387_v2 = vpop.f32.mrb[227].mxu0  ;;  %v3171_v3 = vmax.f32 %v2887_v60, 0.0  ;;  %v2890_v4 = vadd.f32 %v7390_v54, %v2889_v63  ;;  %v2891_v5 = vpop.f32.mrb[227].mxu1 }
 0x2d9   :  { %v5067_v6 = vpack.c.bf16 %v3045_v0, %v3045_v0  ;;  %v3046_v7 = vmax.f32 %v2386_v1, 0.0  ;;  %v5193_v8 = vpack.c.bf16 %v3171_v3, %v3171_v3  ;;  %v3172_v9 = vmax.f32 %v2890_v4, 0.0 }
 0x2db   :  { %4296 = vst.msk [vmem:[%s7805_s3 + $0x1c0] sm:$0xf] %vm4183_vm0, %v5067_v6  ;;  %v5068_v35 = vpack.c.bf16 %v3046_v7, %v3046_v7  ;;  %4422 = vst.msk [vmem:[%s7805_s3 + $0x3b8] sm:$0xf] %vm4183_vm0, %v5193_v8  ;;  %v5194_v10 = vpack.c.bf16 %v3172_v9, %v3172_v9 }
 0x2dc   :  { %v2390_v11 = vpop.f32.mrb[228].mxu0  ;;  %v2894_v12 = vpop.f32.mrb[228].mxu1 }
 0x2dd   :  { %4297 = vst.msk [vmem:[%s7805_s3 + $0x1c4] sm:$0xf] %vm4183_vm0, %v5068_v35  ;;  %4423 = vst.msk [vmem:[%s7805_s3 + $0x3bc] sm:$0xf] %vm4183_vm0, %v5194_v10  ;;  %v2391_v13 = vadd.f32 %v7390_v54, %v2390_v11  ;;  %v2392_v14 = vpop.f32.mrb[229].mxu0  ;;  %v2895_v16 = vadd.f32 %v7390_v54, %v2894_v12  ;;  %v2896_v17 = vpop.f32.mrb[229].mxu1 }
 0x2de   :  { %v2393_v18 = vpop.f32.mrb[230].mxu0  ;;  %v2897_v19 = vpop.f32.mrb[230].mxu1 }
 0x2df   :  { %v3047_v20 = vmax.f32 %v2391_v13, 0.0  ;;  %v2394_v21 = vadd.f32 %v7390_v54, %v2393_v18  ;;  %v2395_v22 = vpop.f32.mrb[231].mxu0  ;;  %v3173_v23 = vmax.f32 %v2895_v16, 0.0  ;;  %v2898_v24 = vadd.f32 %v7390_v54, %v2897_v19  ;;  %v2899_v25 = vpop.f32.mrb[231].mxu1 }
 0x2e1   :  { %v5069_v26 = vpack.c.bf16 %v3047_v20, %v3047_v20  ;;  %v3048_v27 = vmax.f32 %v2394_v21, 0.0  ;;  %v5195_v28 = vpack.c.bf16 %v3173_v23, %v3173_v23  ;;  %v3174_v29 = vmax.f32 %v2898_v24, 0.0 }
 0x2e3   :  { %4298 = vst.msk [vmem:[%s7805_s3 + $0x1c8] sm:$0xf] %vm4183_vm0, %v5069_v26  ;;  %v5070_v30 = vpack.c.bf16 %v3048_v27, %v3048_v27  ;;  %4424 = vst.msk [vmem:[%s7805_s3 + $0x3c0] sm:$0xf] %vm4183_vm0, %v5195_v28  ;;  %v5196_v31 = vpack.c.bf16 %v3174_v29, %v3174_v29 }
 0x2e4   :  { %v2398_v32 = vpop.f32.mrb[232].mxu0  ;;  %v2902_v33 = vpop.f32.mrb[232].mxu1 }
 0x2e5   :  { %4299 = vst.msk [vmem:[%s7805_s3 + $0x1cc] sm:$0xf] %vm4183_vm0, %v5070_v30  ;;  %4425 = vst.msk [vmem:[%s7805_s3 + $0x3c4] sm:$0xf] %vm4183_vm0, %v5196_v31  ;;  %v2399_v34 = vadd.f32 %v7390_v54, %v2398_v32  ;;  %v2400_v36 = vpop.f32.mrb[233].mxu0  ;;  %v2903_v37 = vadd.f32 %v7390_v54, %v2902_v33  ;;  %v2904_v38 = vpop.f32.mrb[233].mxu1 }
 0x2e6   :  { %v2401_v39 = vpop.f32.mrb[234].mxu0  ;;  %v2905_v40 = vpop.f32.mrb[234].mxu1 }
 0x2e7   :  { %v3049_v41 = vmax.f32 %v2399_v34, 0.0  ;;  %v2402_v42 = vadd.f32 %v7390_v54, %v2401_v39  ;;  %v2403_v43 = vpop.f32.mrb[235].mxu0  ;;  %v3175_v44 = vmax.f32 %v2903_v37, 0.0  ;;  %v2906_v45 = vadd.f32 %v7390_v54, %v2905_v40  ;;  %v2907_v46 = vpop.f32.mrb[235].mxu1 }
 0x2e9   :  { %v5071_v47 = vpack.c.bf16 %v3049_v41, %v3049_v41  ;;  %v3050_v48 = vmax.f32 %v2402_v42, 0.0  ;;  %v5197_v15 = vpack.c.bf16 %v3175_v44, %v3175_v44  ;;  %v3176_v49 = vmax.f32 %v2906_v45, 0.0 }
 0x2eb   :  { %4300 = vst.msk [vmem:[%s7805_s3 + $0x1d0] sm:$0xf] %vm4183_vm0, %v5071_v47  ;;  %v5072_v50 = vpack.c.bf16 %v3050_v48, %v3050_v48  ;;  %4426 = vst.msk [vmem:[%s7805_s3 + $0x3c8] sm:$0xf] %vm4183_vm0, %v5197_v15  ;;  %v5198_v51 = vpack.c.bf16 %v3176_v49, %v3176_v49 }
 0x2ec   :  { %v2406_v52 = vpop.f32.mrb[236].mxu0  ;;  %v2910_v53 = vpop.f32.mrb[236].mxu1 }
 0x2ed   :  { %4301 = vst.msk [vmem:[%s7805_s3 + $0x1d4] sm:$0xf] %vm4183_vm0, %v5072_v50  ;;  %4427 = vst.msk [vmem:[%s7805_s3 + $0x3cc] sm:$0xf] %vm4183_vm0, %v5198_v51  ;;  %v2407_v55 = vadd.f32 %v7390_v54, %v2406_v52  ;;  %v2408_v56 = vpop.f32.mrb[237].mxu0  ;;  %v2911_v57 = vadd.f32 %v7390_v54, %v2910_v53  ;;  %v2912_v58 = vpop.f32.mrb[237].mxu1 }
 0x2ee   :  { %v2409_v59 = vpop.f32.mrb[238].mxu0  ;;  %v2913_v60 = vpop.f32.mrb[238].mxu1 }
 0x2ef   :  { %v3051_v61 = vmax.f32 %v2407_v55, 0.0  ;;  %v2410_v62 = vadd.f32 %v7390_v54, %v2409_v59  ;;  %v2411_v63 = vpop.f32.mrb[239].mxu0  ;;  %v3177_v0 = vmax.f32 %v2911_v57, 0.0  ;;  %v2914_v1 = vadd.f32 %v7390_v54, %v2913_v60  ;;  %v2915_v2 = vpop.f32.mrb[239].mxu1 }
 0x2f1   :  { %v5073_v3 = vpack.c.bf16 %v3051_v61, %v3051_v61  ;;  %v3052_v4 = vmax.f32 %v2410_v62, 0.0  ;;  %v5199_v5 = vpack.c.bf16 %v3177_v0, %v3177_v0  ;;  %v3178_v6 = vmax.f32 %v2914_v1, 0.0 }
 0x2f3   :  { %4302 = vst.msk [vmem:[%s7805_s3 + $0x1d8] sm:$0xf] %vm4183_vm0, %v5073_v3  ;;  %v5074_v7 = vpack.c.bf16 %v3052_v4, %v3052_v4  ;;  %4428 = vst.msk [vmem:[%s7805_s3 + $0x3d0] sm:$0xf] %vm4183_vm0, %v5199_v5  ;;  %v5200_v8 = vpack.c.bf16 %v3178_v6, %v3178_v6 }
 0x2f4   :  { %v2414_v9 = vpop.f32.mrb[240].mxu0  ;;  %v2918_v35 = vpop.f32.mrb[240].mxu1 }
 0x2f5   :  { %4303 = vst.msk [vmem:[%s7805_s3 + $0x1dc] sm:$0xf] %vm4183_vm0, %v5074_v7  ;;  %4429 = vst.msk [vmem:[%s7805_s3 + $0x3d4] sm:$0xf] %vm4183_vm0, %v5200_v8  ;;  %v2415_v10 = vadd.f32 %v7390_v54, %v2414_v9  ;;  %v2416_v11 = vpop.f32.mrb[241].mxu0  ;;  %v2919_v12 = vadd.f32 %v7390_v54, %v2918_v35  ;;  %v2920_v13 = vpop.f32.mrb[241].mxu1 }
 0x2f6   :  { %v2417_v14 = vpop.f32.mrb[242].mxu0  ;;  %v2921_v16 = vpop.f32.mrb[242].mxu1 }
 0x2f7   :  { %v3053_v17 = vmax.f32 %v2415_v10, 0.0  ;;  %v2418_v18 = vadd.f32 %v7390_v54, %v2417_v14  ;;  %v2419_v19 = vpop.f32.mrb[243].mxu0  ;;  %v3179_v20 = vmax.f32 %v2919_v12, 0.0  ;;  %v2922_v21 = vadd.f32 %v7390_v54, %v2921_v16  ;;  %v2923_v22 = vpop.f32.mrb[243].mxu1 }
 0x2f9   :  { %v5075_v23 = vpack.c.bf16 %v3053_v17, %v3053_v17  ;;  %v3054_v24 = vmax.f32 %v2418_v18, 0.0  ;;  %v5201_v25 = vpack.c.bf16 %v3179_v20, %v3179_v20  ;;  %v3180_v26 = vmax.f32 %v2922_v21, 0.0 }
 0x2fb   :  { %4304 = vst.msk [vmem:[%s7805_s3 + $0x1e0] sm:$0xf] %vm4183_vm0, %v5075_v23  ;;  %v5076_v27 = vpack.c.bf16 %v3054_v24, %v3054_v24  ;;  %4430 = vst.msk [vmem:[%s7805_s3 + $0x3d8] sm:$0xf] %vm4183_vm0, %v5201_v25  ;;  %v5202_v28 = vpack.c.bf16 %v3180_v26, %v3180_v26 }
 0x2fc   :  { %v2422_v29 = vpop.f32.mrb[244].mxu0  ;;  %v2926_v30 = vpop.f32.mrb[244].mxu1 }
 0x2fd   :  { %4305 = vst.msk [vmem:[%s7805_s3 + $0x1e4] sm:$0xf] %vm4183_vm0, %v5076_v27  ;;  %4431 = vst.msk [vmem:[%s7805_s3 + $0x3dc] sm:$0xf] %vm4183_vm0, %v5202_v28  ;;  %v2423_v31 = vadd.f32 %v7390_v54, %v2422_v29  ;;  %v2424_v32 = vpop.f32.mrb[245].mxu0  ;;  %v2927_v33 = vadd.f32 %v7390_v54, %v2926_v30  ;;  %v2928_v34 = vpop.f32.mrb[245].mxu1 }
 0x2fe   :  { %v2425_v36 = vpop.f32.mrb[246].mxu0  ;;  %v2929_v37 = vpop.f32.mrb[246].mxu1 }
 0x2ff   :  { %v3055_v38 = vmax.f32 %v2423_v31, 0.0  ;;  %v2426_v39 = vadd.f32 %v7390_v54, %v2425_v36  ;;  %v2427_v40 = vpop.f32.mrb[247].mxu0  ;;  %v3181_v41 = vmax.f32 %v2927_v33, 0.0  ;;  %v2930_v42 = vadd.f32 %v7390_v54, %v2929_v37  ;;  %v2931_v43 = vpop.f32.mrb[247].mxu1 }
 0x301   :  { %v5077_v44 = vpack.c.bf16 %v3055_v38, %v3055_v38  ;;  %v3056_v45 = vmax.f32 %v2426_v39, 0.0  ;;  %v5203_v46 = vpack.c.bf16 %v3181_v41, %v3181_v41  ;;  %v3182_v47 = vmax.f32 %v2930_v42, 0.0 }
 0x303   :  { %4306 = vst.msk [vmem:[%s7805_s3 + $0x1e8] sm:$0xf] %vm4183_vm0, %v5077_v44  ;;  %v5078_v48 = vpack.c.bf16 %v3056_v45, %v3056_v45  ;;  %4432 = vst.msk [vmem:[%s7805_s3 + $0x3e0] sm:$0xf] %vm4183_vm0, %v5203_v46  ;;  %v5204_v15 = vpack.c.bf16 %v3182_v47, %v3182_v47 }
 0x304   :  { %v2430_v49 = vpop.f32.mrb[248].mxu0 }
 0x305   :  { %4307 = vst.msk [vmem:[%s7805_s3 + $0x1ec] sm:$0xf] %vm4183_vm0, %v5078_v48  ;;  %4433 = vst.msk [vmem:[%s7805_s3 + $0x3e4] sm:$0xf] %vm4183_vm0, %v5204_v15  ;;  %v2431_v50 = vadd.f32 %v7390_v54, %v2430_v49  ;;  %v2432_v51 = vpop.f32.mrb[249].mxu0 }
 0x306   :  { %v2433_v52 = vpop.f32.mrb[250].mxu0 }
 0x307   :  { %v3057_v53 = vmax.f32 %v2431_v50, 0.0  ;;  %v2434_v55 = vadd.f32 %v7390_v54, %v2433_v52  ;;  %v2435_v56 = vpop.f32.mrb[251].mxu0 }
 0x309   :  { %v5079_v57 = vpack.c.bf16 %v3057_v53, %v3057_v53  ;;  %v3058_v58 = vmax.f32 %v2434_v55, 0.0 }
 0x30b   :  { %4308 = vst.msk [vmem:[%s7805_s3 + $0x1f0] sm:$0xf] %vm4183_vm0, %v5079_v57  ;;  %v5080_v59 = vpack.c.bf16 %v3058_v58, %v3058_v58 }
 0x30d   :  { %4309 = vst.msk [vmem:[%s7805_s3 + $0x1f4] sm:$0xf] %vm4183_vm0, %v5080_v59 }

// kernel: reward_classifier_forward.6
= control target key start
LH: loop header
LB: loop body
LE: loop exit
PB: predicated region body
PF: predicated region fallthrough
CT: control target
= control target key end

     0   :  { %v2219_v0 = vmov 0   ;;  %vm1630_vm0 = vcmask 519168   ;;  %vm1681_vm1 = vcmask 518144   ;;  %vm1682_vm2 = vsmask.f32 2304  ;;  %s2936_s1 = inlined_call_operand.vmem [shape: bf16[512,64], index: 1, kind: input, shape index: {}]   ;;  %s2937_s0 = inlined_call_operand.vmem [shape: bf16[405,512], index: 0, kind: input, shape index: {}]   ;;  %s2938_s2 = inlined_call_operand.vmem [shape: f32[1,64], index: 2, kind: input, shape index: {}]   ;;  %s2939_s3 = inlined_call_operand.vmem [shape: bf16[405,64], index: 3, kind: output, shape index: {}]  }
   0x1   :  { %894 = vmatprep.subr.bf16.mxu1 %v2219_v0  ;;  %1134 = vmatprep.subr.bf16.mxu0 %v2219_v0  ;;  %v2033_v1 = vld [vmem:[%s2936_s1] sm:$0xff]   ;;  %v2035_v3 = vld [vmem:[%s2936_s1 + $0x8] sm:$0xff]   ;;  %v2037_v5 = vld [vmem:[%s2936_s1 + $0x10] sm:$0xff]  }
   0x2   :  { %v2034_v2 = vld [vmem:[%s2936_s1 + $0x80] sm:$0xff]   ;;  %895 = vmatpush1.bf16.msra.mxu1 %v2033_v1  ;;  %v2036_v4 = vld [vmem:[%s2936_s1 + $0x88] sm:$0xff]   ;;  %v2038_v6 = vld [vmem:[%s2936_s1 + $0x90] sm:$0xff]  }
   0x3   :  { %1135 = vmatpush1.bf16.msra.mxu0 %v2034_v2  ;;  %896 = vmatprep.subr.bf16.mxu1 %v2219_v0  ;;  %v2039_v7 = vld [vmem:[%s2936_s1 + $0x18] sm:$0xff]   ;;  %v2041_v9 = vld [vmem:[%s2936_s1 + $0x20] sm:$0xff]   ;;  %v2043_v11 = vld [vmem:[%s2936_s1 + $0x28] sm:$0xff]  }
   0x4   :  { %1136 = vmatprep.subr.bf16.mxu0 %v2219_v0  ;;  %v2040_v8 = vld [vmem:[%s2936_s1 + $0x98] sm:$0xff]   ;;  %v2042_v10 = vld [vmem:[%s2936_s1 + $0xa0] sm:$0xff]   ;;  %v2044_v12 = vld [vmem:[%s2936_s1 + $0xa8] sm:$0xff]  }
   0x5   :  { %v2045_v13 = vld [vmem:[%s2936_s1 + $0x30] sm:$0xff]   ;;  %v2047_v15 = vld [vmem:[%s2936_s1 + $0x38] sm:$0xff]   ;;  %v2049_v17 = vld [vmem:[%s2936_s1 + $0x40] sm:$0xff]  }
   0x6   :  { %897 = vmatpush1.bf16.msra.mxu1 %v2035_v3  ;;  %v2046_v14 = vld [vmem:[%s2936_s1 + $0xb0] sm:$0xff]   ;;  %v2048_v16 = vld [vmem:[%s2936_s1 + $0xb8] sm:$0xff]   ;;  %v2050_v18 = vld [vmem:[%s2936_s1 + $0xc0] sm:$0xff]  }
   0x7   :  { %1137 = vmatpush1.bf16.msra.mxu0 %v2036_v4  ;;  %898 = vmatprep.subr.bf16.mxu1 %v2219_v0  ;;  %v2067_v19 = vld [vmem:[%s2937_s0 + $0x4] ss:$16 sps:$4 sm:$0xff]   ;;  %v2051_v20 = vld [vmem:[%s2936_s1 + $0x48] sm:$0xff]   ;;  %v2055_v25 = vld [vmem:[%s2936_s1 + $0x58] sm:$0xff]  }
   0x8   :  { %1138 = vmatprep.subr.bf16.mxu0 %v2219_v0  ;;  %v2070_v21 = vld [vmem:[%s2937_s0 + $0xc] ss:$16 sps:$4 sm:$0xff]   ;;  %926 = vmatprep.mubr.bf16.mxu1 %v2067_v19  ;;  %v2053_v23 = vld [vmem:[%s2936_s1 + $0x50] sm:$0xff]   ;;  %v2057_v27 = vld [vmem:[%s2936_s1 + $0x60] sm:$0xff]  }
   0x9   :  { %v2052_v22 = vld [vmem:[%s2936_s1 + $0xc8] sm:$0xff]   ;;  %1166 = vmatprep.mubr.bf16.mxu0 %v2070_v21  ;;  %v2054_v24 = vld [vmem:[%s2936_s1 + $0xd0] sm:$0xff]   ;;  %v2056_v26 = vld [vmem:[%s2936_s1 + $0xd8] sm:$0xff]  }
   0xa   :  { %899 = vmatpush1.bf16.msra.mxu1 %v2037_v5  ;;  %v2058_v28 = vld [vmem:[%s2936_s1 + $0xe0] sm:$0xff]   ;;  %v2059_v29 = vld [vmem:[%s2936_s1 + $0x68] sm:$0xff]   ;;  %v2061_v31 = vld [vmem:[%s2936_s1 + $0x70] sm:$0xff]  }
   0xb   :  { %1139 = vmatpush1.bf16.msra.mxu0 %v2038_v6  ;;  %900 = vmatprep.subr.bf16.mxu1 %v2219_v0  ;;  %v2060_v30 = vld [vmem:[%s2936_s1 + $0xe8] sm:$0xff]   ;;  %v2062_v32 = vld [vmem:[%s2936_s1 + $0xf0] sm:$0xff]   ;;  %v2063_v33 = vld [vmem:[%s2936_s1 + $0x78] sm:$0xff]  }
   0xc   :  { %1140 = vmatprep.subr.bf16.mxu0 %v2219_v0  ;;  %v2064_v34 = vld [vmem:[%s2936_s1 + $0xf8] sm:$0xff]   ;;  %v2065_v35 = vld [vmem:[%s2937_s0] ss:$16 sps:$4 sm:$0xff]   ;;  %v2071_v37 = vld [vmem:[%s2937_s0 + $0x24] ss:$16 sps:$4 sm:$0xff]  }
   0xd   :  { %v2068_v36 = vld [vmem:[%s2937_s0 + $0x8] ss:$16 sps:$4 sm:$0xff]   ;;  %v2073_v38 = vld [vmem:[%s2937_s0 + $0x2c] ss:$16 sps:$4 sm:$0xff]   ;;  %v2075_v39 = vld [vmem:[%s2937_s0 + $0x20] ss:$16 sps:$4 sm:$0xff]  }
   0xe   :  { %901 = vmatpush1.bf16.msra.mxu1 %v2039_v7  ;;  %v2076_v40 = vld [vmem:[%s2937_s0 + $0x28] ss:$16 sps:$4 sm:$0xff]   ;;  %v2077_v41 = vld [vmem:[%s2937_s0 + $0x44] ss:$16 sps:$4 sm:$0xff]   ;;  %v2079_v42 = vld [vmem:[%s2937_s0 + $0x4c] ss:$16 sps:$4 sm:$0xff]  }
   0xf   :  { %1141 = vmatpush1.bf16.msra.mxu0 %v2040_v8  ;;  %902 = vmatprep.subr.bf16.mxu1 %v2219_v0  ;;  %v2081_v43 = vld [vmem:[%s2937_s0 + $0x40] ss:$16 sps:$4 sm:$0xff]   ;;  %v2082_v44 = vld [vmem:[%s2937_s0 + $0x48] ss:$16 sps:$4 sm:$0xff]   ;;  %v2083_v45 = vld [vmem:[%s2937_s0 + $0x64] ss:$16 sps:$4 sm:$0xff]  }
  0x10   :  { %1142 = vmatprep.subr.bf16.mxu0 %v2219_v0  ;;  %v2085_v46 = vld [vmem:[%s2937_s0 + $0x6c] ss:$16 sps:$4 sm:$0xff]   ;;  %v2087_v47 = vld [vmem:[%s2937_s0 + $0x60] ss:$16 sps:$4 sm:$0xff]   ;;  %v2088_v48 = vld [vmem:[%s2937_s0 + $0x68] ss:$16 sps:$4 sm:$0xff]  }
  0x11   :  { %v2089_v49 = vld [vmem:[%s2937_s0 + $0x84] ss:$16 sps:$4 sm:$0xff]   ;;  %v2091_v50 = vld [vmem:[%s2937_s0 + $0x8c] ss:$16 sps:$4 sm:$0xff]   ;;  %v2093_v51 = vld [vmem:[%s2937_s0 + $0x80] ss:$16 sps:$4 sm:$0xff]  }
  0x12   :  { %903 = vmatpush1.bf16.msra.mxu1 %v2041_v9  ;;  %v2094_v52 = vld [vmem:[%s2937_s0 + $0x88] ss:$16 sps:$4 sm:$0xff]   ;;  %v2095_v53 = vld [vmem:[%s2937_s0 + $0xa4] ss:$16 sps:$4 sm:$0xff]   ;;  %v2097_v54 = vld [vmem:[%s2937_s0 + $0xac] ss:$16 sps:$4 sm:$0xff]  }
  0x13   :  { %1143 = vmatpush1.bf16.msra.mxu0 %v2042_v10  ;;  %904 = vmatprep.subr.bf16.mxu1 %v2219_v0  ;;  %v2099_v55 = vld [vmem:[%s2937_s0 + $0xa0] ss:$16 sps:$4 sm:$0xff]   ;;  %v2100_v56 = vld [vmem:[%s2937_s0 + $0xa8] ss:$16 sps:$4 sm:$0xff]   ;;  %v2101_v57 = vld [vmem:[%s2937_s0 + $0xc4] ss:$16 sps:$4 sm:$0xff]  }
  0x14   :  { %1144 = vmatprep.subr.bf16.mxu0 %v2219_v0  ;;  %v2103_v58 = vld [vmem:[%s2937_s0 + $0xcc] ss:$16 sps:$4 sm:$0xff]   ;;  %v2105_v59 = vld [vmem:[%s2937_s0 + $0xc0] ss:$16 sps:$4 sm:$0xff]   ;;  %v2106_v60 = vld [vmem:[%s2937_s0 + $0xc8] ss:$16 sps:$4 sm:$0xff]  }
  0x15   :  { %v2107_v61 = vld [vmem:[%s2937_s0 + $0xe4] ss:$16 sps:$4 sm:$0xff]   ;;  %v2109_v62 = vld [vmem:[%s2937_s0 + $0xec] ss:$16 sps:$4 sm:$0xff]   ;;  %v2111_v63 = vld [vmem:[%s2937_s0 + $0xe0] ss:$16 sps:$4 sm:$0xff]  }
  0x16   :  { %905 = vmatpush1.bf16.msra.mxu1 %v2043_v11  ;;  %v2113_v1 = vld [vmem:[%s2937_s0 + $0x104] ss:$16 sps:$4 sm:$0xff]   ;;  %v2115_v2 = vld [vmem:[%s2937_s0 + $0x10c] ss:$16 sps:$4 sm:$0xff]   ;;  %v2117_v3 = vld [vmem:[%s2937_s0 + $0x100] ss:$16 sps:$4 sm:$0xff]  }
  0x17   :  { %1145 = vmatpush1.bf16.msra.mxu0 %v2044_v12  ;;  %906 = vmatprep.subr.bf16.mxu1 %v2219_v0  ;;  %v2118_v4 = vld [vmem:[%s2937_s0 + $0x108] ss:$16 sps:$4 sm:$0xff]   ;;  %v2119_v5 = vld [vmem:[%s2937_s0 + $0x124] ss:$16 sps:$4 sm:$0xff]   ;;  %v2121_v6 = vld [vmem:[%s2937_s0 + $0x12c] ss:$16 sps:$4 sm:$0xff]  }
  0x18   :  { %1146 = vmatprep.subr.bf16.mxu0 %v2219_v0  ;;  %v2123_v7 = vld [vmem:[%s2937_s0 + $0x120] ss:$16 sps:$4 sm:$0xff]   ;;  %v2124_v8 = vld [vmem:[%s2937_s0 + $0x128] ss:$16 sps:$4 sm:$0xff]   ;;  %v2125_v9 = vld [vmem:[%s2937_s0 + $0x144] ss:$16 sps:$4 sm:$0xff]  }
  0x19   :  { %v2127_v10 = vld [vmem:[%s2937_s0 + $0x14c] ss:$16 sps:$4 sm:$0xff]   ;;  %v2129_v11 = vld [vmem:[%s2937_s0 + $0x140] ss:$16 sps:$4 sm:$0xff]   ;;  %v2130_v12 = vld [vmem:[%s2937_s0 + $0x148] ss:$16 sps:$4 sm:$0xff]  }
  0x1a   :  { %907 = vmatpush1.bf16.msra.mxu1 %v2045_v13  ;;  %v2131_v13 = vld [vmem:[%s2937_s0 + $0x164] ss:$16 sps:$4 sm:$0xff]   ;;  %v2141_v19 = vld [vmem:[%s2937_s0 + $0x180] ss:$16 sps:$4 sm:$0xff]   ;;  %vm1683_vm3 = vmand %vm1681_vm1, %vm1682_vm2 }
  0x1b   :  { %1147 = vmatpush1.bf16.msra.mxu0 %v2046_v14  ;;  %908 = vmatprep.subr.bf16.mxu1 %v2219_v0  ;;  %v2133_v14 = vld [vmem:[%s2937_s0 + $0x16c] ss:$16 sps:$4 sm:$0xff]   ;;  %v2143_v21 = vld [vmem:[%s2937_s0 + $0x1a4] ss:$16 sps:$4 sm:$0xff]  }
  0x1c   :  { %1148 = vmatprep.subr.bf16.mxu0 %v2219_v0 }
  0x1e   :  { %909 = vmatpush1.bf16.msra.mxu1 %v2047_v15  ;;  %v2135_v15 = vld [vmem:[%s2937_s0 + $0x160] ss:$16 sps:$4 sm:$0xff]  }
  0x1f   :  { %1149 = vmatpush1.bf16.msra.mxu0 %v2048_v16  ;;  %910 = vmatprep.subr.bf16.mxu1 %v2219_v0  ;;  %v2136_v16 = vld [vmem:[%s2937_s0 + $0x168] ss:$16 sps:$4 sm:$0xff]  }
  0x20   :  { %1150 = vmatprep.subr.bf16.mxu0 %v2219_v0 }
  0x22   :  { %911 = vmatpush1.bf16.msra.mxu1 %v2049_v17  ;;  %v2137_v17 = vld [vmem:[%s2937_s0 + $0x184] ss:$16 sps:$4 sm:$0xff]  }
  0x23   :  { %1151 = vmatpush1.bf16.msra.mxu0 %v2050_v18  ;;  %912 = vmatprep.subr.bf16.mxu1 %v2219_v0  ;;  %v2139_v18 = vld [vmem:[%s2937_s0 + $0x18c] ss:$16 sps:$4 sm:$0xff]  }
  0x24   :  { %1152 = vmatprep.subr.bf16.mxu0 %v2219_v0 }
  0x26   :  { %913 = vmatpush1.bf16.msra.mxu1 %v2051_v20  ;;  %v2142_v20 = vld [vmem:[%s2937_s0 + $0x188] ss:$16 sps:$4 sm:$0xff]  }
  0x27   :  { %1153 = vmatpush1.bf16.msra.mxu0 %v2052_v22  ;;  %914 = vmatprep.subr.bf16.mxu1 %v2219_v0  ;;  %v2145_v22 = vld [vmem:[%s2937_s0 + $0x1ac] ss:$16 sps:$4 sm:$0xff]  }
  0x28   :  { %1154 = vmatprep.subr.bf16.mxu0 %v2219_v0 }
  0x2a   :  { %915 = vmatpush1.bf16.msra.mxu1 %v2053_v23  ;;  %v2147_v23 = vld [vmem:[%s2937_s0 + $0x1a0] ss:$16 sps:$4 sm:$0xff]  }
  0x2b   :  { %1155 = vmatpush1.bf16.msra.mxu0 %v2054_v24  ;;  %916 = vmatprep.subr.bf16.mxu1 %v2219_v0  ;;  %v2148_v24 = vld [vmem:[%s2937_s0 + $0x1a8] ss:$16 sps:$4 sm:$0xff]  }
  0x2c   :  { %1156 = vmatprep.subr.bf16.mxu0 %v2219_v0 }
  0x2e   :  { %917 = vmatpush1.bf16.msra.mxu1 %v2055_v25  ;;  %v2149_v25 = vld [vmem:[%s2937_s0 + $0x1c4] ss:$16 sps:$4 sm:$0xff]  }
  0x2f   :  { %1157 = vmatpush1.bf16.msra.mxu0 %v2056_v26  ;;  %918 = vmatprep.subr.bf16.mxu1 %v2219_v0  ;;  %v2151_v26 = vld [vmem:[%s2937_s0 + $0x1cc] ss:$16 sps:$4 sm:$0xff]  }
  0x30   :  { %1158 = vmatprep.subr.bf16.mxu0 %v2219_v0 }
  0x32   :  { %919 = vmatpush1.bf16.msra.mxu1 %v2057_v27  ;;  %v2153_v27 = vld [vmem:[%s2937_s0 + $0x1c0] ss:$16 sps:$4 sm:$0xff]  }
  0x33   :  { %1159 = vmatpush1.bf16.msra.mxu0 %v2058_v28  ;;  %920 = vmatprep.subr.bf16.mxu1 %v2219_v0  ;;  %v2154_v28 = vld [vmem:[%s2937_s0 + $0x1c8] ss:$16 sps:$4 sm:$0xff]  }
  0x34   :  { %1160 = vmatprep.subr.bf16.mxu0 %v2219_v0 }
  0x36   :  { %921 = vmatpush1.bf16.msra.mxu1 %v2059_v29  ;;  %v2155_v29 = vld [vmem:[%s2937_s0 + $0x1e4] ss:$16 sps:$4 sm:$0xff]  }
  0x37   :  { %1161 = vmatpush1.bf16.msra.mxu0 %v2060_v30  ;;  %922 = vmatprep.subr.bf16.mxu1 %v2219_v0  ;;  %v2157_v30 = vld [vmem:[%s2937_s0 + $0x1ec] ss:$16 sps:$4 sm:$0xff]  }
  0x38   :  { %1162 = vmatprep.subr.bf16.mxu0 %v2219_v0 }
  0x3a   :  { %923 = vmatpush1.bf16.msra.mxu1 %v2061_v31  ;;  %v2159_v31 = vld [vmem:[%s2937_s0 + $0x1e0] ss:$16 sps:$4 sm:$0xff]  }
  0x3b   :  { %1163 = vmatpush1.bf16.msra.mxu0 %v2062_v32  ;;  %924 = vmatprep.subr.bf16.mxu1 %v2219_v0  ;;  %v2160_v32 = vld [vmem:[%s2937_s0 + $0x1e8] ss:$16 sps:$4 sm:$0xff]  }
  0x3c   :  { %1164 = vmatprep.subr.bf16.mxu0 %v2219_v0  ;;  %v2112_v0 = vld [vmem:[%s2937_s0 + $0xe8] ss:$16 sps:$4 sm:$0xff]  }
  0x3e   :  { %925 = vmatpush1.bf16.msra.mxu1 %v2063_v33  ;;  %v2161_v33 = vld [vmem:[%s2937_s0 + $0x204] ss:$16 sps:$4 sm:$0xff]  }
  0x3f   :  { %1165 = vmatpush1.bf16.msra.mxu0 %v2064_v34  ;;  %v2163_v34 = vld [vmem:[%s2937_s0 + $0x20c] ss:$16 sps:$4 sm:$0xff]  }
  0x41   :  { %927 = vmatmul.mubr.bf16.vlgmr.msra.gmra.mrb[0].mxu1 %v2065_v35  ;;  %v2165_v35 = vld [vmem:[%s2937_s0 + $0x200] ss:$16 sps:$4 sm:$0xff]  }
  0x42   :  { %1167 = vmatmul.mubr.bf16.vlgmr.msra.gmra.mrb[0].mxu0 %v2068_v36  ;;  %934 = vmatprep.mubr.bf16.mxu1 %v2071_v37  ;;  %v2166_v36 = vld [vmem:[%s2937_s0 + $0x208] ss:$16 sps:$4 sm:$0xff]   ;;  %v2167_v37 = vld [vmem:[%s2937_s0 + $0x224] ss:$16 sps:$4 sm:$0xff]  }
  0x43   :  { %1174 = vmatprep.mubr.bf16.mxu0 %v2073_v38  ;;  %v2169_v38 = vld [vmem:[%s2937_s0 + $0x22c] ss:$16 sps:$4 sm:$0xff]  }
  0x49   :  { %935 = vmatmul.mubr.bf16.gmra.mrb[4].mxu1 %v2075_v39  ;;  %v2171_v39 = vld [vmem:[%s2937_s0 + $0x220] ss:$16 sps:$4 sm:$0xff]  }
  0x4a   :  { %1175 = vmatmul.mubr.bf16.gmra.mrb[4].mxu0 %v2076_v40  ;;  %942 = vmatprep.mubr.bf16.mxu1 %v2077_v41  ;;  %v2172_v40 = vld [vmem:[%s2937_s0 + $0x228] ss:$16 sps:$4 sm:$0xff]   ;;  %v2173_v41 = vld [vmem:[%s2937_s0 + $0x244] ss:$16 sps:$4 sm:$0xff]  }
  0x4b   :  { %1182 = vmatprep.mubr.bf16.mxu0 %v2079_v42  ;;  %v2175_v42 = vld [vmem:[%s2937_s0 + $0x24c] ss:$16 sps:$4 sm:$0xff]  }
  0x51   :  { %943 = vmatmul.mubr.bf16.gmra.mrb[8].mxu1 %v2081_v43  ;;  %v2177_v43 = vld [vmem:[%s2937_s0 + $0x240] ss:$16 sps:$4 sm:$0xff]  }
  0x52   :  { %1183 = vmatmul.mubr.bf16.gmra.mrb[8].mxu0 %v2082_v44  ;;  %950 = vmatprep.mubr.bf16.mxu1 %v2083_v45  ;;  %v2178_v44 = vld [vmem:[%s2937_s0 + $0x248] ss:$16 sps:$4 sm:$0xff]   ;;  %v2179_v45 = vld [vmem:[%s2937_s0 + $0x264] ss:$16 sps:$4 sm:$0xff]  }
  0x53   :  { %1190 = vmatprep.mubr.bf16.mxu0 %v2085_v46  ;;  %v2181_v46 = vld [vmem:[%s2937_s0 + $0x26c] ss:$16 sps:$4 sm:$0xff]  }
  0x59   :  { %951 = vmatmul.mubr.bf16.gmra.mrb[12].mxu1 %v2087_v47  ;;  %v2183_v47 = vld [vmem:[%s2937_s0 + $0x260] ss:$16 sps:$4 sm:$0xff]  }
  0x5a   :  { %1191 = vmatmul.mubr.bf16.gmra.mrb[12].mxu0 %v2088_v48  ;;  %958 = vmatprep.mubr.bf16.mxu1 %v2089_v49  ;;  %v2184_v48 = vld [vmem:[%s2937_s0 + $0x268] ss:$16 sps:$4 sm:$0xff]   ;;  %v2185_v49 = vld [vmem:[%s2937_s0 + $0x284] ss:$16 sps:$4 sm:$0xff]  }
  0x5b   :  { %1198 = vmatprep.mubr.bf16.mxu0 %v2091_v50  ;;  %v2187_v50 = vld [vmem:[%s2937_s0 + $0x28c] ss:$16 sps:$4 sm:$0xff]  }
  0x61   :  { %959 = vmatmul.mubr.bf16.gmra.mrb[16].mxu1 %v2093_v51  ;;  %v2189_v51 = vld [vmem:[%s2937_s0 + $0x280] ss:$16 sps:$4 sm:$0xff]  }
  0x62   :  { %1199 = vmatmul.mubr.bf16.gmra.mrb[16].mxu0 %v2094_v52  ;;  %966 = vmatprep.mubr.bf16.mxu1 %v2095_v53  ;;  %v2190_v52 = vld [vmem:[%s2937_s0 + $0x288] ss:$16 sps:$4 sm:$0xff]   ;;  %v2191_v53 = vld [vmem:[%s2937_s0 + $0x2a4] ss:$16 sps:$4 sm:$0xff]  }
  0x63   :  { %1206 = vmatprep.mubr.bf16.mxu0 %v2097_v54  ;;  %v2193_v54 = vld [vmem:[%s2937_s0 + $0x2ac] ss:$16 sps:$4 sm:$0xff]  }
  0x69   :  { %967 = vmatmul.mubr.bf16.gmra.mrb[20].mxu1 %v2099_v55  ;;  %v2195_v55 = vld [vmem:[%s2937_s0 + $0x2a0] ss:$16 sps:$4 sm:$0xff]  }
  0x6a   :  { %1207 = vmatmul.mubr.bf16.gmra.mrb[20].mxu0 %v2100_v56  ;;  %974 = vmatprep.mubr.bf16.mxu1 %v2101_v57  ;;  %v2196_v56 = vld [vmem:[%s2937_s0 + $0x2a8] ss:$16 sps:$4 sm:$0xff]   ;;  %v2197_v57 = vld [vmem:[%s2937_s0 + $0x2c4] ss:$16 sps:$4 sm:$0xff]  }
  0x6b   :  { %1214 = vmatprep.mubr.bf16.mxu0 %v2103_v58  ;;  %v2199_v58 = vld [vmem:[%s2937_s0 + $0x2cc] ss:$16 sps:$4 sm:$0xff]  }
  0x71   :  { %975 = vmatmul.mubr.bf16.gmra.mrb[24].mxu1 %v2105_v59  ;;  %v2201_v59 = vld [vmem:[%s2937_s0 + $0x2c0] ss:$16 sps:$4 sm:$0xff]  }
  0x72   :  { %1215 = vmatmul.mubr.bf16.gmra.mrb[24].mxu0 %v2106_v60  ;;  %982 = vmatprep.mubr.bf16.mxu1 %v2107_v61  ;;  %v2202_v60 = vld [vmem:[%s2937_s0 + $0x2c8] ss:$16 sps:$4 sm:$0xff]   ;;  %v2203_v61 = vld [vmem:[%s2937_s0 + $0x2e4] ss:$16 sps:$4 sm:$0xff]  }
  0x73   :  { %1222 = vmatprep.mubr.bf16.mxu0 %v2109_v62  ;;  %v2205_v62 = vld [vmem:[%s2937_s0 + $0x2ec] ss:$16 sps:$4 sm:$0xff]  }
  0x79   :  { %983 = vmatmul.mubr.bf16.gmra.mrb[28].mxu1 %v2111_v63  ;;  %v2207_v63 = vld [vmem:[%s2937_s0 + $0x2e0] ss:$16 sps:$4 sm:$0xff]  }
  0x7a   :  { %1223 = vmatmul.mubr.bf16.gmra.mrb[28].mxu0 %v2112_v0  ;;  %990 = vmatprep.mubr.bf16.mxu1 %v2113_v1  ;;  %v2208_v0 = vld [vmem:[%s2937_s0 + $0x2e8] ss:$16 sps:$4 sm:$0xff]   ;;  %v2209_v1 = vld [vmem:[%s2937_s0 + $0x304] ss:$16 sps:$4 sm:$0xff]  }
  0x7b   :  { %1230 = vmatprep.mubr.bf16.mxu0 %v2115_v2  ;;  %v2211_v2 = vld [vmem:[%s2937_s0 + $0x30c] ss:$16 sps:$4 sm:$0xff]  }
  0x81   :  { %991 = vmatmul.mubr.bf16.gmra.mrb[32].mxu1 %v2117_v3  ;;  %v115_v3 = vld [vmem:[%s2937_s0 + $0x320] sm:$0x77] }
  0x82   :  { %1231 = vmatmul.mubr.bf16.gmra.mrb[32].mxu0 %v2118_v4  ;;  %998 = vmatprep.mubr.bf16.mxu1 %v2119_v5  ;;  %v116_v4 = vld [vmem:[%s2937_s0 + $0x328] sm:$0x77]  ;;  %v2213_v5 = vld [vmem:[%s2937_s0 + $0x300] ss:$16 sps:$4 sm:$0xff]  }
  0x83   :  { %1238 = vmatprep.mubr.bf16.mxu0 %v2121_v6  ;;  %v2214_v6 = vld [vmem:[%s2937_s0 + $0x308] ss:$16 sps:$4 sm:$0xff]  }
  0x89   :  { %999 = vmatmul.mubr.bf16.gmra.mrb[36].mxu1 %v2123_v7  ;;  %v1793_v7 = vcombine.high %v115_v3, %v115_v3 }
  0x8a   :  { %1239 = vmatmul.mubr.bf16.gmra.mrb[36].mxu0 %v2124_v8  ;;  %1006 = vmatprep.mubr.bf16.mxu1 %v2125_v9  ;;  %v1795_v8 = vcombine.high %v116_v4, %v116_v4  ;;  %v1792_v9 = vcombine.low %v115_v3, %v115_v3 }
  0x8b   :  { %1246 = vmatprep.mubr.bf16.mxu0 %v2127_v10  ;;  %v1794_v10 = vcombine.low %v116_v4, %v116_v4 }
  0x91   :  { %1007 = vmatmul.mubr.bf16.gmra.mrb[40].mxu1 %v2129_v11  ;;  %v2677_v11 = vld [vmem:[%s2938_s2] ss:$0 sm:$0xff] }
  0x92   :  { %1247 = vmatmul.mubr.bf16.gmra.mrb[40].mxu0 %v2130_v12  ;;  %1014 = vmatprep.mubr.bf16.mxu1 %v2131_v13 }
  0x93   :  { %1254 = vmatprep.mubr.bf16.mxu0 %v2133_v14 }
  0x99   :  { %1015 = vmatmul.mubr.bf16.gmra.mrb[44].mxu1 %v2135_v15 }
  0x9a   :  { %1255 = vmatmul.mubr.bf16.gmra.mrb[44].mxu0 %v2136_v16  ;;  %1022 = vmatprep.mubr.bf16.mxu1 %v2137_v17 }
  0x9b   :  { %1262 = vmatprep.mubr.bf16.mxu0 %v2139_v18 }
  0xa1   :  { %1023 = vmatmul.mubr.bf16.gmra.mrb[48].mxu1 %v2141_v19 }
  0xa2   :  { %1263 = vmatmul.mubr.bf16.gmra.mrb[48].mxu0 %v2142_v20  ;;  %1030 = vmatprep.mubr.bf16.mxu1 %v2143_v21 }
  0xa3   :  { %1270 = vmatprep.mubr.bf16.mxu0 %v2145_v22 }
  0xa9   :  { %1031 = vmatmul.mubr.bf16.gmra.mrb[52].mxu1 %v2147_v23 }
  0xaa   :  { %1271 = vmatmul.mubr.bf16.gmra.mrb[52].mxu0 %v2148_v24  ;;  %1038 = vmatprep.mubr.bf16.mxu1 %v2149_v25 }
  0xab   :  { %1278 = vmatprep.mubr.bf16.mxu0 %v2151_v26 }
  0xb1   :  { %1039 = vmatmul.mubr.bf16.gmra.mrb[56].mxu1 %v2153_v27 }
  0xb2   :  { %1279 = vmatmul.mubr.bf16.gmra.mrb[56].mxu0 %v2154_v28  ;;  %1046 = vmatprep.mubr.bf16.mxu1 %v2155_v29 }
  0xb3   :  { %1286 = vmatprep.mubr.bf16.mxu0 %v2157_v30 }
  0xb9   :  { %1047 = vmatmul.mubr.bf16.gmra.mrb[60].mxu1 %v2159_v31 }
  0xba   :  { %1287 = vmatmul.mubr.bf16.gmra.mrb[60].mxu0 %v2160_v32  ;;  %1054 = vmatprep.mubr.bf16.mxu1 %v2161_v33 }
  0xbb   :  { %1294 = vmatprep.mubr.bf16.mxu0 %v2163_v34 }
  0xc1   :  { %1055 = vmatmul.mubr.bf16.gmra.mrb[64].mxu1 %v2165_v35 }
  0xc2   :  { %1295 = vmatmul.mubr.bf16.gmra.mrb[64].mxu0 %v2166_v36  ;;  %1062 = vmatprep.mubr.bf16.mxu1 %v2167_v37 }
  0xc3   :  { %1302 = vmatprep.mubr.bf16.mxu0 %v2169_v38 }
  0xc9   :  { %1063 = vmatmul.mubr.bf16.gmra.mrb[68].mxu1 %v2171_v39 }
  0xca   :  { %1303 = vmatmul.mubr.bf16.gmra.mrb[68].mxu0 %v2172_v40  ;;  %1070 = vmatprep.mubr.bf16.mxu1 %v2173_v41 }
  0xcb   :  { %1310 = vmatprep.mubr.bf16.mxu0 %v2175_v42 }
  0xd1   :  { %1071 = vmatmul.mubr.bf16.gmra.mrb[72].mxu1 %v2177_v43 }
  0xd2   :  { %1311 = vmatmul.mubr.bf16.gmra.mrb[72].mxu0 %v2178_v44  ;;  %1078 = vmatprep.mubr.bf16.mxu1 %v2179_v45 }
  0xd3   :  { %1318 = vmatprep.mubr.bf16.mxu0 %v2181_v46 }
  0xd9   :  { %1079 = vmatmul.mubr.bf16.gmra.mrb[76].mxu1 %v2183_v47 }
  0xda   :  { %1319 = vmatmul.mubr.bf16.gmra.mrb[76].mxu0 %v2184_v48  ;;  %1086 = vmatprep.mubr.bf16.mxu1 %v2185_v49 }
  0xdb   :  { %1326 = vmatprep.mubr.bf16.mxu0 %v2187_v50 }
  0xe1   :  { %1087 = vmatmul.mubr.bf16.gmra.mrb[80].mxu1 %v2189_v51 }
  0xe2   :  { %1327 = vmatmul.mubr.bf16.gmra.mrb[80].mxu0 %v2190_v52  ;;  %1094 = vmatprep.mubr.bf16.mxu1 %v2191_v53 }
  0xe3   :  { %1334 = vmatprep.mubr.bf16.mxu0 %v2193_v54 }
  0xe9   :  { %1095 = vmatmul.mubr.bf16.gmra.mrb[84].mxu1 %v2195_v55 }
  0xea   :  { %1335 = vmatmul.mubr.bf16.gmra.mrb[84].mxu0 %v2196_v56  ;;  %1102 = vmatprep.mubr.bf16.mxu1 %v2197_v57 }
  0xeb   :  { %1342 = vmatprep.mubr.bf16.mxu0 %v2199_v58 }
  0xf1   :  { %1103 = vmatmul.mubr.bf16.gmra.mrb[88].mxu1 %v2201_v59 }
  0xf2   :  { %1343 = vmatmul.mubr.bf16.gmra.mrb[88].mxu0 %v2202_v60  ;;  %1110 = vmatprep.mubr.bf16.mxu1 %v2203_v61 }
  0xf3   :  { %1350 = vmatprep.mubr.bf16.mxu0 %v2205_v62 }
  0xf9   :  { %1111 = vmatmul.mubr.bf16.gmra.mrb[92].mxu1 %v2207_v63 }
  0xfa   :  { %1351 = vmatmul.mubr.bf16.gmra.mrb[92].mxu0 %v2208_v0  ;;  %1118 = vmatprep.mubr.bf16.mxu1 %v2209_v1 }
  0xfb   :  { %1358 = vmatprep.mubr.bf16.mxu0 %v2211_v2 }
 0x101   :  { %1119 = vmatmul.mubr.bf16.gmra.mrb[96].mxu1 %v2213_v5 }
 0x102   :  { %1359 = vmatmul.mubr.bf16.gmra.mrb[96].mxu0 %v2214_v6  ;;  %1126 = vmatprep.mubr.bf16.mxu1 %v1793_v7 }
 0x103   :  { %1366 = vmatprep.mubr.bf16.mxu0 %v1795_v8 }
 0x109   :  { %1127 = vmatmul.mubr.bf16.gmra.mrb[100].mxu1 %v1792_v9 }
 0x10a   :  { %1367 = vmatmul.mubr.bf16.gmra.mrb[100].mxu0 %v1794_v10 }
 0x114   :  { %v928_v12 = vpop.f32.mrb[0].mxu1 }
 0x115   :  { %v929_v13 = vadd.f32 %v2677_v11, %v928_v12  ;;  %v1168_v14 = vpop.f32.mrb[0].mxu0  ;;  %v930_v15 = vpop.f32.mrb[1].mxu1 }
 0x116   :  { %v1170_v16 = vpop.f32.mrb[1].mxu0  ;;  %v931_v17 = vpop.f32.mrb[2].mxu1 }
 0x117   :  { %v1169_v18 = vadd.f32 %v1168_v14, %v929_v13  ;;  %v932_v19 = vadd.f32 %v2677_v11, %v931_v17  ;;  %v1171_v20 = vpop.f32.mrb[2].mxu0  ;;  %v933_v21 = vpop.f32.mrb[3].mxu1 }
 0x118   :  { %v1173_v22 = vpop.f32.mrb[3].mxu0 }
 0x119   :  { %v1374_v23 = vmax.f32 %v1169_v18, 0.0  ;;  %v1172_v24 = vadd.f32 %v1171_v20, %v932_v19 }
 0x11b   :  { %v1879_v25 = vpack.c.bf16 %v1374_v23, %v1374_v23  ;;  %v1375_v26 = vmax.f32 %v1172_v24, 0.0 }
 0x11c   :  { %v936_v27 = vpop.f32.mrb[4].mxu1 }
 0x11d   :  { %1631 = vst.msk [vmem:[%s2939_s3] sm:$0xf] %vm1630_vm0, %v1879_v25  ;;  %v1880_v28 = vpack.c.bf16 %v1375_v26, %v1375_v26  ;;  %v937_v29 = vadd.f32 %v2677_v11, %v936_v27  ;;  %v1176_v30 = vpop.f32.mrb[4].mxu0  ;;  %v938_v31 = vpop.f32.mrb[5].mxu1 }
 0x11e   :  { %v1178_v32 = vpop.f32.mrb[5].mxu0  ;;  %v939_v33 = vpop.f32.mrb[6].mxu1 }
 0x11f   :  { %1632 = vst.msk [vmem:[%s2939_s3 + $0x4] sm:$0xf] %vm1630_vm0, %v1880_v28  ;;  %v1177_v34 = vadd.f32 %v1176_v30, %v937_v29  ;;  %v940_v35 = vadd.f32 %v2677_v11, %v939_v33  ;;  %v1179_v36 = vpop.f32.mrb[6].mxu0  ;;  %v941_v37 = vpop.f32.mrb[7].mxu1 }
 0x120   :  { %v1181_v38 = vpop.f32.mrb[7].mxu0 }
 0x121   :  { %v1376_v39 = vmax.f32 %v1177_v34, 0.0  ;;  %v1180_v40 = vadd.f32 %v1179_v36, %v940_v35 }
 0x123   :  { %v1881_v41 = vpack.c.bf16 %v1376_v39, %v1376_v39  ;;  %v1377_v42 = vmax.f32 %v1180_v40, 0.0 }
 0x124   :  { %v944_v43 = vpop.f32.mrb[8].mxu1 }
 0x125   :  { %1633 = vst.msk [vmem:[%s2939_s3 + $0x8] sm:$0xf] %vm1630_vm0, %v1881_v41  ;;  %v1882_v44 = vpack.c.bf16 %v1377_v42, %v1377_v42  ;;  %v945_v45 = vadd.f32 %v2677_v11, %v944_v43  ;;  %v1184_v46 = vpop.f32.mrb[8].mxu0  ;;  %v946_v47 = vpop.f32.mrb[9].mxu1 }
 0x126   :  { %v1186_v48 = vpop.f32.mrb[9].mxu0  ;;  %v947_v49 = vpop.f32.mrb[10].mxu1 }
 0x127   :  { %1634 = vst.msk [vmem:[%s2939_s3 + $0xc] sm:$0xf] %vm1630_vm0, %v1882_v44  ;;  %v1185_v50 = vadd.f32 %v1184_v46, %v945_v45  ;;  %v948_v51 = vadd.f32 %v2677_v11, %v947_v49  ;;  %v1187_v52 = vpop.f32.mrb[10].mxu0  ;;  %v949_v53 = vpop.f32.mrb[11].mxu1 }
 0x128   :  { %v1189_v54 = vpop.f32.mrb[11].mxu0 }
 0x129   :  { %v1378_v55 = vmax.f32 %v1185_v50, 0.0  ;;  %v1188_v56 = vadd.f32 %v1187_v52, %v948_v51 }
 0x12b   :  { %v1883_v57 = vpack.c.bf16 %v1378_v55, %v1378_v55  ;;  %v1379_v58 = vmax.f32 %v1188_v56, 0.0 }
 0x12c   :  { %v952_v59 = vpop.f32.mrb[12].mxu1 }
 0x12d   :  { %1635 = vst.msk [vmem:[%s2939_s3 + $0x10] sm:$0xf] %vm1630_vm0, %v1883_v57  ;;  %v1884_v60 = vpack.c.bf16 %v1379_v58, %v1379_v58  ;;  %v953_v61 = vadd.f32 %v2677_v11, %v952_v59  ;;  %v1192_v62 = vpop.f32.mrb[12].mxu0  ;;  %v954_v63 = vpop.f32.mrb[13].mxu1 }
 0x12e   :  { %v1194_v0 = vpop.f32.mrb[13].mxu0  ;;  %v955_v1 = vpop.f32.mrb[14].mxu1 }
 0x12f   :  { %1636 = vst.msk [vmem:[%s2939_s3 + $0x14] sm:$0xf] %vm1630_vm0, %v1884_v60  ;;  %v1193_v2 = vadd.f32 %v1192_v62, %v953_v61  ;;  %v956_v3 = vadd.f32 %v2677_v11, %v955_v1  ;;  %v1195_v4 = vpop.f32.mrb[14].mxu0  ;;  %v957_v5 = vpop.f32.mrb[15].mxu1 }
 0x130   :  { %v1197_v6 = vpop.f32.mrb[15].mxu0 }
 0x131   :  { %v1380_v7 = vmax.f32 %v1193_v2, 0.0  ;;  %v1196_v8 = vadd.f32 %v1195_v4, %v956_v3 }
 0x133   :  { %v1885_v9 = vpack.c.bf16 %v1380_v7, %v1380_v7  ;;  %v1381_v10 = vmax.f32 %v1196_v8, 0.0 }
 0x134   :  { %v960_v12 = vpop.f32.mrb[16].mxu1 }
 0x135   :  { %1637 = vst.msk [vmem:[%s2939_s3 + $0x18] sm:$0xf] %vm1630_vm0, %v1885_v9  ;;  %v1886_v13 = vpack.c.bf16 %v1381_v10, %v1381_v10  ;;  %v961_v14 = vadd.f32 %v2677_v11, %v960_v12  ;;  %v1200_v15 = vpop.f32.mrb[16].mxu0  ;;  %v962_v16 = vpop.f32.mrb[17].mxu1 }
 0x136   :  { %v1202_v17 = vpop.f32.mrb[17].mxu0  ;;  %v963_v18 = vpop.f32.mrb[18].mxu1 }
 0x137   :  { %1638 = vst.msk [vmem:[%s2939_s3 + $0x1c] sm:$0xf] %vm1630_vm0, %v1886_v13  ;;  %v1201_v19 = vadd.f32 %v1200_v15, %v961_v14  ;;  %v964_v20 = vadd.f32 %v2677_v11, %v963_v18  ;;  %v1203_v21 = vpop.f32.mrb[18].mxu0  ;;  %v965_v22 = vpop.f32.mrb[19].mxu1 }
 0x138   :  { %v1205_v23 = vpop.f32.mrb[19].mxu0 }
 0x139   :  { %v1382_v24 = vmax.f32 %v1201_v19, 0.0  ;;  %v1204_v25 = vadd.f32 %v1203_v21, %v964_v20 }
 0x13b   :  { %v1887_v26 = vpack.c.bf16 %v1382_v24, %v1382_v24  ;;  %v1383_v27 = vmax.f32 %v1204_v25, 0.0 }
 0x13c   :  { %v968_v28 = vpop.f32.mrb[20].mxu1 }
 0x13d   :  { %1639 = vst.msk [vmem:[%s2939_s3 + $0x20] sm:$0xf] %vm1630_vm0, %v1887_v26  ;;  %v1888_v29 = vpack.c.bf16 %v1383_v27, %v1383_v27  ;;  %v969_v30 = vadd.f32 %v2677_v11, %v968_v28  ;;  %v1208_v31 = vpop.f32.mrb[20].mxu0  ;;  %v970_v32 = vpop.f32.mrb[21].mxu1 }
 0x13e   :  { %v1210_v33 = vpop.f32.mrb[21].mxu0  ;;  %v971_v34 = vpop.f32.mrb[22].mxu1 }
 0x13f   :  { %1640 = vst.msk [vmem:[%s2939_s3 + $0x24] sm:$0xf] %vm1630_vm0, %v1888_v29  ;;  %v1209_v35 = vadd.f32 %v1208_v31, %v969_v30  ;;  %v972_v36 = vadd.f32 %v2677_v11, %v971_v34  ;;  %v1211_v37 = vpop.f32.mrb[22].mxu0  ;;  %v973_v38 = vpop.f32.mrb[23].mxu1 }
 0x140   :  { %v1213_v39 = vpop.f32.mrb[23].mxu0 }
 0x141   :  { %v1384_v40 = vmax.f32 %v1209_v35, 0.0  ;;  %v1212_v41 = vadd.f32 %v1211_v37, %v972_v36 }
 0x143   :  { %v1889_v42 = vpack.c.bf16 %v1384_v40, %v1384_v40  ;;  %v1385_v43 = vmax.f32 %v1212_v41, 0.0 }
 0x144   :  { %v976_v44 = vpop.f32.mrb[24].mxu1 }
 0x145   :  { %1641 = vst.msk [vmem:[%s2939_s3 + $0x28] sm:$0xf] %vm1630_vm0, %v1889_v42  ;;  %v1890_v45 = vpack.c.bf16 %v1385_v43, %v1385_v43  ;;  %v977_v46 = vadd.f32 %v2677_v11, %v976_v44  ;;  %v1216_v47 = vpop.f32.mrb[24].mxu0  ;;  %v978_v48 = vpop.f32.mrb[25].mxu1 }
 0x146   :  { %v1218_v49 = vpop.f32.mrb[25].mxu0  ;;  %v979_v50 = vpop.f32.mrb[26].mxu1 }
 0x147   :  { %1642 = vst.msk [vmem:[%s2939_s3 + $0x2c] sm:$0xf] %vm1630_vm0, %v1890_v45  ;;  %v1217_v51 = vadd.f32 %v1216_v47, %v977_v46  ;;  %v980_v52 = vadd.f32 %v2677_v11, %v979_v50  ;;  %v1219_v53 = vpop.f32.mrb[26].mxu0  ;;  %v981_v54 = vpop.f32.mrb[27].mxu1 }
 0x148   :  { %v1221_v55 = vpop.f32.mrb[27].mxu0 }
 0x149   :  { %v1386_v56 = vmax.f32 %v1217_v51, 0.0  ;;  %v1220_v57 = vadd.f32 %v1219_v53, %v980_v52 }
 0x14b   :  { %v1891_v58 = vpack.c.bf16 %v1386_v56, %v1386_v56  ;;  %v1387_v59 = vmax.f32 %v1220_v57, 0.0 }
 0x14c   :  { %v984_v60 = vpop.f32.mrb[28].mxu1 }
 0x14d   :  { %1643 = vst.msk [vmem:[%s2939_s3 + $0x30] sm:$0xf] %vm1630_vm0, %v1891_v58  ;;  %v1892_v61 = vpack.c.bf16 %v1387_v59, %v1387_v59  ;;  %v985_v62 = vadd.f32 %v2677_v11, %v984_v60  ;;  %v1224_v63 = vpop.f32.mrb[28].mxu0  ;;  %v986_v0 = vpop.f32.mrb[29].mxu1 }
 0x14e   :  { %v1226_v1 = vpop.f32.mrb[29].mxu0  ;;  %v987_v2 = vpop.f32.mrb[30].mxu1 }
 0x14f   :  { %1644 = vst.msk [vmem:[%s2939_s3 + $0x34] sm:$0xf] %vm1630_vm0, %v1892_v61  ;;  %v1225_v3 = vadd.f32 %v1224_v63, %v985_v62  ;;  %v988_v4 = vadd.f32 %v2677_v11, %v987_v2  ;;  %v1227_v5 = vpop.f32.mrb[30].mxu0  ;;  %v989_v6 = vpop.f32.mrb[31].mxu1 }
 0x150   :  { %v1229_v7 = vpop.f32.mrb[31].mxu0 }
 0x151   :  { %v1388_v8 = vmax.f32 %v1225_v3, 0.0  ;;  %v1228_v9 = vadd.f32 %v1227_v5, %v988_v4 }
 0x153   :  { %v1893_v10 = vpack.c.bf16 %v1388_v8, %v1388_v8  ;;  %v1389_v12 = vmax.f32 %v1228_v9, 0.0 }
 0x154   :  { %v992_v13 = vpop.f32.mrb[32].mxu1 }
 0x155   :  { %1645 = vst.msk [vmem:[%s2939_s3 + $0x38] sm:$0xf] %vm1630_vm0, %v1893_v10  ;;  %v1894_v14 = vpack.c.bf16 %v1389_v12, %v1389_v12  ;;  %v993_v15 = vadd.f32 %v2677_v11, %v992_v13  ;;  %v1232_v16 = vpop.f32.mrb[32].mxu0  ;;  %v994_v17 = vpop.f32.mrb[33].mxu1 }
 0x156   :  { %v1234_v18 = vpop.f32.mrb[33].mxu0  ;;  %v995_v19 = vpop.f32.mrb[34].mxu1 }
 0x157   :  { %1646 = vst.msk [vmem:[%s2939_s3 + $0x3c] sm:$0xf] %vm1630_vm0, %v1894_v14  ;;  %v1233_v20 = vadd.f32 %v1232_v16, %v993_v15  ;;  %v996_v21 = vadd.f32 %v2677_v11, %v995_v19  ;;  %v1235_v22 = vpop.f32.mrb[34].mxu0  ;;  %v997_v23 = vpop.f32.mrb[35].mxu1 }
 0x158   :  { %v1237_v24 = vpop.f32.mrb[35].mxu0 }
 0x159   :  { %v1390_v25 = vmax.f32 %v1233_v20, 0.0  ;;  %v1236_v26 = vadd.f32 %v1235_v22, %v996_v21 }
 0x15b   :  { %v1895_v27 = vpack.c.bf16 %v1390_v25, %v1390_v25  ;;  %v1391_v28 = vmax.f32 %v1236_v26, 0.0 }
 0x15c   :  { %v1000_v29 = vpop.f32.mrb[36].mxu1 }
 0x15d   :  { %1647 = vst.msk [vmem:[%s2939_s3 + $0x40] sm:$0xf] %vm1630_vm0, %v1895_v27  ;;  %v1896_v30 = vpack.c.bf16 %v1391_v28, %v1391_v28  ;;  %v1001_v31 = vadd.f32 %v2677_v11, %v1000_v29  ;;  %v1240_v32 = vpop.f32.mrb[36].mxu0  ;;  %v1002_v33 = vpop.f32.mrb[37].mxu1 }
 0x15e   :  { %v1242_v34 = vpop.f32.mrb[37].mxu0  ;;  %v1003_v35 = vpop.f32.mrb[38].mxu1 }
 0x15f   :  { %1648 = vst.msk [vmem:[%s2939_s3 + $0x44] sm:$0xf] %vm1630_vm0, %v1896_v30  ;;  %v1241_v36 = vadd.f32 %v1240_v32, %v1001_v31  ;;  %v1004_v37 = vadd.f32 %v2677_v11, %v1003_v35  ;;  %v1243_v38 = vpop.f32.mrb[38].mxu0  ;;  %v1005_v39 = vpop.f32.mrb[39].mxu1 }
 0x160   :  { %v1245_v40 = vpop.f32.mrb[39].mxu0 }
 0x161   :  { %v1392_v41 = vmax.f32 %v1241_v36, 0.0  ;;  %v1244_v42 = vadd.f32 %v1243_v38, %v1004_v37 }
 0x163   :  { %v1897_v43 = vpack.c.bf16 %v1392_v41, %v1392_v41  ;;  %v1393_v44 = vmax.f32 %v1244_v42, 0.0 }
 0x164   :  { %v1008_v45 = vpop.f32.mrb[40].mxu1 }
 0x165   :  { %1649 = vst.msk [vmem:[%s2939_s3 + $0x48] sm:$0xf] %vm1630_vm0, %v1897_v43  ;;  %v1898_v46 = vpack.c.bf16 %v1393_v44, %v1393_v44  ;;  %v1009_v47 = vadd.f32 %v2677_v11, %v1008_v45  ;;  %v1248_v48 = vpop.f32.mrb[40].mxu0  ;;  %v1010_v49 = vpop.f32.mrb[41].mxu1 }
 0x166   :  { %v1250_v50 = vpop.f32.mrb[41].mxu0  ;;  %v1011_v51 = vpop.f32.mrb[42].mxu1 }
 0x167   :  { %1650 = vst.msk [vmem:[%s2939_s3 + $0x4c] sm:$0xf] %vm1630_vm0, %v1898_v46  ;;  %v1249_v52 = vadd.f32 %v1248_v48, %v1009_v47  ;;  %v1012_v53 = vadd.f32 %v2677_v11, %v1011_v51  ;;  %v1251_v54 = vpop.f32.mrb[42].mxu0  ;;  %v1013_v55 = vpop.f32.mrb[43].mxu1 }
 0x168   :  { %v1253_v56 = vpop.f32.mrb[43].mxu0 }
 0x169   :  { %v1394_v57 = vmax.f32 %v1249_v52, 0.0  ;;  %v1252_v58 = vadd.f32 %v1251_v54, %v1012_v53 }
 0x16b   :  { %v1899_v59 = vpack.c.bf16 %v1394_v57, %v1394_v57  ;;  %v1395_v60 = vmax.f32 %v1252_v58, 0.0 }
 0x16c   :  { %v1016_v61 = vpop.f32.mrb[44].mxu1 }
 0x16d   :  { %1651 = vst.msk [vmem:[%s2939_s3 + $0x50] sm:$0xf] %vm1630_vm0, %v1899_v59  ;;  %v1900_v62 = vpack.c.bf16 %v1395_v60, %v1395_v60  ;;  %v1017_v63 = vadd.f32 %v2677_v11, %v1016_v61  ;;  %v1256_v0 = vpop.f32.mrb[44].mxu0  ;;  %v1018_v1 = vpop.f32.mrb[45].mxu1 }
 0x16e   :  { %v1258_v2 = vpop.f32.mrb[45].mxu0  ;;  %v1019_v3 = vpop.f32.mrb[46].mxu1 }
 0x16f   :  { %1652 = vst.msk [vmem:[%s2939_s3 + $0x54] sm:$0xf] %vm1630_vm0, %v1900_v62  ;;  %v1257_v4 = vadd.f32 %v1256_v0, %v1017_v63  ;;  %v1020_v5 = vadd.f32 %v2677_v11, %v1019_v3  ;;  %v1259_v6 = vpop.f32.mrb[46].mxu0  ;;  %v1021_v7 = vpop.f32.mrb[47].mxu1 }
 0x170   :  { %v1261_v8 = vpop.f32.mrb[47].mxu0 }
 0x171   :  { %v1396_v9 = vmax.f32 %v1257_v4, 0.0  ;;  %v1260_v10 = vadd.f32 %v1259_v6, %v1020_v5 }
 0x173   :  { %v1901_v12 = vpack.c.bf16 %v1396_v9, %v1396_v9  ;;  %v1397_v13 = vmax.f32 %v1260_v10, 0.0 }
 0x174   :  { %v1024_v14 = vpop.f32.mrb[48].mxu1 }
 0x175   :  { %1653 = vst.msk [vmem:[%s2939_s3 + $0x58] sm:$0xf] %vm1630_vm0, %v1901_v12  ;;  %v1902_v15 = vpack.c.bf16 %v1397_v13, %v1397_v13  ;;  %v1025_v16 = vadd.f32 %v2677_v11, %v1024_v14  ;;  %v1264_v17 = vpop.f32.mrb[48].mxu0  ;;  %v1026_v18 = vpop.f32.mrb[49].mxu1 }
 0x176   :  { %v1266_v19 = vpop.f32.mrb[49].mxu0  ;;  %v1027_v20 = vpop.f32.mrb[50].mxu1 }
 0x177   :  { %1654 = vst.msk [vmem:[%s2939_s3 + $0x5c] sm:$0xf] %vm1630_vm0, %v1902_v15  ;;  %v1265_v21 = vadd.f32 %v1264_v17, %v1025_v16  ;;  %v1028_v22 = vadd.f32 %v2677_v11, %v1027_v20  ;;  %v1267_v23 = vpop.f32.mrb[50].mxu0  ;;  %v1029_v24 = vpop.f32.mrb[51].mxu1 }
 0x178   :  { %v1269_v25 = vpop.f32.mrb[51].mxu0 }
 0x179   :  { %v1398_v26 = vmax.f32 %v1265_v21, 0.0  ;;  %v1268_v27 = vadd.f32 %v1267_v23, %v1028_v22 }
 0x17b   :  { %v1903_v28 = vpack.c.bf16 %v1398_v26, %v1398_v26  ;;  %v1399_v29 = vmax.f32 %v1268_v27, 0.0 }
 0x17c   :  { %v1032_v30 = vpop.f32.mrb[52].mxu1 }
 0x17d   :  { %1655 = vst.msk [vmem:[%s2939_s3 + $0x60] sm:$0xf] %vm1630_vm0, %v1903_v28  ;;  %v1904_v31 = vpack.c.bf16 %v1399_v29, %v1399_v29  ;;  %v1033_v32 = vadd.f32 %v2677_v11, %v1032_v30  ;;  %v1272_v33 = vpop.f32.mrb[52].mxu0  ;;  %v1034_v34 = vpop.f32.mrb[53].mxu1 }
 0x17e   :  { %v1274_v35 = vpop.f32.mrb[53].mxu0  ;;  %v1035_v36 = vpop.f32.mrb[54].mxu1 }
 0x17f   :  { %1656 = vst.msk [vmem:[%s2939_s3 + $0x64] sm:$0xf] %vm1630_vm0, %v1904_v31  ;;  %v1273_v37 = vadd.f32 %v1272_v33, %v1033_v32  ;;  %v1036_v38 = vadd.f32 %v2677_v11, %v1035_v36  ;;  %v1275_v39 = vpop.f32.mrb[54].mxu0  ;;  %v1037_v40 = vpop.f32.mrb[55].mxu1 }
 0x180   :  { %v1277_v41 = vpop.f32.mrb[55].mxu0 }
 0x181   :  { %v1400_v42 = vmax.f32 %v1273_v37, 0.0  ;;  %v1276_v43 = vadd.f32 %v1275_v39, %v1036_v38 }
 0x183   :  { %v1905_v44 = vpack.c.bf16 %v1400_v42, %v1400_v42  ;;  %v1401_v45 = vmax.f32 %v1276_v43, 0.0 }
 0x184   :  { %v1040_v46 = vpop.f32.mrb[56].mxu1 }
 0x185   :  { %1657 = vst.msk [vmem:[%s2939_s3 + $0x68] sm:$0xf] %vm1630_vm0, %v1905_v44  ;;  %v1906_v47 = vpack.c.bf16 %v1401_v45, %v1401_v45  ;;  %v1041_v48 = vadd.f32 %v2677_v11, %v1040_v46  ;;  %v1280_v49 = vpop.f32.mrb[56].mxu0  ;;  %v1042_v50 = vpop.f32.mrb[57].mxu1 }
 0x186   :  { %v1282_v51 = vpop.f32.mrb[57].mxu0  ;;  %v1043_v52 = vpop.f32.mrb[58].mxu1 }
 0x187   :  { %1658 = vst.msk [vmem:[%s2939_s3 + $0x6c] sm:$0xf] %vm1630_vm0, %v1906_v47  ;;  %v1281_v53 = vadd.f32 %v1280_v49, %v1041_v48  ;;  %v1044_v54 = vadd.f32 %v2677_v11, %v1043_v52  ;;  %v1283_v55 = vpop.f32.mrb[58].mxu0  ;;  %v1045_v56 = vpop.f32.mrb[59].mxu1 }
 0x188   :  { %v1285_v57 = vpop.f32.mrb[59].mxu0 }
 0x189   :  { %v1402_v58 = vmax.f32 %v1281_v53, 0.0  ;;  %v1284_v59 = vadd.f32 %v1283_v55, %v1044_v54 }
 0x18b   :  { %v1907_v60 = vpack.c.bf16 %v1402_v58, %v1402_v58  ;;  %v1403_v61 = vmax.f32 %v1284_v59, 0.0 }
 0x18c   :  { %v1048_v62 = vpop.f32.mrb[60].mxu1 }
 0x18d   :  { %1659 = vst.msk [vmem:[%s2939_s3 + $0x70] sm:$0xf] %vm1630_vm0, %v1907_v60  ;;  %v1908_v63 = vpack.c.bf16 %v1403_v61, %v1403_v61  ;;  %v1049_v0 = vadd.f32 %v2677_v11, %v1048_v62  ;;  %v1288_v1 = vpop.f32.mrb[60].mxu0  ;;  %v1050_v2 = vpop.f32.mrb[61].mxu1 }
 0x18e   :  { %v1290_v3 = vpop.f32.mrb[61].mxu0  ;;  %v1051_v4 = vpop.f32.mrb[62].mxu1 }
 0x18f   :  { %1660 = vst.msk [vmem:[%s2939_s3 + $0x74] sm:$0xf] %vm1630_vm0, %v1908_v63  ;;  %v1289_v5 = vadd.f32 %v1288_v1, %v1049_v0  ;;  %v1052_v6 = vadd.f32 %v2677_v11, %v1051_v4  ;;  %v1291_v7 = vpop.f32.mrb[62].mxu0  ;;  %v1053_v8 = vpop.f32.mrb[63].mxu1 }
 0x190   :  { %v1293_v9 = vpop.f32.mrb[63].mxu0 }
 0x191   :  { %v1404_v10 = vmax.f32 %v1289_v5, 0.0  ;;  %v1292_v12 = vadd.f32 %v1291_v7, %v1052_v6 }
 0x193   :  { %v1909_v13 = vpack.c.bf16 %v1404_v10, %v1404_v10  ;;  %v1405_v14 = vmax.f32 %v1292_v12, 0.0 }
 0x194   :  { %v1056_v15 = vpop.f32.mrb[64].mxu1 }
 0x195   :  { %1661 = vst.msk [vmem:[%s2939_s3 + $0x78] sm:$0xf] %vm1630_vm0, %v1909_v13  ;;  %v1910_v16 = vpack.c.bf16 %v1405_v14, %v1405_v14  ;;  %v1057_v17 = vadd.f32 %v2677_v11, %v1056_v15  ;;  %v1296_v18 = vpop.f32.mrb[64].mxu0  ;;  %v1058_v19 = vpop.f32.mrb[65].mxu1 }
 0x196   :  { %v1298_v20 = vpop.f32.mrb[65].mxu0  ;;  %v1059_v21 = vpop.f32.mrb[66].mxu1 }
 0x197   :  { %1662 = vst.msk [vmem:[%s2939_s3 + $0x7c] sm:$0xf] %vm1630_vm0, %v1910_v16  ;;  %v1297_v22 = vadd.f32 %v1296_v18, %v1057_v17  ;;  %v1060_v23 = vadd.f32 %v2677_v11, %v1059_v21  ;;  %v1299_v24 = vpop.f32.mrb[66].mxu0  ;;  %v1061_v25 = vpop.f32.mrb[67].mxu1 }
 0x198   :  { %v1301_v26 = vpop.f32.mrb[67].mxu0 }
 0x199   :  { %v1406_v27 = vmax.f32 %v1297_v22, 0.0  ;;  %v1300_v28 = vadd.f32 %v1299_v24, %v1060_v23 }
 0x19b   :  { %v1911_v29 = vpack.c.bf16 %v1406_v27, %v1406_v27  ;;  %v1407_v30 = vmax.f32 %v1300_v28, 0.0 }
 0x19c   :  { %v1064_v31 = vpop.f32.mrb[68].mxu1 }
 0x19d   :  { %1663 = vst.msk [vmem:[%s2939_s3 + $0x80] sm:$0xf] %vm1630_vm0, %v1911_v29  ;;  %v1912_v32 = vpack.c.bf16 %v1407_v30, %v1407_v30  ;;  %v1065_v33 = vadd.f32 %v2677_v11, %v1064_v31  ;;  %v1304_v34 = vpop.f32.mrb[68].mxu0  ;;  %v1066_v35 = vpop.f32.mrb[69].mxu1 }
 0x19e   :  { %v1306_v36 = vpop.f32.mrb[69].mxu0  ;;  %v1067_v37 = vpop.f32.mrb[70].mxu1 }
 0x19f   :  { %1664 = vst.msk [vmem:[%s2939_s3 + $0x84] sm:$0xf] %vm1630_vm0, %v1912_v32  ;;  %v1305_v38 = vadd.f32 %v1304_v34, %v1065_v33  ;;  %v1068_v39 = vadd.f32 %v2677_v11, %v1067_v37  ;;  %v1307_v40 = vpop.f32.mrb[70].mxu0  ;;  %v1069_v41 = vpop.f32.mrb[71].mxu1 }
 0x1a0   :  { %v1309_v42 = vpop.f32.mrb[71].mxu0 }
 0x1a1   :  { %v1408_v43 = vmax.f32 %v1305_v38, 0.0  ;;  %v1308_v44 = vadd.f32 %v1307_v40, %v1068_v39 }
 0x1a3   :  { %v1913_v45 = vpack.c.bf16 %v1408_v43, %v1408_v43  ;;  %v1409_v46 = vmax.f32 %v1308_v44, 0.0 }
 0x1a4   :  { %v1072_v47 = vpop.f32.mrb[72].mxu1 }
 0x1a5   :  { %1665 = vst.msk [vmem:[%s2939_s3 + $0x88] sm:$0xf] %vm1630_vm0, %v1913_v45  ;;  %v1914_v48 = vpack.c.bf16 %v1409_v46, %v1409_v46  ;;  %v1073_v49 = vadd.f32 %v2677_v11, %v1072_v47  ;;  %v1312_v50 = vpop.f32.mrb[72].mxu0  ;;  %v1074_v51 = vpop.f32.mrb[73].mxu1 }
 0x1a6   :  { %v1314_v52 = vpop.f32.mrb[73].mxu0  ;;  %v1075_v53 = vpop.f32.mrb[74].mxu1 }
 0x1a7   :  { %1666 = vst.msk [vmem:[%s2939_s3 + $0x8c] sm:$0xf] %vm1630_vm0, %v1914_v48  ;;  %v1313_v54 = vadd.f32 %v1312_v50, %v1073_v49  ;;  %v1076_v55 = vadd.f32 %v2677_v11, %v1075_v53  ;;  %v1315_v56 = vpop.f32.mrb[74].mxu0  ;;  %v1077_v57 = vpop.f32.mrb[75].mxu1 }
 0x1a8   :  { %v1317_v58 = vpop.f32.mrb[75].mxu0 }
 0x1a9   :  { %v1410_v59 = vmax.f32 %v1313_v54, 0.0  ;;  %v1316_v60 = vadd.f32 %v1315_v56, %v1076_v55 }
 0x1ab   :  { %v1915_v61 = vpack.c.bf16 %v1410_v59, %v1410_v59  ;;  %v1411_v62 = vmax.f32 %v1316_v60, 0.0 }
 0x1ac   :  { %v1080_v63 = vpop.f32.mrb[76].mxu1 }
 0x1ad   :  { %1667 = vst.msk [vmem:[%s2939_s3 + $0x90] sm:$0xf] %vm1630_vm0, %v1915_v61  ;;  %v1916_v0 = vpack.c.bf16 %v1411_v62, %v1411_v62  ;;  %v1081_v1 = vadd.f32 %v2677_v11, %v1080_v63  ;;  %v1320_v2 = vpop.f32.mrb[76].mxu0  ;;  %v1082_v3 = vpop.f32.mrb[77].mxu1 }
 0x1ae   :  { %v1322_v4 = vpop.f32.mrb[77].mxu0  ;;  %v1083_v5 = vpop.f32.mrb[78].mxu1 }
 0x1af   :  { %1668 = vst.msk [vmem:[%s2939_s3 + $0x94] sm:$0xf] %vm1630_vm0, %v1916_v0  ;;  %v1321_v6 = vadd.f32 %v1320_v2, %v1081_v1  ;;  %v1084_v7 = vadd.f32 %v2677_v11, %v1083_v5  ;;  %v1323_v8 = vpop.f32.mrb[78].mxu0  ;;  %v1085_v9 = vpop.f32.mrb[79].mxu1 }
 0x1b0   :  { %v1325_v10 = vpop.f32.mrb[79].mxu0 }
 0x1b1   :  { %v1412_v12 = vmax.f32 %v1321_v6, 0.0  ;;  %v1324_v13 = vadd.f32 %v1323_v8, %v1084_v7 }
 0x1b3   :  { %v1917_v14 = vpack.c.bf16 %v1412_v12, %v1412_v12  ;;  %v1413_v15 = vmax.f32 %v1324_v13, 0.0 }
 0x1b4   :  { %v1088_v16 = vpop.f32.mrb[80].mxu1 }
 0x1b5   :  { %1669 = vst.msk [vmem:[%s2939_s3 + $0x98] sm:$0xf] %vm1630_vm0, %v1917_v14  ;;  %v1918_v17 = vpack.c.bf16 %v1413_v15, %v1413_v15  ;;  %v1089_v18 = vadd.f32 %v2677_v11, %v1088_v16  ;;  %v1328_v19 = vpop.f32.mrb[80].mxu0  ;;  %v1090_v20 = vpop.f32.mrb[81].mxu1 }
 0x1b6   :  { %v1330_v21 = vpop.f32.mrb[81].mxu0  ;;  %v1091_v22 = vpop.f32.mrb[82].mxu1 }
 0x1b7   :  { %1670 = vst.msk [vmem:[%s2939_s3 + $0x9c] sm:$0xf] %vm1630_vm0, %v1918_v17  ;;  %v1329_v23 = vadd.f32 %v1328_v19, %v1089_v18  ;;  %v1092_v24 = vadd.f32 %v2677_v11, %v1091_v22  ;;  %v1331_v25 = vpop.f32.mrb[82].mxu0  ;;  %v1093_v26 = vpop.f32.mrb[83].mxu1 }
 0x1b8   :  { %v1333_v27 = vpop.f32.mrb[83].mxu0 }
 0x1b9   :  { %v1414_v28 = vmax.f32 %v1329_v23, 0.0  ;;  %v1332_v29 = vadd.f32 %v1331_v25, %v1092_v24 }
 0x1bb   :  { %v1919_v30 = vpack.c.bf16 %v1414_v28, %v1414_v28  ;;  %v1415_v31 = vmax.f32 %v1332_v29, 0.0 }
 0x1bc   :  { %v1096_v32 = vpop.f32.mrb[84].mxu1 }
 0x1bd   :  { %1671 = vst.msk [vmem:[%s2939_s3 + $0xa0] sm:$0xf] %vm1630_vm0, %v1919_v30  ;;  %v1920_v33 = vpack.c.bf16 %v1415_v31, %v1415_v31  ;;  %v1097_v34 = vadd.f32 %v2677_v11, %v1096_v32  ;;  %v1336_v35 = vpop.f32.mrb[84].mxu0  ;;  %v1098_v36 = vpop.f32.mrb[85].mxu1 }
 0x1be   :  { %v1338_v37 = vpop.f32.mrb[85].mxu0  ;;  %v1099_v38 = vpop.f32.mrb[86].mxu1 }
 0x1bf   :  { %1672 = vst.msk [vmem:[%s2939_s3 + $0xa4] sm:$0xf] %vm1630_vm0, %v1920_v33  ;;  %v1337_v39 = vadd.f32 %v1336_v35, %v1097_v34  ;;  %v1100_v40 = vadd.f32 %v2677_v11, %v1099_v38  ;;  %v1339_v41 = vpop.f32.mrb[86].mxu0  ;;  %v1101_v42 = vpop.f32.mrb[87].mxu1 }
 0x1c0   :  { %v1341_v43 = vpop.f32.mrb[87].mxu0 }
 0x1c1   :  { %v1416_v44 = vmax.f32 %v1337_v39, 0.0  ;;  %v1340_v45 = vadd.f32 %v1339_v41, %v1100_v40 }
 0x1c3   :  { %v1921_v46 = vpack.c.bf16 %v1416_v44, %v1416_v44  ;;  %v1417_v47 = vmax.f32 %v1340_v45, 0.0 }
 0x1c4   :  { %v1104_v48 = vpop.f32.mrb[88].mxu1 }
 0x1c5   :  { %1673 = vst.msk [vmem:[%s2939_s3 + $0xa8] sm:$0xf] %vm1630_vm0, %v1921_v46  ;;  %v1922_v49 = vpack.c.bf16 %v1417_v47, %v1417_v47  ;;  %v1105_v50 = vadd.f32 %v2677_v11, %v1104_v48  ;;  %v1344_v51 = vpop.f32.mrb[88].mxu0  ;;  %v1106_v52 = vpop.f32.mrb[89].mxu1 }
 0x1c6   :  { %v1346_v53 = vpop.f32.mrb[89].mxu0  ;;  %v1107_v54 = vpop.f32.mrb[90].mxu1 }
 0x1c7   :  { %1674 = vst.msk [vmem:[%s2939_s3 + $0xac] sm:$0xf] %vm1630_vm0, %v1922_v49  ;;  %v1345_v55 = vadd.f32 %v1344_v51, %v1105_v50  ;;  %v1108_v56 = vadd.f32 %v2677_v11, %v1107_v54  ;;  %v1347_v57 = vpop.f32.mrb[90].mxu0  ;;  %v1109_v58 = vpop.f32.mrb[91].mxu1 }
 0x1c8   :  { %v1349_v59 = vpop.f32.mrb[91].mxu0 }
 0x1c9   :  { %v1418_v60 = vmax.f32 %v1345_v55, 0.0  ;;  %v1348_v61 = vadd.f32 %v1347_v57, %v1108_v56 }
 0x1cb   :  { %v1923_v62 = vpack.c.bf16 %v1418_v60, %v1418_v60  ;;  %v1419_v63 = vmax.f32 %v1348_v61, 0.0 }
 0x1cc   :  { %v1112_v0 = vpop.f32.mrb[92].mxu1 }
 0x1cd   :  { %1675 = vst.msk [vmem:[%s2939_s3 + $0xb0] sm:$0xf] %vm1630_vm0, %v1923_v62  ;;  %v1924_v1 = vpack.c.bf16 %v1419_v63, %v1419_v63  ;;  %v1113_v2 = vadd.f32 %v2677_v11, %v1112_v0  ;;  %v1352_v3 = vpop.f32.mrb[92].mxu0  ;;  %v1114_v4 = vpop.f32.mrb[93].mxu1 }
 0x1ce   :  { %v1354_v5 = vpop.f32.mrb[93].mxu0  ;;  %v1115_v6 = vpop.f32.mrb[94].mxu1 }
 0x1cf   :  { %1676 = vst.msk [vmem:[%s2939_s3 + $0xb4] sm:$0xf] %vm1630_vm0, %v1924_v1  ;;  %v1353_v7 = vadd.f32 %v1352_v3, %v1113_v2  ;;  %v1116_v8 = vadd.f32 %v2677_v11, %v1115_v6  ;;  %v1355_v9 = vpop.f32.mrb[94].mxu0  ;;  %v1117_v10 = vpop.f32.mrb[95].mxu1 }
 0x1d0   :  { %v1357_v12 = vpop.f32.mrb[95].mxu0 }
 0x1d1   :  { %v1420_v13 = vmax.f32 %v1353_v7, 0.0  ;;  %v1356_v14 = vadd.f32 %v1355_v9, %v1116_v8 }
 0x1d3   :  { %v1925_v15 = vpack.c.bf16 %v1420_v13, %v1420_v13  ;;  %v1421_v16 = vmax.f32 %v1356_v14, 0.0 }
 0x1d4   :  { %v1120_v17 = vpop.f32.mrb[96].mxu1 }
 0x1d5   :  { %1677 = vst.msk [vmem:[%s2939_s3 + $0xb8] sm:$0xf] %vm1630_vm0, %v1925_v15  ;;  %v1926_v18 = vpack.c.bf16 %v1421_v16, %v1421_v16  ;;  %v1121_v19 = vadd.f32 %v2677_v11, %v1120_v17  ;;  %v1360_v20 = vpop.f32.mrb[96].mxu0  ;;  %v1122_v21 = vpop.f32.mrb[97].mxu1 }
 0x1d6   :  { %v1362_v22 = vpop.f32.mrb[97].mxu0  ;;  %v1123_v23 = vpop.f32.mrb[98].mxu1 }
 0x1d7   :  { %1678 = vst.msk [vmem:[%s2939_s3 + $0xbc] sm:$0xf] %vm1630_vm0, %v1926_v18  ;;  %v1361_v24 = vadd.f32 %v1360_v20, %v1121_v19  ;;  %v1124_v25 = vadd.f32 %v2677_v11, %v1123_v23  ;;  %v1363_v26 = vpop.f32.mrb[98].mxu0  ;;  %v1125_v27 = vpop.f32.mrb[99].mxu1 }
 0x1d8   :  { %v1365_v28 = vpop.f32.mrb[99].mxu0 }
 0x1d9   :  { %v1422_v29 = vmax.f32 %v1361_v24, 0.0  ;;  %v1364_v30 = vadd.f32 %v1363_v26, %v1124_v25 }
 0x1db   :  { %v1927_v31 = vpack.c.bf16 %v1422_v29, %v1422_v29  ;;  %v1423_v32 = vmax.f32 %v1364_v30, 0.0 }
 0x1dc   :  { %v1128_v33 = vpop.f32.mrb[100].mxu1 }
 0x1dd   :  { %1679 = vst.msk [vmem:[%s2939_s3 + $0xc0] sm:$0xf] %vm1630_vm0, %v1927_v31  ;;  %v1928_v34 = vpack.c.bf16 %v1423_v32, %v1423_v32  ;;  %v1129_v35 = vadd.f32 %v2677_v11, %v1128_v33  ;;  %v1368_v36 = vpop.f32.mrb[100].mxu0  ;;  %v1130_v37 = vpop.f32.mrb[101].mxu1  ;;  %v1684_v11 = vld [vmem:[%s2939_s3 + $0xc8] sm:$0x7] }
 0x1de   :  { %v1370_v38 = vpop.f32.mrb[101].mxu0  ;;  %v1131_v39 = vpop.f32.mrb[102].mxu1 }
 0x1df   :  { %1680 = vst.msk [vmem:[%s2939_s3 + $0xc4] sm:$0xf] %vm1630_vm0, %v1928_v34  ;;  %v1369_v40 = vadd.f32 %v1368_v36, %v1129_v35  ;;  %v1371_v41 = vpop.f32.mrb[102].mxu0  ;;  %v1132_v42 = vpop.f32.mrb[103].mxu1 }
 0x1e0   :  { %v1372_v43 = vpop.f32.mrb[103].mxu0 }
 0x1e1   :  { %v1424_v44 = vmax.f32 %v1369_v40, 0.0 }
 0x1e3   :  { %v1929_v45 = vpack.c.bf16 %v1424_v44, %v1424_v44 }
 0x1e5   :  { %v1685_v46 = vsel %vm1683_vm3, %v1929_v45, %v1684_v11 }
 0x1e6   :  { %1686 = vst [vmem:[%s2939_s3 + $0xc8] sm:$0x7] %v1685_v46 }

// kernel: reward_classifier_forward.7
= control target key start
LH: loop header
LB: loop body
LE: loop exit
PB: predicated region body
PF: predicated region fallthrough
CT: control target
= control target key end

     0   :  { %vm795_vm0 = vcmask 523264   ;;  %vm1480_vm1 = vcmask 519168   ;;  %vm1511_vm2 = vcmask 518144   ;;  %vm1512_vm3 = vsmask.f32 2304  ;;  %s2810_s1 = inlined_call_operand.vmem [shape: bf16[576,64], index: 1, kind: input, shape index: {}]   ;;  %s2811_s0 = inlined_call_operand.vmem [shape: bf16[245,576], index: 0, kind: input, shape index: {}]   ;;  %s2812_s2 = inlined_call_operand.vmem [shape: f32[1,64], index: 2, kind: input, shape index: {}]   ;;  %s2813_s3 = inlined_call_operand.vmem [shape: bf16[245,64], index: 3, kind: output, shape index: {}]  }
   0x1   :  { %v2016_v0 = vld [vmem:[%s2810_s1 + $0x40] sm:$0xff]   ;;  %v2018_v2 = vld [vmem:[%s2810_s1 + $0x48] sm:$0xff]   ;;  %v2020_v4 = vld [vmem:[%s2810_s1 + $0x50] sm:$0xff]  }
   0x2   :  { %v2017_v1 = vld [vmem:[%s2810_s1] sm:$0xff]   ;;  %1716 = vmatprep.subr.bf16.mxu0 %v2016_v0  ;;  %2000 = vmatprep.subr.bf16.mxu1 %v2016_v0  ;;  %v2019_v3 = vld [vmem:[%s2810_s1 + $0x8] sm:$0xff]   ;;  %v2021_v5 = vld [vmem:[%s2810_s1 + $0x10] sm:$0xff]  }
   0x3   :  { %1717 = vmatpush3.bf16.msra.mxu0 %v2017_v1  ;;  %2008 = vmatpush3.bf16.msra.mxu1 %v2017_v1  ;;  %v2022_v6 = vld [vmem:[%s2810_s1 + $0x58] sm:$0xff]   ;;  %v2024_v8 = vld [vmem:[%s2810_s1 + $0x60] sm:$0xff]   ;;  %v2026_v10 = vld [vmem:[%s2810_s1 + $0x68] sm:$0xff]  }
   0x4   :  { %1718 = vmatprep.subr.bf16.mxu0 %v2018_v2  ;;  %2001 = vmatprep.subr.bf16.mxu1 %v2018_v2  ;;  %v2023_v7 = vld [vmem:[%s2810_s1 + $0x18] sm:$0xff]   ;;  %v2025_v9 = vld [vmem:[%s2810_s1 + $0x20] sm:$0xff]   ;;  %v2027_v13 = vld [vmem:[%s2810_s1 + $0x28] sm:$0xff]  }
   0x5   :  { %v2034_v11 = vld [vmem:[%s2811_s0 + $0x4] ss:$20 sps:$4 sm:$0xff]   ;;  %v2028_v14 = vld [vmem:[%s2810_s1 + $0x70] sm:$0xff]   ;;  %v2041_v23 = vld [vmem:[%s2810_s1 + $0xc8] sm:$0xff]  }
   0x6   :  { %v2037_v12 = vld [vmem:[%s2811_s0 + $0x1e4] ss:$20 sps:$4 sm:$0xff]   ;;  %876 = vmatprep.mubr.bf16.mxu0 %v2034_v11  ;;  %v2029_v15 = vld [vmem:[%s2810_s1 + $0x30] sm:$0xff]   ;;  %v2043_v24 = vld [vmem:[%s2811_s0 + $0x2c] ss:$20 sps:$4 sm:$0xff]  }
   0x7   :  { %1719 = vmatpush3.bf16.msra.mxu0 %v2019_v3  ;;  %2009 = vmatpush3.bf16.msra.mxu1 %v2019_v3  ;;  %v2030_v16 = vld [vmem:[%s2810_s1 + $0x78] sm:$0xff]   ;;  %v2038_v18 = vld [vmem:[%s2810_s1 + $0xc0] sm:$0xff]   ;;  %v2042_v26 = vld [vmem:[%s2810_s1 + $0x88] sm:$0xff]  }
   0x8   :  { %1720 = vmatprep.subr.bf16.mxu0 %v2020_v4  ;;  %2002 = vmatprep.subr.bf16.mxu1 %v2020_v4  ;;  %v2031_v17 = vld [vmem:[%s2810_s1 + $0x38] sm:$0xff]   ;;  %v2040_v19 = vld [vmem:[%s2810_s1 + $0x100] sm:$0xff]   ;;  %v2049_v28 = vld [vmem:[%s2810_s1 + $0xd0] sm:$0xff]  }
   0x9   :  { %972 = vmatprep.mubr.bf16.mxu1 %v2037_v12  ;;  %v2032_v20 = vld [vmem:[%s2811_s0] ss:$20 sps:$4 sm:$0xff]   ;;  %v2047_v27 = vld [vmem:[%s2811_s0 + $0x28] ss:$20 sps:$4 sm:$0xff]   ;;  %v2057_v36 = vld [vmem:[%s2811_s0 + $0x50] ss:$20 sps:$4 sm:$0xff]  }
   0xa   :  { %v2035_v21 = vld [vmem:[%s2811_s0 + $0x1e0] ss:$20 sps:$4 sm:$0xff]   ;;  %v2048_v29 = vld [vmem:[%s2811_s0 + $0x208] ss:$20 sps:$4 sm:$0xff]   ;;  %v2058_v38 = vld [vmem:[%s2811_s0 + $0x230] ss:$20 sps:$4 sm:$0xff]  }
   0xb   :  { %1721 = vmatpush3.bf16.msra.mxu0 %v2021_v5  ;;  %2010 = vmatpush3.bf16.msra.mxu1 %v2021_v5  ;;  %v2039_v22 = vld [vmem:[%s2810_s1 + $0x80] sm:$0xff]   ;;  %v2050_v30 = vld [vmem:[%s2810_s1 + $0x90] sm:$0xff]   ;;  %v2051_v31 = vld [vmem:[%s2810_s1 + $0xd8] sm:$0xff]  }
   0xc   :  { %1722 = vmatprep.subr.bf16.mxu0 %v2022_v6  ;;  %2003 = vmatprep.subr.bf16.mxu1 %v2022_v6  ;;  %v2045_v25 = vld [vmem:[%s2811_s0 + $0x20c] ss:$20 sps:$4 sm:$0xff]   ;;  %v2053_v32 = vld [vmem:[%s2811_s0 + $0x54] ss:$20 sps:$4 sm:$0xff]   ;;  %v2052_v35 = vld [vmem:[%s2810_s1 + $0x98] sm:$0xff]  }
   0xd   :  { %v2055_v33 = vld [vmem:[%s2811_s0 + $0x234] ss:$20 sps:$4 sm:$0xff]   ;;  %v2059_v37 = vld [vmem:[%s2810_s1 + $0xe0] sm:$0xff]   ;;  %v105_v39 = vld [vmem:[%s2811_s0 + $0x258] sm:$0x77] }
   0xe   :  { %v2070_v34 = vld [vmem:[%s2810_s1 + $0x108] sm:$0xff]   ;;  %v2060_v40 = vld [vmem:[%s2810_s1 + $0xa0] sm:$0xff]   ;;  %v2063_v41 = vld [vmem:[%s2811_s0 + $0x7c] ss:$20 sps:$4 sm:$0xff]   ;;  %v1598_v43 = vcombine.high %v105_v39, %v105_v39  ;;  %v1597_v48 = vcombine.low %v105_v39, %v105_v39 }
   0xf   :  { %1723 = vmatpush3.bf16.msra.mxu0 %v2023_v7  ;;  %2011 = vmatpush3.bf16.msra.mxu1 %v2023_v7  ;;  %v2061_v42 = vld [vmem:[%s2810_s1 + $0xe8] sm:$0xff]   ;;  %v2068_v45 = vld [vmem:[%s2810_s1 + $0xf0] sm:$0xff]   ;;  %v2071_v50 = vld [vmem:[%s2810_s1 + $0xf8] sm:$0xff]  }
  0x10   :  { %1724 = vmatprep.subr.bf16.mxu0 %v2024_v8  ;;  %2004 = vmatprep.subr.bf16.mxu1 %v2024_v8  ;;  %v2062_v44 = vld [vmem:[%s2810_s1 + $0xa8] sm:$0xff]   ;;  %v2091_v46 = vld [vmem:[%s2810_s1 + $0x110] sm:$0xff]   ;;  %v2073_v51 = vld [vmem:[%s2811_s0 + $0xa4] ss:$20 sps:$4 sm:$0xff]  }
  0x11   :  { %v2066_v47 = vld [vmem:[%s2811_s0 + $0x78] ss:$20 sps:$4 sm:$0xff]   ;;  %v2069_v49 = vld [vmem:[%s2810_s1 + $0xb0] sm:$0xff]   ;;  %v2075_v54 = vld [vmem:[%s2811_s0 + $0x8] ss:$20 sps:$4 sm:$0xff]  }
  0x12   :  { %v2077_v52 = vld [vmem:[%s2811_s0 + $0xc] ss:$20 sps:$4 sm:$0xff]   ;;  %v2072_v53 = vld [vmem:[%s2810_s1 + $0xb8] sm:$0xff]   ;;  %v2081_v58 = vld [vmem:[%s2811_s0 + $0x34] ss:$20 sps:$4 sm:$0xff]  }
  0x13   :  { %1725 = vmatpush3.bf16.msra.mxu0 %v2025_v9  ;;  %2012 = vmatpush3.bf16.msra.mxu1 %v2025_v9  ;;  %v2110_v55 = vld [vmem:[%s2810_s1 + $0x118] sm:$0xff]   ;;  %v2078_v56 = vld [vmem:[%s2811_s0 + $0xa0] ss:$20 sps:$4 sm:$0xff]   ;;  %v2084_v60 = vld [vmem:[%s2811_s0 + $0x30] ss:$20 sps:$4 sm:$0xff]  }
  0x14   :  { %1726 = vmatprep.subr.bf16.mxu0 %v2026_v10  ;;  %2005 = vmatprep.subr.bf16.mxu1 %v2026_v10  ;;  %v2079_v57 = vld [vmem:[%s2811_s0 + $0xcc] ss:$20 sps:$4 sm:$0xff]   ;;  %v2083_v59 = vld [vmem:[%s2811_s0 + $0xc8] ss:$20 sps:$4 sm:$0xff]   ;;  %v2089_v63 = vld [vmem:[%s2811_s0 + $0xf0] ss:$20 sps:$4 sm:$0xff]  }
  0x15   :  { %v2085_v61 = vld [vmem:[%s2811_s0 + $0xf4] ss:$20 sps:$4 sm:$0xff]   ;;  %v2087_v62 = vld [vmem:[%s2811_s0 + $0x5c] ss:$20 sps:$4 sm:$0xff]   ;;  %v2090_v0 = vld [vmem:[%s2811_s0 + $0x58] ss:$20 sps:$4 sm:$0xff]  }
  0x16   :  { %v2092_v1 = vld [vmem:[%s2811_s0 + $0x11c] ss:$20 sps:$4 sm:$0xff]   ;;  %v2094_v2 = vld [vmem:[%s2811_s0 + $0x84] ss:$20 sps:$4 sm:$0xff]   ;;  %v2097_v4 = vld [vmem:[%s2811_s0 + $0x80] ss:$20 sps:$4 sm:$0xff]  }
  0x17   :  { %1727 = vmatpush3.bf16.msra.mxu0 %v2027_v13  ;;  %2013 = vmatpush3.bf16.msra.mxu1 %v2027_v13  ;;  %v2096_v3 = vld [vmem:[%s2811_s0 + $0x118] ss:$20 sps:$4 sm:$0xff]   ;;  %v2102_v7 = vld [vmem:[%s2811_s0 + $0x140] ss:$20 sps:$4 sm:$0xff]   ;;  %v2103_v8 = vld [vmem:[%s2811_s0 + $0xa8] ss:$20 sps:$4 sm:$0xff]  }
  0x18   :  { %1728 = vmatprep.subr.bf16.mxu0 %v2028_v14  ;;  %2006 = vmatprep.subr.bf16.mxu1 %v2028_v14  ;;  %v2098_v5 = vld [vmem:[%s2811_s0 + $0x144] ss:$20 sps:$4 sm:$0xff]   ;;  %v2100_v6 = vld [vmem:[%s2811_s0 + $0xac] ss:$20 sps:$4 sm:$0xff]   ;;  %v2106_v10 = vld [vmem:[%s2811_s0 + $0xd4] ss:$20 sps:$4 sm:$0xff]  }
  0x19   :  { %v2104_v9 = vld [vmem:[%s2811_s0 + $0x16c] ss:$20 sps:$4 sm:$0xff]   ;;  %v2108_v11 = vld [vmem:[%s2811_s0 + $0x168] ss:$20 sps:$4 sm:$0xff]   ;;  %v2109_v12 = vld [vmem:[%s2811_s0 + $0xd0] ss:$20 sps:$4 sm:$0xff]  }
  0x1a   :  { %v2111_v13 = vld [vmem:[%s2811_s0 + $0x194] ss:$20 sps:$4 sm:$0xff]   ;;  %v2113_v14 = vld [vmem:[%s2811_s0 + $0xfc] ss:$20 sps:$4 sm:$0xff]   ;;  %vm1513_vm4 = vmand %vm1511_vm2, %vm1512_vm3 }
  0x1b   :  { %1729 = vmatpush3.bf16.msra.mxu0 %v2029_v15  ;;  %2014 = vmatpush3.bf16.msra.mxu1 %v2029_v15  ;;  %v2115_v15 = vld [vmem:[%s2811_s0 + $0x190] ss:$20 sps:$4 sm:$0xff]   ;;  %v2146_v39 = vld [vmem:[%s2811_s0 + $0x1e8] ss:$20 sps:$4 sm:$0xff]  }
  0x1c   :  { %1730 = vmatprep.subr.bf16.mxu0 %v2030_v16  ;;  %2007 = vmatprep.subr.bf16.mxu1 %v2030_v16  ;;  %v2116_v16 = vld [vmem:[%s2811_s0 + $0xf8] ss:$20 sps:$4 sm:$0xff]  }
  0x1f   :  { %1731 = vmatpush3.bf16.msra.mxu0 %v2031_v17  ;;  %2015 = vmatpush3.bf16.msra.mxu1 %v2031_v17  ;;  %v2117_v17 = vld [vmem:[%s2811_s0 + $0x1bc] ss:$20 sps:$4 sm:$0xff]  }
  0x20   :  { %1828 = vmatprep.subr.bf16.mxu1 %v2038_v18  ;;  %1960 = vmatprep.subr.bf16.mxu0 %v2040_v19  ;;  %v2119_v18 = vld [vmem:[%s2811_s0 + $0x124] ss:$20 sps:$4 sm:$0xff]  }
  0x22   :  { %877 = vmatmul.mubr.bf16.vlgmr.msra.gmra.mrb[0].mxu0 %v2032_v20  ;;  %973 = vmatmul.mubr.bf16.vlgmr.msra.gmra.mrb[0].mxu1 %v2035_v21  ;;  %v2122_v20 = vld [vmem:[%s2811_s0 + $0x120] ss:$20 sps:$4 sm:$0xff]  }
  0x23   :  { %1829 = vmatpush3.bf16.msra.mxu1 %v2039_v22  ;;  %1961 = vmatpush3.bf16.msra.mxu0 %v2040_v19  ;;  %v2121_v19 = vld [vmem:[%s2811_s0 + $0x1b8] ss:$20 sps:$4 sm:$0xff]   ;;  %v2125_v22 = vld [vmem:[%s2811_s0 + $0x10] ss:$20 sps:$4 sm:$0xff]  }
  0x24   :  { %1830 = vmatprep.subr.bf16.mxu1 %v2041_v23  ;;  %884 = vmatprep.mubr.bf16.mxu0 %v2043_v24  ;;  %v2123_v21 = vld [vmem:[%s2811_s0 + $0x14c] ss:$20 sps:$4 sm:$0xff]   ;;  %v2126_v23 = vld [vmem:[%s2811_s0 + $0x148] ss:$20 sps:$4 sm:$0xff]  }
  0x25   :  { %980 = vmatprep.mubr.bf16.mxu1 %v2045_v25  ;;  %1962 = vmatprep.subr.bf16.mxu0 %v2070_v34  ;;  %v2127_v24 = vld [vmem:[%s2811_s0 + $0x38] ss:$20 sps:$4 sm:$0xff]   ;;  %v2128_v25 = vld [vmem:[%s2811_s0 + $0x174] ss:$20 sps:$4 sm:$0xff]  }
  0x27   :  { %1831 = vmatpush3.bf16.msra.mxu1 %v2042_v26  ;;  %1963 = vmatpush3.bf16.msra.mxu0 %v2070_v34  ;;  %v2130_v26 = vld [vmem:[%s2811_s0 + $0x60] ss:$20 sps:$4 sm:$0xff]  }
  0x28   :  { %1832 = vmatprep.subr.bf16.mxu1 %v2049_v28  ;;  %1964 = vmatprep.subr.bf16.mxu0 %v2091_v46  ;;  %v2132_v28 = vld [vmem:[%s2811_s0 + $0x88] ss:$20 sps:$4 sm:$0xff]   ;;  %v2140_v34 = vld [vmem:[%s2811_s0 + $0x100] ss:$20 sps:$4 sm:$0xff]  }
  0x2a   :  { %885 = vmatmul.mubr.bf16.gmra.mrb[4].mxu0 %v2047_v27  ;;  %981 = vmatmul.mubr.bf16.gmra.mrb[4].mxu1 %v2048_v29  ;;  %v2131_v27 = vld [vmem:[%s2811_s0 + $0x170] ss:$20 sps:$4 sm:$0xff]  }
  0x2b   :  { %1833 = vmatpush3.bf16.msra.mxu1 %v2050_v30  ;;  %892 = vmatprep.mubr.bf16.mxu0 %v2053_v32  ;;  %v2133_v29 = vld [vmem:[%s2811_s0 + $0x19c] ss:$20 sps:$4 sm:$0xff]   ;;  %v2137_v32 = vld [vmem:[%s2811_s0 + $0xd8] ss:$20 sps:$4 sm:$0xff]  }
  0x2c   :  { %1834 = vmatprep.subr.bf16.mxu1 %v2051_v31  ;;  %988 = vmatprep.mubr.bf16.mxu1 %v2055_v33  ;;  %v2135_v30 = vld [vmem:[%s2811_s0 + $0xb0] ss:$20 sps:$4 sm:$0xff]   ;;  %v2136_v31 = vld [vmem:[%s2811_s0 + $0x198] ss:$20 sps:$4 sm:$0xff]  }
  0x2d   :  { %1965 = vmatpush3.bf16.msra.mxu0 %v2091_v46  ;;  %v2138_v33 = vld [vmem:[%s2811_s0 + $0x1c4] ss:$20 sps:$4 sm:$0xff]  }
  0x2e   :  { %1966 = vmatprep.subr.bf16.mxu0 %v2110_v55  ;;  %v2155_v46 = vld [vmem:[%s2811_s0 + $0x1f0] ss:$20 sps:$4 sm:$0xff]  }
  0x2f   :  { %1835 = vmatpush3.bf16.msra.mxu1 %v2052_v35  ;;  %v2141_v35 = vld [vmem:[%s2811_s0 + $0x1c0] ss:$20 sps:$4 sm:$0xff]  }
  0x30   :  { %1836 = vmatprep.subr.bf16.mxu1 %v2059_v37  ;;  %v2143_v37 = vld [vmem:[%s2811_s0 + $0x1ec] ss:$20 sps:$4 sm:$0xff]  }
  0x31   :  { %1967 = vmatpush3.bf16.msra.mxu0 %v2110_v55 }
  0x32   :  { %893 = vmatmul.mubr.bf16.gmra.mrb[8].mxu0 %v2057_v36  ;;  %989 = vmatmul.mubr.bf16.gmra.mrb[8].mxu1 %v2058_v38  ;;  %v2142_v36 = vld [vmem:[%s2811_s0 + $0x128] ss:$20 sps:$4 sm:$0xff]   ;;  %v2145_v38 = vld [vmem:[%s2811_s0 + $0x150] ss:$20 sps:$4 sm:$0xff]  }
  0x33   :  { %1837 = vmatpush3.bf16.msra.mxu1 %v2060_v40  ;;  %900 = vmatprep.mubr.bf16.mxu0 %v2063_v41  ;;  %v2147_v40 = vld [vmem:[%s2811_s0 + $0x178] ss:$20 sps:$4 sm:$0xff]   ;;  %v2148_v41 = vld [vmem:[%s2811_s0 + $0x214] ss:$20 sps:$4 sm:$0xff]  }
  0x34   :  { %1838 = vmatprep.subr.bf16.mxu1 %v2061_v42  ;;  %996 = vmatprep.mubr.bf16.mxu1 %v1598_v43  ;;  %v2150_v42 = vld [vmem:[%s2811_s0 + $0x1a0] ss:$20 sps:$4 sm:$0xff]   ;;  %v2151_v43 = vld [vmem:[%s2811_s0 + $0x210] ss:$20 sps:$4 sm:$0xff]  }
  0x37   :  { %1839 = vmatpush3.bf16.msra.mxu1 %v2062_v44  ;;  %v2152_v44 = vld [vmem:[%s2811_s0 + $0x1c8] ss:$20 sps:$4 sm:$0xff]  }
  0x38   :  { %1840 = vmatprep.subr.bf16.mxu1 %v2068_v45  ;;  %v2153_v45 = vld [vmem:[%s2811_s0 + $0x23c] ss:$20 sps:$4 sm:$0xff]  }
  0x3a   :  { %901 = vmatmul.mubr.bf16.gmra.mrb[12].mxu0 %v2066_v47  ;;  %997 = vmatmul.mubr.bf16.gmra.mrb[12].mxu1 %v1597_v48  ;;  %v106_v47 = vld [vmem:[%s2811_s0 + $0x260] sm:$0x77]  ;;  %v2156_v48 = vld [vmem:[%s2811_s0 + $0x238] ss:$20 sps:$4 sm:$0xff]  }
  0x3b   :  { %1841 = vmatpush3.bf16.msra.mxu1 %v2069_v49  ;;  %908 = vmatprep.mubr.bf16.mxu0 %v2073_v51  ;;  %v2157_v49 = vld [vmem:[%s2811_s0 + $0x218] ss:$20 sps:$4 sm:$0xff]   ;;  %v2159_v51 = vld [vmem:[%s2811_s0 + $0x240] ss:$20 sps:$4 sm:$0xff]  }
  0x3c   :  { %1842 = vmatprep.subr.bf16.mxu1 %v2071_v50  ;;  %1036 = vmatprep.mubr.bf16.mxu1 %v2077_v52  ;;  %v1600_v50 = vcombine.high %v106_v47, %v106_v47  ;;  %v1599_v52 = vcombine.low %v106_v47, %v106_v47 }
  0x3f   :  { %1843 = vmatpush3.bf16.msra.mxu1 %v2072_v53  ;;  %v2161_v53 = vld [vmem:[%s2811_s0 + $0x268] ss:$0 sps:$4 sm:$0x77]  }
  0x42   :  { %909 = vmatmul.mubr.bf16.gmra.mrb[16].mxu0 %v2078_v56  ;;  %1037 = vmatmul.mubr.bf16.vlgmr.msra.gmra.mrb[16].mxu1 %v2075_v54 }
  0x43   :  { %916 = vmatprep.mubr.bf16.mxu0 %v2079_v57  ;;  %1044 = vmatprep.mubr.bf16.mxu1 %v2081_v58 }
  0x4a   :  { %917 = vmatmul.mubr.bf16.gmra.mrb[20].mxu0 %v2083_v59  ;;  %1045 = vmatmul.mubr.bf16.gmra.mrb[20].mxu1 %v2084_v60 }
  0x4b   :  { %924 = vmatprep.mubr.bf16.mxu0 %v2085_v61  ;;  %1052 = vmatprep.mubr.bf16.mxu1 %v2087_v62 }
  0x52   :  { %925 = vmatmul.mubr.bf16.gmra.mrb[24].mxu0 %v2089_v63  ;;  %1053 = vmatmul.mubr.bf16.gmra.mrb[24].mxu1 %v2090_v0 }
  0x53   :  { %932 = vmatprep.mubr.bf16.mxu0 %v2092_v1  ;;  %1060 = vmatprep.mubr.bf16.mxu1 %v2094_v2 }
  0x5a   :  { %933 = vmatmul.mubr.bf16.gmra.mrb[28].mxu0 %v2096_v3  ;;  %1061 = vmatmul.mubr.bf16.gmra.mrb[28].mxu1 %v2097_v4 }
  0x5b   :  { %940 = vmatprep.mubr.bf16.mxu0 %v2098_v5  ;;  %1068 = vmatprep.mubr.bf16.mxu1 %v2100_v6 }
  0x62   :  { %941 = vmatmul.mubr.bf16.gmra.mrb[32].mxu0 %v2102_v7  ;;  %1069 = vmatmul.mubr.bf16.gmra.mrb[32].mxu1 %v2103_v8 }
  0x63   :  { %948 = vmatprep.mubr.bf16.mxu0 %v2104_v9  ;;  %1076 = vmatprep.mubr.bf16.mxu1 %v2106_v10 }
  0x6a   :  { %949 = vmatmul.mubr.bf16.gmra.mrb[36].mxu0 %v2108_v11  ;;  %1077 = vmatmul.mubr.bf16.gmra.mrb[36].mxu1 %v2109_v12 }
  0x6b   :  { %956 = vmatprep.mubr.bf16.mxu0 %v2111_v13  ;;  %1084 = vmatprep.mubr.bf16.mxu1 %v2113_v14 }
  0x72   :  { %957 = vmatmul.mubr.bf16.gmra.mrb[40].mxu0 %v2115_v15  ;;  %1085 = vmatmul.mubr.bf16.gmra.mrb[40].mxu1 %v2116_v16 }
  0x73   :  { %964 = vmatprep.mubr.bf16.mxu0 %v2117_v17  ;;  %1092 = vmatprep.mubr.bf16.mxu1 %v2119_v18 }
  0x7a   :  { %965 = vmatmul.mubr.bf16.gmra.mrb[44].mxu0 %v2121_v19  ;;  %1093 = vmatmul.mubr.bf16.gmra.mrb[44].mxu1 %v2122_v20 }
  0x7b   :  { %1100 = vmatprep.mubr.bf16.mxu1 %v2123_v21  ;;  %1968 = vmatprep.mubr.msk.bf16.mxu0 %vm795_vm0, %v2125_v22 }
  0x82   :  { %1101 = vmatmul.mubr.bf16.gmra.mrb[48].mxu1 %v2126_v23  ;;  %1969 = vmatmul.mubr.msk.bf16.vlgmr.msra.gmra.mrb[48].mxu0 %vm795_vm0, %v2127_v24 }
  0x83   :  { %1108 = vmatprep.mubr.bf16.mxu1 %v2128_v25  ;;  %1972 = vmatprep.mubr.msk.bf16.mxu0 %vm795_vm0, %v2130_v26 }
  0x8a   :  { %1109 = vmatmul.mubr.bf16.gmra.mrb[52].mxu1 %v2131_v27  ;;  %1973 = vmatmul.mubr.msk.bf16.gmra.mrb[52].mxu0 %vm795_vm0, %v2132_v28 }
  0x8b   :  { %1116 = vmatprep.mubr.bf16.mxu1 %v2133_v29  ;;  %1976 = vmatprep.mubr.msk.bf16.mxu0 %vm795_vm0, %v2135_v30 }
  0x92   :  { %1117 = vmatmul.mubr.bf16.gmra.mrb[56].mxu1 %v2136_v31  ;;  %1977 = vmatmul.mubr.msk.bf16.gmra.mrb[56].mxu0 %vm795_vm0, %v2137_v32 }
  0x93   :  { %1124 = vmatprep.mubr.bf16.mxu1 %v2138_v33  ;;  %1980 = vmatprep.mubr.msk.bf16.mxu0 %vm795_vm0, %v2140_v34 }
  0x9a   :  { %1125 = vmatmul.mubr.bf16.gmra.mrb[60].mxu1 %v2141_v35  ;;  %1981 = vmatmul.mubr.msk.bf16.gmra.mrb[60].mxu0 %vm795_vm0, %v2142_v36 }
  0x9b   :  { %1132 = vmatprep.mubr.bf16.mxu1 %v2143_v37  ;;  %1984 = vmatprep.mubr.msk.bf16.mxu0 %vm795_vm0, %v2145_v38 }
  0xa2   :  { %1133 = vmatmul.mubr.bf16.gmra.mrb[64].mxu1 %v2146_v39  ;;  %1985 = vmatmul.mubr.msk.bf16.gmra.mrb[64].mxu0 %vm795_vm0, %v2147_v40  ;;  %v2557_v39 = vld [vmem:[%s2812_s2] ss:$0 sm:$0xff] }
  0xa3   :  { %1140 = vmatprep.mubr.bf16.mxu1 %v2148_v41  ;;  %1988 = vmatprep.mubr.msk.bf16.mxu0 %vm795_vm0, %v2150_v42 }
  0xaa   :  { %1141 = vmatmul.mubr.bf16.gmra.mrb[68].mxu1 %v2151_v43  ;;  %1989 = vmatmul.mubr.msk.bf16.gmra.mrb[68].mxu0 %vm795_vm0, %v2152_v44 }
  0xab   :  { %1148 = vmatprep.mubr.bf16.mxu1 %v2153_v45  ;;  %1992 = vmatprep.mubr.msk.bf16.mxu0 %vm795_vm0, %v2155_v46 }
  0xb2   :  { %1149 = vmatmul.mubr.bf16.gmra.mrb[72].mxu1 %v2156_v48  ;;  %1993 = vmatmul.mubr.msk.bf16.gmra.mrb[72].mxu0 %vm795_vm0, %v2157_v49 }
  0xb3   :  { %1156 = vmatprep.mubr.bf16.mxu1 %v1600_v50  ;;  %1996 = vmatprep.mubr.msk.bf16.mxu0 %vm795_vm0, %v2159_v51 }
  0xba   :  { %1157 = vmatmul.mubr.bf16.gmra.mrb[76].mxu1 %v1599_v52  ;;  %1997 = vmatmul.mubr.msk.bf16.gmra.mrb[76].mxu0 %vm795_vm0, %v2161_v53 }
  0xf5   :  { %v1804_v54 = vpop.f32.mrb[0].mxu1  ;;  %v1732_v55 = vpop.f32.mrb[0].mxu0 }
  0xf6   :  { %v1805_v56 = vpop.f32.mrb[1].mxu1  ;;  %v1733_v57 = vpop.f32.mrb[1].mxu0 }
  0xf7   :  { %v2540_v58 = vadd.f32 %v1805_v56, %v1804_v54  ;;  %v1734_v59 = vadd.f32 %v1733_v57, %v1732_v55  ;;  %v1807_v60 = vpop.f32.mrb[2].mxu1  ;;  %v1735_v61 = vpop.f32.mrb[2].mxu0 }
  0xf8   :  { %v1808_v62 = vpop.f32.mrb[3].mxu1  ;;  %v1736_v63 = vpop.f32.mrb[3].mxu0 }
  0xf9   :  { %v2542_v0 = vadd.f32 %v1808_v62, %v1807_v60  ;;  %v1737_v1 = vadd.f32 %v1736_v63, %v1735_v61  ;;  %v879_v42 = vadd.f32 %v1734_v59, %v2557_v39 }
  0xfb   :  { %v882_v49 = vadd.f32 %v1737_v1, %v2557_v39 }
  0xfd   :  { %v1810_v2 = vpop.f32.mrb[4].mxu1  ;;  %v1738_v3 = vpop.f32.mrb[4].mxu0 }
  0xfe   :  { %v1811_v4 = vpop.f32.mrb[5].mxu1  ;;  %v1739_v5 = vpop.f32.mrb[5].mxu0 }
  0xff   :  { %v2544_v6 = vadd.f32 %v1811_v4, %v1810_v2  ;;  %v1740_v7 = vadd.f32 %v1739_v5, %v1738_v3  ;;  %v1813_v8 = vpop.f32.mrb[6].mxu1  ;;  %v1741_v9 = vpop.f32.mrb[6].mxu0 }
 0x100   :  { %v1814_v10 = vpop.f32.mrb[7].mxu1  ;;  %v1742_v11 = vpop.f32.mrb[7].mxu0 }
 0x101   :  { %v2546_v12 = vadd.f32 %v1814_v10, %v1813_v8  ;;  %v1743_v13 = vadd.f32 %v1742_v11, %v1741_v9  ;;  %v887_v59 = vadd.f32 %v1740_v7, %v2557_v39 }
 0x103   :  { %v890_v1 = vadd.f32 %v1743_v13, %v2557_v39 }
 0x105   :  { %v1816_v14 = vpop.f32.mrb[8].mxu1  ;;  %v1744_v15 = vpop.f32.mrb[8].mxu0 }
 0x106   :  { %v1817_v16 = vpop.f32.mrb[9].mxu1  ;;  %v1745_v17 = vpop.f32.mrb[9].mxu0 }
 0x107   :  { %v2548_v18 = vadd.f32 %v1817_v16, %v1816_v14  ;;  %v1746_v19 = vadd.f32 %v1745_v17, %v1744_v15  ;;  %v1819_v20 = vpop.f32.mrb[10].mxu1  ;;  %v1747_v21 = vpop.f32.mrb[10].mxu0 }
 0x108   :  { %v1820_v22 = vpop.f32.mrb[11].mxu1  ;;  %v1748_v23 = vpop.f32.mrb[11].mxu0 }
 0x109   :  { %v2550_v24 = vadd.f32 %v1820_v22, %v1819_v20  ;;  %v1749_v25 = vadd.f32 %v1748_v23, %v1747_v21  ;;  %v895_v7 = vadd.f32 %v1746_v19, %v2557_v39 }
 0x10b   :  { %v898_v13 = vadd.f32 %v1749_v25, %v2557_v39 }
 0x10d   :  { %v1822_v26 = vpop.f32.mrb[12].mxu1  ;;  %v1750_v27 = vpop.f32.mrb[12].mxu0 }
 0x10e   :  { %v1823_v28 = vpop.f32.mrb[13].mxu1  ;;  %v1751_v29 = vpop.f32.mrb[13].mxu0 }
 0x10f   :  { %v2552_v30 = vadd.f32 %v1823_v28, %v1822_v26  ;;  %v1752_v31 = vadd.f32 %v1751_v29, %v1750_v27  ;;  %v1825_v32 = vpop.f32.mrb[14].mxu1  ;;  %v1753_v33 = vpop.f32.mrb[14].mxu0 }
 0x110   :  { %v1826_v34 = vpop.f32.mrb[15].mxu1  ;;  %v1754_v35 = vpop.f32.mrb[15].mxu0 }
 0x111   :  { %v1755_v36 = vadd.f32 %v1754_v35, %v1753_v33  ;;  %v903_v19 = vadd.f32 %v1752_v31, %v2557_v39 }
 0x113   :  { %v906_v25 = vadd.f32 %v1755_v36, %v2557_v39 }
 0x115   :  { %v1844_v37 = vpop.f32.mrb[16].mxu1  ;;  %v1756_v38 = vpop.f32.mrb[16].mxu0 }
 0x116   :  { %v1845_v40 = vpop.f32.mrb[17].mxu1  ;;  %v1757_v41 = vpop.f32.mrb[17].mxu0 }
 0x117   :  { %v1846_v43 = vadd.f32 %v1845_v40, %v1844_v37  ;;  %v1758_v44 = vadd.f32 %v1757_v41, %v1756_v38  ;;  %v1847_v45 = vpop.f32.mrb[18].mxu1  ;;  %v1759_v46 = vpop.f32.mrb[18].mxu0 }
 0x118   :  { %v1848_v47 = vpop.f32.mrb[19].mxu1  ;;  %v1760_v48 = vpop.f32.mrb[19].mxu0 }
 0x119   :  { %v1849_v50 = vadd.f32 %v1848_v47, %v1847_v45  ;;  %v1761_v51 = vadd.f32 %v1760_v48, %v1759_v46  ;;  %v2561_v52 = vadd.f32 %v1846_v43, %v879_v42  ;;  %v911_v31 = vadd.f32 %v1758_v44, %v2557_v39 }
 0x11b   :  { %v2563_v53 = vadd.f32 %v1849_v50, %v882_v49  ;;  %v914_v36 = vadd.f32 %v1761_v51, %v2557_v39 }
 0x11d   :  { %v1850_v54 = vpop.f32.mrb[20].mxu1  ;;  %v1762_v55 = vpop.f32.mrb[20].mxu0 }
 0x11e   :  { %v1851_v56 = vpop.f32.mrb[21].mxu1  ;;  %v1763_v57 = vpop.f32.mrb[21].mxu0 }
 0x11f   :  { %v1852_v60 = vadd.f32 %v1851_v56, %v1850_v54  ;;  %v1764_v61 = vadd.f32 %v1763_v57, %v1762_v55  ;;  %v1853_v62 = vpop.f32.mrb[22].mxu1  ;;  %v1765_v63 = vpop.f32.mrb[22].mxu0 }
 0x120   :  { %v1854_v2 = vpop.f32.mrb[23].mxu1  ;;  %v1766_v3 = vpop.f32.mrb[23].mxu0 }
 0x121   :  { %v1855_v4 = vadd.f32 %v1854_v2, %v1853_v62  ;;  %v1767_v5 = vadd.f32 %v1766_v3, %v1765_v63  ;;  %v2567_v8 = vadd.f32 %v1852_v60, %v887_v59  ;;  %v919_v44 = vadd.f32 %v1764_v61, %v2557_v39 }
 0x123   :  { %v2569_v9 = vadd.f32 %v1855_v4, %v890_v1  ;;  %v922_v51 = vadd.f32 %v1767_v5, %v2557_v39 }
 0x125   :  { %v1856_v10 = vpop.f32.mrb[24].mxu1  ;;  %v1768_v11 = vpop.f32.mrb[24].mxu0 }
 0x126   :  { %v1857_v14 = vpop.f32.mrb[25].mxu1  ;;  %v1769_v15 = vpop.f32.mrb[25].mxu0 }
 0x127   :  { %v1858_v16 = vadd.f32 %v1857_v14, %v1856_v10  ;;  %v1770_v17 = vadd.f32 %v1769_v15, %v1768_v11  ;;  %v1859_v20 = vpop.f32.mrb[26].mxu1  ;;  %v1771_v21 = vpop.f32.mrb[26].mxu0 }
 0x128   :  { %v1860_v22 = vpop.f32.mrb[27].mxu1  ;;  %v1772_v23 = vpop.f32.mrb[27].mxu0 }
 0x129   :  { %v1861_v26 = vadd.f32 %v1860_v22, %v1859_v20  ;;  %v1773_v27 = vadd.f32 %v1772_v23, %v1771_v21  ;;  %v2573_v28 = vadd.f32 %v1858_v16, %v895_v7 }
 0x12b   :  { %v2575_v29 = vadd.f32 %v1861_v26, %v898_v13 }
 0x12d   :  { %v1862_v32 = vpop.f32.mrb[28].mxu1  ;;  %v1774_v33 = vpop.f32.mrb[28].mxu0 }
 0x12e   :  { %v1863_v34 = vpop.f32.mrb[29].mxu1  ;;  %v1775_v35 = vpop.f32.mrb[29].mxu0 }
 0x12f   :  { %v1864_v37 = vadd.f32 %v1863_v34, %v1862_v32  ;;  %v1776_v38 = vadd.f32 %v1775_v35, %v1774_v33  ;;  %v1865_v40 = vpop.f32.mrb[30].mxu1  ;;  %v1777_v41 = vpop.f32.mrb[30].mxu0 }
 0x130   :  { %v1866_v42 = vpop.f32.mrb[31].mxu1  ;;  %v1778_v43 = vpop.f32.mrb[31].mxu0 }
 0x131   :  { %v1867_v45 = vadd.f32 %v1866_v42, %v1865_v40  ;;  %v1779_v46 = vadd.f32 %v1778_v43, %v1777_v41  ;;  %v2579_v47 = vadd.f32 %v1864_v37, %v903_v19  ;;  %v927_v37 = vadd.f32 %v1770_v17, %v2557_v39 }
 0x133   :  { %v2581_v48 = vadd.f32 %v1867_v45, %v906_v25  ;;  %v930_v45 = vadd.f32 %v1773_v27, %v2557_v39 }
 0x135   :  { %v1868_v49 = vpop.f32.mrb[32].mxu1  ;;  %v1780_v50 = vpop.f32.mrb[32].mxu0 }
 0x136   :  { %v1869_v54 = vpop.f32.mrb[33].mxu1  ;;  %v1781_v55 = vpop.f32.mrb[33].mxu0 }
 0x137   :  { %v1870_v56 = vadd.f32 %v1869_v54, %v1868_v49  ;;  %v2584_v57 = vadd.f32 %v1781_v55, %v1780_v50  ;;  %v1871_v59 = vpop.f32.mrb[34].mxu1  ;;  %v1783_v60 = vpop.f32.mrb[34].mxu0 }
 0x138   :  { %v1872_v62 = vpop.f32.mrb[35].mxu1  ;;  %v1784_v63 = vpop.f32.mrb[35].mxu0 }
 0x139   :  { %v1873_v2 = vadd.f32 %v1872_v62, %v1871_v59  ;;  %v1785_v3 = vadd.f32 %v1784_v63, %v1783_v60  ;;  %v2587_v1 = vadd.f32 %v1870_v56, %v911_v31  ;;  %v935_v60 = vadd.f32 %v1776_v38, %v2557_v39 }
 0x13b   :  { %v2589_v4 = vadd.f32 %v1873_v2, %v914_v36 }
 0x13d   :  { %v1874_v10 = vpop.f32.mrb[36].mxu1  ;;  %v1786_v11 = vpop.f32.mrb[36].mxu0 }
 0x13e   :  { %v1875_v14 = vpop.f32.mrb[37].mxu1  ;;  %v1787_v15 = vpop.f32.mrb[37].mxu0 }
 0x13f   :  { %v1876_v7 = vadd.f32 %v1875_v14, %v1874_v10  ;;  %v2592_v16 = vadd.f32 %v1787_v15, %v1786_v11  ;;  %v1877_v20 = vpop.f32.mrb[38].mxu1  ;;  %v1789_v21 = vpop.f32.mrb[38].mxu0  ;;  %v938_v11 = vadd.f32 %v1779_v46, %v2557_v39 }
 0x140   :  { %v1878_v22 = vpop.f32.mrb[39].mxu1  ;;  %v1790_v23 = vpop.f32.mrb[39].mxu0 }
 0x141   :  { %v1879_v13 = vadd.f32 %v1878_v22, %v1877_v20  ;;  %v2595_v26 = vadd.f32 %v1790_v23, %v1789_v21  ;;  %v2597_v32 = vadd.f32 %v1876_v7, %v919_v44 }
 0x143   :  { %v2599_v33 = vadd.f32 %v1879_v13, %v922_v51  ;;  %v943_v51 = vadd.f32 %v2584_v57, %v2557_v39 }
 0x145   :  { %v1880_v34 = vpop.f32.mrb[40].mxu1  ;;  %v1792_v35 = vpop.f32.mrb[40].mxu0 }
 0x146   :  { %v1881_v19 = vpop.f32.mrb[41].mxu1  ;;  %v1793_v61 = vpop.f32.mrb[41].mxu0 }
 0x147   :  { %v1882_v40 = vadd.f32 %v1881_v19, %v1880_v34  ;;  %v2602_v41 = vadd.f32 %v1793_v61, %v1792_v35  ;;  %v1883_v42 = vpop.f32.mrb[42].mxu1  ;;  %v1795_v43 = vpop.f32.mrb[42].mxu0  ;;  %v946_v19 = vadd.f32 %v1785_v3, %v2557_v39 }
 0x148   :  { %v1884_v25 = vpop.f32.mrb[43].mxu1  ;;  %v1796_v5 = vpop.f32.mrb[43].mxu0 }
 0x149   :  { %v1885_v49 = vadd.f32 %v1884_v25, %v1883_v42  ;;  %v2605_v50 = vadd.f32 %v1796_v5, %v1795_v43  ;;  %v2607_v54 = vadd.f32 %v1882_v40, %v927_v37 }
 0x14b   :  { %v2609_v55 = vadd.f32 %v1885_v49, %v930_v45 }
 0x14d   :  { %v1886_v31 = vpop.f32.mrb[44].mxu1  ;;  %v1798_v56 = vpop.f32.mrb[44].mxu0 }
 0x14e   :  { %v1887_v59 = vpop.f32.mrb[45].mxu1  ;;  %v1799_v17 = vpop.f32.mrb[45].mxu0 }
 0x14f   :  { %v1888_v62 = vadd.f32 %v1887_v59, %v1886_v31  ;;  %v2612_v63 = vadd.f32 %v1799_v17, %v1798_v56  ;;  %v1889_v36 = vpop.f32.mrb[46].mxu1  ;;  %v1801_v2 = vpop.f32.mrb[46].mxu0 }
 0x150   :  { %v1890_v10 = vpop.f32.mrb[47].mxu1  ;;  %v1802_v27 = vpop.f32.mrb[47].mxu0 }
 0x151   :  { %v1891_v14 = vadd.f32 %v1890_v10, %v1889_v36  ;;  %v2615_v15 = vadd.f32 %v1802_v27, %v1801_v2  ;;  %v2617_v44 = vadd.f32 %v1888_v62, %v935_v60  ;;  %v951_v62 = vadd.f32 %v2592_v16, %v2557_v39 }
 0x153   :  { %v2619_v7 = vadd.f32 %v1891_v14, %v938_v11  ;;  %v954_v11 = vadd.f32 %v2595_v26, %v2557_v39 }
 0x155   :  { %v1892_v20 = vpop.f32.mrb[48].mxu1  ;;  %v1970_v21 = vpop.f32.mrb[48].mxu0 }
 0x156   :  { %v1207_v38 = vadd.f32 %v1970_v21, %v2567_v8  ;;  %v1893_v22 = vpop.f32.mrb[49].mxu1  ;;  %v1198_v23 = vpop.f32.mrb[49].mxu0 }
 0x157   :  { %v1894_v13 = vadd.f32 %v1893_v22, %v1892_v20  ;;  %v1199_v34 = vadd.f32 %v1198_v23, %v2561_v52  ;;  %v1895_v46 = vpop.f32.mrb[50].mxu1  ;;  %v1971_v35 = vpop.f32.mrb[50].mxu0 }
 0x158   :  { %v1326_v61 = vmax.f32 %v1207_v38, 0.0  ;;  %v1210_v37 = vadd.f32 %v1971_v35, %v2569_v9  ;;  %v1896_v40 = vpop.f32.mrb[51].mxu1  ;;  %v1201_v42 = vpop.f32.mrb[51].mxu0 }
 0x159   :  { %v1324_v43 = vmax.f32 %v1199_v34, 0.0  ;;  %v1897_v8 = vadd.f32 %v1896_v40, %v1895_v46  ;;  %v1202_v25 = vadd.f32 %v1201_v42, %v2563_v53  ;;  %v2628_v5 = vadd.f32 %v1894_v13, %v943_v51 }
 0x15a   :  { %v1687_v57 = vpack.c.bf16 %v1326_v61, %v1326_v61  ;;  %v1327_v45 = vmax.f32 %v1210_v37, 0.0  ;;  %v959_v40 = vadd.f32 %v2602_v41, %v2557_v39 }
 0x15b   :  { %v1685_v49 = vpack.c.bf16 %v1324_v43, %v1324_v43  ;;  %v1325_v52 = vmax.f32 %v1202_v25, 0.0  ;;  %v2630_v31 = vadd.f32 %v1897_v8, %v946_v19 }
 0x15c   :  { %1483 = vst.msk [vmem:[%s2813_s3 + $0x8] sm:$0xf] %vm1480_vm1, %v1687_v57  ;;  %v1688_v9 = vpack.c.bf16 %v1327_v45, %v1327_v45  ;;  %v962_v57 = vadd.f32 %v2605_v50, %v2557_v39 }
 0x15d   :  { %1481 = vst.msk [vmem:[%s2813_s3] sm:$0xf] %vm1480_vm1, %v1685_v49  ;;  %v1686_v53 = vpack.c.bf16 %v1325_v52, %v1325_v52  ;;  %v1898_v3 = vpop.f32.mrb[52].mxu1  ;;  %v1974_v56 = vpop.f32.mrb[52].mxu0 }
 0x15e   :  { %1484 = vst.msk [vmem:[%s2813_s3 + $0xc] sm:$0xf] %vm1480_vm1, %v1688_v9  ;;  %v1223_v59 = vadd.f32 %v1974_v56, %v2579_v47  ;;  %v1899_v17 = vpop.f32.mrb[53].mxu1  ;;  %v1214_v60 = vpop.f32.mrb[53].mxu0 }
 0x15f   :  { %1482 = vst.msk [vmem:[%s2813_s3 + $0x4] sm:$0xf] %vm1480_vm1, %v1686_v53  ;;  %v1900_v36 = vadd.f32 %v1899_v17, %v1898_v3  ;;  %v1215_v2 = vadd.f32 %v1214_v60, %v2573_v28  ;;  %v1901_v10 = vpop.f32.mrb[54].mxu1  ;;  %v1975_v27 = vpop.f32.mrb[54].mxu0 }
 0x160   :  { %v1330_v14 = vmax.f32 %v1223_v59, 0.0  ;;  %v1226_v47 = vadd.f32 %v1975_v27, %v2581_v48  ;;  %v1902_v20 = vpop.f32.mrb[55].mxu1  ;;  %v1217_v21 = vpop.f32.mrb[55].mxu0  ;;  %v967_v27 = vadd.f32 %v2612_v63, %v2557_v39 }
 0x161   :  { %v1328_v38 = vmax.f32 %v1215_v2, 0.0  ;;  %v1903_v16 = vadd.f32 %v1902_v20, %v1901_v10  ;;  %v1218_v22 = vadd.f32 %v1217_v21, %v2575_v29  ;;  %v2656_v23 = vadd.f32 %v1900_v36, %v951_v62 }
 0x162   :  { %v1691_v51 = vpack.c.bf16 %v1330_v14, %v1330_v14  ;;  %v1331_v13 = vmax.f32 %v1226_v47, 0.0  ;;  %v970_v21 = vadd.f32 %v2615_v15, %v2557_v39 }
 0x163   :  { %v1689_v34 = vpack.c.bf16 %v1328_v38, %v1328_v38  ;;  %v1329_v28 = vmax.f32 %v1218_v22, 0.0  ;;  %v2658_v46 = vadd.f32 %v1903_v16, %v954_v11 }
 0x164   :  { %1487 = vst.msk [vmem:[%s2813_s3 + $0x18] sm:$0xf] %vm1480_vm1, %v1691_v51  ;;  %v1692_v48 = vpack.c.bf16 %v1331_v13, %v1331_v13 }
 0x165   :  { %1485 = vst.msk [vmem:[%s2813_s3 + $0x10] sm:$0xf] %vm1480_vm1, %v1689_v34  ;;  %v1690_v29 = vpack.c.bf16 %v1329_v28, %v1329_v28  ;;  %v1904_v26 = vpop.f32.mrb[56].mxu1  ;;  %v1978_v35 = vpop.f32.mrb[56].mxu0 }
 0x166   :  { %1488 = vst.msk [vmem:[%s2813_s3 + $0x1c] sm:$0xf] %vm1480_vm1, %v1692_v48  ;;  %v1239_v19 = vadd.f32 %v1978_v35, %v2597_v32  ;;  %v1905_v61 = vpop.f32.mrb[57].mxu1  ;;  %v1230_v37 = vpop.f32.mrb[57].mxu0 }
 0x167   :  { %1486 = vst.msk [vmem:[%s2813_s3 + $0x14] sm:$0xf] %vm1480_vm1, %v1690_v29  ;;  %v1906_v42 = vadd.f32 %v1905_v61, %v1904_v26  ;;  %v1231_v43 = vadd.f32 %v1230_v37, %v2587_v1  ;;  %v1907_v8 = vpop.f32.mrb[58].mxu1  ;;  %v1979_v25 = vpop.f32.mrb[58].mxu0 }
 0x168   :  { %v1334_v45 = vmax.f32 %v1239_v19, 0.0  ;;  %v1242_v32 = vadd.f32 %v1979_v25, %v2599_v33  ;;  %v1908_v49 = vpop.f32.mrb[59].mxu1  ;;  %v1233_v52 = vpop.f32.mrb[59].mxu0 }
 0x169   :  { %v1332_v9 = vmax.f32 %v1231_v43, 0.0  ;;  %v1909_v41 = vadd.f32 %v1908_v49, %v1907_v8  ;;  %v1234_v53 = vadd.f32 %v1233_v52, %v2589_v4  ;;  %v2684_v3 = vadd.f32 %v1906_v42, %v959_v40 }
 0x16a   :  { %v1695_v56 = vpack.c.bf16 %v1334_v45, %v1334_v45  ;;  %v1335_v59 = vmax.f32 %v1242_v32, 0.0  ;;  %v975_v40 = vadd.f32 %v2540_v58, %v2557_v39 }
 0x16b   :  { %v1693_v17 = vpack.c.bf16 %v1332_v9, %v1332_v9  ;;  %v1333_v1 = vmax.f32 %v1234_v53, 0.0  ;;  %v2686_v60 = vadd.f32 %v1909_v41, %v962_v57  ;;  %v978_v57 = vadd.f32 %v2542_v0, %v2557_v39 }
 0x16c   :  { %1491 = vst.msk [vmem:[%s2813_s3 + $0x28] sm:$0xf] %vm1480_vm1, %v1695_v56  ;;  %v1696_v33 = vpack.c.bf16 %v1335_v59, %v1335_v59 }
 0x16d   :  { %1489 = vst.msk [vmem:[%s2813_s3 + $0x20] sm:$0xf] %vm1480_vm1, %v1693_v17  ;;  %v1694_v4 = vpack.c.bf16 %v1333_v1, %v1333_v1  ;;  %v1910_v50 = vpop.f32.mrb[60].mxu1  ;;  %v1982_v62 = vpop.f32.mrb[60].mxu0 }
 0x16e   :  { %1492 = vst.msk [vmem:[%s2813_s3 + $0x2c] sm:$0xf] %vm1480_vm1, %v1696_v33  ;;  %v1255_v36 = vadd.f32 %v1982_v62, %v2617_v44  ;;  %v1911_v2 = vpop.f32.mrb[61].mxu1  ;;  %v1246_v10 = vpop.f32.mrb[61].mxu0  ;;  %v983_v62 = vadd.f32 %v2544_v6, %v2557_v39 }
 0x16f   :  { %1490 = vst.msk [vmem:[%s2813_s3 + $0x24] sm:$0xf] %vm1480_vm1, %v1694_v4  ;;  %v1912_v11 = vadd.f32 %v1911_v2, %v1910_v50  ;;  %v1247_v14 = vadd.f32 %v1246_v10, %v2607_v54  ;;  %v1913_v47 = vpop.f32.mrb[62].mxu1  ;;  %v1983_v20 = vpop.f32.mrb[62].mxu0 }
 0x170   :  { %v1338_v38 = vmax.f32 %v1255_v36, 0.0  ;;  %v1258_v44 = vadd.f32 %v1983_v20, %v2619_v7  ;;  %v1914_v16 = vpop.f32.mrb[63].mxu1  ;;  %v1249_v22 = vpop.f32.mrb[63].mxu0 }
 0x171   :  { %v1336_v51 = vmax.f32 %v1247_v14, 0.0  ;;  %v1915_v63 = vadd.f32 %v1914_v16, %v1913_v47  ;;  %v1250_v13 = vadd.f32 %v1249_v22, %v2609_v55  ;;  %v1127_v34 = vadd.f32 %v1912_v11, %v967_v27 }
 0x172   :  { %v1699_v28 = vpack.c.bf16 %v1338_v38, %v1338_v38  ;;  %v1339_v48 = vmax.f32 %v1258_v44, 0.0  ;;  %v986_v11 = vadd.f32 %v2546_v12, %v2557_v39 }
 0x173   :  { %v1697_v29 = vpack.c.bf16 %v1336_v51, %v1336_v51  ;;  %v1337_v26 = vmax.f32 %v1250_v13, 0.0  ;;  %v1130_v54 = vadd.f32 %v1915_v63, %v970_v21 }
 0x174   :  { %1495 = vst.msk [vmem:[%s2813_s3 + $0x38] sm:$0xf] %vm1480_vm1, %v1699_v28  ;;  %v1700_v15 = vpack.c.bf16 %v1339_v48, %v1339_v48 }
 0x175   :  { %1493 = vst.msk [vmem:[%s2813_s3 + $0x30] sm:$0xf] %vm1480_vm1, %v1697_v29  ;;  %v1698_v7 = vpack.c.bf16 %v1337_v26, %v1337_v26  ;;  %v1916_v35 = vpop.f32.mrb[64].mxu1  ;;  %v1986_v55 = vpop.f32.mrb[64].mxu0 }
 0x176   :  { %1496 = vst.msk [vmem:[%s2813_s3 + $0x3c] sm:$0xf] %vm1480_vm1, %v1700_v15  ;;  %v1271_v19 = vadd.f32 %v1986_v55, %v2656_v23  ;;  %v1917_v61 = vpop.f32.mrb[65].mxu1  ;;  %v1262_v37 = vpop.f32.mrb[65].mxu0 }
 0x177   :  { %1494 = vst.msk [vmem:[%s2813_s3 + $0x34] sm:$0xf] %vm1480_vm1, %v1698_v7  ;;  %v1918_v42 = vadd.f32 %v1917_v61, %v1916_v35  ;;  %v1263_v43 = vadd.f32 %v1262_v37, %v2628_v5  ;;  %v1919_v8 = vpop.f32.mrb[66].mxu1  ;;  %v1987_v25 = vpop.f32.mrb[66].mxu0 }
 0x178   :  { %v1342_v45 = vmax.f32 %v1271_v19, 0.0  ;;  %v1274_v23 = vadd.f32 %v1987_v25, %v2658_v46  ;;  %v1920_v32 = vpop.f32.mrb[67].mxu1  ;;  %v1265_v49 = vpop.f32.mrb[67].mxu0  ;;  %v994_v19 = vadd.f32 %v2550_v24, %v2557_v39 }
 0x179   :  { %v1340_v52 = vmax.f32 %v1263_v43, 0.0  ;;  %v1921_v58 = vadd.f32 %v1920_v32, %v1919_v8  ;;  %v1266_v9 = vadd.f32 %v1265_v49, %v2630_v31  ;;  %v1135_v41 = vadd.f32 %v1918_v42, %v975_v40 }
 0x17a   :  { %v1703_v53 = vpack.c.bf16 %v1342_v45, %v1342_v45  ;;  %v1343_v56 = vmax.f32 %v1274_v23, 0.0 }
 0x17b   :  { %v1701_v59 = vpack.c.bf16 %v1340_v52, %v1340_v52  ;;  %v1341_v17 = vmax.f32 %v1266_v9, 0.0  ;;  %v1138_v5 = vadd.f32 %v1921_v58, %v978_v57 }
 0x17c   :  { %1499 = vst.msk [vmem:[%s2813_s3 + $0x48] sm:$0xf] %vm1480_vm1, %v1703_v53  ;;  %v1704_v0 = vpack.c.bf16 %v1343_v56, %v1343_v56  ;;  %v999_v56 = vadd.f32 %v2552_v30, %v2557_v39 }
 0x17d   :  { %1497 = vst.msk [vmem:[%s2813_s3 + $0x40] sm:$0xf] %vm1480_vm1, %v1701_v59  ;;  %v1702_v46 = vpack.c.bf16 %v1341_v17, %v1341_v17  ;;  %v1922_v1 = vpop.f32.mrb[68].mxu1  ;;  %v1990_v31 = vpop.f32.mrb[68].mxu0 }
 0x17e   :  { %1500 = vst.msk [vmem:[%s2813_s3 + $0x4c] sm:$0xf] %vm1480_vm1, %v1704_v0  ;;  %v1287_v33 = vadd.f32 %v1990_v31, %v1127_v34  ;;  %v1923_v4 = vpop.f32.mrb[69].mxu1  ;;  %v1278_v50 = vpop.f32.mrb[69].mxu0 }
 0x17f   :  { %1498 = vst.msk [vmem:[%s2813_s3 + $0x44] sm:$0xf] %vm1480_vm1, %v1702_v46  ;;  %v1924_v36 = vadd.f32 %v1923_v4, %v1922_v1  ;;  %v1279_v2 = vadd.f32 %v1278_v50, %v2684_v3  ;;  %v1925_v10 = vpop.f32.mrb[70].mxu1  ;;  %v1991_v27 = vpop.f32.mrb[70].mxu0 }
 0x180   :  { %v1346_v14 = vmax.f32 %v1287_v33, 0.0  ;;  %v1290_v47 = vadd.f32 %v1991_v27, %v1130_v54  ;;  %v1926_v20 = vpop.f32.mrb[71].mxu1  ;;  %v1281_v21 = vpop.f32.mrb[71].mxu0  ;;  %v991_v54 = vadd.f32 %v2548_v18, %v2557_v39 }
 0x181   :  { %v1344_v38 = vmax.f32 %v1279_v2, 0.0  ;;  %v1927_v44 = vadd.f32 %v1926_v20, %v1925_v10  ;;  %v1282_v6 = vadd.f32 %v1281_v21, %v2686_v60  ;;  %v1143_v16 = vadd.f32 %v1924_v36, %v983_v62  ;;  %v1514_v2 = vld [vmem:[%s2813_s3 + $0x78] sm:$0x7] }
 0x182   :  { %v1707_v22 = vpack.c.bf16 %v1346_v14, %v1346_v14  ;;  %v1347_v51 = vmax.f32 %v1290_v47, 0.0 }
 0x183   :  { %v1705_v63 = vpack.c.bf16 %v1344_v38, %v1344_v38  ;;  %v1345_v13 = vmax.f32 %v1282_v6, 0.0  ;;  %v1146_v34 = vadd.f32 %v1927_v44, %v986_v11 }
 0x184   :  { %1503 = vst.msk [vmem:[%s2813_s3 + $0x58] sm:$0xf] %vm1480_vm1, %v1707_v22  ;;  %v1708_v12 = vpack.c.bf16 %v1347_v51, %v1347_v51 }
 0x185   :  { %1501 = vst.msk [vmem:[%s2813_s3 + $0x50] sm:$0xf] %vm1480_vm1, %v1705_v63  ;;  %v1706_v3 = vpack.c.bf16 %v1345_v13, %v1345_v13  ;;  %v1928_v28 = vpop.f32.mrb[72].mxu1  ;;  %v1994_v60 = vpop.f32.mrb[72].mxu0 }
 0x186   :  { %1504 = vst.msk [vmem:[%s2813_s3 + $0x5c] sm:$0xf] %vm1480_vm1, %v1708_v12  ;;  %v1303_v48 = vadd.f32 %v1994_v60, %v1143_v16  ;;  %v1929_v29 = vpop.f32.mrb[73].mxu1  ;;  %v1294_v26 = vpop.f32.mrb[73].mxu0 }
 0x187   :  { %1502 = vst.msk [vmem:[%s2813_s3 + $0x54] sm:$0xf] %vm1480_vm1, %v1706_v3  ;;  %v1930_v15 = vadd.f32 %v1929_v29, %v1928_v28  ;;  %v1295_v7 = vadd.f32 %v1294_v26, %v1135_v41  ;;  %v1931_v35 = vpop.f32.mrb[74].mxu1  ;;  %v1995_v55 = vpop.f32.mrb[74].mxu0 }
 0x188   :  { %v1350_v61 = vmax.f32 %v1303_v48, 0.0  ;;  %v1306_v37 = vadd.f32 %v1995_v55, %v1146_v34  ;;  %v1932_v40 = vpop.f32.mrb[75].mxu1  ;;  %v1297_v42 = vpop.f32.mrb[75].mxu0 }
 0x189   :  { %v1348_v43 = vmax.f32 %v1295_v7, 0.0  ;;  %v1933_v8 = vadd.f32 %v1932_v40, %v1931_v35  ;;  %v1298_v25 = vadd.f32 %v1297_v42, %v1138_v5  ;;  %v1151_v18 = vadd.f32 %v1930_v15, %v991_v54 }
 0x18a   :  { %v1711_v57 = vpack.c.bf16 %v1350_v61, %v1350_v61  ;;  %v1351_v45 = vmax.f32 %v1306_v37, 0.0 }
 0x18b   :  { %v1709_v23 = vpack.c.bf16 %v1348_v43, %v1348_v43  ;;  %v1349_v32 = vmax.f32 %v1298_v25, 0.0  ;;  %v1154_v49 = vadd.f32 %v1933_v8, %v994_v19 }
 0x18c   :  { %1507 = vst.msk [vmem:[%s2813_s3 + $0x68] sm:$0xf] %vm1480_vm1, %v1711_v57  ;;  %v1712_v52 = vpack.c.bf16 %v1351_v45, %v1351_v45 }
 0x18d   :  { %1505 = vst.msk [vmem:[%s2813_s3 + $0x60] sm:$0xf] %vm1480_vm1, %v1709_v23  ;;  %v1710_v24 = vpack.c.bf16 %v1349_v32, %v1349_v32  ;;  %v1934_v58 = vpop.f32.mrb[76].mxu1  ;;  %v1998_v9 = vpop.f32.mrb[76].mxu0 }
 0x18e   :  { %1508 = vst.msk [vmem:[%s2813_s3 + $0x6c] sm:$0xf] %vm1480_vm1, %v1712_v52  ;;  %v1935_v41 = vpop.f32.mrb[77].mxu1  ;;  %v1310_v53 = vpop.f32.mrb[77].mxu0 }
 0x18f   :  { %1506 = vst.msk [vmem:[%s2813_s3 + $0x64] sm:$0xf] %vm1480_vm1, %v1710_v24  ;;  %v1936_v59 = vadd.f32 %v1935_v41, %v1934_v58  ;;  %v1311_v17 = vadd.f32 %v1310_v53, %v1151_v18  ;;  %v1937_v5 = vpop.f32.mrb[78].mxu1  ;;  %v1999_v0 = vpop.f32.mrb[78].mxu0 }
 0x190   :  { %v1938_v46 = vpop.f32.mrb[79].mxu1  ;;  %v1313_v1 = vpop.f32.mrb[79].mxu0 }
 0x191   :  { %v1159_v31 = vadd.f32 %v1936_v59, %v999_v56  ;;  %v1352_v33 = vmax.f32 %v1311_v17, 0.0  ;;  %v1314_v4 = vadd.f32 %v1313_v1, %v1154_v49 }
 0x193   :  { %v1319_v50 = vadd.f32 %v1998_v9, %v1159_v31  ;;  %v1713_v62 = vpack.c.bf16 %v1352_v33, %v1352_v33  ;;  %v1353_v36 = vmax.f32 %v1314_v4, 0.0 }
 0x195   :  { %v1354_v30 = vmax.f32 %v1319_v50, 0.0  ;;  %1509 = vst.msk [vmem:[%s2813_s3 + $0x70] sm:$0xf] %vm1480_vm1, %v1713_v62  ;;  %v1714_v39 = vpack.c.bf16 %v1353_v36, %v1353_v36 }
 0x197   :  { %v1715_v10 = vpack.c.bf16 %v1354_v30, %v1354_v30  ;;  %1510 = vst.msk [vmem:[%s2813_s3 + $0x74] sm:$0xf] %vm1480_vm1, %v1714_v39 }
 0x199   :  { %v1515_v27 = vsel %vm1513_vm4, %v1715_v10, %v1514_v2 }
 0x19a   :  { %1516 = vst [vmem:[%s2813_s3 + $0x78] sm:$0x7] %v1515_v27 }

// kernel: mul.16
= control target key start
LH: loop header
LB: loop body
LE: loop exit
PB: predicated region body
PF: predicated region fallthrough
CT: control target
= control target key end

     0   :  { %vm7_vm0 = vcmask 15360   ;;  %vm13_vm1 = vcmask 31760   ;;  %s39_s0 = inlined_call_operand.vmem [shape: f32[2,2], index: 0, kind: input, shape index: {}]   ;;  %s40_s1 = inlined_call_operand.vmem [shape: f32[4], index: 1, kind: output, shape index: {}]  }
   0x1   :  { %v4_v0 = vld [vmem:[%s39_s0] sm:$0x3]  ;;  %s22_s0 = smov 2  }
   0x2   :  { %5 = vst [vmem:[#allocation1] sm:$0x3] %v4_v0 }
   0x9   :  { %v10_v1 = vld [vmem:[#allocation1 + $0x1] sm:$0x1]   ;;  %v6_v2 = vld [vmem:[#allocation1] sm:$0x1]  }
   0xa   :  { %11 = vrot.lane.b32.xlu0 %v10_v1, %s22_s0  ;;  %8 = vst.msk [vmem:[#allocation0] sm:$0x1] %vm7_vm0, %v6_v2  }
  0x7c   :  { %v12_v3 = vpop.permute.xlu0 %11  }
  0x7d   :  { %14 = vst.msk [vmem:[#allocation0] sm:$0x1] %vm13_vm1, %v12_v3  }
  0x84   :  { %v18_v4 = vld [vmem:[#allocation0] sm:$0x1] }
  0x85   :  { %20 = vst [vmem:[%s40_s1] sm:$0x1] %v18_v4 }

// kernel: reward_classifier_forward.9
= control target key start
LH: loop header
LB: loop body
LE: loop exit
PB: predicated region body
PF: predicated region fallthrough
CT: control target
= control target key end

     0   :  { %v271_v0 = vmov 0.0   ;;  %vm272_vm0 = vmmov 0   ;;  %vm43_vm1 = vcmask 261120   ;;  %vm164_vm2 = vcmask 257024   ;;  %s350_s2 = inlined_call_operand.vmem [shape: bf16[32,32], index: 2, kind: input, shape index: {}]   ;;  %s351_s0 = inlined_call_operand.vmem [shape: f32[4,32], index: 0, kind: input, shape index: {}]   ;;  %s352_s3 = inlined_call_operand.vmem [shape: bf16[32,32], index: 3, kind: input, shape index: {}]   ;;  %s353_s1 = inlined_call_operand.vmem [shape: f32[4,32], index: 1, kind: input, shape index: {}]   ;;  %s354_s4 = inlined_call_operand.vmem [shape: f32[1,32], index: 4, kind: input, shape index: {}]   ;;  %s355_s5 = inlined_call_operand.vmem [shape: f32[5,32], index: 5, kind: input, shape index: {}]   ;;  %s356_s6 = inlined_call_operand.vmem [shape: s32[4,1], index: 6, kind: output, shape index: {}]  }
   0x1   :  { %248 = vmatprep.subr.bf16.mxu0 %v271_v0  ;;  %v267_v1 = vld [vmem:[%s350_s2] sm:$0xff]   ;;  %252 = vmatprep.mubr.msk.bf16.mxu0 %vm272_vm0, %v271_v0  ;;  %v268_v2 = vld [vmem:[%s350_s2 + $0x8] sm:$0xff]   ;;  %v273_v48 = vmov 0   ;;  %vm224_vm8 = vcmask 3072  }
   0x2   :  { %256 = vmatprep.subr.bf16.mxu1 %v271_v0  ;;  %260 = vmatprep.mubr.msk.bf16.mxu1 %vm272_vm0, %v271_v0  ;;  %v24_v3 = vld [vmem:[%s351_s0] sm:$0xf]  ;;  %v270_v6 = vld [vmem:[%s352_s3 + $0x8] sm:$0xff]   ;;  %v241_v31 = vld [vmem:[%s355_s5 + $0x4] ss:$0 sm:$0xff] }
   0x3   :  { %249 = vmatpush3.bf16.msra.mxu0 %v267_v1  ;;  %v25_v4 = vpack.c.bf16 %v24_v3, %v24_v3  ;;  %v269_v5 = vld [vmem:[%s352_s3] sm:$0xff]  }
   0x4   :  { %250 = vmatprep.subr.bf16.mxu0 %v271_v0  ;;  %257 = vmatpush3.bf16.msra.mxu1 %v269_v5  ;;  %v30_v7 = vld [vmem:[%s353_s1] sm:$0xf] }
   0x5   :  { %258 = vmatprep.subr.bf16.mxu1 %v271_v0  ;;  %v233_v15 = vld [vmem:[%s354_s4] ss:$0 sm:$0xff]  ;;  %v239_v22 = vld [vmem:[%s355_s5 + $0x2] ss:$0 sm:$0xff]  ;;  %v240_v24 = vld [vmem:[%s355_s5 + $0x3] ss:$0 sm:$0xff] }
   0x6   :  { %v237_v23 = vld [vmem:[%s355_s5] ss:$0 sm:$0xff]  ;;  %v238_v25 = vld [vmem:[%s355_s5 + $0x1] ss:$0 sm:$0xff] }
   0x7   :  { %251 = vmatpush3.bf16.msra.mxu0 %v268_v2 }
   0x8   :  { %259 = vmatpush3.bf16.msra.mxu1 %v270_v6 }
   0xa   :  { %253 = vmatmul.mubr.msk.bf16.vlgmr.msra.gmra.mrb[0].mxu0 %vm43_vm1, %v25_v4 }
  0xdd   :  { %v81_v8 = vpop.f32.mrb[0].mxu0 }
  0xde   :  { %v82_v9 = vadd.f32 %v81_v8, %v30_v7  ;;  %v254_v10 = vpop.f32.mrb[1].mxu0 }
  0xdf   :  { %v84_v11 = vpop.f32.mrb[2].mxu0 }
  0xe0   :  { %v87_v12 = vmax.f32 %v82_v9, 0.0  ;;  %v255_v13 = vpop.f32.mrb[3].mxu0 }
  0xe2   :  { %v88_v14 = vpack.c.bf16 %v87_v12, %v87_v12 }
  0xe4   :  { %261 = vmatmul.mubr.msk.bf16.vlgmr.msra.gmra.mrb[0].mxu1 %vm43_vm1, %v88_v14 }
 0x1b7   :  { %v149_v16 = vpop.f32.mrb[0].mxu1 }
 0x1b8   :  { %v150_v17 = vadd.f32 %v233_v15, %v149_v16  ;;  %v262_v18 = vpop.f32.mrb[1].mxu1 }
 0x1b9   :  { %v152_v19 = vpop.f32.mrb[2].mxu1 }
 0x1ba   :  { %v155_v20 = vmax.f32 %v150_v17, 0.0  ;;  %v263_v21 = vpop.f32.mrb[3].mxu1 }
 0x1bc   :  { %v156_v26 = vadd.f32 %v155_v20, %v24_v3 }
 0x1be   :  { %v188_v27 = vsub.f32 %v156_v26, %v239_v22  ;;  %v162_v28 = vsub.f32 %v156_v26, %v237_v23  ;;  %v201_v29 = vsub.f32 %v156_v26, %v240_v24  ;;  %v175_v30 = vsub.f32 %v156_v26, %v238_v25 }
 0x1bf   :  { %v214_v34 = vsub.f32 %v156_v26, %v241_v31 }
 0x1c0   :  { %v189_v32 = vmul.f32 %v188_v27, %v188_v27  ;;  %v163_v33 = vmul.f32 %v162_v28, %v162_v28  ;;  %v202_v37 = vmul.f32 %v201_v29, %v201_v29  ;;  %v176_v38 = vmul.f32 %v175_v30, %v175_v30 }
 0x1c1   :  { %v215_v41 = vmul.f32 %v214_v34, %v214_v34 }
 0x1c2   :  { %v190_v35 = vsel %vm164_vm2, %v189_v32, 0.0  ;;  %v165_v36 = vsel %vm164_vm2, %v163_v33, 0.0  ;;  %v203_v39 = vsel %vm164_vm2, %v202_v37, 0.0  ;;  %v177_v40 = vsel %vm164_vm2, %v176_v38, 0.0 }
 0x1c3   :  { %191 = vadd.xlane.f32.xlu1 %v190_v35  ;;  %166 = vadd.xlane.f32.xlu0 %v165_v36  ;;  %v216_v42 = vsel %vm164_vm2, %v215_v41, 0.0 }
 0x1c7   :  { %204 = vadd.xlane.f32.xlu1 %v203_v39  ;;  %178 = vadd.xlane.f32.xlu0 %v177_v40 }
 0x1cb   :  { %217 = vadd.xlane.f32.xlu0 %v216_v42 }
 0x250   :  { %v167_v43 = vpop.xlane.xlu0 %166  ;;  %v192_v44 = vpop.xlane.xlu1 %191 }
 0x251   :  { %vm168_vm3 = vcmp.lt.f32.partialorder %v167_v43, inf }
 0x252   :  { %v169_v45 = vsel %vm168_vm3, %v167_v43, inf }
 0x254   :  { %v179_v46 = vpop.xlane.xlu0 %178  ;;  %v205_v50 = vpop.xlane.xlu1 %204 }
 0x255   :  { %vm180_vm4 = vcmp.lt.f32.partialorder %v179_v46, %v169_v45 }
 0x256   :  { %v181_v47 = vsel %vm180_vm4, %v179_v46, %v169_v45  ;;  %v182_v49 = vsel %vm180_vm4, 1, %v273_v48 }
 0x257   :  { %vm193_vm5 = vcmp.lt.f32.partialorder %v192_v44, %v181_v47 }
 0x258   :  { %v194_v51 = vsel %vm193_vm5, %v192_v44, %v181_v47  ;;  %v195_v52 = vsel %vm193_vm5, 2, %v182_v49  ;;  %v218_v55 = vpop.xlane.xlu0 %217 }
 0x259   :  { %vm206_vm6 = vcmp.lt.f32.partialorder %v205_v50, %v194_v51 }
 0x25a   :  { %v207_v53 = vsel %vm206_vm6, %v205_v50, %v194_v51  ;;  %v208_v54 = vsel %vm206_vm6, 3, %v195_v52 }
 0x25b   :  { %vm219_vm7 = vcmp.lt.f32.partialorder %v218_v55, %v207_v53 }
 0x25c   :  { %v220_v56 = vsel %vm219_vm7, %v218_v55, %v207_v53  ;;  %v221_v57 = vsel %vm219_vm7, 4, %v208_v54 }
 0x25d   :  { %vm222_vm9 = vcmp.lt.f32.partialorder %v220_v56, 10.0 }
 0x25e   :  { %v223_v58 = vsel %vm222_vm9, %v221_v57, 5 }
 0x25f   :  { %225 = vst.msk [vmem:[%s356_s6] sm:$0xf] %vm224_vm8, %v223_v58 }

// kernel: squeeze.3
= control target key start
LH: loop header
LB: loop body
LE: loop exit
PB: predicated region body
PF: predicated region fallthrough
CT: control target
= control target key end

     0   :  { %s85_s0 = inlined_call_operand.vmem [shape: s32[4], index: 0, kind: input, shape index: {}]   ;;  %s86_s1 = inlined_call_operand.hbm [shape: s32[2,2], index: 1, kind: output, shape index: {}]  }
   0x1   :  { %v5_v0 = vld [vmem:[%s85_s0] sm:$0x1] }
   0x2   :  { %2 = vsyncpa [#allocation1], 0  ;;  %6 = vst [vmem:[#allocation3] sm:$0x1] %v5_v0  ;;  %vm8_vm0 = vcmask 15360   ;;  %s58_s0 = smov 126  }
   0x3   :  { %s59_s8 = smov [#allocation0]  }
   0x4   :  { %s26_s9 = sshll.u32 %s59_s8, 4  ;;  %s27_s9 = int_to_ptr.vmem [resolvable:$true] %s26_s9 }
   0x5   :  { %s34_s10 = scalar_lea.vmem %s27_s9, 32  ;;  %p39_p1 = scmp.lt.s32.totalorder %s27_s9, %s27_s9 }
   0x6   :  { %p35_p0 = scmp.ne.s32.totalorder %s27_s9, %s34_s10  ;;  %p40_p2 = scmp.lt.s32.totalorder %s34_s10, %s34_s10 }
   0x8   :  { %p41_p3 = por %p40_p2, %p39_p1 }
   0x9   :  { %v10_v1 = vld [vmem:[#allocation3] sm:$0x1]  }
   0xa   :  { %v7_v2 = vld [vmem:[#allocation3] sm:$0x1]   ;;  %11 = vrot.lane.b32.xlu0 %v10_v1, %s58_s0  ;;  %p42_p4 = pnand %p41_p3, %p35_p0 }
   0xb   :  { %9 = vst.msk [vmem:[#allocation2] sm:$0x1] %vm8_vm0, %v7_v2  }
  0x7c   :  { %v12_v3 = vpop.permute.xlu0 %11  }
  0x7d   :  { %15 = vst.msk [vmem:[#allocation2 + $0x1] sm:$0x1] %vm8_vm0, %v12_v3  }
  0x84   :  { %v19_v4 = vld [vmem:[#allocation2] sm:$0x3] }
  0x85   :  { %21 = vst [vmem:[#allocation0] sm:$0x3] %v19_v4 }
  0x86   :  { %45 = shalt.err (!%p42_p4)
}
  0x87   :  { %s46_s13 = scalar_lea.hbm %s86_s1, 32 }
  0x88   :  { %p47_p5 = scmp.ne.s32.totalorder %s86_s1, %s46_s13  ;;  %p50_p6 = scmp.lt.u32.totalorder %s46_s13, %s86_s1 }
  0x8a   :  { %p52_p7 = pnand %p50_p6, %p47_p5 }
  0x8c   :  { %55 = shalt.err (!%p52_p7)
}
  0x8d   :  { %29 = dma.vmem_to_hbm [thread:$0]  %s27_s9, 32, %s86_s1, [#allocation1]  }
  0x8e   :  { %56 = dma.done.wait [#allocation1], 32  }
  0x8f   :  { %57 = vsyncadd [#allocation1], 4294967264 }
  0x90   :  { %31 = vsyncpa [#allocation1], 1 }

// kernel: reward_classifier_forward.8
= control target key start
LH: loop header
LB: loop body
LE: loop exit
PB: predicated region body
PF: predicated region fallthrough
CT: control target
= control target key end

     0   :  { %vm3041_vm0 = vmmov 0   ;;  %vm1696_vm1 = vcmask 523264   ;;  %vm2245_vm2 = vcmask 261120   ;;  %vm2290_vm3 = vcmask 258048   ;;  %s3714_s1 = inlined_call_operand.vmem [shape: bf16[3136,32], index: 1, kind: input, shape index: {}]   ;;  %s3715_s0 = inlined_call_operand.vmem [shape: bf16[5,3136], index: 0, kind: input, shape index: {}]   ;;  %s3716_s2 = inlined_call_operand.vmem [shape: f32[1,32], index: 2, kind: input, shape index: {}]   ;;  %s3717_s3 = inlined_call_operand.vmem [shape: bf16[32,32], index: 3, kind: input, shape index: {}]   ;;  %s3718_s4 = inlined_call_operand.vmem [shape: f32[1,32], index: 4, kind: input, shape index: {}]   ;;  %s3719_s5 = inlined_call_operand.vmem [shape: f32[5,32], index: 5, kind: output, shape index: {}]  }
   0x1   :  { %v2817_v0 = vld [vmem:[%s3714_s1 + $0x40] sm:$0xff]   ;;  %v2821_v4 = vld [vmem:[%s3714_s1 + $0x48] sm:$0xff]   ;;  %v2825_v8 = vld [vmem:[%s3714_s1 + $0x50] sm:$0xff]  }
   0x2   :  { %v2818_v1 = vld [vmem:[%s3714_s1] sm:$0xff]   ;;  %2523 = vmatprep.subr.bf16.mxu0 %v2817_v0  ;;  %v2822_v5 = vld [vmem:[%s3714_s1 + $0x8] sm:$0xff]   ;;  %v2826_v9 = vld [vmem:[%s3714_s1 + $0x10] sm:$0xff]  }
   0x3   :  { %v2819_v2 = vld [vmem:[%s3714_s1 + $0xc0] sm:$0xff]   ;;  %2524 = vmatpush3.bf16.msra.mxu0 %v2818_v1  ;;  %v2823_v6 = vld [vmem:[%s3714_s1 + $0xc8] sm:$0xff]   ;;  %v2827_v10 = vld [vmem:[%s3714_s1 + $0xd0] sm:$0xff]  }
   0x4   :  { %v2820_v3 = vld [vmem:[%s3714_s1 + $0x80] sm:$0xff]   ;;  %2545 = vmatprep.subr.bf16.mxu1 %v2819_v2  ;;  %2525 = vmatprep.subr.bf16.mxu0 %v2821_v4  ;;  %v2824_v7 = vld [vmem:[%s3714_s1 + $0x88] sm:$0xff]   ;;  %v2828_v11 = vld [vmem:[%s3714_s1 + $0x90] sm:$0xff]  }
   0x5   :  { %2546 = vmatpush3.bf16.msra.mxu1 %v2820_v3  ;;  %v2829_v12 = vld [vmem:[%s3714_s1 + $0x58] sm:$0xff]   ;;  %v2833_v16 = vld [vmem:[%s3714_s1 + $0x60] sm:$0xff]   ;;  %v2837_v20 = vld [vmem:[%s3714_s1 + $0x68] sm:$0xff]  }
   0x6   :  { %2547 = vmatprep.subr.bf16.mxu1 %v2823_v6  ;;  %v2830_v13 = vld [vmem:[%s3714_s1 + $0x18] sm:$0xff]   ;;  %v2834_v17 = vld [vmem:[%s3714_s1 + $0x20] sm:$0xff]   ;;  %v2838_v21 = vld [vmem:[%s3714_s1 + $0x28] sm:$0xff]  }
   0x7   :  { %2526 = vmatpush3.bf16.msra.mxu0 %v2822_v5  ;;  %v2831_v14 = vld [vmem:[%s3714_s1 + $0xd8] sm:$0xff]   ;;  %v2835_v18 = vld [vmem:[%s3714_s1 + $0xe0] sm:$0xff]   ;;  %v2839_v22 = vld [vmem:[%s3714_s1 + $0xe8] sm:$0xff]  }
   0x8   :  { %2527 = vmatprep.subr.bf16.mxu0 %v2825_v8  ;;  %v2832_v15 = vld [vmem:[%s3714_s1 + $0x98] sm:$0xff]   ;;  %v2836_v19 = vld [vmem:[%s3714_s1 + $0xa0] sm:$0xff]   ;;  %v2840_v23 = vld [vmem:[%s3714_s1 + $0xa8] sm:$0xff]  }
   0x9   :  { %2548 = vmatpush3.bf16.msra.mxu1 %v2824_v7  ;;  %v2841_v24 = vld [vmem:[%s3714_s1 + $0x70] sm:$0xff]   ;;  %v2845_v28 = vld [vmem:[%s3714_s1 + $0x78] sm:$0xff]   ;;  %v21_v31 = vld [vmem:[%s3715_s0] sm:$0x77] }
   0xa   :  { %2549 = vmatprep.subr.bf16.mxu1 %v2827_v10  ;;  %v2842_v25 = vld [vmem:[%s3714_s1 + $0x30] sm:$0xff]   ;;  %v2846_v29 = vld [vmem:[%s3714_s1 + $0x38] sm:$0xff]   ;;  %v2297_v32 = vcombine.low %v21_v31, %v21_v31  ;;  %v2298_v33 = vcombine.high %v21_v31, %v21_v31  ;;  %v2851_v35 = vld [vmem:[%s3714_s1 + $0x140] sm:$0xff]  }
   0xb   :  { %2528 = vmatpush3.bf16.msra.mxu0 %v2826_v9  ;;  %v2843_v26 = vld [vmem:[%s3714_s1 + $0xf0] sm:$0xff]   ;;  %v2847_v30 = vld [vmem:[%s3714_s1 + $0xf8] sm:$0xff]   ;;  %v22_v36 = vld [vmem:[%s3715_s0 + $0x8] sm:$0x77] }
   0xc   :  { %2529 = vmatprep.subr.bf16.mxu0 %v2829_v12  ;;  %v2844_v27 = vld [vmem:[%s3714_s1 + $0xb0] sm:$0xff]   ;;  %v2850_v34 = vld [vmem:[%s3714_s1 + $0xb8] sm:$0xff]   ;;  %1732 = vmatprep.mubr.bf16.mxu0 %v2298_v33  ;;  %v2299_v37 = vcombine.low %v22_v36, %v22_v36  ;;  %v2300_v38 = vcombine.high %v22_v36, %v22_v36  ;;  %v2854_v39 = vld [vmem:[%s3714_s1 + $0x100] sm:$0xff]  }
   0xd   :  { %2550 = vmatpush3.bf16.msra.mxu1 %v2828_v11  ;;  %v2855_v40 = vld [vmem:[%s3714_s1 + $0x1c0] sm:$0xff]   ;;  %v2857_v42 = vld [vmem:[%s3714_s1 + $0x148] sm:$0xff]   ;;  %v2861_v46 = vld [vmem:[%s3714_s1 + $0x150] sm:$0xff]  }
   0xe   :  { %2551 = vmatprep.subr.bf16.mxu1 %v2831_v14  ;;  %1772 = vmatprep.mubr.bf16.mxu1 %v2300_v38  ;;  %v2856_v41 = vld [vmem:[%s3714_s1 + $0x180] sm:$0xff]   ;;  %v2858_v43 = vld [vmem:[%s3714_s1 + $0x108] sm:$0xff]   ;;  %v2862_v47 = vld [vmem:[%s3714_s1 + $0x110] sm:$0xff]  }
   0xf   :  { %2530 = vmatpush3.bf16.msra.mxu0 %v2830_v13  ;;  %v2859_v44 = vld [vmem:[%s3714_s1 + $0x1c8] sm:$0xff]   ;;  %v2863_v48 = vld [vmem:[%s3714_s1 + $0x1d0] sm:$0xff]   ;;  %v2865_v50 = vld [vmem:[%s3714_s1 + $0x158] sm:$0xff]  }
  0x10   :  { %2531 = vmatprep.subr.bf16.mxu0 %v2833_v16  ;;  %v2860_v45 = vld [vmem:[%s3714_s1 + $0x188] sm:$0xff]   ;;  %v2864_v49 = vld [vmem:[%s3714_s1 + $0x190] sm:$0xff]   ;;  %v2866_v51 = vld [vmem:[%s3714_s1 + $0x118] sm:$0xff]  }
  0x11   :  { %2552 = vmatpush3.bf16.msra.mxu1 %v2832_v15  ;;  %v2867_v52 = vld [vmem:[%s3714_s1 + $0x1d8] sm:$0xff]   ;;  %v2869_v54 = vld [vmem:[%s3714_s1 + $0x160] sm:$0xff]   ;;  %v2873_v58 = vld [vmem:[%s3714_s1 + $0x168] sm:$0xff]  }
  0x12   :  { %2553 = vmatprep.subr.bf16.mxu1 %v2835_v18  ;;  %v2868_v53 = vld [vmem:[%s3714_s1 + $0x198] sm:$0xff]   ;;  %v2870_v55 = vld [vmem:[%s3714_s1 + $0x120] sm:$0xff]   ;;  %v2874_v59 = vld [vmem:[%s3714_s1 + $0x128] sm:$0xff]  }
  0x13   :  { %2532 = vmatpush3.bf16.msra.mxu0 %v2834_v17  ;;  %v2871_v56 = vld [vmem:[%s3714_s1 + $0x1e0] sm:$0xff]   ;;  %v2875_v60 = vld [vmem:[%s3714_s1 + $0x1e8] sm:$0xff]   ;;  %v2877_v62 = vld [vmem:[%s3714_s1 + $0x170] sm:$0xff]  }
  0x14   :  { %2533 = vmatprep.subr.bf16.mxu0 %v2837_v20  ;;  %v2872_v57 = vld [vmem:[%s3714_s1 + $0x1a0] sm:$0xff]   ;;  %v2876_v61 = vld [vmem:[%s3714_s1 + $0x1a8] sm:$0xff]   ;;  %v2878_v63 = vld [vmem:[%s3714_s1 + $0x130] sm:$0xff]  }
  0x15   :  { %2554 = vmatpush3.bf16.msra.mxu1 %v2836_v19  ;;  %v2879_v0 = vld [vmem:[%s3714_s1 + $0x1f0] sm:$0xff]   ;;  %v2881_v2 = vld [vmem:[%s3714_s1 + $0x178] sm:$0xff]   ;;  %v2887_v9 = vld [vmem:[%s3714_s1 + $0x240] sm:$0xff]  }
  0x16   :  { %2555 = vmatprep.subr.bf16.mxu1 %v2839_v22  ;;  %v2880_v1 = vld [vmem:[%s3714_s1 + $0x1b0] sm:$0xff]   ;;  %v2882_v3 = vld [vmem:[%s3714_s1 + $0x138] sm:$0xff]   ;;  %v2890_v13 = vld [vmem:[%s3714_s1 + $0x200] sm:$0xff]  }
  0x17   :  { %2534 = vmatpush3.bf16.msra.mxu0 %v2838_v21  ;;  %v2883_v4 = vld [vmem:[%s3714_s1 + $0x1f8] sm:$0xff]   ;;  %v23_v5 = vld [vmem:[%s3715_s0 + $0x10] sm:$0x77]  ;;  %v2891_v14 = vld [vmem:[%s3714_s1 + $0x2c0] sm:$0xff]  }
  0x18   :  { %2535 = vmatprep.subr.bf16.mxu0 %v2841_v24  ;;  %v2301_v6 = vcombine.low %v23_v5, %v23_v5  ;;  %v2302_v7 = vcombine.high %v23_v5, %v23_v5  ;;  %v2886_v8 = vld [vmem:[%s3714_s1 + $0x1b8] sm:$0xff]   ;;  %v2892_v15 = vld [vmem:[%s3714_s1 + $0x280] sm:$0xff]   ;;  %v2893_v16 = vld [vmem:[%s3714_s1 + $0x248] sm:$0xff]  }
  0x19   :  { %2556 = vmatpush3.bf16.msra.mxu1 %v2840_v23  ;;  %v24_v10 = vld [vmem:[%s3715_s0 + $0x18] sm:$0x77]  ;;  %v2894_v17 = vld [vmem:[%s3714_s1 + $0x208] sm:$0xff]   ;;  %v2897_v20 = vld [vmem:[%s3714_s1 + $0x250] sm:$0xff]  }
  0x1a   :  { %2557 = vmatprep.subr.bf16.mxu1 %v2843_v26  ;;  %v2303_v11 = vcombine.low %v24_v10, %v24_v10  ;;  %v2304_v12 = vcombine.high %v24_v10, %v24_v10  ;;  %v2895_v18 = vld [vmem:[%s3714_s1 + $0x2c8] sm:$0xff]   ;;  %v2898_v21 = vld [vmem:[%s3714_s1 + $0x210] sm:$0xff]   ;;  %v2901_v24 = vld [vmem:[%s3714_s1 + $0x258] sm:$0xff]  }
  0x1b   :  { %2536 = vmatpush3.bf16.msra.mxu0 %v2842_v25  ;;  %v2896_v19 = vld [vmem:[%s3714_s1 + $0x288] sm:$0xff]   ;;  %v2899_v22 = vld [vmem:[%s3714_s1 + $0x2d0] sm:$0xff]   ;;  %v2902_v25 = vld [vmem:[%s3714_s1 + $0x218] sm:$0xff]  }
  0x1c   :  { %2537 = vmatprep.subr.bf16.mxu0 %v2845_v28  ;;  %v2900_v23 = vld [vmem:[%s3714_s1 + $0x290] sm:$0xff]   ;;  %v2903_v26 = vld [vmem:[%s3714_s1 + $0x2d8] sm:$0xff]   ;;  %v2905_v28 = vld [vmem:[%s3714_s1 + $0x260] sm:$0xff]  }
  0x1d   :  { %2558 = vmatpush3.bf16.msra.mxu1 %v2844_v27  ;;  %v2904_v27 = vld [vmem:[%s3714_s1 + $0x298] sm:$0xff]   ;;  %v2908_v31 = vld [vmem:[%s3714_s1 + $0x2a0] sm:$0xff]   ;;  %v2910_v33 = vld [vmem:[%s3714_s1 + $0x228] sm:$0xff]  }
  0x1e   :  { %2559 = vmatprep.subr.bf16.mxu1 %v2847_v30  ;;  %v2907_v30 = vld [vmem:[%s3714_s1 + $0x2e0] sm:$0xff]   ;;  %v2913_v36 = vld [vmem:[%s3714_s1 + $0x270] sm:$0xff]  }
  0x1f   :  { %2538 = vmatpush3.bf16.msra.mxu0 %v2846_v29  ;;  %v2906_v29 = vld [vmem:[%s3714_s1 + $0x220] sm:$0xff]   ;;  %v2915_v38 = vld [vmem:[%s3714_s1 + $0x2f0] sm:$0xff]  }
  0x20   :  { %2567 = vmatprep.subr.bf16.mxu0 %v2851_v35  ;;  %v2912_v35 = vld [vmem:[%s3714_s1 + $0x2a8] sm:$0xff]   ;;  %v2944_v5 = vld [vmem:[%s3714_s1 + $0x3a0] sm:$0xff]   ;;  %v2949_v10 = vld [vmem:[%s3714_s1 + $0x370] sm:$0xff]  }
  0x21   :  { %2560 = vmatpush3.bf16.msra.mxu1 %v2850_v34  ;;  %v2911_v34 = vld [vmem:[%s3714_s1 + $0x2e8] sm:$0xff]  }
  0x22   :  { %1733 = vmatmul.mubr.bf16.vlgmr.msra.gmra.mrb[0].mxu0 %v2297_v32  ;;  %2589 = vmatprep.subr.bf16.mxu1 %v2855_v40  ;;  %v2909_v32 = vld [vmem:[%s3714_s1 + $0x268] sm:$0xff]   ;;  %v2917_v40 = vld [vmem:[%s3714_s1 + $0x278] sm:$0xff]  }
  0x23   :  { %2568 = vmatpush3.bf16.msra.mxu0 %v2854_v39  ;;  %1812 = vmatprep.mubr.bf16.mxu0 %v2302_v7  ;;  %v2916_v39 = vld [vmem:[%s3714_s1 + $0x2b0] sm:$0xff]   ;;  %v2946_v7 = vld [vmem:[%s3714_s1 + $0x328] sm:$0xff]  }
  0x24   :  { %1773 = vmatmul.mubr.bf16.vlgmr.msra.gmra.mrb[0].mxu1 %v2299_v37  ;;  %2569 = vmatprep.subr.bf16.mxu0 %v2857_v42  ;;  %v2914_v37 = vld [vmem:[%s3714_s1 + $0x230] sm:$0xff]   ;;  %v2919_v42 = vld [vmem:[%s3714_s1 + $0x2f8] sm:$0xff]  }
  0x25   :  { %2590 = vmatpush3.bf16.msra.mxu1 %v2856_v41  ;;  %1852 = vmatprep.mubr.bf16.mxu1 %v2304_v12  ;;  %v2918_v41 = vld [vmem:[%s3714_s1 + $0x238] sm:$0xff]   ;;  %v2951_v12 = vld [vmem:[%s3714_s1 + $0x3f0] sm:$0xff]  }
  0x26   :  { %2591 = vmatprep.subr.bf16.mxu1 %v2859_v44 }
  0x27   :  { %2570 = vmatpush3.bf16.msra.mxu0 %v2858_v43  ;;  %v25_v43 = vld [vmem:[%s3715_s0 + $0x20] sm:$0x77] }
  0x28   :  { %2571 = vmatprep.subr.bf16.mxu0 %v2861_v46  ;;  %v2305_v44 = vcombine.low %v25_v43, %v25_v43  ;;  %v2922_v46 = vld [vmem:[%s3714_s1 + $0x2b8] sm:$0xff]  }
  0x29   :  { %2592 = vmatpush3.bf16.msra.mxu1 %v2860_v45  ;;  %v2306_v45 = vcombine.high %v25_v43, %v25_v43  ;;  %v2980_v43 = vld [vmem:[%s3714_s1 + $0x4a0] sm:$0xff]  }
  0x2a   :  { %2593 = vmatprep.subr.bf16.mxu1 %v2863_v48  ;;  %v26_v48 = vld [vmem:[%s3715_s0 + $0x28] sm:$0x77] }
  0x2b   :  { %2572 = vmatpush3.bf16.msra.mxu0 %v2862_v47  ;;  %v2923_v47 = vld [vmem:[%s3714_s1 + $0x340] sm:$0xff]  }
  0x2c   :  { %2573 = vmatprep.subr.bf16.mxu0 %v2865_v50  ;;  %v2308_v50 = vcombine.high %v26_v48, %v26_v48 }
  0x2d   :  { %2594 = vmatpush3.bf16.msra.mxu1 %v2864_v49  ;;  %v2307_v49 = vcombine.low %v26_v48, %v26_v48  ;;  %v2985_v48 = vld [vmem:[%s3714_s1 + $0x470] sm:$0xff]  }
  0x2e   :  { %2595 = vmatprep.subr.bf16.mxu1 %v2867_v52  ;;  %v2927_v52 = vld [vmem:[%s3714_s1 + $0x3c0] sm:$0xff]  }
  0x2f   :  { %2574 = vmatpush3.bf16.msra.mxu0 %v2866_v51  ;;  %v2926_v51 = vld [vmem:[%s3714_s1 + $0x300] sm:$0xff]  }
  0x30   :  { %2575 = vmatprep.subr.bf16.mxu0 %v2869_v54  ;;  %v2929_v54 = vld [vmem:[%s3714_s1 + $0x348] sm:$0xff]  }
  0x31   :  { %2596 = vmatpush3.bf16.msra.mxu1 %v2868_v53  ;;  %v2928_v53 = vld [vmem:[%s3714_s1 + $0x380] sm:$0xff]  }
  0x32   :  { %2597 = vmatprep.subr.bf16.mxu1 %v2871_v56  ;;  %v2931_v56 = vld [vmem:[%s3714_s1 + $0x3c8] sm:$0xff]  }
  0x33   :  { %2576 = vmatpush3.bf16.msra.mxu0 %v2870_v55  ;;  %v2930_v55 = vld [vmem:[%s3714_s1 + $0x308] sm:$0xff]  }
  0x34   :  { %2577 = vmatprep.subr.bf16.mxu0 %v2873_v58  ;;  %v2933_v58 = vld [vmem:[%s3714_s1 + $0x350] sm:$0xff]  }
  0x35   :  { %2598 = vmatpush3.bf16.msra.mxu1 %v2872_v57  ;;  %v2932_v57 = vld [vmem:[%s3714_s1 + $0x388] sm:$0xff]  }
  0x36   :  { %2599 = vmatprep.subr.bf16.mxu1 %v2875_v60  ;;  %v2935_v60 = vld [vmem:[%s3714_s1 + $0x3d0] sm:$0xff]  }
  0x37   :  { %2578 = vmatpush3.bf16.msra.mxu0 %v2874_v59  ;;  %v2934_v59 = vld [vmem:[%s3714_s1 + $0x310] sm:$0xff]  }
  0x38   :  { %2579 = vmatprep.subr.bf16.mxu0 %v2877_v62  ;;  %v2937_v62 = vld [vmem:[%s3714_s1 + $0x358] sm:$0xff]  }
  0x39   :  { %2600 = vmatpush3.bf16.msra.mxu1 %v2876_v61  ;;  %v2936_v61 = vld [vmem:[%s3714_s1 + $0x390] sm:$0xff]  }
  0x3a   :  { %2601 = vmatprep.subr.bf16.mxu1 %v2879_v0  ;;  %v2939_v0 = vld [vmem:[%s3714_s1 + $0x3d8] sm:$0xff]  }
  0x3b   :  { %2580 = vmatpush3.bf16.msra.mxu0 %v2878_v63  ;;  %v2938_v63 = vld [vmem:[%s3714_s1 + $0x318] sm:$0xff]  }
  0x3c   :  { %2581 = vmatprep.subr.bf16.mxu0 %v2881_v2  ;;  %v2941_v2 = vld [vmem:[%s3714_s1 + $0x360] sm:$0xff]  }
  0x3d   :  { %2602 = vmatpush3.bf16.msra.mxu1 %v2880_v1  ;;  %v2940_v1 = vld [vmem:[%s3714_s1 + $0x398] sm:$0xff]  }
  0x3e   :  { %2603 = vmatprep.subr.bf16.mxu1 %v2883_v4  ;;  %v2943_v4 = vld [vmem:[%s3714_s1 + $0x3e0] sm:$0xff]  }
  0x3f   :  { %2582 = vmatpush3.bf16.msra.mxu0 %v2882_v3  ;;  %v2942_v3 = vld [vmem:[%s3714_s1 + $0x320] sm:$0xff]  }
  0x40   :  { %2611 = vmatprep.subr.bf16.mxu0 %v2887_v9  ;;  %v2948_v9 = vld [vmem:[%s3714_s1 + $0x3a8] sm:$0xff]  }
  0x41   :  { %2604 = vmatpush3.bf16.msra.mxu1 %v2886_v8  ;;  %v2947_v8 = vld [vmem:[%s3714_s1 + $0x3e8] sm:$0xff]  }
  0x42   :  { %1813 = vmatmul.mubr.bf16.vlgmr.msra.gmra.mrb[4].mxu0 %v2301_v6  ;;  %2633 = vmatprep.subr.bf16.mxu1 %v2891_v14  ;;  %v2945_v6 = vld [vmem:[%s3714_s1 + $0x368] sm:$0xff]   ;;  %v2953_v14 = vld [vmem:[%s3714_s1 + $0x378] sm:$0xff]  }
  0x43   :  { %2612 = vmatpush3.bf16.msra.mxu0 %v2890_v13  ;;  %1892 = vmatprep.mubr.bf16.mxu0 %v2306_v45  ;;  %v2952_v13 = vld [vmem:[%s3714_s1 + $0x3b0] sm:$0xff]   ;;  %v2982_v45 = vld [vmem:[%s3714_s1 + $0x428] sm:$0xff]  }
  0x44   :  { %1853 = vmatmul.mubr.bf16.vlgmr.msra.gmra.mrb[4].mxu1 %v2303_v11  ;;  %2613 = vmatprep.subr.bf16.mxu0 %v2893_v16  ;;  %v2950_v11 = vld [vmem:[%s3714_s1 + $0x330] sm:$0xff]   ;;  %v2955_v16 = vld [vmem:[%s3714_s1 + $0x3f8] sm:$0xff]  }
  0x45   :  { %2634 = vmatpush3.bf16.msra.mxu1 %v2892_v15  ;;  %1932 = vmatprep.mubr.bf16.mxu1 %v2308_v50  ;;  %v2954_v15 = vld [vmem:[%s3714_s1 + $0x338] sm:$0xff]   ;;  %v2987_v50 = vld [vmem:[%s3714_s1 + $0x4f0] sm:$0xff]  }
  0x46   :  { %2635 = vmatprep.subr.bf16.mxu1 %v2895_v18 }
  0x47   :  { %2614 = vmatpush3.bf16.msra.mxu0 %v2894_v17  ;;  %v27_v17 = vld [vmem:[%s3715_s0 + $0x30] sm:$0x77] }
  0x48   :  { %2615 = vmatprep.subr.bf16.mxu0 %v2897_v20  ;;  %v2309_v18 = vcombine.low %v27_v17, %v27_v17  ;;  %v2958_v20 = vld [vmem:[%s3714_s1 + $0x3b8] sm:$0xff]  }
  0x49   :  { %2636 = vmatpush3.bf16.msra.mxu1 %v2896_v19  ;;  %v2310_v19 = vcombine.high %v27_v17, %v27_v17  ;;  %v3016_v17 = vld [vmem:[%s3714_s1 + $0x5a0] sm:$0xff]  }
  0x4a   :  { %2637 = vmatprep.subr.bf16.mxu1 %v2899_v22  ;;  %v28_v22 = vld [vmem:[%s3715_s0 + $0x38] sm:$0x77] }
  0x4b   :  { %2616 = vmatpush3.bf16.msra.mxu0 %v2898_v21  ;;  %v2959_v21 = vld [vmem:[%s3714_s1 + $0x440] sm:$0xff]  }
  0x4c   :  { %2617 = vmatprep.subr.bf16.mxu0 %v2901_v24  ;;  %v2312_v24 = vcombine.high %v28_v22, %v28_v22 }
  0x4d   :  { %2638 = vmatpush3.bf16.msra.mxu1 %v2900_v23  ;;  %v2311_v23 = vcombine.low %v28_v22, %v28_v22  ;;  %v3021_v22 = vld [vmem:[%s3714_s1 + $0x570] sm:$0xff]  }
  0x4e   :  { %2639 = vmatprep.subr.bf16.mxu1 %v2903_v26  ;;  %v2963_v26 = vld [vmem:[%s3714_s1 + $0x4c0] sm:$0xff]  }
  0x4f   :  { %2618 = vmatpush3.bf16.msra.mxu0 %v2902_v25  ;;  %v2962_v25 = vld [vmem:[%s3714_s1 + $0x400] sm:$0xff]  }
  0x50   :  { %2619 = vmatprep.subr.bf16.mxu0 %v2905_v28  ;;  %v2965_v28 = vld [vmem:[%s3714_s1 + $0x448] sm:$0xff]  }
  0x51   :  { %2640 = vmatpush3.bf16.msra.mxu1 %v2904_v27  ;;  %v2964_v27 = vld [vmem:[%s3714_s1 + $0x480] sm:$0xff]  }
  0x52   :  { %2641 = vmatprep.subr.bf16.mxu1 %v2907_v30  ;;  %v2967_v30 = vld [vmem:[%s3714_s1 + $0x4c8] sm:$0xff]  }
  0x53   :  { %2620 = vmatpush3.bf16.msra.mxu0 %v2906_v29  ;;  %v2966_v29 = vld [vmem:[%s3714_s1 + $0x408] sm:$0xff]  }
  0x54   :  { %2621 = vmatprep.subr.bf16.mxu0 %v2909_v32  ;;  %v2969_v32 = vld [vmem:[%s3714_s1 + $0x450] sm:$0xff]  }
  0x55   :  { %2642 = vmatpush3.bf16.msra.mxu1 %v2908_v31  ;;  %v2968_v31 = vld [vmem:[%s3714_s1 + $0x488] sm:$0xff]  }
  0x56   :  { %2643 = vmatprep.subr.bf16.mxu1 %v2911_v34  ;;  %v2971_v34 = vld [vmem:[%s3714_s1 + $0x4d0] sm:$0xff]  }
  0x57   :  { %2622 = vmatpush3.bf16.msra.mxu0 %v2910_v33  ;;  %v2970_v33 = vld [vmem:[%s3714_s1 + $0x410] sm:$0xff]  }
  0x58   :  { %2623 = vmatprep.subr.bf16.mxu0 %v2913_v36  ;;  %v2973_v36 = vld [vmem:[%s3714_s1 + $0x458] sm:$0xff]  }
  0x59   :  { %2644 = vmatpush3.bf16.msra.mxu1 %v2912_v35  ;;  %v2972_v35 = vld [vmem:[%s3714_s1 + $0x490] sm:$0xff]  }
  0x5a   :  { %2645 = vmatprep.subr.bf16.mxu1 %v2915_v38  ;;  %v2975_v38 = vld [vmem:[%s3714_s1 + $0x4d8] sm:$0xff]  }
  0x5b   :  { %2624 = vmatpush3.bf16.msra.mxu0 %v2914_v37  ;;  %v2974_v37 = vld [vmem:[%s3714_s1 + $0x418] sm:$0xff]  }
  0x5c   :  { %2625 = vmatprep.subr.bf16.mxu0 %v2917_v40  ;;  %v2977_v40 = vld [vmem:[%s3714_s1 + $0x460] sm:$0xff]  }
  0x5d   :  { %2646 = vmatpush3.bf16.msra.mxu1 %v2916_v39  ;;  %v2976_v39 = vld [vmem:[%s3714_s1 + $0x498] sm:$0xff]  }
  0x5e   :  { %2647 = vmatprep.subr.bf16.mxu1 %v2919_v42  ;;  %v2979_v42 = vld [vmem:[%s3714_s1 + $0x4e0] sm:$0xff]  }
  0x5f   :  { %2626 = vmatpush3.bf16.msra.mxu0 %v2918_v41  ;;  %v2978_v41 = vld [vmem:[%s3714_s1 + $0x420] sm:$0xff]  }
  0x60   :  { %2655 = vmatprep.subr.bf16.mxu0 %v2923_v47  ;;  %v2984_v47 = vld [vmem:[%s3714_s1 + $0x4a8] sm:$0xff]  }
  0x61   :  { %2648 = vmatpush3.bf16.msra.mxu1 %v2922_v46  ;;  %v2983_v46 = vld [vmem:[%s3714_s1 + $0x4e8] sm:$0xff]  }
  0x62   :  { %1893 = vmatmul.mubr.bf16.vlgmr.msra.gmra.mrb[8].mxu0 %v2305_v44  ;;  %2677 = vmatprep.subr.bf16.mxu1 %v2927_v52  ;;  %v2981_v44 = vld [vmem:[%s3714_s1 + $0x468] sm:$0xff]   ;;  %v2989_v52 = vld [vmem:[%s3714_s1 + $0x478] sm:$0xff]  }
  0x63   :  { %2656 = vmatpush3.bf16.msra.mxu0 %v2926_v51  ;;  %1972 = vmatprep.mubr.bf16.mxu0 %v2310_v19  ;;  %v2988_v51 = vld [vmem:[%s3714_s1 + $0x4b0] sm:$0xff]   ;;  %v3018_v19 = vld [vmem:[%s3714_s1 + $0x528] sm:$0xff]  }
  0x64   :  { %1933 = vmatmul.mubr.bf16.vlgmr.msra.gmra.mrb[8].mxu1 %v2307_v49  ;;  %2657 = vmatprep.subr.bf16.mxu0 %v2929_v54  ;;  %v2986_v49 = vld [vmem:[%s3714_s1 + $0x430] sm:$0xff]   ;;  %v2991_v54 = vld [vmem:[%s3714_s1 + $0x4f8] sm:$0xff]  }
  0x65   :  { %2678 = vmatpush3.bf16.msra.mxu1 %v2928_v53  ;;  %2012 = vmatprep.mubr.bf16.mxu1 %v2312_v24  ;;  %v2990_v53 = vld [vmem:[%s3714_s1 + $0x438] sm:$0xff]   ;;  %v3023_v24 = vld [vmem:[%s3714_s1 + $0x5f0] sm:$0xff]  }
  0x66   :  { %2679 = vmatprep.subr.bf16.mxu1 %v2931_v56 }
  0x67   :  { %2658 = vmatpush3.bf16.msra.mxu0 %v2930_v55  ;;  %v29_v55 = vld [vmem:[%s3715_s0 + $0x40] sm:$0x77] }
  0x68   :  { %2659 = vmatprep.subr.bf16.mxu0 %v2933_v58  ;;  %v2313_v56 = vcombine.low %v29_v55, %v29_v55  ;;  %v2994_v58 = vld [vmem:[%s3714_s1 + $0x4b8] sm:$0xff]  }
  0x69   :  { %2680 = vmatpush3.bf16.msra.mxu1 %v2932_v57  ;;  %v2314_v57 = vcombine.high %v29_v55, %v29_v55 }
  0x6a   :  { %2681 = vmatprep.subr.bf16.mxu1 %v2935_v60  ;;  %v30_v60 = vld [vmem:[%s3715_s0 + $0x48] sm:$0x77] }
  0x6b   :  { %2660 = vmatpush3.bf16.msra.mxu0 %v2934_v59  ;;  %v2995_v59 = vld [vmem:[%s3714_s1 + $0x540] sm:$0xff]  }
  0x6c   :  { %2661 = vmatprep.subr.bf16.mxu0 %v2937_v62  ;;  %v2316_v62 = vcombine.high %v30_v60, %v30_v60 }
  0x6d   :  { %2682 = vmatpush3.bf16.msra.mxu1 %v2936_v61  ;;  %v2315_v61 = vcombine.low %v30_v60, %v30_v60 }
  0x6e   :  { %2683 = vmatprep.subr.bf16.mxu1 %v2939_v0  ;;  %v2999_v0 = vld [vmem:[%s3714_s1 + $0x5c0] sm:$0xff]  }
  0x6f   :  { %2662 = vmatpush3.bf16.msra.mxu0 %v2938_v63  ;;  %v2998_v63 = vld [vmem:[%s3714_s1 + $0x500] sm:$0xff]  }
  0x70   :  { %2663 = vmatprep.subr.bf16.mxu0 %v2941_v2  ;;  %v3001_v2 = vld [vmem:[%s3714_s1 + $0x548] sm:$0xff]  }
  0x71   :  { %2684 = vmatpush3.bf16.msra.mxu1 %v2940_v1  ;;  %v3000_v1 = vld [vmem:[%s3714_s1 + $0x580] sm:$0xff]  }
  0x72   :  { %2685 = vmatprep.subr.bf16.mxu1 %v2943_v4  ;;  %v3003_v4 = vld [vmem:[%s3714_s1 + $0x5c8] sm:$0xff]  }
  0x73   :  { %2664 = vmatpush3.bf16.msra.mxu0 %v2942_v3  ;;  %v3002_v3 = vld [vmem:[%s3714_s1 + $0x508] sm:$0xff]  }
  0x74   :  { %2665 = vmatprep.subr.bf16.mxu0 %v2945_v6  ;;  %v3005_v6 = vld [vmem:[%s3714_s1 + $0x550] sm:$0xff]  }
  0x75   :  { %2686 = vmatpush3.bf16.msra.mxu1 %v2944_v5  ;;  %v3004_v5 = vld [vmem:[%s3714_s1 + $0x588] sm:$0xff]  }
  0x76   :  { %2687 = vmatprep.subr.bf16.mxu1 %v2947_v8  ;;  %v3007_v8 = vld [vmem:[%s3714_s1 + $0x5d0] sm:$0xff]  }
  0x77   :  { %2666 = vmatpush3.bf16.msra.mxu0 %v2946_v7  ;;  %v3006_v7 = vld [vmem:[%s3714_s1 + $0x510] sm:$0xff]  }
  0x78   :  { %2667 = vmatprep.subr.bf16.mxu0 %v2949_v10  ;;  %v3009_v10 = vld [vmem:[%s3714_s1 + $0x558] sm:$0xff]  }
  0x79   :  { %2688 = vmatpush3.bf16.msra.mxu1 %v2948_v9  ;;  %v3008_v9 = vld [vmem:[%s3714_s1 + $0x590] sm:$0xff]  }
  0x7a   :  { %2689 = vmatprep.subr.bf16.mxu1 %v2951_v12  ;;  %v3011_v12 = vld [vmem:[%s3714_s1 + $0x5d8] sm:$0xff]  }
  0x7b   :  { %2668 = vmatpush3.bf16.msra.mxu0 %v2950_v11  ;;  %v3010_v11 = vld [vmem:[%s3714_s1 + $0x518] sm:$0xff]  }
  0x7c   :  { %2669 = vmatprep.subr.bf16.mxu0 %v2953_v14  ;;  %v3013_v14 = vld [vmem:[%s3714_s1 + $0x560] sm:$0xff]  }
  0x7d   :  { %2690 = vmatpush3.bf16.msra.mxu1 %v2952_v13  ;;  %v3012_v13 = vld [vmem:[%s3714_s1 + $0x598] sm:$0xff]  }
  0x7e   :  { %2691 = vmatprep.subr.bf16.mxu1 %v2955_v16  ;;  %v3015_v16 = vld [vmem:[%s3714_s1 + $0x5e0] sm:$0xff]  }
  0x7f   :  { %2670 = vmatpush3.bf16.msra.mxu0 %v2954_v15  ;;  %v3014_v15 = vld [vmem:[%s3714_s1 + $0x520] sm:$0xff]  }
  0x80   :  { %2699 = vmatprep.subr.bf16.mxu0 %v2959_v21  ;;  %v3020_v21 = vld [vmem:[%s3714_s1 + $0x5a8] sm:$0xff]  }
  0x81   :  { %2692 = vmatpush3.bf16.msra.mxu1 %v2958_v20  ;;  %v3019_v20 = vld [vmem:[%s3714_s1 + $0x5e8] sm:$0xff]  }
  0x82   :  { %1973 = vmatmul.mubr.bf16.vlgmr.msra.gmra.mrb[12].mxu0 %v2309_v18  ;;  %2721 = vmatprep.subr.bf16.mxu1 %v2963_v26  ;;  %v3017_v18 = vld [vmem:[%s3714_s1 + $0x568] sm:$0xff]   ;;  %v3025_v26 = vld [vmem:[%s3714_s1 + $0x578] sm:$0xff]  }
  0x83   :  { %2700 = vmatpush3.bf16.msra.mxu0 %v2962_v25  ;;  %2052 = vmatprep.mubr.bf16.mxu0 %v2314_v57  ;;  %v3024_v25 = vld [vmem:[%s3714_s1 + $0x5b0] sm:$0xff]  }
  0x84   :  { %2013 = vmatmul.mubr.bf16.vlgmr.msra.gmra.mrb[12].mxu1 %v2311_v23  ;;  %2701 = vmatprep.subr.bf16.mxu0 %v2965_v28  ;;  %v3022_v23 = vld [vmem:[%s3714_s1 + $0x530] sm:$0xff]   ;;  %v3027_v28 = vld [vmem:[%s3714_s1 + $0x5f8] sm:$0xff]  }
  0x85   :  { %2722 = vmatpush3.bf16.msra.mxu1 %v2964_v27  ;;  %2092 = vmatprep.mubr.bf16.mxu1 %v2316_v62  ;;  %v3026_v27 = vld [vmem:[%s3714_s1 + $0x538] sm:$0xff]  }
  0x86   :  { %2723 = vmatprep.subr.bf16.mxu1 %v2967_v30 }
  0x87   :  { %2702 = vmatpush3.bf16.msra.mxu0 %v2966_v29  ;;  %v31_v29 = vld [vmem:[%s3715_s0 + $0x50] sm:$0x77] }
  0x88   :  { %2703 = vmatprep.subr.bf16.mxu0 %v2969_v32  ;;  %v2317_v30 = vcombine.low %v31_v29, %v31_v29  ;;  %v3030_v32 = vld [vmem:[%s3714_s1 + $0x5b8] sm:$0xff]  }
  0x89   :  { %2724 = vmatpush3.bf16.msra.mxu1 %v2968_v31  ;;  %v2318_v31 = vcombine.high %v31_v29, %v31_v29 }
  0x8a   :  { %2725 = vmatprep.subr.bf16.mxu1 %v2971_v34  ;;  %v3040_v34 = vmov 0.0  }
  0x8b   :  { %2704 = vmatpush3.bf16.msra.mxu0 %v2970_v33  ;;  %v32_v33 = vld [vmem:[%s3715_s0 + $0x58] sm:$0x77] }
  0x8c   :  { %2705 = vmatprep.subr.bf16.mxu0 %v2973_v36  ;;  %v2320_v36 = vcombine.high %v32_v33, %v32_v33 }
  0x8d   :  { %2726 = vmatpush3.bf16.msra.mxu1 %v2972_v35  ;;  %v2319_v35 = vcombine.low %v32_v33, %v32_v33 }
  0x8e   :  { %2727 = vmatprep.subr.bf16.mxu1 %v2975_v38  ;;  %v3034_v38 = vld [vmem:[%s3714_s1 + $0x608] sm:$0xff]  }
  0x8f   :  { %2706 = vmatpush3.bf16.msra.mxu0 %v2974_v37  ;;  %v3033_v37 = vld [vmem:[%s3714_s1 + $0x600] sm:$0xff]  }
  0x90   :  { %2707 = vmatprep.subr.bf16.mxu0 %v2977_v40  ;;  %v3036_v40 = vld [vmem:[%s3714_s1 + $0x618] sm:$0xff]  }
  0x91   :  { %2728 = vmatpush3.bf16.msra.mxu1 %v2976_v39  ;;  %v3035_v39 = vld [vmem:[%s3714_s1 + $0x610] sm:$0xff]  }
  0x92   :  { %2729 = vmatprep.subr.bf16.mxu1 %v2979_v42 }
  0x93   :  { %2708 = vmatpush3.bf16.msra.mxu0 %v2978_v41  ;;  %v3037_v41 = vld [vmem:[%s3715_s0 + $0x60] ss:$0 sps:$4 sm:$0x77]  }
  0x94   :  { %2709 = vmatprep.subr.bf16.mxu0 %v2981_v44 }
  0x95   :  { %2730 = vmatpush3.bf16.msra.mxu1 %v2980_v43  ;;  %v2296_v43 = vld [vmem:[%s3716_s2] ss:$0 sm:$0xff] }
  0x96   :  { %2731 = vmatprep.subr.bf16.mxu1 %v2983_v46 }
  0x97   :  { %2710 = vmatpush3.bf16.msra.mxu0 %v2982_v45 }
  0x98   :  { %2711 = vmatprep.subr.bf16.mxu0 %v2985_v48 }
  0x99   :  { %2732 = vmatpush3.bf16.msra.mxu1 %v2984_v47 }
  0x9a   :  { %2733 = vmatprep.subr.bf16.mxu1 %v2987_v50 }
  0x9b   :  { %2712 = vmatpush3.bf16.msra.mxu0 %v2986_v49 }
  0x9c   :  { %2713 = vmatprep.subr.bf16.mxu0 %v2989_v52 }
  0x9d   :  { %2734 = vmatpush3.bf16.msra.mxu1 %v2988_v51 }
  0x9e   :  { %2735 = vmatprep.subr.bf16.mxu1 %v2991_v54 }
  0x9f   :  { %2714 = vmatpush3.bf16.msra.mxu0 %v2990_v53 }
  0xa0   :  { %2743 = vmatprep.subr.bf16.mxu0 %v2995_v59 }
  0xa1   :  { %2736 = vmatpush3.bf16.msra.mxu1 %v2994_v58 }
  0xa2   :  { %2053 = vmatmul.mubr.bf16.vlgmr.msra.gmra.mrb[16].mxu0 %v2313_v56  ;;  %2765 = vmatprep.subr.bf16.mxu1 %v2999_v0 }
  0xa3   :  { %2744 = vmatpush3.bf16.msra.mxu0 %v2998_v63  ;;  %2132 = vmatprep.mubr.bf16.mxu0 %v2318_v31 }
  0xa4   :  { %2093 = vmatmul.mubr.bf16.vlgmr.msra.gmra.mrb[16].mxu1 %v2315_v61  ;;  %2745 = vmatprep.subr.bf16.mxu0 %v3001_v2 }
  0xa5   :  { %2766 = vmatpush3.bf16.msra.mxu1 %v3000_v1  ;;  %2172 = vmatprep.mubr.bf16.mxu1 %v2320_v36 }
  0xa6   :  { %2767 = vmatprep.subr.bf16.mxu1 %v3003_v4  ;;  %v3039_v4 = vld [vmem:[%s3717_s3 + $0x8] sm:$0xff]  }
  0xa7   :  { %2746 = vmatpush3.bf16.msra.mxu0 %v3002_v3  ;;  %v3038_v3 = vld [vmem:[%s3717_s3] sm:$0xff]  }
  0xa8   :  { %2747 = vmatprep.subr.bf16.mxu0 %v3005_v6 }
  0xa9   :  { %2768 = vmatpush3.bf16.msra.mxu1 %v3004_v5 }
  0xaa   :  { %2769 = vmatprep.subr.bf16.mxu1 %v3007_v8 }
  0xab   :  { %2748 = vmatpush3.bf16.msra.mxu0 %v3006_v7 }
  0xac   :  { %2749 = vmatprep.subr.bf16.mxu0 %v3009_v10 }
  0xad   :  { %2770 = vmatpush3.bf16.msra.mxu1 %v3008_v9 }
  0xae   :  { %2771 = vmatprep.subr.bf16.mxu1 %v3011_v12 }
  0xaf   :  { %2750 = vmatpush3.bf16.msra.mxu0 %v3010_v11 }
  0xb0   :  { %2751 = vmatprep.subr.bf16.mxu0 %v3013_v14 }
  0xb1   :  { %2772 = vmatpush3.bf16.msra.mxu1 %v3012_v13 }
  0xb2   :  { %2773 = vmatprep.subr.bf16.mxu1 %v3015_v16 }
  0xb3   :  { %2752 = vmatpush3.bf16.msra.mxu0 %v3014_v15 }
  0xb4   :  { %2753 = vmatprep.subr.bf16.mxu0 %v3017_v18 }
  0xb5   :  { %2774 = vmatpush3.bf16.msra.mxu1 %v3016_v17 }
  0xb6   :  { %2775 = vmatprep.subr.bf16.mxu1 %v3019_v20 }
  0xb7   :  { %2754 = vmatpush3.bf16.msra.mxu0 %v3018_v19 }
  0xb8   :  { %2755 = vmatprep.subr.bf16.mxu0 %v3021_v22 }
  0xb9   :  { %2776 = vmatpush3.bf16.msra.mxu1 %v3020_v21 }
  0xba   :  { %2777 = vmatprep.subr.bf16.mxu1 %v3023_v24 }
  0xbb   :  { %2756 = vmatpush3.bf16.msra.mxu0 %v3022_v23 }
  0xbc   :  { %2757 = vmatprep.subr.bf16.mxu0 %v3025_v26 }
  0xbd   :  { %2778 = vmatpush3.bf16.msra.mxu1 %v3024_v25 }
  0xbe   :  { %2779 = vmatprep.subr.bf16.mxu1 %v3027_v28 }
  0xbf   :  { %2758 = vmatpush3.bf16.msra.mxu0 %v3026_v27 }
  0xc0   :  { %2795 = vmatprep.subr.bf16.mxu0 %v3040_v34 }
  0xc1   :  { %2780 = vmatpush3.bf16.msra.mxu1 %v3030_v32 }
  0xc2   :  { %2133 = vmatmul.mubr.bf16.vlgmr.msra.gmra.mrb[20].mxu0 %v2317_v30  ;;  %2807 = vmatprep.subr.bf16.mxu1 %v3040_v34 }
  0xc3   :  { %2796 = vmatpush3.bf16.msra.mxu0 %v3033_v37  ;;  %2803 = vmatprep.mubr.msk.bf16.mxu0 %vm3041_vm0, %v3040_v34 }
  0xc4   :  { %2173 = vmatmul.mubr.bf16.vlgmr.msra.gmra.mrb[20].mxu1 %v2319_v35  ;;  %2797 = vmatprep.subr.bf16.mxu0 %v3040_v34 }
  0xc5   :  { %2811 = vmatprep.mubr.msk.bf16.mxu1 %vm3041_vm0, %v3040_v34  ;;  %2808 = vmatpush3.bf16.msra.mxu1 %v3038_v3 }
  0xc6   :  { %2809 = vmatprep.subr.bf16.mxu1 %v3040_v34 }
  0xc7   :  { %2798 = vmatpush3.bf16.msra.mxu0 %v3034_v38 }
  0xc8   :  { %2799 = vmatprep.subr.bf16.mxu0 %v3040_v34 }
  0xc9   :  { %2810 = vmatpush3.bf16.msra.mxu1 %v3039_v4 }
  0xcb   :  { %2800 = vmatpush3.bf16.msra.mxu0 %v3035_v39 }
  0xcc   :  { %2801 = vmatprep.subr.bf16.mxu0 %v3040_v34 }
  0xcf   :  { %2802 = vmatpush3.bf16.msra.mxu0 %v3036_v40 }
  0xd2   :  { %2804 = vmatmul.mubr.msk.bf16.vlgmr.msra.gmra.mrb[24].mxu0 %vm1696_vm1, %v3037_v41 }
  0xf5   :  { %v2539_v42 = vpop.f32.mrb[0].mxu0 }
  0xf6   :  { %v2540_v44 = vpop.f32.mrb[1].mxu0 }
  0xf7   :  { %v2541_v45 = vadd.f32 %v2540_v44, %v2539_v42  ;;  %v2542_v46 = vpop.f32.mrb[2].mxu0  ;;  %v2561_v47 = vpop.f32.mrb[0].mxu1 }
  0xf8   :  { %v2543_v48 = vpop.f32.mrb[3].mxu0  ;;  %v2562_v49 = vpop.f32.mrb[1].mxu1 }
  0xf9   :  { %v1735_v50 = vadd.f32 %v2541_v45, %v2296_v43  ;;  %v2563_v51 = vadd.f32 %v2562_v49, %v2561_v47  ;;  %v2564_v52 = vpop.f32.mrb[2].mxu1 }
  0xfa   :  { %v2565_v53 = vpop.f32.mrb[3].mxu1 }
  0xfb   :  { %v1775_v54 = vadd.f32 %v2563_v51, %v1735_v50 }
 0x115   :  { %v2583_v55 = vpop.f32.mrb[4].mxu0 }
 0x116   :  { %v2584_v56 = vpop.f32.mrb[5].mxu0 }
 0x117   :  { %v2585_v57 = vadd.f32 %v2584_v56, %v2583_v55  ;;  %v2586_v58 = vpop.f32.mrb[6].mxu0  ;;  %v2605_v59 = vpop.f32.mrb[4].mxu1 }
 0x118   :  { %v2587_v60 = vpop.f32.mrb[7].mxu0  ;;  %v2606_v62 = vpop.f32.mrb[5].mxu1 }
 0x119   :  { %v1815_v61 = vadd.f32 %v2585_v57, %v1775_v54  ;;  %v2607_v63 = vadd.f32 %v2606_v62, %v2605_v59  ;;  %v2608_v0 = vpop.f32.mrb[6].mxu1  ;;  %v2519_v60 = vld [vmem:[%s3718_s4] ss:$0 sm:$0xff] }
 0x11a   :  { %v2609_v1 = vpop.f32.mrb[7].mxu1 }
 0x11b   :  { %v1855_v2 = vadd.f32 %v2607_v63, %v1815_v61 }
 0x135   :  { %v2627_v5 = vpop.f32.mrb[8].mxu0 }
 0x136   :  { %v2628_v6 = vpop.f32.mrb[9].mxu0 }
 0x137   :  { %v2629_v7 = vadd.f32 %v2628_v6, %v2627_v5  ;;  %v2630_v8 = vpop.f32.mrb[10].mxu0  ;;  %v2649_v9 = vpop.f32.mrb[8].mxu1 }
 0x138   :  { %v2631_v10 = vpop.f32.mrb[11].mxu0  ;;  %v2650_v11 = vpop.f32.mrb[9].mxu1 }
 0x139   :  { %v1895_v12 = vadd.f32 %v2629_v7, %v1855_v2  ;;  %v2651_v13 = vadd.f32 %v2650_v11, %v2649_v9  ;;  %v2652_v14 = vpop.f32.mrb[10].mxu1 }
 0x13a   :  { %v2653_v15 = vpop.f32.mrb[11].mxu1 }
 0x13b   :  { %v1935_v16 = vadd.f32 %v2651_v13, %v1895_v12 }
 0x155   :  { %v2671_v17 = vpop.f32.mrb[12].mxu0 }
 0x156   :  { %v2672_v18 = vpop.f32.mrb[13].mxu0 }
 0x157   :  { %v2673_v19 = vadd.f32 %v2672_v18, %v2671_v17  ;;  %v2674_v20 = vpop.f32.mrb[14].mxu0  ;;  %v2693_v21 = vpop.f32.mrb[12].mxu1 }
 0x158   :  { %v2675_v22 = vpop.f32.mrb[15].mxu0  ;;  %v2694_v23 = vpop.f32.mrb[13].mxu1 }
 0x159   :  { %v1975_v24 = vadd.f32 %v2673_v19, %v1935_v16  ;;  %v2695_v25 = vadd.f32 %v2694_v23, %v2693_v21  ;;  %v2696_v26 = vpop.f32.mrb[14].mxu1 }
 0x15a   :  { %v2697_v27 = vpop.f32.mrb[15].mxu1 }
 0x15b   :  { %v2015_v28 = vadd.f32 %v2695_v25, %v1975_v24 }
 0x175   :  { %v2715_v29 = vpop.f32.mrb[16].mxu0 }
 0x176   :  { %v2716_v30 = vpop.f32.mrb[17].mxu0 }
 0x177   :  { %v2717_v31 = vadd.f32 %v2716_v30, %v2715_v29  ;;  %v2718_v32 = vpop.f32.mrb[18].mxu0  ;;  %v2737_v33 = vpop.f32.mrb[16].mxu1 }
 0x178   :  { %v2719_v34 = vpop.f32.mrb[19].mxu0  ;;  %v2738_v36 = vpop.f32.mrb[17].mxu1 }
 0x179   :  { %v2055_v35 = vadd.f32 %v2717_v31, %v2015_v28  ;;  %v2739_v37 = vadd.f32 %v2738_v36, %v2737_v33  ;;  %v2740_v38 = vpop.f32.mrb[18].mxu1 }
 0x17a   :  { %v2741_v39 = vpop.f32.mrb[19].mxu1 }
 0x17b   :  { %v2095_v40 = vadd.f32 %v2739_v37, %v2055_v35 }
 0x195   :  { %v2759_v41 = vpop.f32.mrb[20].mxu0 }
 0x196   :  { %v2760_v42 = vpop.f32.mrb[21].mxu0 }
 0x197   :  { %v2761_v43 = vadd.f32 %v2760_v42, %v2759_v41  ;;  %v2762_v44 = vpop.f32.mrb[22].mxu0  ;;  %v2781_v45 = vpop.f32.mrb[20].mxu1 }
 0x198   :  { %v2763_v46 = vpop.f32.mrb[23].mxu0  ;;  %v2782_v47 = vpop.f32.mrb[21].mxu1 }
 0x199   :  { %v2135_v48 = vadd.f32 %v2761_v43, %v2095_v40  ;;  %v2783_v49 = vadd.f32 %v2782_v47, %v2781_v45  ;;  %v2784_v50 = vpop.f32.mrb[22].mxu1 }
 0x19a   :  { %v2785_v51 = vpop.f32.mrb[23].mxu1 }
 0x19b   :  { %v2175_v52 = vadd.f32 %v2783_v49, %v2135_v48 }
 0x1a5   :  { %v2214_v53 = vpop.f32.mrb[24].mxu0 }
 0x1a6   :  { %v2215_v54 = vadd.f32 %v2214_v53, %v2175_v52  ;;  %v2805_v55 = vpop.f32.mrb[25].mxu0 }
 0x1a7   :  { %v2217_v56 = vpop.f32.mrb[26].mxu0 }
 0x1a8   :  { %v2220_v57 = vmax.f32 %v2215_v54, 0.0  ;;  %v2806_v58 = vpop.f32.mrb[27].mxu0 }
 0x1aa   :  { %v2221_v59 = vpack.c.bf16 %v2220_v57, %v2220_v57 }
 0x1ac   :  { %2812 = vmatmul.mubr.msk.bf16.vlgmr.msra.gmra.mrb[24].mxu1 %vm2245_vm2, %v2221_v59 }
 0x27f   :  { %v2283_v61 = vpop.f32.mrb[24].mxu1 }
 0x280   :  { %v2284_v62 = vadd.f32 %v2519_v60, %v2283_v61  ;;  %v2813_v63 = vpop.f32.mrb[25].mxu1 }
 0x281   :  { %v2286_v0 = vpop.f32.mrb[26].mxu1 }
 0x282   :  { %v2289_v1 = vmax.f32 %v2284_v62, 0.0  ;;  %v2814_v2 = vpop.f32.mrb[27].mxu1 }
 0x284   :  { %2291 = vst.msk [vmem:[%s3719_s5] sm:$0x1f] %vm2290_vm3, %v2289_v1 }

</bundles_post_ra>
